<compile_context>
chip_gen: v7x
topology: tpu7x:2x2x1
jax: 0.10.0
libtpu: 0.0.40
codegen_flags: <defaults>
</compile_context>

<pallas_src>
import numpy as np

import jax
import jax.numpy as jnp
from jax.experimental import pallas as pl
from jax.experimental.pallas import tpu as pltpu


# (cin, cout, kernel, stride, padding) -- the PyTorch Model's four Conv2d layers.
LAYER_SPECS = (
    (97, 71, 30, 9, 11),
    (71, 70, 20, 8, 10),
    (70, 49, 10, 7, 9),
    (49, 39, 5, 6, 4),
)
TK_MAX = 10240  # upper bound on the layer-1 K tile (keeps double-buffered VMEM < ~8 MB)


def _round_up(x, m):
    return ((x + m - 1) // m) * m


def _conv_out(n, k, s, p):
    return (n + 2 * p - k) // s + 1


def _pick_tk(kp):
    """Largest K tile <= TK_MAX that is a multiple of 256 and divides kp exactly."""
    units = kp // 256
    for d in range(1, units + 1):
        if units % d == 0 and kp // d <= TK_MAX:
            return kp // d
    return 256


# ----------------------------------------------------------------------------- layer 1 kernel
def _conv1_matmul_kernel(a_ref, b_ref, bias_ref, o_ref):
    """One K-step of out = A @ B; bias added on the final step.  Output block is constant
    across the K grid, so it stays VMEM-resident and doubles as the f32 accumulator."""
    k = pl.program_id(0)

    @pl.when(k == 0)
    def _():
        o_ref[...] = jnp.zeros_like(o_ref)

    o_ref[...] += jnp.dot(a_ref[...], b_ref[...], preferred_element_type=jnp.float32)

    @pl.when(k == pl.num_programs(0) - 1)
    def _():
        o_ref[...] += bias_ref[...]


def _conv1_matmul(a_p, b_p, bias_p, *, tk):
    """a_p: (M, Kp) bf16, b_p: (Kp, N) bf16, bias_p: (1, N) f32 -> (M, N) f32."""
    m, kp = a_p.shape
    _, n = b_p.shape
    return pl.pallas_call(
        _conv1_matmul_kernel,
        out_shape=jax.ShapeDtypeStruct((m, n), jnp.float32),
        grid_spec=pltpu.PrefetchScalarGridSpec(
            num_scalar_prefetch=0,
            grid=(kp // tk,),
            in_specs=[
                pl.BlockSpec((m, tk), lambda k: (0, k)),
                pl.BlockSpec((tk, n), lambda k: (k, 0)),   # N = full array dim (no 128 pad)
                pl.BlockSpec((1, n), lambda k: (0, 0)),
            ],
            out_specs=pl.BlockSpec((m, n), lambda k: (0, 0)),
        ),
        compiler_params=pltpu.CompilerParams(dimension_semantics=("arbitrary",)),
    )(a_p, b_p, bias_p)


def _conv1_im2col(x, *, k, s, p, oh, ow):
    """x: (1, C, H, W) f32 -> (M, K) bf16 im2col matrix with K ordered (kh, kw, cin)."""
    c = x.shape[1]
    x_hwc = jnp.transpose(x[0].astype(jnp.bfloat16), (1, 2, 0))            # (H, W, C) bf16
    x_hwc = jnp.pad(x_hwc, ((p, p), (p, p), (0, 0)))
    h_idx = jnp.arange(oh)[:, None] * s + jnp.arange(k)[None, :]           # (OH, KH)
    w_idx = jnp.arange(ow)[:, None] * s + jnp.arange(k)[None, :]           # (OW, KW)
    patches = x_hwc[h_idx[:, None, :, None], w_idx[None, :, None, :], :]   # (OH,OW,KH,KW,C)
    return patches.reshape(oh * ow, c * k * k)


# ----------------------------------------------------------------------------- tail kernel
def _tail_kernel(x_ref, w2_ref, b2_ref, w3_ref, b3_ref, w4_ref, b4_ref, o_ref):
    """Layers 2-4 as three chained matvecs (weights pre-gathered per output position) plus the
    fused tanh-GELU epilogue (v5..v13 of the PyTorch forward)."""
    x2 = jnp.dot(x_ref[...], w2_ref[...], preferred_element_type=jnp.float32) + b2_ref[...]
    x3 = jnp.dot(x2, w3_ref[...], preferred_element_type=jnp.float32) + b3_ref[...]
    v4 = jnp.dot(x3, w4_ref[...], preferred_element_type=jnp.float32) + b4_ref[...]
    v5 = v4 * 0.5
    v10 = (v4 + (v4 * v4 * v4) * 0.044715) * 0.7978845608028654
    o_ref[...] = (v5 * (jnp.tanh(v10) + 1.0)).astype(o_ref.dtype)


def _tail(x1_flat, w2, b2, w3, b3, w4, b4):
    return pl.pallas_call(
        _tail_kernel,
        out_shape=jax.ShapeDtypeStruct((1, w4.shape[1]), jnp.float32),
    )(x1_flat, w2, b2, w3, b3, w4, b4)


# ----------------------------------------------------------------------------- init
def _pack_tail_weights(w, b, in_h, in_w, k, stride, padding):
    """w: (Cout, Cin, k, k) f32.  Returns W_flat: (in_h*in_w*Cin, M*Cout) and b_flat: (1, M*Cout)
    with M = OH*OW output positions; K rows ordered (ih, iw, cin) so a row-major HWC flatten of
    the layer input multiplies it directly (taps falling outside the kernel window are zero)."""
    cout, cin, _, _ = w.shape
    oh = _conv_out(in_h, k, stride, padding)
    ow = _conv_out(in_w, k, stride, padding)
    wm = np.zeros((in_h, in_w, cin, oh * ow, cout), np.float32)
    for a in range(oh):
        for bb in range(ow):
            m = a * ow + bb
            for ih in range(in_h):
                kh = ih + padding - stride * a
                if kh < 0 or kh >= k:
                    continue
                for iw in range(in_w):
                    kw = iw + padding - stride * bb
                    if kw < 0 or kw >= k:
                        continue
                    wm[ih, iw, :, m, :] = w[:, :, kh, kw].T
    w_flat = wm.reshape(in_h * in_w * cin, oh * ow * cout)
    b_flat = np.tile(b, oh * ow).reshape(1, oh * ow * cout)
    return w_flat, b_flat, (oh, ow)


def init_params(key, input_hw):
    """PyTorch-style Conv2d init; all weight packing happens once here (not per forward call)."""
    h, w_sp = input_hw
    raw = []
    for i, (cin, cout, k, _, _) in enumerate(LAYER_SPECS):
        kw_key, kb_key = jax.random.split(jax.random.fold_in(key, i))
        bound = 1.0 / float(cin * k * k) ** 0.5
        wt = jax.random.uniform(kw_key, (cout, cin, k, k), jnp.float32, -bound, bound)
        bs = jax.random.uniform(kb_key, (cout,), jnp.float32, -bound, bound)
        raw.append((np.asarray(wt), np.asarray(bs)))

    params = []

    # Layer 1: (Kp, Cout) bf16 matmul operand, K ordered (kh, kw, cin) to match the im2col.
    cin, cout, k, s, p = LAYER_SPECS[0]
    w1, b1 = raw[0]
    k_full = cin * k * k
    kp = _round_up(k_full, 256)
    w1_mat = np.transpose(w1, (2, 3, 1, 0)).reshape(k_full, cout)
    w1_pad = np.zeros((kp, cout), np.float32)
    w1_pad[:k_full] = w1_mat
    params.append((jnp.asarray(w1_pad, jnp.bfloat16),
                   jnp.asarray(b1.reshape(1, cout), jnp.float32)))

    # Layers 2-4: pre-gather weight taps per output position (inputs are tiny).
    in_h, in_w = _conv_out(h, k, s, p), _conv_out(w_sp, k, s, p)
    for i in range(1, 4):
        _, _, k_i, s_i, p_i = LAYER_SPECS[i]
        w_i, b_i = raw[i]
        w_flat, b_flat, (oh_i, ow_i) = _pack_tail_weights(w_i, b_i, in_h, in_w, k_i, s_i, p_i)
        params.append((jnp.asarray(w_flat, jnp.float32), jnp.asarray(b_flat, jnp.float32)))
        in_h, in_w = oh_i, ow_i

    return params


# ----------------------------------------------------------------------------- forward
def _forward_impl(x, params):
    (w1_pad, b1), (w2, b2), (w3, b3), (w4, b4) = params
    cin, cout, k, s, p = LAYER_SPECS[0]
    oh = _conv_out(x.shape[2], k, s, p)
    ow = _conv_out(x.shape[3], k, s, p)
    m = oh * ow
    k_full = cin * k * k
    kp = w1_pad.shape[0]
    tk = _pick_tk(kp)

    # Layer 1: im2col (bf16 throughout) + Pallas K-grid matmul with fused bias.
    a = _conv1_im2col(x, k=k, s=s, p=p, oh=oh, ow=ow)                  # (M, K) bf16
    a_p = jnp.pad(a, ((0, 0), (0, kp - k_full)))                       # zero K-pad: safe for dot
    out1 = _conv1_matmul(a_p, w1_pad, b1, tk=tk)                       # (M, 71) f32

    # Layers 2-4 + tanh-GELU: one tiny Pallas kernel on the flattened (HWC-order) activations.
    x1_flat = out1.reshape(1, m * cout)                                # (1, 3834) f32
    out = _tail(x1_flat, w2, b2, w3, b3, w4, b4)                       # (1, 39) f32
    return out.reshape(1, out.shape[1], 1, 1)                          # (1, 39, 1, 1)


forward = jax.jit(_forward_impl)


if __name__ == "__main__":
    key = jax.random.PRNGKey(0)
    x4 = jax.random.normal(jax.random.fold_in(key, 100), (1, 97, 61, 83), jnp.float32)
    params = init_params(key, input_hw=(61, 83))

    out = jax.block_until_ready(forward(x4, params))
    assert out.shape == (1, 39, 1, 1), out.shape
    assert bool(jnp.all(jnp.isfinite(out)))
    print("KERNEL_OK")
</pallas_src>

<mosaic_0001>
module attributes {stable_mosaic.version = 11 : i64} {
  func.func @_conv1_matmul_kernel(%arg0: i32, %arg1: memref<54x9728xbf16, #tpu.memory_space<vmem>>, %arg2: memref<9728x71xbf16, #tpu.memory_space<vmem>>, %arg3: memref<1x71xf32, #tpu.memory_space<vmem>>, %arg4: memref<54x71xf32, #tpu.memory_space<vmem>>) attributes {dimension_semantics = [#tpu.dimension_semantics<arbitrary>], iteration_bounds = array<i64: 9>, scalar_prefetch = 0 : i64, scratch_operands = 0 : i64, tpu.core_type = #tpu.core_type<tc>, window_params = [{transform_indices = @transform_0, window_bounds = array<i64: 54, 9728>}, {transform_indices = @transform_1, window_bounds = array<i64: 9728, 71>}, {pipeline_mode = #tpu.pipeline_mode<synchronous>, transform_indices = @transform_2, window_bounds = array<i64: 1, 71>}, {pipeline_mode = #tpu.pipeline_mode<synchronous>, transform_indices = @transform_3, window_bounds = array<i64: 54, 71>}]} {
    %c0_i32 = arith.constant 0 : i32
    %0 = arith.cmpi eq, %arg0, %c0_i32 : i32
    %1 = arith.extui %0 : i1 to i32
    %c0_i32_0 = arith.constant 0 : i32
    %2 = arith.cmpi ne, %1, %c0_i32_0 : i32
    scf.if %2 {
      %cst_9 = arith.constant 0.000000e+00 : f32
      %12 = vector.broadcast %cst_9 : f32 to vector<54x71xf32>
      %c0_10 = arith.constant 0 : index
      %c0_11 = arith.constant 0 : index
      %13 = vector.load %arg4[%c0_10, %c0_11] : memref<54x71xf32, #tpu.memory_space<vmem>>, vector<54x71xf32>
      tpu.vector_store %arg4[%c0_10, %c0_11], %12 {strides = array<i32>} : memref<54x71xf32, #tpu.memory_space<vmem>>, vector<54x71xf32>,
    } else {
    }
    %c0 = arith.constant 0 : index
    %c0_1 = arith.constant 0 : index
    %3 = vector.load %arg4[%c0, %c0_1] : memref<54x71xf32, #tpu.memory_space<vmem>>, vector<54x71xf32>
    %c0_2 = arith.constant 0 : index
    %c0_3 = arith.constant 0 : index
    %4 = vector.load %arg1[%c0_2, %c0_3] : memref<54x9728xbf16, #tpu.memory_space<vmem>>, vector<54x9728xbf16>
    %c0_4 = arith.constant 0 : index
    %c0_5 = arith.constant 0 : index
    %5 = vector.load %arg2[%c0_4, %c0_5] : memref<9728x71xbf16, #tpu.memory_space<vmem>>, vector<9728x71xbf16>
    %cst = arith.constant dense<0.000000e+00> : vector<54x71xf32>
    %6 = tpu.matmul %4, %5, %cst {dimension_numbers = #tpu.dot_dimension_numbers<[1], [0], [0], [1], [0, 0, 1, 1], [], []>} : vector<54x9728xbf16>, vector<9728x71xbf16>, vector<54x71xf32> -> vector<54x71xf32>
    %7 = arith.addf %3, %6 : vector<54x71xf32>
    %c0_6 = arith.constant 0 : index
    %c0_7 = arith.constant 0 : index
    %8 = vector.load %arg4[%c0_6, %c0_7] : memref<54x71xf32, #tpu.memory_space<vmem>>, vector<54x71xf32>
    tpu.vector_store %arg4[%c0_6, %c0_7], %7 {strides = array<i32>} : memref<54x71xf32, #tpu.memory_space<vmem>>, vector<54x71xf32>,
    %c8_i32 = arith.constant 8 : i32
    %9 = arith.cmpi eq, %arg0, %c8_i32 : i32
    %10 = arith.extui %9 : i1 to i32
    %c0_i32_8 = arith.constant 0 : i32
    %11 = arith.cmpi ne, %10, %c0_i32_8 : i32
    scf.if %11 {
      %c0_9 = arith.constant 0 : index
      %c0_10 = arith.constant 0 : index
      %12 = vector.load %arg4[%c0_9, %c0_10] : memref<54x71xf32, #tpu.memory_space<vmem>>, vector<54x71xf32>
      %c0_11 = arith.constant 0 : index
      %c0_12 = arith.constant 0 : index
      %13 = vector.load %arg3[%c0_11, %c0_12] : memref<1x71xf32, #tpu.memory_space<vmem>>, vector<1x71xf32>
      %14 = vector.broadcast %13 : vector<1x71xf32> to vector<54x71xf32>
      %15 = arith.addf %12, %14 : vector<54x71xf32>
      %c0_13 = arith.constant 0 : index
      %c0_14 = arith.constant 0 : index
      %16 = vector.load %arg4[%c0_13, %c0_14] : memref<54x71xf32, #tpu.memory_space<vmem>>, vector<54x71xf32>
      tpu.vector_store %arg4[%c0_13, %c0_14], %15 {strides = array<i32>} : memref<54x71xf32, #tpu.memory_space<vmem>>, vector<54x71xf32>,
    } else {
    }
    return
  }
  func.func @transform_0(%arg0: i32) -> (i32, i32) {
    %c0_i32 = arith.constant 0 : i32
    %c0_i32_0 = arith.constant 0 : i32
    return %c0_i32, %arg0 : i32, i32
  }
  func.func @transform_1(%arg0: i32) -> (i32, i32) {
    %c0_i32 = arith.constant 0 : i32
    %c0_i32_0 = arith.constant 0 : i32
    return %arg0, %c0_i32 : i32, i32
  }
  func.func @transform_2(%arg0: i32) -> (i32, i32) {
    %c0_i32 = arith.constant 0 : i32
    %c0_i32_0 = arith.constant 0 : i32
    %c0_i32_1 = arith.constant 0 : i32
    return %c0_i32, %c0_i32_0 : i32, i32
  }
  func.func @transform_3(%arg0: i32) -> (i32, i32) {
    %c0_i32 = arith.constant 0 : i32
    %c0_i32_0 = arith.constant 0 : i32
    %c0_i32_1 = arith.constant 0 : i32
    return %c0_i32, %c0_i32_0 : i32, i32
  }
}

module attributes {stable_mosaic.version = 11 : i64} {
  func.func @_tail_kernel(%arg0: memref<1x3834xf32, #tpu.memory_space<vmem>>, %arg1: memref<3834x140xf32, #tpu.memory_space<vmem>>, %arg2: memref<1x140xf32, #tpu.memory_space<vmem>>, %arg3: memref<140x196xf32, #tpu.memory_space<vmem>>, %arg4: memref<1x196xf32, #tpu.memory_space<vmem>>, %arg5: memref<196x39xf32, #tpu.memory_space<vmem>>, %arg6: memref<1x39xf32, #tpu.memory_space<vmem>>, %arg7: memref<1x39xf32, #tpu.memory_space<vmem>>) attributes {dimension_semantics = [], scalar_prefetch = 0 : i64, scratch_operands = 0 : i64, tpu.core_type = #tpu.core_type<tc>} {
    %c0 = arith.constant 0 : index
    %c0_0 = arith.constant 0 : index
    %0 = vector.load %arg0[%c0, %c0_0] : memref<1x3834xf32, #tpu.memory_space<vmem>>, vector<1x3834xf32>
    %c0_1 = arith.constant 0 : index
    %c0_2 = arith.constant 0 : index
    %1 = vector.load %arg1[%c0_1, %c0_2] : memref<3834x140xf32, #tpu.memory_space<vmem>>, vector<3834x140xf32>
    %cst = arith.constant dense<0.000000e+00> : vector<1x140xf32>
    %2 = tpu.matmul %0, %1, %cst {dimension_numbers = #tpu.dot_dimension_numbers<[1], [0], [0], [1], [0, 0, 1, 1], [], []>} : vector<1x3834xf32>, vector<3834x140xf32>, vector<1x140xf32> -> vector<1x140xf32>
    %c0_3 = arith.constant 0 : index
    %c0_4 = arith.constant 0 : index
    %3 = vector.load %arg2[%c0_3, %c0_4] : memref<1x140xf32, #tpu.memory_space<vmem>>, vector<1x140xf32>
    %4 = arith.addf %2, %3 : vector<1x140xf32>
    %c0_5 = arith.constant 0 : index
    %c0_6 = arith.constant 0 : index
    %5 = vector.load %arg3[%c0_5, %c0_6] : memref<140x196xf32, #tpu.memory_space<vmem>>, vector<140x196xf32>
    %cst_7 = arith.constant dense<0.000000e+00> : vector<1x196xf32>
    %6 = tpu.matmul %4, %5, %cst_7 {dimension_numbers = #tpu.dot_dimension_numbers<[1], [0], [0], [1], [0, 0, 1, 1], [], []>} : vector<1x140xf32>, vector<140x196xf32>, vector<1x196xf32> -> vector<1x196xf32>
    %c0_8 = arith.constant 0 : index
    %c0_9 = arith.constant 0 : index
    %7 = vector.load %arg4[%c0_8, %c0_9] : memref<1x196xf32, #tpu.memory_space<vmem>>, vector<1x196xf32>
    %8 = arith.addf %6, %7 : vector<1x196xf32>
    %c0_10 = arith.constant 0 : index
    %c0_11 = arith.constant 0 : index
    %9 = vector.load %arg5[%c0_10, %c0_11] : memref<196x39xf32, #tpu.memory_space<vmem>>, vector<196x39xf32>
    %cst_12 = arith.constant dense<0.000000e+00> : vector<1x39xf32>
    %10 = tpu.matmul %8, %9, %cst_12 {dimension_numbers = #tpu.dot_dimension_numbers<[1], [0], [0], [1], [0, 0, 1, 1], [], []>} : vector<1x196xf32>, vector<196x39xf32>, vector<1x39xf32> -> vector<1x39xf32>
    %c0_13 = arith.constant 0 : index
    %c0_14 = arith.constant 0 : index
    %11 = vector.load %arg6[%c0_13, %c0_14] : memref<1x39xf32, #tpu.memory_space<vmem>>, vector<1x39xf32>
    %12 = arith.addf %10, %11 : vector<1x39xf32>
    %cst_15 = arith.constant 5.000000e-01 : f32
    %13 = vector.broadcast %cst_15 : f32 to vector<1x39xf32>
    %14 = arith.mulf %12, %13 : vector<1x39xf32>
    %15 = arith.mulf %12, %12 : vector<1x39xf32>
    %16 = arith.mulf %15, %12 : vector<1x39xf32>
    %cst_16 = arith.constant 4.471500e-02 : f32
    %17 = vector.broadcast %cst_16 : f32 to vector<1x39xf32>
    %18 = arith.mulf %16, %17 : vector<1x39xf32>
    %19 = arith.addf %12, %18 : vector<1x39xf32>
    %cst_17 = arith.constant 0.797884583 : f32
    %20 = vector.broadcast %cst_17 : f32 to vector<1x39xf32>
    %21 = arith.mulf %19, %20 : vector<1x39xf32>
    %22 = math.tanh %21 : vector<1x39xf32>
    %cst_18 = arith.constant 1.000000e+00 : f32
    %23 = vector.broadcast %cst_18 : f32 to vector<1x39xf32>
    %24 = arith.addf %22, %23 : vector<1x39xf32>
    %25 = arith.mulf %14, %24 : vector<1x39xf32>
    %c0_19 = arith.constant 0 : index
    %c0_20 = arith.constant 0 : index
    %26 = vector.load %arg7[%c0_19, %c0_20] : memref<1x39xf32, #tpu.memory_space<vmem>>, vector<1x39xf32>
    tpu.vector_store %arg7[%c0_19, %c0_20], %25 {strides = array<i32>} : memref<1x39xf32, #tpu.memory_space<vmem>>, vector<1x39xf32>,
    return
  }
}

</mosaic_0001>

<bundles_post_ra>
// kernel: _forward_impl.3
= control target key start
LH: loop header
LB: loop body
LE: loop exit
PB: predicated region body
PF: predicated region fallthrough
CT: control target
= control target key end

     0   :  { %s6877_s0 = inlined_call_operand.vmem [shape: f32[1,3834], index: 0, kind: input, shape index: {}]   ;;  %s6878_s1 = inlined_call_operand.vmem [shape: f32[3834,140], index: 1, kind: input, shape index: {}]   ;;  %s6879_s2 = inlined_call_operand.vmem [shape: f32[1,140], index: 2, kind: input, shape index: {}]   ;;  %s6880_s3 = inlined_call_operand.vmem [shape: f32[140,196], index: 3, kind: input, shape index: {}]   ;;  %s6881_s4 = inlined_call_operand.vmem [shape: f32[1,196], index: 4, kind: input, shape index: {}]   ;;  %s6882_s5 = inlined_call_operand.vmem [shape: f32[196,39], index: 5, kind: input, shape index: {}]   ;;  %s6883_s6 = inlined_call_operand.vmem [shape: f32[1,39], index: 6, kind: input, shape index: {}]   ;;  %s6884_s7 = inlined_call_operand.hbm [shape: f32[1,39], index: 7, kind: output, shape index: {}]  }
   0x1   :  { %v32_v0 = vld [vmem:[%s6878_s1 + $0x8] sm:$0xff]  ;;  %v34_v1 = vld [vmem:[%s6878_s1 + $0x18] sm:$0xff]  ;;  %v31_v5 = vld [vmem:[%s6878_s1] sm:$0xff] }
   0x2   :  { %v480_v2 = vld [vmem:[%s6878_s1 + $0xe08] sm:$0xff]  ;;  %v2497_v3 = vpack.c.bf16 %v34_v1, %v32_v0  ;;  %v482_v4 = vld [vmem:[%s6878_s1 + $0xe18] sm:$0xff]  ;;  %v33_v6 = vld [vmem:[%s6878_s1 + $0x10] sm:$0xff] }
   0x3   :  { %v2945_v7 = vpack.c.bf16 %v482_v4, %v480_v2  ;;  %v2499_v8 = vpack.c.bf16 %v33_v6, %v31_v5  ;;  %v479_v9 = vld [vmem:[%s6878_s1 + $0xe00] sm:$0xff]  ;;  %v481_v10 = vld [vmem:[%s6878_s1 + $0xe10] sm:$0xff]  ;;  %v36_v11 = vld [vmem:[%s6878_s1 + $0x28] sm:$0xff] }
   0x4   :  { %2498 = vmatprep.subr.bf16.mxu1 %v2497_v3  ;;  %v2947_v12 = vpack.c.bf16 %v481_v10, %v479_v9  ;;  %v38_v13 = vld [vmem:[%s6878_s1 + $0x38] sm:$0xff]  ;;  %v484_v14 = vld [vmem:[%s6878_s1 + $0xe28] sm:$0xff]  ;;  %v35_v18 = vld [vmem:[%s6878_s1 + $0x20] sm:$0xff] }
   0x5   :  { %v486_v15 = vld [vmem:[%s6878_s1 + $0xe38] sm:$0xff]  ;;  %2946 = vmatprep.subr.bf16.mxu0 %v2945_v7  ;;  %2500 = vmatpush1.bf16.msra.mxu1 %v2499_v8  ;;  %v2501_v16 = vpack.c.bf16 %v38_v13, %v36_v11  ;;  %v37_v19 = vld [vmem:[%s6878_s1 + $0x30] sm:$0xff]  ;;  %v483_v20 = vld [vmem:[%s6878_s1 + $0xe20] sm:$0xff] }
   0x6   :  { %v2949_v17 = vpack.c.bf16 %v486_v15, %v484_v14  ;;  %2948 = vmatpush1.bf16.msra.mxu0 %v2947_v12  ;;  %v2503_v21 = vpack.c.bf16 %v37_v19, %v35_v18  ;;  %v485_v22 = vld [vmem:[%s6878_s1 + $0xe30] sm:$0xff]  ;;  %v40_v23 = vld [vmem:[%s6878_s1 + $0x48] sm:$0xff]  ;;  %v42_v24 = vld [vmem:[%s6878_s1 + $0x58] sm:$0xff] }
   0x7   :  { %2502 = vmatprep.subr.bf16.mxu1 %v2501_v16  ;;  %v2951_v25 = vpack.c.bf16 %v485_v22, %v483_v20  ;;  %v2505_v26 = vpack.c.bf16 %v42_v24, %v40_v23  ;;  %v488_v27 = vld [vmem:[%s6878_s1 + $0xe48] sm:$0xff]  ;;  %v490_v28 = vld [vmem:[%s6878_s1 + $0xe58] sm:$0xff]  ;;  %v39_v29 = vld [vmem:[%s6878_s1 + $0x40] sm:$0xff] }
   0x8   :  { %2950 = vmatprep.subr.bf16.mxu0 %v2949_v17  ;;  %v2953_v30 = vpack.c.bf16 %v490_v28, %v488_v27  ;;  %v41_v31 = vld [vmem:[%s6878_s1 + $0x50] sm:$0xff]  ;;  %v487_v32 = vld [vmem:[%s6878_s1 + $0xe40] sm:$0xff]  ;;  %v44_v35 = vld [vmem:[%s6878_s1 + $0x68] sm:$0xff] }
   0x9   :  { %v489_v33 = vld [vmem:[%s6878_s1 + $0xe50] sm:$0xff]  ;;  %2504 = vmatpush1.bf16.msra.mxu1 %v2503_v21  ;;  %v2507_v34 = vpack.c.bf16 %v41_v31, %v39_v29  ;;  %v46_v36 = vld [vmem:[%s6878_s1 + $0x78] sm:$0xff]  ;;  %v492_v37 = vld [vmem:[%s6878_s1 + $0xe68] sm:$0xff] }
   0xa   :  { %2952 = vmatpush1.bf16.msra.mxu0 %v2951_v25  ;;  %2506 = vmatprep.subr.bf16.mxu1 %v2505_v26  ;;  %v2955_v38 = vpack.c.bf16 %v489_v33, %v487_v32  ;;  %v2509_v39 = vpack.c.bf16 %v46_v36, %v44_v35  ;;  %v494_v40 = vld [vmem:[%s6878_s1 + $0xe78] sm:$0xff]  ;;  %v43_v41 = vld [vmem:[%s6878_s1 + $0x60] sm:$0xff]  ;;  %v45_v42 = vld [vmem:[%s6878_s1 + $0x70] sm:$0xff] }
   0xb   :  { %2954 = vmatprep.subr.bf16.mxu0 %v2953_v30  ;;  %v2957_v43 = vpack.c.bf16 %v494_v40, %v492_v37  ;;  %v491_v44 = vld [vmem:[%s6878_s1 + $0xe60] sm:$0xff]  ;;  %v493_v45 = vld [vmem:[%s6878_s1 + $0xe70] sm:$0xff]  ;;  %v48_v46 = vld [vmem:[%s6878_s1 + $0x88] sm:$0xff]  ;;  %v2511_v50 = vpack.c.bf16 %v45_v42, %v43_v41 }
   0xc   :  { %v50_v47 = vld [vmem:[%s6878_s1 + $0x98] sm:$0xff]  ;;  %v496_v48 = vld [vmem:[%s6878_s1 + $0xe88] sm:$0xff]  ;;  %v2959_v51 = vpack.c.bf16 %v493_v45, %v491_v44  ;;  %v47_v53 = vld [vmem:[%s6878_s1 + $0x80] sm:$0xff] }
   0xd   :  { %v498_v49 = vld [vmem:[%s6878_s1 + $0xe98] sm:$0xff]  ;;  %2508 = vmatpush1.bf16.msra.mxu1 %v2507_v34  ;;  %v2513_v52 = vpack.c.bf16 %v50_v47, %v48_v46  ;;  %v49_v54 = vld [vmem:[%s6878_s1 + $0x90] sm:$0xff]  ;;  %v495_v55 = vld [vmem:[%s6878_s1 + $0xe80] sm:$0xff]  ;;  %v996_v46 = vlaneseq }
   0xe   :  { %2956 = vmatpush1.bf16.msra.mxu0 %v2955_v38  ;;  %2510 = vmatprep.subr.bf16.mxu1 %v2509_v39  ;;  %v2961_v56 = vpack.c.bf16 %v498_v49, %v496_v48  ;;  %v497_v57 = vld [vmem:[%s6878_s1 + $0xe90] sm:$0xff]  ;;  %v52_v58 = vld [vmem:[%s6878_s1 + $0xa8] sm:$0xff]  ;;  %v54_v59 = vld [vmem:[%s6878_s1 + $0xb8] sm:$0xff]  ;;  %v2515_v62 = vpack.c.bf16 %v49_v54, %v47_v53 }
   0xf   :  { %2958 = vmatprep.subr.bf16.mxu0 %v2957_v43  ;;  %v500_v60 = vld [vmem:[%s6878_s1 + $0xea8] sm:$0xff]  ;;  %v502_v61 = vld [vmem:[%s6878_s1 + $0xeb8] sm:$0xff]  ;;  %v2963_v63 = vpack.c.bf16 %v497_v57, %v495_v55  ;;  %v2517_v0 = vpack.c.bf16 %v54_v59, %v52_v58  ;;  %v51_v1 = vld [vmem:[%s6878_s1 + $0xa0] sm:$0xff]  ;;  %v3894_v59 = vshrl.u32 %v996_v46, 7 }
  0x10   :  { %v53_v2 = vld [vmem:[%s6878_s1 + $0xb0] sm:$0xff]  ;;  %v499_v3 = vld [vmem:[%s6878_s1 + $0xea0] sm:$0xff]  ;;  %v2965_v4 = vpack.c.bf16 %v502_v61, %v500_v60  ;;  %v56_v6 = vld [vmem:[%s6878_s1 + $0xc8] sm:$0xff] }
  0x11   :  { %2512 = vmatpush1.bf16.msra.mxu1 %v2511_v50  ;;  %v501_v5 = vld [vmem:[%s6878_s1 + $0xeb0] sm:$0xff]  ;;  %v58_v7 = vld [vmem:[%s6878_s1 + $0xd8] sm:$0xff]  ;;  %v504_v8 = vld [vmem:[%s6878_s1 + $0xec8] sm:$0xff]  ;;  %v2519_v10 = vpack.c.bf16 %v53_v2, %v51_v1 }
  0x12   :  { %2960 = vmatpush1.bf16.msra.mxu0 %v2959_v51  ;;  %2514 = vmatprep.subr.bf16.mxu1 %v2513_v52  ;;  %v506_v9 = vld [vmem:[%s6878_s1 + $0xed8] sm:$0xff]  ;;  %v2967_v11 = vpack.c.bf16 %v501_v5, %v499_v3  ;;  %v2521_v12 = vpack.c.bf16 %v58_v7, %v56_v6  ;;  %v55_v13 = vld [vmem:[%s6878_s1 + $0xc0] sm:$0xff]  ;;  %v57_v14 = vld [vmem:[%s6878_s1 + $0xd0] sm:$0xff] }
  0x13   :  { %2962 = vmatprep.subr.bf16.mxu0 %v2961_v56  ;;  %v503_v15 = vld [vmem:[%s6878_s1 + $0xec0] sm:$0xff]  ;;  %v2969_v16 = vpack.c.bf16 %v506_v9, %v504_v8  ;;  %v505_v17 = vld [vmem:[%s6878_s1 + $0xed0] sm:$0xff]  ;;  %v60_v18 = vld [vmem:[%s6878_s1 + $0xe8] sm:$0xff]  ;;  %v2523_v22 = vpack.c.bf16 %v57_v14, %v55_v13  ;;  %v3921_v8 = vsub.s32 1, %v3894_v59 }
  0x14   :  { %v62_v19 = vld [vmem:[%s6878_s1 + $0xf8] sm:$0xff]  ;;  %v508_v20 = vld [vmem:[%s6878_s1 + $0xee8] sm:$0xff]  ;;  %v2971_v23 = vpack.c.bf16 %v505_v17, %v503_v15  ;;  %v59_v25 = vld [vmem:[%s6878_s1 + $0xe0] sm:$0xff] }
  0x15   :  { %2516 = vmatpush1.bf16.msra.mxu1 %v2515_v62  ;;  %v510_v21 = vld [vmem:[%s6878_s1 + $0xef8] sm:$0xff]  ;;  %v2525_v24 = vpack.c.bf16 %v62_v19, %v60_v18  ;;  %v61_v26 = vld [vmem:[%s6878_s1 + $0xf0] sm:$0xff]  ;;  %v507_v27 = vld [vmem:[%s6878_s1 + $0xee0] sm:$0xff] }
  0x16   :  { %2964 = vmatpush1.bf16.msra.mxu0 %v2963_v63  ;;  %2518 = vmatprep.subr.bf16.mxu1 %v2517_v0  ;;  %v2973_v28 = vpack.c.bf16 %v510_v21, %v508_v20  ;;  %v509_v29 = vld [vmem:[%s6878_s1 + $0xef0] sm:$0xff]  ;;  %v64_v30 = vld [vmem:[%s6878_s1 + $0x108] sm:$0xff]  ;;  %v66_v31 = vld [vmem:[%s6878_s1 + $0x118] sm:$0xff]  ;;  %v2527_v34 = vpack.c.bf16 %v61_v26, %v59_v25 }
  0x17   :  { %2966 = vmatprep.subr.bf16.mxu0 %v2965_v4  ;;  %v512_v32 = vld [vmem:[%s6878_s1 + $0xf08] sm:$0xff]  ;;  %v514_v33 = vld [vmem:[%s6878_s1 + $0xf18] sm:$0xff]  ;;  %v2975_v35 = vpack.c.bf16 %v509_v29, %v507_v27  ;;  %v2529_v36 = vpack.c.bf16 %v66_v31, %v64_v30  ;;  %v63_v37 = vld [vmem:[%s6878_s1 + $0x100] sm:$0xff] }
  0x18   :  { %v65_v38 = vld [vmem:[%s6878_s1 + $0x110] sm:$0xff]  ;;  %v511_v39 = vld [vmem:[%s6878_s1 + $0xf00] sm:$0xff]  ;;  %v2977_v40 = vpack.c.bf16 %v514_v33, %v512_v32  ;;  %v68_v42 = vld [vmem:[%s6878_s1 + $0x128] sm:$0xff] }
  0x19   :  { %2520 = vmatpush1.bf16.msra.mxu1 %v2519_v10  ;;  %v513_v41 = vld [vmem:[%s6878_s1 + $0xf10] sm:$0xff]  ;;  %v70_v43 = vld [vmem:[%s6878_s1 + $0x138] sm:$0xff]  ;;  %v516_v44 = vld [vmem:[%s6878_s1 + $0xf28] sm:$0xff]  ;;  %v2531_v47 = vpack.c.bf16 %v65_v38, %v63_v37 }
  0x1a   :  { %2968 = vmatpush1.bf16.msra.mxu0 %v2967_v11  ;;  %2522 = vmatprep.subr.bf16.mxu1 %v2521_v12  ;;  %v518_v45 = vld [vmem:[%s6878_s1 + $0xf38] sm:$0xff]  ;;  %v2979_v48 = vpack.c.bf16 %v513_v41, %v511_v39  ;;  %v2533_v49 = vpack.c.bf16 %v70_v43, %v68_v42  ;;  %v67_v50 = vld [vmem:[%s6878_s1 + $0x120] sm:$0xff]  ;;  %v69_v51 = vld [vmem:[%s6878_s1 + $0x130] sm:$0xff]  ;;  %v3927_v11 = vsub.s32 7, %v3894_v59 }
  0x1b   :  { %2970 = vmatprep.subr.bf16.mxu0 %v2969_v16  ;;  %v515_v52 = vld [vmem:[%s6878_s1 + $0xf20] sm:$0xff]  ;;  %v2981_v53 = vpack.c.bf16 %v518_v45, %v516_v44  ;;  %v517_v54 = vld [vmem:[%s6878_s1 + $0xf30] sm:$0xff]  ;;  %v72_v55 = vld [vmem:[%s6878_s1 + $0x148] sm:$0xff]  ;;  %v2535_v60 = vpack.c.bf16 %v69_v51, %v67_v50 }
  0x1c   :  { %v74_v56 = vld [vmem:[%s6878_s1 + $0x158] sm:$0xff]  ;;  %v520_v57 = vld [vmem:[%s6878_s1 + $0xf48] sm:$0xff]  ;;  %v2983_v61 = vpack.c.bf16 %v517_v54, %v515_v52  ;;  %v71_v63 = vld [vmem:[%s6878_s1 + $0x140] sm:$0xff] }
  0x1d   :  { %2524 = vmatpush1.bf16.msra.mxu1 %v2523_v22  ;;  %v522_v58 = vld [vmem:[%s6878_s1 + $0xf58] sm:$0xff]  ;;  %v2537_v62 = vpack.c.bf16 %v74_v56, %v72_v55  ;;  %v73_v0 = vld [vmem:[%s6878_s1 + $0x150] sm:$0xff]  ;;  %v519_v1 = vld [vmem:[%s6878_s1 + $0xf40] sm:$0xff] }
  0x1e   :  { %2972 = vmatpush1.bf16.msra.mxu0 %v2971_v23  ;;  %2526 = vmatprep.subr.bf16.mxu1 %v2525_v24  ;;  %v2985_v2 = vpack.c.bf16 %v522_v58, %v520_v57  ;;  %v521_v3 = vld [vmem:[%s6878_s1 + $0xf50] sm:$0xff]  ;;  %v76_v4 = vld [vmem:[%s6878_s1 + $0x168] sm:$0xff]  ;;  %v78_v5 = vld [vmem:[%s6878_s1 + $0x178] sm:$0xff]  ;;  %v2539_v9 = vpack.c.bf16 %v73_v0, %v71_v63 }
  0x1f   :  { %2974 = vmatprep.subr.bf16.mxu0 %v2973_v28  ;;  %v524_v6 = vld [vmem:[%s6878_s1 + $0xf68] sm:$0xff]  ;;  %v526_v7 = vld [vmem:[%s6878_s1 + $0xf78] sm:$0xff]  ;;  %v75_v10 = vld [vmem:[%s6878_s1 + $0x160] sm:$0xff]  ;;  %v2987_v12 = vpack.c.bf16 %v521_v3, %v519_v1  ;;  %v2541_v13 = vpack.c.bf16 %v78_v5, %v76_v4 }
  0x20   :  { %v77_v14 = vld [vmem:[%s6878_s1 + $0x170] sm:$0xff]  ;;  %v523_v15 = vld [vmem:[%s6878_s1 + $0xf60] sm:$0xff]  ;;  %v2989_v17 = vpack.c.bf16 %v526_v7, %v524_v6  ;;  %v80_v18 = vld [vmem:[%s6878_s1 + $0x188] sm:$0xff] }
  0x21   :  { %2528 = vmatpush1.bf16.msra.mxu1 %v2527_v34  ;;  %v525_v16 = vld [vmem:[%s6878_s1 + $0xf70] sm:$0xff]  ;;  %v82_v19 = vld [vmem:[%s6878_s1 + $0x198] sm:$0xff]  ;;  %v3947_v20 = vld [vmem:[%s6877_s0] sm:$0xff]  ;;  %v2543_v25 = vpack.c.bf16 %v77_v14, %v75_v10 }
  0x22   :  { %2976 = vmatpush1.bf16.msra.mxu0 %v2975_v35  ;;  %2530 = vmatprep.subr.bf16.mxu1 %v2529_v36  ;;  %v528_v21 = vld [vmem:[%s6878_s1 + $0xf88] sm:$0xff]  ;;  %v530_v22 = vld [vmem:[%s6878_s1 + $0xf98] sm:$0xff]  ;;  %v1003_v23 = vrot.slane %v3947_v20, %v3921_v8  ;;  %v2991_v27 = vpack.c.bf16 %v525_v16, %v523_v15  ;;  %v2545_v28 = vpack.c.bf16 %v82_v19, %v80_v18  ;;  %v79_v29 = vld [vmem:[%s6878_s1 + $0x180] sm:$0xff]  ;;  %v4064_v15 = vsub.s32 6, %v3894_v59 }
  0x23   :  { %2978 = vmatprep.subr.bf16.mxu0 %v2977_v40  ;;  %v3960_v24 = vld [vmem:[%s6877_s0 + $0x8] sm:$0xff]  ;;  %v81_v30 = vld [vmem:[%s6878_s1 + $0x190] sm:$0xff]  ;;  %v527_v31 = vld [vmem:[%s6878_s1 + $0xf80] sm:$0xff]  ;;  %v2993_v32 = vpack.c.bf16 %v530_v22, %v528_v21 }
  0x24   :  { %v1059_v26 = vrot.slane %v3960_v24, %v3927_v11  ;;  %v529_v33 = vld [vmem:[%s6878_s1 + $0xf90] sm:$0xff]  ;;  %v84_v34 = vld [vmem:[%s6878_s1 + $0x1a8] sm:$0xff]  ;;  %v86_v35 = vld [vmem:[%s6878_s1 + $0x1b8] sm:$0xff]  ;;  %1230 = vmatprep.mubr.f32.mxu1 %v1003_v23  ;;  %v2547_v38 = vpack.c.bf16 %v81_v30, %v79_v29 }
  0x25   :  { %2532 = vmatpush1.bf16.msra.mxu1 %v2531_v47  ;;  %v532_v36 = vld [vmem:[%s6878_s1 + $0xfa8] sm:$0xff]  ;;  %v534_v37 = vld [vmem:[%s6878_s1 + $0xfb8] sm:$0xff]  ;;  %v2995_v39 = vpack.c.bf16 %v529_v33, %v527_v31  ;;  %v2549_v40 = vpack.c.bf16 %v86_v35, %v84_v34  ;;  %v83_v41 = vld [vmem:[%s6878_s1 + $0x1a0] sm:$0xff] }
  0x26   :  { %2980 = vmatpush1.bf16.msra.mxu0 %v2979_v48  ;;  %2534 = vmatprep.subr.bf16.mxu1 %v2533_v49  ;;  %v85_v42 = vld [vmem:[%s6878_s1 + $0x1b0] sm:$0xff]  ;;  %v531_v43 = vld [vmem:[%s6878_s1 + $0xfa0] sm:$0xff]  ;;  %v2997_v44 = vpack.c.bf16 %v534_v37, %v532_v36  ;;  %v88_v46 = vld [vmem:[%s6878_s1 + $0x1c8] sm:$0xff] }
  0x27   :  { %2982 = vmatprep.subr.bf16.mxu0 %v2981_v53  ;;  %1727 = vmatprep.mubr.f32.mxu0 %v1059_v26  ;;  %v533_v45 = vld [vmem:[%s6878_s1 + $0xfb0] sm:$0xff]  ;;  %v90_v47 = vld [vmem:[%s6878_s1 + $0x1d8] sm:$0xff]  ;;  %v536_v48 = vld [vmem:[%s6878_s1 + $0xfc8] sm:$0xff]  ;;  %v2551_v50 = vpack.c.bf16 %v85_v42, %v83_v41 }
  0x28   :  { %v538_v49 = vld [vmem:[%s6878_s1 + $0xfd8] sm:$0xff]  ;;  %v2999_v51 = vpack.c.bf16 %v533_v45, %v531_v43  ;;  %v2553_v52 = vpack.c.bf16 %v90_v47, %v88_v46  ;;  %v87_v53 = vld [vmem:[%s6878_s1 + $0x1c0] sm:$0xff]  ;;  %v89_v54 = vld [vmem:[%s6878_s1 + $0x1d0] sm:$0xff] }
  0x29   :  { %2536 = vmatpush1.bf16.msra.mxu1 %v2535_v60  ;;  %v535_v55 = vld [vmem:[%s6878_s1 + $0xfc0] sm:$0xff]  ;;  %v3001_v56 = vpack.c.bf16 %v538_v49, %v536_v48  ;;  %v537_v57 = vld [vmem:[%s6878_s1 + $0xfd0] sm:$0xff]  ;;  %v92_v58 = vld [vmem:[%s6878_s1 + $0x1e8] sm:$0xff]  ;;  %v2555_v63 = vpack.c.bf16 %v89_v54, %v87_v53 }
  0x2a   :  { %2984 = vmatpush1.bf16.msra.mxu0 %v2983_v61  ;;  %2538 = vmatprep.subr.bf16.mxu1 %v2537_v62  ;;  %v94_v60 = vld [vmem:[%s6878_s1 + $0x1f8] sm:$0xff]  ;;  %v540_v61 = vld [vmem:[%s6878_s1 + $0xfe8] sm:$0xff]  ;;  %v3003_v0 = vpack.c.bf16 %v537_v57, %v535_v55  ;;  %v93_v3 = vld [vmem:[%s6878_s1 + $0x1f0] sm:$0xff] }
  0x2b   :  { %2986 = vmatprep.subr.bf16.mxu0 %v2985_v2  ;;  %v542_v62 = vld [vmem:[%s6878_s1 + $0xff8] sm:$0xff]  ;;  %v2557_v1 = vpack.c.bf16 %v94_v60, %v92_v58  ;;  %v91_v2 = vld [vmem:[%s6878_s1 + $0x1e0] sm:$0xff]  ;;  %v541_v6 = vld [vmem:[%s6878_s1 + $0xff0] sm:$0xff] }
  0x2c   :  { %v539_v4 = vld [vmem:[%s6878_s1 + $0xfe0] sm:$0xff]  ;;  %v3005_v5 = vpack.c.bf16 %v542_v62, %v540_v61  ;;  %v96_v7 = vld [vmem:[%s6878_s1 + $0x208] sm:$0xff]  ;;  %v2559_v14 = vpack.c.bf16 %v93_v3, %v91_v2  ;;  %v97_v19 = vld [vmem:[%s6878_s1 + $0x210] sm:$0xff] }
  0x2d   :  { %2540 = vmatpush1.bf16.msra.mxu1 %v2539_v9  ;;  %v98_v9 = vld [vmem:[%s6878_s1 + $0x218] sm:$0xff]  ;;  %v544_v10 = vld [vmem:[%s6878_s1 + $0x1008] sm:$0xff]  ;;  %v3007_v16 = vpack.c.bf16 %v541_v6, %v539_v4  ;;  %v95_v18 = vld [vmem:[%s6878_s1 + $0x200] sm:$0xff] }
  0x2e   :  { %2988 = vmatpush1.bf16.msra.mxu0 %v2987_v12  ;;  %2542 = vmatprep.subr.bf16.mxu1 %v2541_v13  ;;  %v546_v12 = vld [vmem:[%s6878_s1 + $0x1018] sm:$0xff]  ;;  %v4061_v13 = vsub.s32 0, %v3894_v59  ;;  %v543_v21 = vld [vmem:[%s6878_s1 + $0x1000] sm:$0xff]  ;;  %v545_v23 = vld [vmem:[%s6878_s1 + $0x1010] sm:$0xff]  ;;  %v2563_v31 = vpack.c.bf16 %v97_v19, %v95_v18 }
  0x2f   :  { %2990 = vmatprep.subr.bf16.mxu0 %v2989_v17  ;;  %v2561_v17 = vpack.c.bf16 %v98_v9, %v96_v7  ;;  %v3009_v22 = vpack.c.bf16 %v546_v12, %v544_v10  ;;  %v102_v26 = vld [vmem:[%s6878_s1 + $0x238] sm:$0xff]  ;;  %v548_v29 = vld [vmem:[%s6878_s1 + $0x1028] sm:$0xff]  ;;  %v3011_v33 = vpack.c.bf16 %v545_v23, %v543_v21  ;;  %v99_v35 = vld [vmem:[%s6878_s1 + $0x220] sm:$0xff] }
  0x30   :  { %v550_v30 = vld [vmem:[%s6878_s1 + $0x1038] sm:$0xff]  ;;  %v101_v36 = vld [vmem:[%s6878_s1 + $0x230] sm:$0xff]  ;;  %v547_v37 = vld [vmem:[%s6878_s1 + $0x1020] sm:$0xff] }
  0x31   :  { %2544 = vmatpush1.bf16.msra.mxu1 %v2543_v25  ;;  %v100_v25 = vld [vmem:[%s6878_s1 + $0x228] sm:$0xff]  ;;  %v554_v43 = vld [vmem:[%s6878_s1 + $0x1058] sm:$0xff]  ;;  %v103_v47 = vld [vmem:[%s6878_s1 + $0x240] sm:$0xff] }
  0x32   :  { %2992 = vmatpush1.bf16.msra.mxu0 %v2991_v27  ;;  %2546 = vmatprep.subr.bf16.mxu1 %v2545_v28  ;;  %v4085_v27 = vsub.s32 3, %v3894_v59  ;;  %v999_v28 = vrot.slane %v3947_v20, %v4061_v13  ;;  %v2565_v34 = vpack.c.bf16 %v102_v26, %v100_v25  ;;  %v552_v42 = vld [vmem:[%s6878_s1 + $0x1048] sm:$0xff]  ;;  %v105_v48 = vld [vmem:[%s6878_s1 + $0x250] sm:$0xff]  ;;  %v551_v49 = vld [vmem:[%s6878_s1 + $0x1040] sm:$0xff] }
  0x33   :  { %2994 = vmatprep.subr.bf16.mxu0 %v2993_v32  ;;  %v1055_v32 = vrot.slane %v3960_v24, %v4064_v15  ;;  %v549_v24 = vld [vmem:[%s6878_s1 + $0x1030] sm:$0xff]  ;;  %v110_v53 = vld [vmem:[%s6878_s1 + $0x278] sm:$0xff]  ;;  %v556_v54 = vld [vmem:[%s6878_s1 + $0x1068] sm:$0xff] }
  0x34   :  { %v1011_v41 = vrot.slane %v3947_v20, %v4085_v27  ;;  %v3015_v45 = vpack.c.bf16 %v549_v24, %v547_v37  ;;  %v558_v55 = vld [vmem:[%s6878_s1 + $0x1078] sm:$0xff]  ;;  %v107_v60 = vld [vmem:[%s6878_s1 + $0x260] sm:$0xff]  ;;  %v109_v61 = vld [vmem:[%s6878_s1 + $0x270] sm:$0xff] }
  0x35   :  { %2548 = vmatpush1.bf16.msra.mxu1 %v2547_v38  ;;  %v3013_v38 = vpack.c.bf16 %v550_v30, %v548_v29  ;;  %v555_v62 = vld [vmem:[%s6878_s1 + $0x1060] sm:$0xff]  ;;  %v114_v2 = vld [vmem:[%s6878_s1 + $0x298] sm:$0xff]  ;;  %v560_v3 = vld [vmem:[%s6878_s1 + $0x1088] sm:$0xff] }
  0x36   :  { %2996 = vmatpush1.bf16.msra.mxu0 %v2995_v39  ;;  %2550 = vmatprep.subr.bf16.mxu1 %v2549_v40  ;;  %v104_v39 = vld [vmem:[%s6878_s1 + $0x248] sm:$0xff]  ;;  %v106_v40 = vld [vmem:[%s6878_s1 + $0x258] sm:$0xff]  ;;  %v111_v9 = vld [vmem:[%s6878_s1 + $0x280] sm:$0xff] }
  0x37   :  { %2998 = vmatprep.subr.bf16.mxu0 %v2997_v44  ;;  %v2567_v44 = vpack.c.bf16 %v101_v36, %v99_v35  ;;  %v2569_v46 = vpack.c.bf16 %v106_v40, %v104_v39  ;;  %v562_v4 = vld [vmem:[%s6878_s1 + $0x1098] sm:$0xff]  ;;  %v113_v10 = vld [vmem:[%s6878_s1 + $0x290] sm:$0xff]  ;;  %v559_v12 = vld [vmem:[%s6878_s1 + $0x1080] sm:$0xff] }
  0x38   :  { %v118_v18 = vld [vmem:[%s6878_s1 + $0x2b8] sm:$0xff]  ;;  %v564_v19 = vld [vmem:[%s6878_s1 + $0x10a8] sm:$0xff]  ;;  %v115_v26 = vld [vmem:[%s6878_s1 + $0x2a0] sm:$0xff] }
  0x39   :  { %2552 = vmatpush1.bf16.msra.mxu1 %v2551_v50  ;;  %v3017_v50 = vpack.c.bf16 %v554_v43, %v552_v42  ;;  %v566_v21 = vld [vmem:[%s6878_s1 + $0x10b8] sm:$0xff]  ;;  %v563_v29 = vld [vmem:[%s6878_s1 + $0x10a0] sm:$0xff]  ;;  %v121_v39 = vld [vmem:[%s6878_s1 + $0x2d0] sm:$0xff] }
  0x3a   :  { %3000 = vmatpush1.bf16.msra.mxu0 %v2999_v51  ;;  %2554 = vmatprep.subr.bf16.mxu1 %v2553_v52  ;;  %v553_v51 = vld [vmem:[%s6878_s1 + $0x1050] sm:$0xff]  ;;  %v108_v52 = vld [vmem:[%s6878_s1 + $0x268] sm:$0xff]  ;;  %v3029_v30 = vpack.c.bf16 %v566_v21, %v564_v19  ;;  %v570_v35 = vld [vmem:[%s6878_s1 + $0x10d8] sm:$0xff] }
  0x3b   :  { %3002 = vmatprep.subr.bf16.mxu0 %v3001_v56  ;;  %v2571_v56 = vpack.c.bf16 %v105_v48, %v103_v47  ;;  %v3019_v57 = vpack.c.bf16 %v553_v51, %v551_v49  ;;  %v2573_v58 = vpack.c.bf16 %v110_v53, %v108_v52  ;;  %v119_v37 = vld [vmem:[%s6878_s1 + $0x2c0] sm:$0xff]  ;;  %v124_v43 = vld [vmem:[%s6878_s1 + $0x2e8] sm:$0xff]  ;;  %v574_v47 = vld [vmem:[%s6878_s1 + $0x10f8] sm:$0xff] }
  0x3c   :  { %v567_v40 = vld [vmem:[%s6878_s1 + $0x10c0] sm:$0xff]  ;;  %v2587_v49 = vpack.c.bf16 %v121_v39, %v119_v37  ;;  %v125_v53 = vld [vmem:[%s6878_s1 + $0x2f0] sm:$0xff]  ;;  %v140_v37 = vld [vmem:[%s6878_s1 + $0x368] sm:$0xff] }
  0x3d   :  { %2556 = vmatpush1.bf16.msra.mxu1 %v2555_v63  ;;  %v3021_v63 = vpack.c.bf16 %v558_v55, %v556_v54  ;;  %v123_v52 = vld [vmem:[%s6878_s1 + $0x2e0] sm:$0xff]  ;;  %v590_v39 = vld [vmem:[%s6878_s1 + $0x1178] sm:$0xff] }
  0x3e   :  { %3004 = vmatpush1.bf16.msra.mxu0 %v3003_v0  ;;  %2558 = vmatprep.subr.bf16.mxu1 %v2557_v1  ;;  %v557_v0 = vld [vmem:[%s6878_s1 + $0x1070] sm:$0xff]  ;;  %v112_v1 = vld [vmem:[%s6878_s1 + $0x288] sm:$0xff]  ;;  %v571_v54 = vld [vmem:[%s6878_s1 + $0x10e0] sm:$0xff] }
  0x3f   :  { %3006 = vmatprep.subr.bf16.mxu0 %v3005_v5  ;;  %v2575_v5 = vpack.c.bf16 %v109_v61, %v107_v60  ;;  %v3023_v6 = vpack.c.bf16 %v557_v0, %v555_v62  ;;  %v2577_v7 = vpack.c.bf16 %v114_v2, %v112_v1  ;;  %v576_v60 = vld [vmem:[%s6878_s1 + $0x1108] sm:$0xff]  ;;  %v578_v61 = vld [vmem:[%s6878_s1 + $0x1118] sm:$0xff]  ;;  %v2591_v62 = vpack.c.bf16 %v125_v53, %v123_v52  ;;  %v127_v1 = vld [vmem:[%s6878_s1 + $0x300] sm:$0xff] }
  0x40   :  { %v129_v2 = vld [vmem:[%s6878_s1 + $0x310] sm:$0xff]  ;;  %v579_v19 = vld [vmem:[%s6878_s1 + $0x1120] sm:$0xff]  ;;  %v594_v52 = vld [vmem:[%s6878_s1 + $0x1198] sm:$0xff] }
  0x41   :  { %2560 = vmatpush1.bf16.msra.mxu1 %v2559_v14  ;;  %v3025_v14 = vpack.c.bf16 %v562_v4, %v560_v3  ;;  %v575_v3 = vld [vmem:[%s6878_s1 + $0x1100] sm:$0xff]  ;;  %v3041_v4 = vpack.c.bf16 %v578_v61, %v576_v60  ;;  %v593_v61 = vld [vmem:[%s6878_s1 + $0x1190] sm:$0xff] }
  0x42   :  { %3008 = vmatpush1.bf16.msra.mxu0 %v3007_v16  ;;  %2562 = vmatprep.subr.bf16.mxu1 %v2561_v17  ;;  %v561_v16 = vld [vmem:[%s6878_s1 + $0x1090] sm:$0xff]  ;;  %v116_v17 = vld [vmem:[%s6878_s1 + $0x2a8] sm:$0xff] }
  0x43   :  { %3010 = vmatprep.subr.bf16.mxu0 %v3009_v22  ;;  %v2579_v22 = vpack.c.bf16 %v113_v10, %v111_v9  ;;  %v3027_v23 = vpack.c.bf16 %v561_v16, %v559_v12  ;;  %v2581_v25 = vpack.c.bf16 %v118_v18, %v116_v17  ;;  %v580_v9 = vld [vmem:[%s6878_s1 + $0x1128] sm:$0xff]  ;;  %v582_v10 = vld [vmem:[%s6878_s1 + $0x1138] sm:$0xff]  ;;  %v2595_v12 = vpack.c.bf16 %v129_v2, %v127_v1  ;;  %v131_v17 = vld [vmem:[%s6878_s1 + $0x320] sm:$0xff] }
  0x44   :  { %1231 = vmatmul.mubr.f32.vlgmr.msra.gmra.mrb[0].mxu1 %v999_v28  ;;  %v117_v28 = vld [vmem:[%s6878_s1 + $0x2b0] sm:$0xff]  ;;  %v3045_v21 = vpack.c.bf16 %v582_v10, %v580_v9  ;;  %v598_v1 = vld [vmem:[%s6878_s1 + $0x11b8] sm:$0xff] }
  0x45   :  { %2564 = vmatpush1.bf16.msra.mxu1 %v2563_v31  ;;  %1728 = vmatmul.mubr.f32.vlgmr.msra.gmra.mrb[0].mxu0 %v1055_v32  ;;  %v565_v31 = vld [vmem:[%s6878_s1 + $0x10b0] sm:$0xff]  ;;  %v120_v32 = vld [vmem:[%s6878_s1 + $0x2c8] sm:$0xff]  ;;  %v2583_v36 = vpack.c.bf16 %v117_v28, %v115_v26  ;;  %v586_v28 = vld [vmem:[%s6878_s1 + $0x1158] sm:$0xff] }
  0x46   :  { %3012 = vmatpush1.bf16.msra.mxu0 %v3011_v33  ;;  %2566 = vmatprep.subr.bf16.mxu1 %v2565_v34  ;;  %v122_v33 = vld [vmem:[%s6878_s1 + $0x2d8] sm:$0xff]  ;;  %v568_v34 = vld [vmem:[%s6878_s1 + $0x10c8] sm:$0xff]  ;;  %v133_v18 = vld [vmem:[%s6878_s1 + $0x330] sm:$0xff] }
  0x47   :  { %3014 = vmatprep.subr.bf16.mxu0 %v3013_v38  ;;  %1301 = vmatprep.mubr.f32.mxu1 %v1011_v41  ;;  %v3031_v38 = vpack.c.bf16 %v565_v31, %v563_v29  ;;  %v2585_v24 = vpack.c.bf16 %v122_v33, %v120_v32  ;;  %v569_v41 = vld [vmem:[%s6878_s1 + $0x10d0] sm:$0xff]  ;;  %v3033_v42 = vpack.c.bf16 %v570_v35, %v568_v34  ;;  %v584_v26 = vld [vmem:[%s6878_s1 + $0x1148] sm:$0xff]  ;;  %v135_v32 = vld [vmem:[%s6878_s1 + $0x340] sm:$0xff] }
  0x48   :  { %v2599_v29 = vpack.c.bf16 %v133_v18, %v131_v17  ;;  %v137_v33 = vld [vmem:[%s6878_s1 + $0x350] sm:$0xff]  ;;  %v583_v34 = vld [vmem:[%s6878_s1 + $0x1140] sm:$0xff]  ;;  %v3049_v35 = vpack.c.bf16 %v586_v28, %v584_v26  ;;  %v602_v17 = vld [vmem:[%s6878_s1 + $0x11d8] sm:$0xff] }
  0x49   :  { %2568 = vmatpush1.bf16.msra.mxu1 %v2567_v44  ;;  %v126_v44 = vld [vmem:[%s6878_s1 + $0x2f8] sm:$0xff]  ;;  %v597_v10 = vld [vmem:[%s6878_s1 + $0x11b0] sm:$0xff] }
  0x4a   :  { %3016 = vmatpush1.bf16.msra.mxu0 %v3015_v45  ;;  %2570 = vmatprep.subr.bf16.mxu1 %v2569_v46  ;;  %v4240_v45 = vld [vmem:[%s6877_s0 + $0x10] sm:$0xff]  ;;  %v572_v46 = vld [vmem:[%s6878_s1 + $0x10e8] sm:$0xff]  ;;  %v2589_v51 = vpack.c.bf16 %v126_v44, %v124_v43  ;;  %v139_v43 = vld [vmem:[%s6878_s1 + $0x360] sm:$0xff] }
  0x4b   :  { %3018 = vmatprep.subr.bf16.mxu0 %v3017_v50  ;;  %v1067_v48 = vrot.slane %v4240_v45, %v3921_v8  ;;  %v3035_v50 = vpack.c.bf16 %v569_v41, %v567_v40  ;;  %v3037_v55 = vpack.c.bf16 %v574_v47, %v572_v46  ;;  %v2603_v40 = vpack.c.bf16 %v137_v33, %v135_v32  ;;  %v141_v44 = vld [vmem:[%s6878_s1 + $0x370] sm:$0xff]  ;;  %v587_v46 = vld [vmem:[%s6878_s1 + $0x1160] sm:$0xff]  ;;  %v606_v32 = vld [vmem:[%s6878_s1 + $0x11f8] sm:$0xff] }
  0x4c   :  { %v2607_v53 = vpack.c.bf16 %v141_v44, %v139_v43  ;;  %v601_v28 = vld [vmem:[%s6878_s1 + $0x11d0] sm:$0xff]  ;;  %v610_v43 = vld [vmem:[%s6878_s1 + $0x1218] sm:$0xff]  ;;  %v4467_v44 = vsub.s32 2, %v3894_v59 }
  0x4d   :  { %2572 = vmatpush1.bf16.msra.mxu1 %v2571_v56  ;;  %v573_v56 = vld [vmem:[%s6878_s1 + $0x10f0] sm:$0xff]  ;;  %1798 = vmatprep.mubr.f32.mxu0 %v1067_v48 }
  0x4e   :  { %3020 = vmatpush1.bf16.msra.mxu0 %v3019_v57  ;;  %2574 = vmatprep.subr.bf16.mxu1 %v2573_v58  ;;  %v128_v57 = vld [vmem:[%s6878_s1 + $0x308] sm:$0xff]  ;;  %v130_v58 = vld [vmem:[%s6878_s1 + $0x318] sm:$0xff]  ;;  %v589_v48 = vld [vmem:[%s6878_s1 + $0x1170] sm:$0xff] }
  0x4f   :  { %3022 = vmatprep.subr.bf16.mxu0 %v3021_v63  ;;  %v3039_v63 = vpack.c.bf16 %v573_v56, %v571_v54  ;;  %v2593_v0 = vpack.c.bf16 %v130_v58, %v128_v57  ;;  %v3055_v54 = vpack.c.bf16 %v589_v48, %v587_v46  ;;  %v143_v56 = vld [vmem:[%s6878_s1 + $0x380] sm:$0xff]  ;;  %v145_v57 = vld [vmem:[%s6878_s1 + $0x390] sm:$0xff] }
  0x50   :  { %v591_v58 = vld [vmem:[%s6878_s1 + $0x1180] sm:$0xff]  ;;  %v2611_v2 = vpack.c.bf16 %v145_v57, %v143_v56  ;;  %v4488_v56 = vsub.s32 5, %v3894_v59  ;;  %v1007_v57 = vrot.slane %v3947_v20, %v4467_v44 }
  0x51   :  { %2576 = vmatpush1.bf16.msra.mxu1 %v2575_v5  ;;  %v577_v5 = vld [vmem:[%s6878_s1 + $0x1110] sm:$0xff] }
  0x52   :  { %3024 = vmatpush1.bf16.msra.mxu0 %v3023_v6  ;;  %2578 = vmatprep.subr.bf16.mxu1 %v2577_v7  ;;  %v132_v6 = vld [vmem:[%s6878_s1 + $0x328] sm:$0xff]  ;;  %v134_v7 = vld [vmem:[%s6878_s1 + $0x338] sm:$0xff] }
  0x53   :  { %3026 = vmatprep.subr.bf16.mxu0 %v3025_v14  ;;  %v3043_v14 = vpack.c.bf16 %v577_v5, %v575_v3  ;;  %v2597_v16 = vpack.c.bf16 %v134_v7, %v132_v6  ;;  %v3059_v3 = vpack.c.bf16 %v593_v61, %v591_v58  ;;  %v147_v5 = vld [vmem:[%s6878_s1 + $0x3a0] sm:$0xff]  ;;  %v149_v6 = vld [vmem:[%s6878_s1 + $0x3b0] sm:$0xff]  ;;  %v612_v58 = vld [vmem:[%s6878_s1 + $0x1228] sm:$0xff] }
  0x54   :  { %v595_v7 = vld [vmem:[%s6878_s1 + $0x11a0] sm:$0xff]  ;;  %v2615_v18 = vpack.c.bf16 %v149_v6, %v147_v5  ;;  %v613_v5 = vld [vmem:[%s6878_s1 + $0x1230] sm:$0xff]  ;;  %v168_v6 = vld [vmem:[%s6878_s1 + $0x448] sm:$0xff] }
  0x55   :  { %2580 = vmatpush1.bf16.msra.mxu1 %v2579_v22  ;;  %v581_v22 = vld [vmem:[%s6878_s1 + $0x1130] sm:$0xff] }
  0x56   :  { %3028 = vmatpush1.bf16.msra.mxu0 %v3027_v23  ;;  %2582 = vmatprep.subr.bf16.mxu1 %v2581_v25  ;;  %v136_v23 = vld [vmem:[%s6878_s1 + $0x348] sm:$0xff]  ;;  %v138_v25 = vld [vmem:[%s6878_s1 + $0x358] sm:$0xff] }
  0x57   :  { %3030 = vmatprep.subr.bf16.mxu0 %v3029_v30  ;;  %v3047_v30 = vpack.c.bf16 %v581_v22, %v579_v19  ;;  %v2601_v31 = vpack.c.bf16 %v138_v25, %v136_v23  ;;  %v3063_v19 = vpack.c.bf16 %v597_v10, %v595_v7  ;;  %v151_v22 = vld [vmem:[%s6878_s1 + $0x3c0] sm:$0xff]  ;;  %v153_v23 = vld [vmem:[%s6878_s1 + $0x3d0] sm:$0xff]  ;;  %v170_v7 = vld [vmem:[%s6878_s1 + $0x458] sm:$0xff] }
  0x58   :  { %v599_v25 = vld [vmem:[%s6878_s1 + $0x11c0] sm:$0xff]  ;;  %v2619_v33 = vpack.c.bf16 %v153_v23, %v151_v22  ;;  %v616_v10 = vld [vmem:[%s6878_s1 + $0x1248] sm:$0xff]  ;;  %v617_v23 = vld [vmem:[%s6878_s1 + $0x1250] sm:$0xff] }
  0x59   :  { %2584 = vmatpush1.bf16.msra.mxu1 %v2583_v36  ;;  %v585_v36 = vld [vmem:[%s6878_s1 + $0x1150] sm:$0xff] }
  0x5a   :  { %3032 = vmatpush1.bf16.msra.mxu0 %v3031_v38  ;;  %2586 = vmatprep.subr.bf16.mxu1 %v2585_v24  ;;  %v142_v38 = vld [vmem:[%s6878_s1 + $0x378] sm:$0xff]  ;;  %v588_v24 = vld [vmem:[%s6878_s1 + $0x1168] sm:$0xff]  ;;  %v3051_v41 = vpack.c.bf16 %v585_v36, %v583_v34  ;;  %v3067_v34 = vpack.c.bf16 %v601_v28, %v599_v25  ;;  %v155_v36 = vld [vmem:[%s6878_s1 + $0x3e0] sm:$0xff] }
  0x5b   :  { %3034 = vmatprep.subr.bf16.mxu0 %v3033_v42  ;;  %v2605_v42 = vpack.c.bf16 %v142_v38, %v140_v37  ;;  %v3053_v47 = vpack.c.bf16 %v590_v39, %v588_v24  ;;  %v157_v37 = vld [vmem:[%s6878_s1 + $0x3f0] sm:$0xff]  ;;  %v603_v38 = vld [vmem:[%s6878_s1 + $0x11e0] sm:$0xff]  ;;  %v172_v25 = vld [vmem:[%s6878_s1 + $0x468] sm:$0xff] }
  0x5c   :  { %v605_v39 = vld [vmem:[%s6878_s1 + $0x11f0] sm:$0xff]  ;;  %v2623_v46 = vpack.c.bf16 %v157_v37, %v155_v36  ;;  %v620_v28 = vld [vmem:[%s6878_s1 + $0x1268] sm:$0xff] }
  0x5d   :  { %2588 = vmatpush1.bf16.msra.mxu1 %v2587_v49  ;;  %v144_v49 = vld [vmem:[%s6878_s1 + $0x388] sm:$0xff]  ;;  %v621_v37 = vld [vmem:[%s6878_s1 + $0x1270] sm:$0xff] }
  0x5e   :  { %3036 = vmatpush1.bf16.msra.mxu0 %v3035_v50  ;;  %2590 = vmatprep.subr.bf16.mxu1 %v2589_v51  ;;  %v146_v50 = vld [vmem:[%s6878_s1 + $0x398] sm:$0xff]  ;;  %v592_v51 = vld [vmem:[%s6878_s1 + $0x1188] sm:$0xff] }
  0x5f   :  { %3038 = vmatprep.subr.bf16.mxu0 %v3037_v55  ;;  %v2609_v55 = vpack.c.bf16 %v146_v50, %v144_v49  ;;  %v3057_v60 = vpack.c.bf16 %v594_v52, %v592_v51  ;;  %v159_v49 = vld [vmem:[%s6878_s1 + $0x400] sm:$0xff]  ;;  %v161_v50 = vld [vmem:[%s6878_s1 + $0x410] sm:$0xff] }
  0x60   :  { %v607_v51 = vld [vmem:[%s6878_s1 + $0x1200] sm:$0xff]  ;;  %v2627_v61 = vpack.c.bf16 %v161_v50, %v159_v49  ;;  %v625_v50 = vld [vmem:[%s6878_s1 + $0x1290] sm:$0xff] }
  0x61   :  { %2592 = vmatpush1.bf16.msra.mxu1 %v2591_v62  ;;  %v148_v62 = vld [vmem:[%s6878_s1 + $0x3a8] sm:$0xff] }
  0x62   :  { %3040 = vmatpush1.bf16.msra.mxu0 %v3039_v63  ;;  %2594 = vmatprep.subr.bf16.mxu1 %v2593_v0  ;;  %v150_v63 = vld [vmem:[%s6878_s1 + $0x3b8] sm:$0xff]  ;;  %v596_v0 = vld [vmem:[%s6878_s1 + $0x11a8] sm:$0xff] }
  0x63   :  { %3042 = vmatprep.subr.bf16.mxu0 %v3041_v4  ;;  %v2613_v4 = vpack.c.bf16 %v150_v63, %v148_v62  ;;  %v3061_v9 = vpack.c.bf16 %v598_v1, %v596_v0  ;;  %v1063_v62 = vrot.slane %v4240_v45, %v4061_v13  ;;  %v163_v1 = vld [vmem:[%s6878_s1 + $0x420] sm:$0xff] }
  0x65   :  { %2596 = vmatpush1.bf16.msra.mxu1 %v2595_v12  ;;  %v152_v12 = vld [vmem:[%s6878_s1 + $0x3c8] sm:$0xff] }
  0x66   :  { %3044 = vmatpush1.bf16.msra.mxu0 %v3043_v14  ;;  %2598 = vmatprep.subr.bf16.mxu1 %v2597_v16  ;;  %v154_v14 = vld [vmem:[%s6878_s1 + $0x3d8] sm:$0xff]  ;;  %v600_v16 = vld [vmem:[%s6878_s1 + $0x11c8] sm:$0xff] }
  0x67   :  { %3046 = vmatprep.subr.bf16.mxu0 %v3045_v21  ;;  %v2617_v21 = vpack.c.bf16 %v154_v14, %v152_v12  ;;  %v3065_v26 = vpack.c.bf16 %v602_v17, %v600_v16  ;;  %v618_v12 = vld [vmem:[%s6878_s1 + $0x1258] sm:$0xff]  ;;  %v1075_v14 = vrot.slane %v4240_v45, %v4085_v27 }
  0x68   :  { %v3081_v22 = vpack.c.bf16 %v618_v12, %v616_v10  ;;  %v185_v10 = vld [vmem:[%s6878_s1 + $0x4d0] sm:$0xff]  ;;  %v631_v12 = vld [vmem:[%s6878_s1 + $0x12c0] sm:$0xff] }
  0x69   :  { %2600 = vmatpush1.bf16.msra.mxu1 %v2599_v29  ;;  %v156_v29 = vld [vmem:[%s6878_s1 + $0x3e8] sm:$0xff] }
  0x6a   :  { %3048 = vmatpush1.bf16.msra.mxu0 %v3047_v30  ;;  %2602 = vmatprep.subr.bf16.mxu1 %v2601_v31  ;;  %v158_v30 = vld [vmem:[%s6878_s1 + $0x3f8] sm:$0xff]  ;;  %v604_v31 = vld [vmem:[%s6878_s1 + $0x11e8] sm:$0xff] }
  0x6b   :  { %3050 = vmatprep.subr.bf16.mxu0 %v3049_v35  ;;  %v2621_v35 = vpack.c.bf16 %v158_v30, %v156_v29  ;;  %v3069_v24 = vpack.c.bf16 %v606_v32, %v604_v31  ;;  %v622_v29 = vld [vmem:[%s6878_s1 + $0x1278] sm:$0xff] }
  0x6c   :  { %v3085_v36 = vpack.c.bf16 %v622_v29, %v620_v28  ;;  %v635_v28 = vld [vmem:[%s6878_s1 + $0x12e0] sm:$0xff] }
  0x6d   :  { %2604 = vmatpush1.bf16.msra.mxu1 %v2603_v40  ;;  %v160_v40 = vld [vmem:[%s6878_s1 + $0x408] sm:$0xff] }
  0x6e   :  { %3052 = vmatpush1.bf16.msra.mxu0 %v3051_v41  ;;  %2606 = vmatprep.subr.bf16.mxu1 %v2605_v42  ;;  %v162_v41 = vld [vmem:[%s6878_s1 + $0x418] sm:$0xff]  ;;  %v608_v42 = vld [vmem:[%s6878_s1 + $0x1208] sm:$0xff] }
  0x6f   :  { %3054 = vmatprep.subr.bf16.mxu0 %v3053_v47  ;;  %v3071_v47 = vpack.c.bf16 %v605_v39, %v603_v38  ;;  %v2625_v48 = vpack.c.bf16 %v162_v41, %v160_v40  ;;  %v3073_v52 = vpack.c.bf16 %v610_v43, %v608_v42  ;;  %v176_v38 = vld [vmem:[%s6878_s1 + $0x488] sm:$0xff]  ;;  %v626_v40 = vld [vmem:[%s6878_s1 + $0x1298] sm:$0xff] }
  0x70   :  { %v624_v39 = vld [vmem:[%s6878_s1 + $0x1288] sm:$0xff] }
  0x71   :  { %2608 = vmatpush1.bf16.msra.mxu1 %v2607_v53  ;;  %v609_v53 = vld [vmem:[%s6878_s1 + $0x1210] sm:$0xff]  ;;  %v3089_v49 = vpack.c.bf16 %v626_v40, %v624_v39  ;;  %v639_v39 = vld [vmem:[%s6878_s1 + $0x1300] sm:$0xff] }
  0x72   :  { %3056 = vmatpush1.bf16.msra.mxu0 %v3055_v54  ;;  %2610 = vmatprep.subr.bf16.mxu1 %v2609_v55  ;;  %v164_v54 = vld [vmem:[%s6878_s1 + $0x428] sm:$0xff]  ;;  %v166_v55 = vld [vmem:[%s6878_s1 + $0x438] sm:$0xff]  ;;  %v3075_v63 = vpack.c.bf16 %v609_v53, %v607_v51 }
  0x73   :  { %3058 = vmatprep.subr.bf16.mxu0 %v3057_v60  ;;  %v614_v60 = vld [vmem:[%s6878_s1 + $0x1238] sm:$0xff]  ;;  %v2629_v0 = vpack.c.bf16 %v166_v55, %v164_v54  ;;  %v180_v51 = vld [vmem:[%s6878_s1 + $0x4a8] sm:$0xff] }
  0x74   :  { %v628_v53 = vld [vmem:[%s6878_s1 + $0x12a8] sm:$0xff]  ;;  %v630_v54 = vld [vmem:[%s6878_s1 + $0x12b8] sm:$0xff] }
  0x75   :  { %2612 = vmatpush1.bf16.msra.mxu1 %v2611_v2  ;;  %v165_v2 = vld [vmem:[%s6878_s1 + $0x430] sm:$0xff] }
  0x76   :  { %3060 = vmatpush1.bf16.msra.mxu0 %v3059_v3  ;;  %2614 = vmatprep.subr.bf16.mxu1 %v2613_v4  ;;  %v611_v3 = vld [vmem:[%s6878_s1 + $0x1220] sm:$0xff]  ;;  %v3077_v4 = vpack.c.bf16 %v614_v60, %v612_v58  ;;  %v2631_v16 = vpack.c.bf16 %v165_v2, %v163_v1  ;;  %v184_v1 = vld [vmem:[%s6878_s1 + $0x4c8] sm:$0xff]  ;;  %v186_v2 = vld [vmem:[%s6878_s1 + $0x4d8] sm:$0xff] }
  0x77   :  { %3062 = vmatprep.subr.bf16.mxu0 %v3061_v9  ;;  %v1019_v9 = vrot.slane %v3947_v20, %v4488_v56  ;;  %v3079_v17 = vpack.c.bf16 %v613_v5, %v611_v3  ;;  %v167_v20 = vld [vmem:[%s6878_s1 + $0x440] sm:$0xff]  ;;  %v632_v3 = vld [vmem:[%s6878_s1 + $0x12c8] sm:$0xff] }
  0x78   :  { %v179_v60 = vld [vmem:[%s6878_s1 + $0x4a0] sm:$0xff] }
  0x79   :  { %2616 = vmatpush1.bf16.msra.mxu1 %v2615_v18  ;;  %v2633_v18 = vpack.c.bf16 %v170_v7, %v168_v6  ;;  %v2649_v7 = vpack.c.bf16 %v186_v2, %v184_v1  ;;  %v199_v1 = vld [vmem:[%s6878_s1 + $0x540] sm:$0xff]  ;;  %v201_v2 = vld [vmem:[%s6878_s1 + $0x550] sm:$0xff] }
  0x7a   :  { %3064 = vmatpush1.bf16.msra.mxu0 %v3063_v19  ;;  %2618 = vmatprep.subr.bf16.mxu1 %v2617_v21  ;;  %v169_v19 = vld [vmem:[%s6878_s1 + $0x450] sm:$0xff]  ;;  %v615_v21 = vld [vmem:[%s6878_s1 + $0x1240] sm:$0xff] }
  0x7b   :  { %3066 = vmatprep.subr.bf16.mxu0 %v3065_v26  ;;  %v174_v26 = vld [vmem:[%s6878_s1 + $0x478] sm:$0xff]  ;;  %v2635_v30 = vpack.c.bf16 %v169_v19, %v167_v20  ;;  %v3083_v31 = vpack.c.bf16 %v617_v23, %v615_v21  ;;  %v636_v20 = vld [vmem:[%s6878_s1 + $0x12e8] sm:$0xff] }
  0x7c   :  { %v2637_v32 = vpack.c.bf16 %v174_v26, %v172_v25  ;;  %v638_v19 = vld [vmem:[%s6878_s1 + $0x12f8] sm:$0xff]  ;;  %v187_v25 = vld [vmem:[%s6878_s1 + $0x4e0] sm:$0xff]  ;;  %v189_v26 = vld [vmem:[%s6878_s1 + $0x4f0] sm:$0xff] }
  0x7d   :  { %2620 = vmatpush1.bf16.msra.mxu1 %v2619_v33  ;;  %v171_v33 = vld [vmem:[%s6878_s1 + $0x460] sm:$0xff]  ;;  %v3101_v29 = vpack.c.bf16 %v638_v19, %v636_v20 }
  0x7e   :  { %3068 = vmatpush1.bf16.msra.mxu0 %v3067_v34  ;;  %2622 = vmatprep.subr.bf16.mxu1 %v2621_v35  ;;  %v173_v34 = vld [vmem:[%s6878_s1 + $0x470] sm:$0xff]  ;;  %v619_v35 = vld [vmem:[%s6878_s1 + $0x1260] sm:$0xff] }
  0x7f   :  { %3070 = vmatprep.subr.bf16.mxu0 %v3069_v24  ;;  %v178_v24 = vld [vmem:[%s6878_s1 + $0x498] sm:$0xff]  ;;  %v2639_v41 = vpack.c.bf16 %v173_v34, %v171_v33  ;;  %v3087_v42 = vpack.c.bf16 %v621_v37, %v619_v35  ;;  %v640_v33 = vld [vmem:[%s6878_s1 + $0x1308] sm:$0xff]  ;;  %v2655_v35 = vpack.c.bf16 %v189_v26, %v187_v25  ;;  %v651_v20 = vld [vmem:[%s6878_s1 + $0x1360] sm:$0xff] }
  0x80   :  { %v2641_v43 = vpack.c.bf16 %v178_v24, %v176_v38  ;;  %v642_v34 = vld [vmem:[%s6878_s1 + $0x1318] sm:$0xff]  ;;  %v191_v38 = vld [vmem:[%s6878_s1 + $0x500] sm:$0xff]  ;;  %v193_v24 = vld [vmem:[%s6878_s1 + $0x510] sm:$0xff] }
  0x81   :  { %2624 = vmatpush1.bf16.msra.mxu1 %v2623_v46  ;;  %v175_v46 = vld [vmem:[%s6878_s1 + $0x480] sm:$0xff]  ;;  %v3105_v40 = vpack.c.bf16 %v642_v34, %v640_v33  ;;  %v656_v25 = vld [vmem:[%s6878_s1 + $0x1388] sm:$0xff]  ;;  %v658_v26 = vld [vmem:[%s6878_s1 + $0x1398] sm:$0xff] }
  0x82   :  { %3072 = vmatpush1.bf16.msra.mxu0 %v3071_v47  ;;  %2626 = vmatprep.subr.bf16.mxu1 %v2625_v48  ;;  %v177_v47 = vld [vmem:[%s6878_s1 + $0x490] sm:$0xff]  ;;  %v623_v48 = vld [vmem:[%s6878_s1 + $0x1280] sm:$0xff]  ;;  %v3121_v34 = vpack.c.bf16 %v658_v26, %v656_v25 }
  0x83   :  { %3074 = vmatprep.subr.bf16.mxu0 %v3073_v52  ;;  %v182_v52 = vld [vmem:[%s6878_s1 + $0x4b8] sm:$0xff]  ;;  %v2643_v55 = vpack.c.bf16 %v177_v47, %v175_v46  ;;  %v644_v46 = vld [vmem:[%s6878_s1 + $0x1328] sm:$0xff]  ;;  %v655_v33 = vld [vmem:[%s6878_s1 + $0x1380] sm:$0xff] }
  0x84   :  { %1302 = vmatmul.mubr.f32.vlgmr.msra.gmra.mrb[0].mxu1 %v1007_v57  ;;  %v3091_v57 = vpack.c.bf16 %v625_v50, %v623_v48  ;;  %v2645_v58 = vpack.c.bf16 %v182_v52, %v180_v51  ;;  %v646_v47 = vld [vmem:[%s6878_s1 + $0x1338] sm:$0xff]  ;;  %v2659_v48 = vpack.c.bf16 %v193_v24, %v191_v38  ;;  %v195_v51 = vld [vmem:[%s6878_s1 + $0x520] sm:$0xff]  ;;  %v197_v52 = vld [vmem:[%s6878_s1 + $0x530] sm:$0xff] }
  0x85   :  { %2628 = vmatpush1.bf16.msra.mxu1 %v2627_v61  ;;  %1799 = vmatmul.mubr.f32.vlgmr.msra.gmra.mrb[0].mxu0 %v1063_v62  ;;  %v181_v61 = vld [vmem:[%s6878_s1 + $0x4b0] sm:$0xff]  ;;  %v627_v62 = vld [vmem:[%s6878_s1 + $0x12a0] sm:$0xff]  ;;  %v660_v38 = vld [vmem:[%s6878_s1 + $0x13a8] sm:$0xff] }
  0x86   :  { %3076 = vmatpush1.bf16.msra.mxu0 %v3075_v63  ;;  %2630 = vmatprep.subr.bf16.mxu1 %v2629_v0  ;;  %v3093_v63 = vpack.c.bf16 %v630_v54, %v628_v53  ;;  %v629_v0 = vld [vmem:[%s6878_s1 + $0x12b0] sm:$0xff]  ;;  %v2647_v5 = vpack.c.bf16 %v181_v61, %v179_v60  ;;  %v643_v53 = vld [vmem:[%s6878_s1 + $0x1320] sm:$0xff]  ;;  %v3109_v54 = vpack.c.bf16 %v646_v47, %v644_v46  ;;  %v648_v60 = vld [vmem:[%s6878_s1 + $0x1348] sm:$0xff] }
  0x87   :  { %3078 = vmatprep.subr.bf16.mxu0 %v3077_v4  ;;  %1372 = vmatprep.mubr.f32.mxu1 %v1019_v9  ;;  %v634_v4 = vld [vmem:[%s6878_s1 + $0x12d8] sm:$0xff]  ;;  %v3095_v6 = vpack.c.bf16 %v629_v0, %v627_v62  ;;  %v183_v9 = vld [vmem:[%s6878_s1 + $0x4c0] sm:$0xff]  ;;  %v2663_v62 = vpack.c.bf16 %v197_v52, %v195_v51  ;;  %v664_v51 = vld [vmem:[%s6878_s1 + $0x13c8] sm:$0xff] }
  0x88   :  { %1869 = vmatprep.mubr.f32.mxu0 %v1075_v14  ;;  %v3097_v14 = vpack.c.bf16 %v634_v4, %v632_v3  ;;  %v2651_v21 = vpack.c.bf16 %v185_v10, %v183_v9  ;;  %v650_v61 = vld [vmem:[%s6878_s1 + $0x1358] sm:$0xff]  ;;  %v647_v3 = vld [vmem:[%s6878_s1 + $0x1340] sm:$0xff]  ;;  %v652_v9 = vld [vmem:[%s6878_s1 + $0x1368] sm:$0xff] }
  0x89   :  { %2632 = vmatpush1.bf16.msra.mxu1 %v2631_v16  ;;  %v633_v16 = vld [vmem:[%s6878_s1 + $0x12d0] sm:$0xff]  ;;  %v3113_v4 = vpack.c.bf16 %v650_v61, %v648_v60  ;;  %v654_v10 = vld [vmem:[%s6878_s1 + $0x1378] sm:$0xff]  ;;  %v659_v46 = vld [vmem:[%s6878_s1 + $0x13a0] sm:$0xff] }
  0x8a   :  { %3080 = vmatpush1.bf16.msra.mxu0 %v3079_v17  ;;  %2634 = vmatprep.subr.bf16.mxu1 %v2633_v18  ;;  %v188_v17 = vld [vmem:[%s6878_s1 + $0x4e8] sm:$0xff]  ;;  %v190_v18 = vld [vmem:[%s6878_s1 + $0x4f8] sm:$0xff]  ;;  %v3117_v19 = vpack.c.bf16 %v654_v10, %v652_v9  ;;  %v663_v60 = vld [vmem:[%s6878_s1 + $0x13c0] sm:$0xff] }
  0x8b   :  { %3082 = vmatprep.subr.bf16.mxu0 %v3081_v22  ;;  %v3099_v22 = vpack.c.bf16 %v633_v16, %v631_v12  ;;  %v2653_v23 = vpack.c.bf16 %v190_v18, %v188_v17  ;;  %v2667_v12 = vpack.c.bf16 %v201_v2, %v199_v1  ;;  %v203_v17 = vld [vmem:[%s6878_s1 + $0x560] sm:$0xff]  ;;  %v205_v18 = vld [vmem:[%s6878_s1 + $0x570] sm:$0xff]  ;;  %v662_v24 = vld [vmem:[%s6878_s1 + $0x13b8] sm:$0xff] }
  0x8c   :  { %v3125_v47 = vpack.c.bf16 %v662_v24, %v660_v38  ;;  %v666_v52 = vld [vmem:[%s6878_s1 + $0x13d8] sm:$0xff]  ;;  %v668_v1 = vld [vmem:[%s6878_s1 + $0x13e8] sm:$0xff]  ;;  %v667_v9 = vld [vmem:[%s6878_s1 + $0x13e0] sm:$0xff] }
  0x8d   :  { %2636 = vmatpush1.bf16.msra.mxu1 %v2635_v30  ;;  %v637_v30 = vld [vmem:[%s6878_s1 + $0x12f0] sm:$0xff]  ;;  %v3129_v61 = vpack.c.bf16 %v666_v52, %v664_v51  ;;  %v670_v2 = vld [vmem:[%s6878_s1 + $0x13f8] sm:$0xff]  ;;  %v671_v26 = vld [vmem:[%s6878_s1 + $0x1400] sm:$0xff] }
  0x8e   :  { %3084 = vmatpush1.bf16.msra.mxu0 %v3083_v31  ;;  %2638 = vmatprep.subr.bf16.mxu1 %v2637_v32  ;;  %v192_v31 = vld [vmem:[%s6878_s1 + $0x508] sm:$0xff]  ;;  %v194_v32 = vld [vmem:[%s6878_s1 + $0x518] sm:$0xff]  ;;  %v3133_v10 = vpack.c.bf16 %v670_v2, %v668_v1  ;;  %v225_v25 = vld [vmem:[%s6878_s1 + $0x610] sm:$0xff] }
  0x8f   :  { %3086 = vmatprep.subr.bf16.mxu0 %v3085_v36  ;;  %v3103_v36 = vpack.c.bf16 %v637_v30, %v635_v28  ;;  %v2657_v37 = vpack.c.bf16 %v194_v32, %v192_v31  ;;  %v2671_v28 = vpack.c.bf16 %v205_v18, %v203_v17  ;;  %v207_v31 = vld [vmem:[%s6878_s1 + $0x580] sm:$0xff]  ;;  %v209_v32 = vld [vmem:[%s6878_s1 + $0x590] sm:$0xff]  ;;  %v672_v17 = vld [vmem:[%s6878_s1 + $0x1408] sm:$0xff] }
  0x90   :  { %v674_v18 = vld [vmem:[%s6878_s1 + $0x1418] sm:$0xff]  ;;  %v227_v24 = vld [vmem:[%s6878_s1 + $0x620] sm:$0xff] }
  0x91   :  { %2640 = vmatpush1.bf16.msra.mxu1 %v2639_v41  ;;  %v641_v41 = vld [vmem:[%s6878_s1 + $0x1310] sm:$0xff] }
  0x92   :  { %3088 = vmatpush1.bf16.msra.mxu0 %v3087_v42  ;;  %2642 = vmatprep.subr.bf16.mxu1 %v2641_v43  ;;  %v196_v42 = vld [vmem:[%s6878_s1 + $0x528] sm:$0xff]  ;;  %v198_v43 = vld [vmem:[%s6878_s1 + $0x538] sm:$0xff] }
  0x93   :  { %3090 = vmatprep.subr.bf16.mxu0 %v3089_v49  ;;  %v3107_v49 = vpack.c.bf16 %v641_v41, %v639_v39  ;;  %v2661_v50 = vpack.c.bf16 %v198_v43, %v196_v42  ;;  %v2675_v39 = vpack.c.bf16 %v209_v32, %v207_v31  ;;  %v211_v42 = vld [vmem:[%s6878_s1 + $0x5a0] sm:$0xff]  ;;  %v213_v43 = vld [vmem:[%s6878_s1 + $0x5b0] sm:$0xff] }
  0x94   :  { %v4888_v31 = vld [vmem:[%s6877_s0] sm:$0xff] }
  0x95   :  { %2644 = vmatpush1.bf16.msra.mxu1 %v2643_v55  ;;  %v645_v55 = vld [vmem:[%s6878_s1 + $0x1330] sm:$0xff] }
  0x96   :  { %3092 = vmatpush1.bf16.msra.mxu0 %v3091_v57  ;;  %2646 = vmatprep.subr.bf16.mxu1 %v2645_v58  ;;  %v200_v57 = vld [vmem:[%s6878_s1 + $0x548] sm:$0xff]  ;;  %v202_v58 = vld [vmem:[%s6878_s1 + $0x558] sm:$0xff] }
  0x97   :  { %3094 = vmatprep.subr.bf16.mxu0 %v3093_v63  ;;  %v3111_v63 = vpack.c.bf16 %v645_v55, %v643_v53  ;;  %v2665_v0 = vpack.c.bf16 %v202_v58, %v200_v57  ;;  %v2679_v53 = vpack.c.bf16 %v213_v43, %v211_v42  ;;  %v215_v57 = vld [vmem:[%s6878_s1 + $0x5c0] sm:$0xff]  ;;  %v217_v58 = vld [vmem:[%s6878_s1 + $0x5d0] sm:$0xff]  ;;  %v232_v43 = vld [vmem:[%s6878_s1 + $0x648] sm:$0xff] }
  0x98   :  { %v677_v42 = vld [vmem:[%s6878_s1 + $0x1430] sm:$0xff] }
  0x99   :  { %2648 = vmatpush1.bf16.msra.mxu1 %v2647_v5  ;;  %v649_v5 = vld [vmem:[%s6878_s1 + $0x1350] sm:$0xff] }
  0x9a   :  { %3096 = vmatpush1.bf16.msra.mxu0 %v3095_v6  ;;  %2650 = vmatprep.subr.bf16.mxu1 %v2649_v7  ;;  %v204_v6 = vld [vmem:[%s6878_s1 + $0x568] sm:$0xff]  ;;  %v206_v7 = vld [vmem:[%s6878_s1 + $0x578] sm:$0xff] }
  0x9b   :  { %3098 = vmatprep.subr.bf16.mxu0 %v3097_v14  ;;  %v3115_v14 = vpack.c.bf16 %v649_v5, %v647_v3  ;;  %v2669_v16 = vpack.c.bf16 %v206_v7, %v204_v6  ;;  %v2683_v3 = vpack.c.bf16 %v217_v58, %v215_v57  ;;  %v219_v6 = vld [vmem:[%s6878_s1 + $0x5e0] sm:$0xff]  ;;  %v221_v7 = vld [vmem:[%s6878_s1 + $0x5f0] sm:$0xff] }
  0x9c   :  { %v679_v57 = vld [vmem:[%s6878_s1 + $0x1440] sm:$0xff]  ;;  %v681_v58 = vld [vmem:[%s6878_s1 + $0x1450] sm:$0xff] }
  0x9d   :  { %2652 = vmatpush1.bf16.msra.mxu1 %v2651_v21  ;;  %v653_v21 = vld [vmem:[%s6878_s1 + $0x1370] sm:$0xff]  ;;  %v3147_v1 = vpack.c.bf16 %v681_v58, %v679_v57 }
  0x9e   :  { %3100 = vmatpush1.bf16.msra.mxu0 %v3099_v22  ;;  %2654 = vmatprep.subr.bf16.mxu1 %v2653_v23  ;;  %v208_v22 = vld [vmem:[%s6878_s1 + $0x588] sm:$0xff]  ;;  %v210_v23 = vld [vmem:[%s6878_s1 + $0x598] sm:$0xff] }
  0x9f   :  { %3102 = vmatprep.subr.bf16.mxu0 %v3101_v29  ;;  %v3119_v29 = vpack.c.bf16 %v653_v21, %v651_v20  ;;  %v2673_v30 = vpack.c.bf16 %v210_v23, %v208_v22  ;;  %v4865_v20 = vsub.s32 4, %v3894_v59  ;;  %v223_v23 = vld [vmem:[%s6878_s1 + $0x600] sm:$0xff]  ;;  %v3137_v59 = vpack.c.bf16 %v674_v18, %v672_v17 }
  0xa1   :  { %2656 = vmatpush1.bf16.msra.mxu1 %v2655_v35  ;;  %v657_v35 = vld [vmem:[%s6878_s1 + $0x1390] sm:$0xff]  ;;  %v1015_v32 = vrot.slane %v4888_v31, %v4865_v20 }
  0xa2   :  { %3104 = vmatpush1.bf16.msra.mxu0 %v3103_v36  ;;  %2658 = vmatprep.subr.bf16.mxu1 %v2657_v37  ;;  %v212_v36 = vld [vmem:[%s6878_s1 + $0x5a8] sm:$0xff]  ;;  %v214_v37 = vld [vmem:[%s6878_s1 + $0x5b8] sm:$0xff] }
  0xa3   :  { %3106 = vmatprep.subr.bf16.mxu0 %v3105_v40  ;;  %v3123_v40 = vpack.c.bf16 %v657_v35, %v655_v33  ;;  %v2677_v41 = vpack.c.bf16 %v214_v37, %v212_v36  ;;  %v676_v33 = vld [vmem:[%s6878_s1 + $0x1428] sm:$0xff]  ;;  %v2691_v35 = vpack.c.bf16 %v225_v25, %v223_v23  ;;  %v1071_v36 = vrot.slane %v4240_v45, %v4467_v44  ;;  %v689_v25 = vld [vmem:[%s6878_s1 + $0x1490] sm:$0xff] }
  0xa5   :  { %2660 = vmatpush1.bf16.msra.mxu1 %v2659_v48  ;;  %v661_v48 = vld [vmem:[%s6878_s1 + $0x13b0] sm:$0xff] }
  0xa6   :  { %3108 = vmatpush1.bf16.msra.mxu0 %v3107_v49  ;;  %2662 = vmatprep.subr.bf16.mxu1 %v2661_v50  ;;  %v216_v49 = vld [vmem:[%s6878_s1 + $0x5c8] sm:$0xff]  ;;  %v218_v50 = vld [vmem:[%s6878_s1 + $0x5d8] sm:$0xff] }
  0xa7   :  { %3110 = vmatprep.subr.bf16.mxu0 %v3109_v54  ;;  %v3127_v54 = vpack.c.bf16 %v661_v48, %v659_v46  ;;  %v2681_v55 = vpack.c.bf16 %v218_v50, %v216_v49  ;;  %v234_v46 = vld [vmem:[%s6878_s1 + $0x658] sm:$0xff]  ;;  %v680_v48 = vld [vmem:[%s6878_s1 + $0x1448] sm:$0xff]  ;;  %v1083_v50 = vrot.slane %v4240_v45, %v4488_v56 }
  0xa8   :  { %v682_v49 = vld [vmem:[%s6878_s1 + $0x1458] sm:$0xff] }
  0xa9   :  { %2664 = vmatpush1.bf16.msra.mxu1 %v2663_v62  ;;  %v665_v62 = vld [vmem:[%s6878_s1 + $0x13d0] sm:$0xff]  ;;  %v3145_v45 = vpack.c.bf16 %v682_v49, %v680_v48  ;;  %v695_v49 = vld [vmem:[%s6878_s1 + $0x14c0] sm:$0xff] }
  0xaa   :  { %3112 = vmatpush1.bf16.msra.mxu0 %v3111_v63  ;;  %2666 = vmatprep.subr.bf16.mxu1 %v2665_v0  ;;  %v220_v63 = vld [vmem:[%s6878_s1 + $0x5e8] sm:$0xff]  ;;  %v222_v0 = vld [vmem:[%s6878_s1 + $0x5f8] sm:$0xff]  ;;  %v249_v48 = vld [vmem:[%s6878_s1 + $0x6d0] sm:$0xff] }
  0xab   :  { %3114 = vmatprep.subr.bf16.mxu0 %v3113_v4  ;;  %v3131_v4 = vpack.c.bf16 %v665_v62, %v663_v60  ;;  %v2685_v5 = vpack.c.bf16 %v222_v0, %v220_v63  ;;  %v236_v60 = vld [vmem:[%s6878_s1 + $0x668] sm:$0xff]  ;;  %v686_v63 = vld [vmem:[%s6878_s1 + $0x1478] sm:$0xff] }
  0xac   :  { %v684_v62 = vld [vmem:[%s6878_s1 + $0x1468] sm:$0xff] }
  0xad   :  { %2668 = vmatpush1.bf16.msra.mxu1 %v2667_v12  ;;  %v669_v12 = vld [vmem:[%s6878_s1 + $0x13f0] sm:$0xff] }
  0xae   :  { %3116 = vmatpush1.bf16.msra.mxu0 %v3115_v14  ;;  %2670 = vmatprep.subr.bf16.mxu1 %v2669_v16  ;;  %v224_v14 = vld [vmem:[%s6878_s1 + $0x608] sm:$0xff]  ;;  %v226_v16 = vld [vmem:[%s6878_s1 + $0x618] sm:$0xff]  ;;  %v3135_v21 = vpack.c.bf16 %v669_v12, %v667_v9 }
  0xaf   :  { %3118 = vmatprep.subr.bf16.mxu0 %v3117_v19  ;;  %v2687_v19 = vpack.c.bf16 %v221_v7, %v219_v6  ;;  %v2689_v22 = vpack.c.bf16 %v226_v16, %v224_v14  ;;  %v3149_v6 = vpack.c.bf16 %v686_v63, %v684_v62  ;;  %v685_v7 = vld [vmem:[%s6878_s1 + $0x1470] sm:$0xff]  ;;  %v240_v9 = vld [vmem:[%s6878_s1 + $0x688] sm:$0xff]  ;;  %v690_v14 = vld [vmem:[%s6878_s1 + $0x1498] sm:$0xff] }
  0xb0   :  { %v688_v12 = vld [vmem:[%s6878_s1 + $0x1488] sm:$0xff]  ;;  %v699_v62 = vld [vmem:[%s6878_s1 + $0x14e0] sm:$0xff] }
  0xb1   :  { %2672 = vmatpush1.bf16.msra.mxu1 %v2671_v28  ;;  %v673_v28 = vld [vmem:[%s6878_s1 + $0x1410] sm:$0xff]  ;;  %v3153_v23 = vpack.c.bf16 %v690_v14, %v688_v12  ;;  %v703_v12 = vld [vmem:[%s6878_s1 + $0x1500] sm:$0xff] }
  0xb2   :  { %3120 = vmatpush1.bf16.msra.mxu0 %v3119_v29  ;;  %2674 = vmatprep.subr.bf16.mxu1 %v2673_v30  ;;  %v228_v29 = vld [vmem:[%s6878_s1 + $0x628] sm:$0xff]  ;;  %v230_v30 = vld [vmem:[%s6878_s1 + $0x638] sm:$0xff]  ;;  %v3139_v37 = vpack.c.bf16 %v673_v28, %v671_v26 }
  0xb3   :  { %3122 = vmatprep.subr.bf16.mxu0 %v3121_v34  ;;  %v678_v34 = vld [vmem:[%s6878_s1 + $0x1438] sm:$0xff]  ;;  %v2693_v38 = vpack.c.bf16 %v230_v30, %v228_v29  ;;  %v244_v26 = vld [vmem:[%s6878_s1 + $0x6a8] sm:$0xff] }
  0xb4   :  { %v692_v28 = vld [vmem:[%s6878_s1 + $0x14a8] sm:$0xff]  ;;  %v694_v29 = vld [vmem:[%s6878_s1 + $0x14b8] sm:$0xff] }
  0xb5   :  { %2676 = vmatpush1.bf16.msra.mxu1 %v2675_v39  ;;  %v229_v39 = vld [vmem:[%s6878_s1 + $0x630] sm:$0xff] }
  0xb6   :  { %3124 = vmatpush1.bf16.msra.mxu0 %v3123_v40  ;;  %2678 = vmatprep.subr.bf16.mxu1 %v2677_v41  ;;  %v675_v40 = vld [vmem:[%s6878_s1 + $0x1420] sm:$0xff]  ;;  %v3141_v41 = vpack.c.bf16 %v678_v34, %v676_v33  ;;  %v2695_v51 = vpack.c.bf16 %v229_v39, %v227_v24  ;;  %v248_v24 = vld [vmem:[%s6878_s1 + $0x6c8] sm:$0xff]  ;;  %v250_v39 = vld [vmem:[%s6878_s1 + $0x6d8] sm:$0xff] }
  0xb7   :  { %3126 = vmatprep.subr.bf16.mxu0 %v3125_v47  ;;  %v1027_v47 = vrot.slane %v4888_v31, %v3927_v11  ;;  %v3143_v52 = vpack.c.bf16 %v677_v42, %v675_v40  ;;  %v243_v34 = vld [vmem:[%s6878_s1 + $0x6a0] sm:$0xff]  ;;  %v696_v40 = vld [vmem:[%s6878_s1 + $0x14c8] sm:$0xff] }
  0xb9   :  { %2680 = vmatpush1.bf16.msra.mxu1 %v2679_v53  ;;  %v2697_v53 = vpack.c.bf16 %v234_v46, %v232_v43  ;;  %v2713_v46 = vpack.c.bf16 %v250_v39, %v248_v24  ;;  %v263_v24 = vld [vmem:[%s6878_s1 + $0x740] sm:$0xff]  ;;  %v265_v39 = vld [vmem:[%s6878_s1 + $0x750] sm:$0xff] }
  0xba   :  { %3128 = vmatpush1.bf16.msra.mxu0 %v3127_v54  ;;  %2682 = vmatprep.subr.bf16.mxu1 %v2681_v55  ;;  %v231_v54 = vld [vmem:[%s6878_s1 + $0x640] sm:$0xff]  ;;  %v233_v55 = vld [vmem:[%s6878_s1 + $0x650] sm:$0xff] }
  0xbb   :  { %3130 = vmatprep.subr.bf16.mxu0 %v3129_v61  ;;  %v238_v61 = vld [vmem:[%s6878_s1 + $0x678] sm:$0xff]  ;;  %v2699_v0 = vpack.c.bf16 %v233_v55, %v231_v54  ;;  %v700_v54 = vld [vmem:[%s6878_s1 + $0x14e8] sm:$0xff] }
  0xbc   :  { %v2701_v2 = vpack.c.bf16 %v238_v61, %v236_v60  ;;  %v702_v55 = vld [vmem:[%s6878_s1 + $0x14f8] sm:$0xff]  ;;  %v251_v60 = vld [vmem:[%s6878_s1 + $0x6e0] sm:$0xff]  ;;  %v253_v61 = vld [vmem:[%s6878_s1 + $0x6f0] sm:$0xff] }
  0xbd   :  { %2684 = vmatpush1.bf16.msra.mxu1 %v2683_v3  ;;  %v235_v3 = vld [vmem:[%s6878_s1 + $0x660] sm:$0xff]  ;;  %v3165_v63 = vpack.c.bf16 %v702_v55, %v700_v54 }
  0xbe   :  { %3132 = vmatpush1.bf16.msra.mxu0 %v3131_v4  ;;  %2686 = vmatprep.subr.bf16.mxu1 %v2685_v5  ;;  %v237_v4 = vld [vmem:[%s6878_s1 + $0x670] sm:$0xff]  ;;  %v683_v5 = vld [vmem:[%s6878_s1 + $0x1460] sm:$0xff] }
  0xbf   :  { %3134 = vmatprep.subr.bf16.mxu0 %v3133_v10  ;;  %v242_v10 = vld [vmem:[%s6878_s1 + $0x698] sm:$0xff]  ;;  %v2703_v16 = vpack.c.bf16 %v237_v4, %v235_v3  ;;  %v3151_v17 = vpack.c.bf16 %v685_v7, %v683_v5  ;;  %v704_v3 = vld [vmem:[%s6878_s1 + $0x1508] sm:$0xff]  ;;  %v2719_v5 = vpack.c.bf16 %v253_v61, %v251_v60  ;;  %v715_v54 = vld [vmem:[%s6878_s1 + $0x1560] sm:$0xff] }
  0xc0   :  { %v2705_v18 = vpack.c.bf16 %v242_v10, %v240_v9  ;;  %v706_v4 = vld [vmem:[%s6878_s1 + $0x1518] sm:$0xff]  ;;  %v255_v9 = vld [vmem:[%s6878_s1 + $0x700] sm:$0xff]  ;;  %v257_v10 = vld [vmem:[%s6878_s1 + $0x710] sm:$0xff] }
  0xc1   :  { %2688 = vmatpush1.bf16.msra.mxu1 %v2687_v19  ;;  %v239_v19 = vld [vmem:[%s6878_s1 + $0x680] sm:$0xff]  ;;  %v3169_v14 = vpack.c.bf16 %v706_v4, %v704_v3  ;;  %v720_v60 = vld [vmem:[%s6878_s1 + $0x1588] sm:$0xff]  ;;  %v722_v61 = vld [vmem:[%s6878_s1 + $0x1598] sm:$0xff] }
  0xc2   :  { %3136 = vmatpush1.bf16.msra.mxu0 %v3135_v21  ;;  %2690 = vmatprep.subr.bf16.mxu1 %v2689_v22  ;;  %v241_v21 = vld [vmem:[%s6878_s1 + $0x690] sm:$0xff]  ;;  %v687_v22 = vld [vmem:[%s6878_s1 + $0x1480] sm:$0xff]  ;;  %v3185_v4 = vpack.c.bf16 %v722_v61, %v720_v60 }
  0xc3   :  { %3138 = vmatprep.subr.bf16.mxu0 %v3137_v59  ;;  %v246_v59 = vld [vmem:[%s6878_s1 + $0x6b8] sm:$0xff]  ;;  %v2707_v30 = vpack.c.bf16 %v241_v21, %v239_v19  ;;  %v708_v19 = vld [vmem:[%s6878_s1 + $0x1528] sm:$0xff]  ;;  %v719_v3 = vld [vmem:[%s6878_s1 + $0x1580] sm:$0xff] }
  0xc4   :  { %1373 = vmatmul.mubr.f32.vlgmr.msra.gmra.mrb[0].mxu1 %v1015_v32  ;;  %v3155_v32 = vpack.c.bf16 %v689_v25, %v687_v22  ;;  %v2709_v33 = vpack.c.bf16 %v246_v59, %v244_v26  ;;  %v710_v21 = vld [vmem:[%s6878_s1 + $0x1538] sm:$0xff]  ;;  %v2723_v22 = vpack.c.bf16 %v257_v10, %v255_v9  ;;  %v259_v26 = vld [vmem:[%s6878_s1 + $0x720] sm:$0xff]  ;;  %v261_v59 = vld [vmem:[%s6878_s1 + $0x730] sm:$0xff] }
  0xc5   :  { %2692 = vmatpush1.bf16.msra.mxu1 %v2691_v35  ;;  %1870 = vmatmul.mubr.f32.vlgmr.msra.gmra.mrb[0].mxu0 %v1071_v36  ;;  %v245_v35 = vld [vmem:[%s6878_s1 + $0x6b0] sm:$0xff]  ;;  %v691_v36 = vld [vmem:[%s6878_s1 + $0x14a0] sm:$0xff]  ;;  %v724_v9 = vld [vmem:[%s6878_s1 + $0x15a8] sm:$0xff] }
  0xc6   :  { %3140 = vmatpush1.bf16.msra.mxu0 %v3139_v37  ;;  %2694 = vmatprep.subr.bf16.mxu1 %v2693_v38  ;;  %v3157_v37 = vpack.c.bf16 %v694_v29, %v692_v28  ;;  %v693_v38 = vld [vmem:[%s6878_s1 + $0x14b0] sm:$0xff]  ;;  %v2711_v42 = vpack.c.bf16 %v245_v35, %v243_v34  ;;  %v707_v28 = vld [vmem:[%s6878_s1 + $0x1520] sm:$0xff]  ;;  %v3173_v29 = vpack.c.bf16 %v710_v21, %v708_v19  ;;  %v712_v34 = vld [vmem:[%s6878_s1 + $0x1548] sm:$0xff] }
  0xc7   :  { %3142 = vmatprep.subr.bf16.mxu0 %v3141_v41  ;;  %1443 = vmatprep.mubr.f32.mxu1 %v1027_v47  ;;  %v698_v41 = vld [vmem:[%s6878_s1 + $0x14d8] sm:$0xff]  ;;  %v3159_v43 = vpack.c.bf16 %v693_v38, %v691_v36  ;;  %v247_v47 = vld [vmem:[%s6878_s1 + $0x6c0] sm:$0xff]  ;;  %v2727_v36 = vpack.c.bf16 %v261_v59, %v259_v26  ;;  %v728_v26 = vld [vmem:[%s6878_s1 + $0x15c8] sm:$0xff] }
  0xc8   :  { %1940 = vmatprep.mubr.f32.mxu0 %v1083_v50  ;;  %v3161_v50 = vpack.c.bf16 %v698_v41, %v696_v40  ;;  %v2715_v57 = vpack.c.bf16 %v249_v48, %v247_v47  ;;  %v714_v35 = vld [vmem:[%s6878_s1 + $0x1558] sm:$0xff]  ;;  %v711_v40 = vld [vmem:[%s6878_s1 + $0x1540] sm:$0xff]  ;;  %v716_v47 = vld [vmem:[%s6878_s1 + $0x1568] sm:$0xff] }
  0xc9   :  { %2696 = vmatpush1.bf16.msra.mxu1 %v2695_v51  ;;  %v697_v51 = vld [vmem:[%s6878_s1 + $0x14d0] sm:$0xff]  ;;  %v3177_v41 = vpack.c.bf16 %v714_v35, %v712_v34  ;;  %v718_v48 = vld [vmem:[%s6878_s1 + $0x1578] sm:$0xff]  ;;  %v723_v19 = vld [vmem:[%s6878_s1 + $0x15a0] sm:$0xff] }
  0xca   :  { %3144 = vmatpush1.bf16.msra.mxu0 %v3143_v52  ;;  %2698 = vmatprep.subr.bf16.mxu1 %v2697_v53  ;;  %v252_v52 = vld [vmem:[%s6878_s1 + $0x6e8] sm:$0xff]  ;;  %v254_v53 = vld [vmem:[%s6878_s1 + $0x6f8] sm:$0xff]  ;;  %v3181_v55 = vpack.c.bf16 %v718_v48, %v716_v47  ;;  %v727_v34 = vld [vmem:[%s6878_s1 + $0x15c0] sm:$0xff] }
  0xcb   :  { %3146 = vmatprep.subr.bf16.mxu0 %v3145_v45  ;;  %v3163_v45 = vpack.c.bf16 %v697_v51, %v695_v49  ;;  %v2717_v58 = vpack.c.bf16 %v254_v53, %v252_v52  ;;  %v2731_v49 = vpack.c.bf16 %v265_v39, %v263_v24  ;;  %v267_v52 = vld [vmem:[%s6878_s1 + $0x760] sm:$0xff]  ;;  %v269_v53 = vld [vmem:[%s6878_s1 + $0x770] sm:$0xff]  ;;  %v726_v10 = vld [vmem:[%s6878_s1 + $0x15b8] sm:$0xff] }
  0xcc   :  { %v3189_v21 = vpack.c.bf16 %v726_v10, %v724_v9  ;;  %v730_v59 = vld [vmem:[%s6878_s1 + $0x15d8] sm:$0xff]  ;;  %v732_v24 = vld [vmem:[%s6878_s1 + $0x15e8] sm:$0xff]  ;;  %v731_v47 = vld [vmem:[%s6878_s1 + $0x15e0] sm:$0xff] }
  0xcd   :  { %2700 = vmatpush1.bf16.msra.mxu1 %v2699_v0  ;;  %v701_v0 = vld [vmem:[%s6878_s1 + $0x14f0] sm:$0xff]  ;;  %v3193_v35 = vpack.c.bf16 %v730_v59, %v728_v26  ;;  %v734_v39 = vld [vmem:[%s6878_s1 + $0x15f8] sm:$0xff]  ;;  %v735_v60 = vld [vmem:[%s6878_s1 + $0x1600] sm:$0xff] }
  0xce   :  { %3148 = vmatpush1.bf16.msra.mxu0 %v3147_v1  ;;  %2702 = vmatprep.subr.bf16.mxu1 %v2701_v2  ;;  %v256_v1 = vld [vmem:[%s6878_s1 + $0x708] sm:$0xff]  ;;  %v258_v2 = vld [vmem:[%s6878_s1 + $0x718] sm:$0xff]  ;;  %v3197_v48 = vpack.c.bf16 %v734_v39, %v732_v24  ;;  %v291_v9 = vld [vmem:[%s6878_s1 + $0x820] sm:$0xff] }
  0xcf   :  { %3150 = vmatprep.subr.bf16.mxu0 %v3149_v6  ;;  %v3167_v6 = vpack.c.bf16 %v701_v0, %v699_v62  ;;  %v2721_v7 = vpack.c.bf16 %v258_v2, %v256_v1  ;;  %v2735_v62 = vpack.c.bf16 %v269_v53, %v267_v52  ;;  %v271_v1 = vld [vmem:[%s6878_s1 + $0x780] sm:$0xff]  ;;  %v273_v2 = vld [vmem:[%s6878_s1 + $0x790] sm:$0xff]  ;;  %v736_v52 = vld [vmem:[%s6878_s1 + $0x1608] sm:$0xff] }
  0xd0   :  { %v738_v53 = vld [vmem:[%s6878_s1 + $0x1618] sm:$0xff]  ;;  %v293_v10 = vld [vmem:[%s6878_s1 + $0x830] sm:$0xff] }
  0xd1   :  { %2704 = vmatpush1.bf16.msra.mxu1 %v2703_v16  ;;  %v705_v16 = vld [vmem:[%s6878_s1 + $0x1510] sm:$0xff]  ;;  %v3201_v61 = vpack.c.bf16 %v738_v53, %v736_v52  ;;  %v2759_v26 = vpack.c.bf16 %v293_v10, %v291_v9 }
  0xd2   :  { %3152 = vmatpush1.bf16.msra.mxu0 %v3151_v17  ;;  %2706 = vmatprep.subr.bf16.mxu1 %v2705_v18  ;;  %v260_v17 = vld [vmem:[%s6878_s1 + $0x728] sm:$0xff]  ;;  %v262_v18 = vld [vmem:[%s6878_s1 + $0x738] sm:$0xff] }
  0xd3   :  { %3154 = vmatprep.subr.bf16.mxu0 %v3153_v23  ;;  %v3171_v23 = vpack.c.bf16 %v705_v16, %v703_v12  ;;  %v2725_v25 = vpack.c.bf16 %v262_v18, %v260_v17  ;;  %v2739_v12 = vpack.c.bf16 %v273_v2, %v271_v1  ;;  %v275_v17 = vld [vmem:[%s6878_s1 + $0x7a0] sm:$0xff]  ;;  %v277_v18 = vld [vmem:[%s6878_s1 + $0x7b0] sm:$0xff]  ;;  %v1023_v1 = vrot.slane %v4888_v31, %v4064_v15  ;;  %v740_v2 = vld [vmem:[%s6878_s1 + $0x1628] sm:$0xff] }
  0xd5   :  { %2708 = vmatpush1.bf16.msra.mxu1 %v2707_v30  ;;  %v709_v30 = vld [vmem:[%s6878_s1 + $0x1530] sm:$0xff] }
  0xd6   :  { %3156 = vmatpush1.bf16.msra.mxu0 %v3155_v32  ;;  %2710 = vmatprep.subr.bf16.mxu1 %v2709_v33  ;;  %v264_v32 = vld [vmem:[%s6878_s1 + $0x748] sm:$0xff]  ;;  %v266_v33 = vld [vmem:[%s6878_s1 + $0x758] sm:$0xff] }
  0xd7   :  { %3158 = vmatprep.subr.bf16.mxu0 %v3157_v37  ;;  %v3175_v37 = vpack.c.bf16 %v709_v30, %v707_v28  ;;  %v2729_v38 = vpack.c.bf16 %v266_v33, %v264_v32  ;;  %v2743_v28 = vpack.c.bf16 %v277_v18, %v275_v17  ;;  %v279_v32 = vld [vmem:[%s6878_s1 + $0x7c0] sm:$0xff]  ;;  %v281_v33 = vld [vmem:[%s6878_s1 + $0x7d0] sm:$0xff]  ;;  %v296_v17 = vld [vmem:[%s6878_s1 + $0x848] sm:$0xff] }
  0xd8   :  { %v298_v18 = vld [vmem:[%s6878_s1 + $0x858] sm:$0xff] }
  0xd9   :  { %2712 = vmatpush1.bf16.msra.mxu1 %v2711_v42  ;;  %v713_v42 = vld [vmem:[%s6878_s1 + $0x1550] sm:$0xff] }
  0xda   :  { %3160 = vmatpush1.bf16.msra.mxu0 %v3159_v43  ;;  %2714 = vmatprep.subr.bf16.mxu1 %v2713_v46  ;;  %v268_v43 = vld [vmem:[%s6878_s1 + $0x768] sm:$0xff]  ;;  %v270_v46 = vld [vmem:[%s6878_s1 + $0x778] sm:$0xff] }
  0xdb   :  { %3162 = vmatprep.subr.bf16.mxu0 %v3161_v50  ;;  %v3179_v50 = vpack.c.bf16 %v713_v42, %v711_v40  ;;  %v2733_v51 = vpack.c.bf16 %v270_v46, %v268_v43  ;;  %v2747_v40 = vpack.c.bf16 %v281_v33, %v279_v32  ;;  %v283_v43 = vld [vmem:[%s6878_s1 + $0x7e0] sm:$0xff]  ;;  %v285_v46 = vld [vmem:[%s6878_s1 + $0x7f0] sm:$0xff] }
  0xdd   :  { %2716 = vmatpush1.bf16.msra.mxu1 %v2715_v57  ;;  %v717_v57 = vld [vmem:[%s6878_s1 + $0x1570] sm:$0xff] }
  0xde   :  { %3164 = vmatpush1.bf16.msra.mxu0 %v3163_v45  ;;  %2718 = vmatprep.subr.bf16.mxu1 %v2717_v58  ;;  %v272_v45 = vld [vmem:[%s6878_s1 + $0x788] sm:$0xff]  ;;  %v274_v58 = vld [vmem:[%s6878_s1 + $0x798] sm:$0xff] }
  0xdf   :  { %3166 = vmatprep.subr.bf16.mxu0 %v3165_v63  ;;  %v3183_v63 = vpack.c.bf16 %v717_v57, %v715_v54  ;;  %v2737_v0 = vpack.c.bf16 %v274_v58, %v272_v45  ;;  %v2751_v54 = vpack.c.bf16 %v285_v46, %v283_v43  ;;  %v287_v45 = vld [vmem:[%s6878_s1 + $0x800] sm:$0xff]  ;;  %v289_v58 = vld [vmem:[%s6878_s1 + $0x810] sm:$0xff] }
  0xe1   :  { %2720 = vmatpush1.bf16.msra.mxu1 %v2719_v5  ;;  %v721_v5 = vld [vmem:[%s6878_s1 + $0x1590] sm:$0xff] }
  0xe2   :  { %3168 = vmatpush1.bf16.msra.mxu0 %v3167_v6  ;;  %2722 = vmatprep.subr.bf16.mxu1 %v2721_v7  ;;  %v276_v6 = vld [vmem:[%s6878_s1 + $0x7a8] sm:$0xff]  ;;  %v278_v7 = vld [vmem:[%s6878_s1 + $0x7b8] sm:$0xff] }
  0xe3   :  { %3170 = vmatprep.subr.bf16.mxu0 %v3169_v14  ;;  %v3187_v14 = vpack.c.bf16 %v721_v5, %v719_v3  ;;  %v2741_v16 = vpack.c.bf16 %v278_v7, %v276_v6  ;;  %v742_v3 = vld [vmem:[%s6878_s1 + $0x1638] sm:$0xff]  ;;  %v5293_v5 = vld [vmem:[%s6877_s0 + $0x10] sm:$0xff] }
  0xe4   :  { %v1079_v6 = vrot.slane %v5293_v5, %v4865_v20 }
  0xe5   :  { %2724 = vmatpush1.bf16.msra.mxu1 %v2723_v22  ;;  %v725_v22 = vld [vmem:[%s6878_s1 + $0x15b0] sm:$0xff] }
  0xe6   :  { %3172 = vmatpush1.bf16.msra.mxu0 %v3171_v23  ;;  %2726 = vmatprep.subr.bf16.mxu1 %v2725_v25  ;;  %v280_v23 = vld [vmem:[%s6878_s1 + $0x7c8] sm:$0xff]  ;;  %v282_v25 = vld [vmem:[%s6878_s1 + $0x7d8] sm:$0xff] }
  0xe7   :  { %3174 = vmatprep.subr.bf16.mxu0 %v3173_v29  ;;  %v3191_v29 = vpack.c.bf16 %v725_v22, %v723_v19  ;;  %v2745_v30 = vpack.c.bf16 %v282_v25, %v280_v23  ;;  %v5318_v19 = vld [vmem:[%s6877_s0 + $0x8] sm:$0xff]  ;;  %v746_v23 = vld [vmem:[%s6878_s1 + $0x1658] sm:$0xff]  ;;  %v1091_v25 = vrot.slane %v5293_v5, %v3927_v11 }
  0xe8   :  { %v744_v22 = vld [vmem:[%s6878_s1 + $0x1648] sm:$0xff] }
  0xe9   :  { %2728 = vmatpush1.bf16.msra.mxu1 %v2727_v36  ;;  %v729_v36 = vld [vmem:[%s6878_s1 + $0x15d0] sm:$0xff] }
  0xea   :  { %3176 = vmatpush1.bf16.msra.mxu0 %v3175_v37  ;;  %2730 = vmatprep.subr.bf16.mxu1 %v2729_v38  ;;  %v284_v37 = vld [vmem:[%s6878_s1 + $0x7e8] sm:$0xff]  ;;  %v286_v38 = vld [vmem:[%s6878_s1 + $0x7f8] sm:$0xff] }
  0xeb   :  { %3178 = vmatprep.subr.bf16.mxu0 %v3177_v41  ;;  %v3195_v41 = vpack.c.bf16 %v729_v36, %v727_v34  ;;  %v2749_v42 = vpack.c.bf16 %v286_v38, %v284_v37 }
  0xed   :  { %2732 = vmatpush1.bf16.msra.mxu1 %v2731_v49  ;;  %v733_v49 = vld [vmem:[%s6878_s1 + $0x15f0] sm:$0xff] }
  0xee   :  { %3180 = vmatpush1.bf16.msra.mxu0 %v3179_v50  ;;  %2734 = vmatprep.subr.bf16.mxu1 %v2733_v51  ;;  %v288_v50 = vld [vmem:[%s6878_s1 + $0x808] sm:$0xff]  ;;  %v290_v51 = vld [vmem:[%s6878_s1 + $0x818] sm:$0xff] }
  0xef   :  { %3182 = vmatprep.subr.bf16.mxu0 %v3181_v55  ;;  %v3199_v55 = vpack.c.bf16 %v733_v49, %v731_v47  ;;  %v2753_v57 = vpack.c.bf16 %v290_v51, %v288_v50 }
  0xf1   :  { %2736 = vmatpush1.bf16.msra.mxu1 %v2735_v62  ;;  %v737_v62 = vld [vmem:[%s6878_s1 + $0x1610] sm:$0xff] }
  0xf2   :  { %3184 = vmatpush1.bf16.msra.mxu0 %v3183_v63  ;;  %2738 = vmatprep.subr.bf16.mxu1 %v2737_v0  ;;  %v292_v63 = vld [vmem:[%s6878_s1 + $0x828] sm:$0xff]  ;;  %v294_v0 = vld [vmem:[%s6878_s1 + $0x838] sm:$0xff]  ;;  %v3203_v31 = vpack.c.bf16 %v737_v62, %v735_v60 }
  0xf3   :  { %3186 = vmatprep.subr.bf16.mxu0 %v3185_v4  ;;  %v2755_v4 = vpack.c.bf16 %v289_v58, %v287_v45  ;;  %v2757_v7 = vpack.c.bf16 %v294_v0, %v292_v63 }
  0xf5   :  { %2740 = vmatpush1.bf16.msra.mxu1 %v2739_v12  ;;  %v739_v12 = vld [vmem:[%s6878_s1 + $0x1620] sm:$0xff] }
  0xf6   :  { %3188 = vmatpush1.bf16.msra.mxu0 %v3187_v14  ;;  %2742 = vmatprep.subr.bf16.mxu1 %v2741_v16  ;;  %v3205_v14 = vpack.c.bf16 %v742_v3, %v740_v2  ;;  %v741_v16 = vld [vmem:[%s6878_s1 + $0x1630] sm:$0xff] }
  0xf7   :  { %3190 = vmatprep.subr.bf16.mxu0 %v3189_v21  ;;  %v1035_v21 = vrot.slane %v5318_v19, %v3921_v8 }
  0xf9   :  { %2744 = vmatpush1.bf16.msra.mxu1 %v2743_v28 }
  0xfa   :  { %3192 = vmatpush1.bf16.msra.mxu0 %v3191_v29  ;;  %2746 = vmatprep.subr.bf16.mxu1 %v2745_v30 }
  0xfb   :  { %3194 = vmatprep.subr.bf16.mxu0 %v3193_v35 }
  0xfd   :  { %2748 = vmatpush1.bf16.msra.mxu1 %v2747_v40 }
  0xfe   :  { %3196 = vmatpush1.bf16.msra.mxu0 %v3195_v41  ;;  %2750 = vmatprep.subr.bf16.mxu1 %v2749_v42 }
  0xff   :  { %3198 = vmatprep.subr.bf16.mxu0 %v3197_v48 }
 0x101   :  { %2752 = vmatpush1.bf16.msra.mxu1 %v2751_v54 }
 0x102   :  { %3200 = vmatpush1.bf16.msra.mxu0 %v3199_v55  ;;  %2754 = vmatprep.subr.bf16.mxu1 %v2753_v57 }
 0x103   :  { %3202 = vmatprep.subr.bf16.mxu0 %v3201_v61 }
 0x104   :  { %1444 = vmatmul.mubr.f32.vlgmr.msra.gmra.mrb[0].mxu1 %v1023_v1 }
 0x105   :  { %2756 = vmatpush1.bf16.msra.mxu1 %v2755_v4  ;;  %1941 = vmatmul.mubr.f32.vlgmr.msra.gmra.mrb[0].mxu0 %v1079_v6 }
 0x106   :  { %12 = vsyncpa [#allocation3], 0  ;;  %3204 = vmatpush1.bf16.msra.mxu0 %v3203_v31  ;;  %2758 = vmatprep.subr.bf16.mxu1 %v2757_v7  ;;  %v3207_v59 = vpack.c.bf16 %v741_v16, %v739_v12  ;;  %v2761_v28 = vpack.c.bf16 %v298_v18, %v296_v17  ;;  %v295_v29 = vld [vmem:[%s6878_s1 + $0x840] sm:$0xff]  ;;  %v297_v30 = vld [vmem:[%s6878_s1 + $0x850] sm:$0xff]  ;;  %v3209_v32 = vpack.c.bf16 %v746_v23, %v744_v22  ;;  %vm1156_vm0 = vcmask 998400  }
 0x107   :  { %v743_v11 = vld [vmem:[%s6878_s1 + $0x1640] sm:$0xff]  ;;  %3206 = vmatprep.subr.bf16.mxu0 %v3205_v14  ;;  %v745_v33 = vld [vmem:[%s6878_s1 + $0x1650] sm:$0xff]  ;;  %v300_v34 = vld [vmem:[%s6878_s1 + $0x868] sm:$0xff]  ;;  %1514 = vmatprep.mubr.f32.mxu1 %v1035_v21  ;;  %v2763_v38 = vpack.c.bf16 %v297_v30, %v295_v29  ;;  %vm1159_vm1 = vcmask 1041408   ;;  %vm3598_vm2 = vmmov 1   ;;  %vm2283_vm4 = vcmask 1043456  }
 0x108   :  { %v302_v35 = vld [vmem:[%s6878_s1 + $0x878] sm:$0xff]  ;;  %v748_v36 = vld [vmem:[%s6878_s1 + $0x1668] sm:$0xff]  ;;  %2011 = vmatprep.mubr.f32.mxu0 %v1091_v25  ;;  %v3211_v24 = vpack.c.bf16 %v745_v33, %v743_v11  ;;  %v299_v40 = vld [vmem:[%s6878_s1 + $0x860] sm:$0xff]  ;;  %vm2279_vm6 = vcmask 97280   ;;  %vm2387_vm7 = vcmask 556032   ;;  %vm2473_vm8 = vcmask 311296  }
 0x109   :  { %v750_v37 = vld [vmem:[%s6878_s1 + $0x1678] sm:$0xff]  ;;  %2760 = vmatpush1.bf16.msra.mxu1 %v2759_v26  ;;  %v2765_v39 = vpack.c.bf16 %v302_v35, %v300_v34  ;;  %v301_v41 = vld [vmem:[%s6878_s1 + $0x870] sm:$0xff]  ;;  %v747_v42 = vld [vmem:[%s6878_s1 + $0x1660] sm:$0xff] }
 0x10a   :  { %3208 = vmatpush1.bf16.msra.mxu0 %v3207_v59  ;;  %2762 = vmatprep.subr.bf16.mxu1 %v2761_v28  ;;  %v3213_v43 = vpack.c.bf16 %v750_v37, %v748_v36  ;;  %v749_v46 = vld [vmem:[%s6878_s1 + $0x1670] sm:$0xff]  ;;  %v304_v47 = vld [vmem:[%s6878_s1 + $0x888] sm:$0xff]  ;;  %v306_v48 = vld [vmem:[%s6878_s1 + $0x898] sm:$0xff]  ;;  %v2767_v51 = vpack.c.bf16 %v301_v41, %v299_v40 }
 0x10b   :  { %3210 = vmatprep.subr.bf16.mxu0 %v3209_v32  ;;  %v752_v49 = vld [vmem:[%s6878_s1 + $0x1688] sm:$0xff]  ;;  %v754_v50 = vld [vmem:[%s6878_s1 + $0x1698] sm:$0xff]  ;;  %v3215_v52 = vpack.c.bf16 %v749_v46, %v747_v42  ;;  %v2769_v53 = vpack.c.bf16 %v306_v48, %v304_v47  ;;  %v303_v54 = vld [vmem:[%s6878_s1 + $0x880] sm:$0xff] }
 0x10c   :  { %v305_v55 = vld [vmem:[%s6878_s1 + $0x890] sm:$0xff]  ;;  %v751_v57 = vld [vmem:[%s6878_s1 + $0x1680] sm:$0xff]  ;;  %v3217_v45 = vpack.c.bf16 %v754_v50, %v752_v49  ;;  %v308_v60 = vld [vmem:[%s6878_s1 + $0x8a8] sm:$0xff] }
 0x10d   :  { %2764 = vmatpush1.bf16.msra.mxu1 %v2763_v38  ;;  %v753_v58 = vld [vmem:[%s6878_s1 + $0x1690] sm:$0xff]  ;;  %v310_v61 = vld [vmem:[%s6878_s1 + $0x8b8] sm:$0xff]  ;;  %v756_v62 = vld [vmem:[%s6878_s1 + $0x16a8] sm:$0xff]  ;;  %v2771_v0 = vpack.c.bf16 %v305_v55, %v303_v54 }
 0x10e   :  { %3212 = vmatpush1.bf16.msra.mxu0 %v3211_v24  ;;  %2766 = vmatprep.subr.bf16.mxu1 %v2765_v39  ;;  %v758_v63 = vld [vmem:[%s6878_s1 + $0x16b8] sm:$0xff]  ;;  %v3219_v1 = vpack.c.bf16 %v753_v58, %v751_v57  ;;  %v2773_v2 = vpack.c.bf16 %v310_v61, %v308_v60  ;;  %v307_v3 = vld [vmem:[%s6878_s1 + $0x8a0] sm:$0xff]  ;;  %v309_v4 = vld [vmem:[%s6878_s1 + $0x8b0] sm:$0xff] }
 0x10f   :  { %3214 = vmatprep.subr.bf16.mxu0 %v3213_v43  ;;  %v755_v6 = vld [vmem:[%s6878_s1 + $0x16a0] sm:$0xff]  ;;  %v3221_v31 = vpack.c.bf16 %v758_v63, %v756_v62  ;;  %v757_v7 = vld [vmem:[%s6878_s1 + $0x16b0] sm:$0xff]  ;;  %v312_v9 = vld [vmem:[%s6878_s1 + $0x8c8] sm:$0xff]  ;;  %v2775_v16 = vpack.c.bf16 %v309_v4, %v307_v3 }
 0x110   :  { %v314_v10 = vld [vmem:[%s6878_s1 + $0x8d8] sm:$0xff]  ;;  %v760_v12 = vld [vmem:[%s6878_s1 + $0x16c8] sm:$0xff]  ;;  %v3223_v17 = vpack.c.bf16 %v757_v7, %v755_v6  ;;  %v311_v21 = vld [vmem:[%s6878_s1 + $0x8c0] sm:$0xff] }
 0x111   :  { %2768 = vmatpush1.bf16.msra.mxu1 %v2767_v51  ;;  %v762_v14 = vld [vmem:[%s6878_s1 + $0x16d8] sm:$0xff]  ;;  %v2777_v18 = vpack.c.bf16 %v314_v10, %v312_v9  ;;  %v313_v22 = vld [vmem:[%s6878_s1 + $0x8d0] sm:$0xff]  ;;  %v759_v23 = vld [vmem:[%s6878_s1 + $0x16c0] sm:$0xff] }
 0x112   :  { %3216 = vmatpush1.bf16.msra.mxu0 %v3215_v52  ;;  %2770 = vmatprep.subr.bf16.mxu1 %v2769_v53  ;;  %v3225_v25 = vpack.c.bf16 %v762_v14, %v760_v12  ;;  %v761_v26 = vld [vmem:[%s6878_s1 + $0x16d0] sm:$0xff]  ;;  %v316_v59 = vld [vmem:[%s6878_s1 + $0x8e8] sm:$0xff]  ;;  %v318_v28 = vld [vmem:[%s6878_s1 + $0x8f8] sm:$0xff]  ;;  %v2779_v11 = vpack.c.bf16 %v313_v22, %v311_v21 }
 0x113   :  { %3218 = vmatprep.subr.bf16.mxu0 %v3217_v45  ;;  %v764_v29 = vld [vmem:[%s6878_s1 + $0x16e8] sm:$0xff]  ;;  %v766_v30 = vld [vmem:[%s6878_s1 + $0x16f8] sm:$0xff]  ;;  %v3227_v32 = vpack.c.bf16 %v761_v26, %v759_v23  ;;  %v2781_v33 = vpack.c.bf16 %v318_v28, %v316_v59  ;;  %v315_v34 = vld [vmem:[%s6878_s1 + $0x8e0] sm:$0xff] }
 0x114   :  { %v317_v35 = vld [vmem:[%s6878_s1 + $0x8f0] sm:$0xff]  ;;  %v763_v36 = vld [vmem:[%s6878_s1 + $0x16e0] sm:$0xff]  ;;  %v3229_v37 = vpack.c.bf16 %v766_v30, %v764_v29  ;;  %v320_v24 = vld [vmem:[%s6878_s1 + $0x908] sm:$0xff] }
 0x115   :  { %2772 = vmatpush1.bf16.msra.mxu1 %v2771_v0  ;;  %v765_v38 = vld [vmem:[%s6878_s1 + $0x16f0] sm:$0xff]  ;;  %v322_v39 = vld [vmem:[%s6878_s1 + $0x918] sm:$0xff]  ;;  %v768_v40 = vld [vmem:[%s6878_s1 + $0x1708] sm:$0xff]  ;;  %v2783_v42 = vpack.c.bf16 %v317_v35, %v315_v34 }
 0x116   :  { %3220 = vmatpush1.bf16.msra.mxu0 %v3219_v1  ;;  %2774 = vmatprep.subr.bf16.mxu1 %v2773_v2  ;;  %v770_v41 = vld [vmem:[%s6878_s1 + $0x1718] sm:$0xff]  ;;  %v3231_v43 = vpack.c.bf16 %v765_v38, %v763_v36  ;;  %v2785_v46 = vpack.c.bf16 %v322_v39, %v320_v24  ;;  %v319_v47 = vld [vmem:[%s6878_s1 + $0x900] sm:$0xff]  ;;  %v321_v48 = vld [vmem:[%s6878_s1 + $0x910] sm:$0xff] }
 0x117   :  { %3222 = vmatprep.subr.bf16.mxu0 %v3221_v31  ;;  %v767_v49 = vld [vmem:[%s6878_s1 + $0x1700] sm:$0xff]  ;;  %v3233_v50 = vpack.c.bf16 %v770_v41, %v768_v40  ;;  %v769_v51 = vld [vmem:[%s6878_s1 + $0x1710] sm:$0xff]  ;;  %v324_v52 = vld [vmem:[%s6878_s1 + $0x928] sm:$0xff]  ;;  %v2787_v57 = vpack.c.bf16 %v321_v48, %v319_v47 }
 0x118   :  { %v326_v53 = vld [vmem:[%s6878_s1 + $0x938] sm:$0xff]  ;;  %v772_v54 = vld [vmem:[%s6878_s1 + $0x1728] sm:$0xff]  ;;  %v3235_v45 = vpack.c.bf16 %v769_v51, %v767_v49  ;;  %v323_v60 = vld [vmem:[%s6878_s1 + $0x920] sm:$0xff] }
 0x119   :  { %2776 = vmatpush1.bf16.msra.mxu1 %v2775_v16  ;;  %v774_v55 = vld [vmem:[%s6878_s1 + $0x1738] sm:$0xff]  ;;  %v2789_v58 = vpack.c.bf16 %v326_v53, %v324_v52  ;;  %v325_v61 = vld [vmem:[%s6878_s1 + $0x930] sm:$0xff]  ;;  %v771_v62 = vld [vmem:[%s6878_s1 + $0x1720] sm:$0xff] }
 0x11a   :  { %3224 = vmatpush1.bf16.msra.mxu0 %v3223_v17  ;;  %2778 = vmatprep.subr.bf16.mxu1 %v2777_v18  ;;  %v3237_v63 = vpack.c.bf16 %v774_v55, %v772_v54  ;;  %v773_v0 = vld [vmem:[%s6878_s1 + $0x1730] sm:$0xff]  ;;  %v328_v1 = vld [vmem:[%s6878_s1 + $0x948] sm:$0xff]  ;;  %v330_v2 = vld [vmem:[%s6878_s1 + $0x958] sm:$0xff]  ;;  %v2791_v6 = vpack.c.bf16 %v325_v61, %v323_v60 }
 0x11b   :  { %3226 = vmatprep.subr.bf16.mxu0 %v3225_v25  ;;  %v776_v3 = vld [vmem:[%s6878_s1 + $0x1748] sm:$0xff]  ;;  %v778_v4 = vld [vmem:[%s6878_s1 + $0x1758] sm:$0xff]  ;;  %v3239_v31 = vpack.c.bf16 %v773_v0, %v771_v62  ;;  %v2793_v7 = vpack.c.bf16 %v330_v2, %v328_v1  ;;  %v327_v9 = vld [vmem:[%s6878_s1 + $0x940] sm:$0xff] }
 0x11c   :  { %v329_v10 = vld [vmem:[%s6878_s1 + $0x950] sm:$0xff]  ;;  %v775_v12 = vld [vmem:[%s6878_s1 + $0x1740] sm:$0xff]  ;;  %v3241_v14 = vpack.c.bf16 %v778_v4, %v776_v3  ;;  %v332_v17 = vld [vmem:[%s6878_s1 + $0x968] sm:$0xff] }
 0x11d   :  { %2780 = vmatpush1.bf16.msra.mxu1 %v2779_v11  ;;  %v777_v16 = vld [vmem:[%s6878_s1 + $0x1750] sm:$0xff]  ;;  %v334_v18 = vld [vmem:[%s6878_s1 + $0x978] sm:$0xff]  ;;  %v780_v21 = vld [vmem:[%s6878_s1 + $0x1768] sm:$0xff]  ;;  %v2795_v23 = vpack.c.bf16 %v329_v10, %v327_v9 }
 0x11e   :  { %3228 = vmatpush1.bf16.msra.mxu0 %v3227_v32  ;;  %2782 = vmatprep.subr.bf16.mxu1 %v2781_v33  ;;  %v782_v22 = vld [vmem:[%s6878_s1 + $0x1778] sm:$0xff]  ;;  %v3243_v25 = vpack.c.bf16 %v777_v16, %v775_v12  ;;  %v2797_v26 = vpack.c.bf16 %v334_v18, %v332_v17  ;;  %v331_v59 = vld [vmem:[%s6878_s1 + $0x960] sm:$0xff]  ;;  %v333_v28 = vld [vmem:[%s6878_s1 + $0x970] sm:$0xff] }
 0x11f   :  { %3230 = vmatprep.subr.bf16.mxu0 %v3229_v37  ;;  %v779_v29 = vld [vmem:[%s6878_s1 + $0x1760] sm:$0xff]  ;;  %v3245_v30 = vpack.c.bf16 %v782_v22, %v780_v21  ;;  %v781_v11 = vld [vmem:[%s6878_s1 + $0x1770] sm:$0xff]  ;;  %v336_v32 = vld [vmem:[%s6878_s1 + $0x988] sm:$0xff]  ;;  %v2799_v36 = vpack.c.bf16 %v333_v28, %v331_v59 }
 0x120   :  { %v338_v33 = vld [vmem:[%s6878_s1 + $0x998] sm:$0xff]  ;;  %v784_v34 = vld [vmem:[%s6878_s1 + $0x1788] sm:$0xff]  ;;  %v3247_v37 = vpack.c.bf16 %v781_v11, %v779_v29  ;;  %v335_v24 = vld [vmem:[%s6878_s1 + $0x980] sm:$0xff] }
 0x121   :  { %2784 = vmatpush1.bf16.msra.mxu1 %v2783_v42  ;;  %v786_v35 = vld [vmem:[%s6878_s1 + $0x1798] sm:$0xff]  ;;  %v2801_v38 = vpack.c.bf16 %v338_v33, %v336_v32  ;;  %v337_v39 = vld [vmem:[%s6878_s1 + $0x990] sm:$0xff]  ;;  %v783_v40 = vld [vmem:[%s6878_s1 + $0x1780] sm:$0xff] }
 0x122   :  { %3232 = vmatpush1.bf16.msra.mxu0 %v3231_v43  ;;  %2786 = vmatprep.subr.bf16.mxu1 %v2785_v46  ;;  %v3249_v41 = vpack.c.bf16 %v786_v35, %v784_v34  ;;  %v785_v42 = vld [vmem:[%s6878_s1 + $0x1790] sm:$0xff]  ;;  %v340_v43 = vld [vmem:[%s6878_s1 + $0x9a8] sm:$0xff]  ;;  %v342_v46 = vld [vmem:[%s6878_s1 + $0x9b8] sm:$0xff]  ;;  %v2803_v49 = vpack.c.bf16 %v337_v39, %v335_v24  ;;  %v1031_v24 = vrot.slane %v5318_v19, %v4061_v13 }
 0x123   :  { %3234 = vmatprep.subr.bf16.mxu0 %v3233_v50  ;;  %v788_v47 = vld [vmem:[%s6878_s1 + $0x17a8] sm:$0xff]  ;;  %v790_v48 = vld [vmem:[%s6878_s1 + $0x17b8] sm:$0xff]  ;;  %v3251_v50 = vpack.c.bf16 %v785_v42, %v783_v40  ;;  %v2805_v51 = vpack.c.bf16 %v342_v46, %v340_v43  ;;  %v339_v52 = vld [vmem:[%s6878_s1 + $0x9a0] sm:$0xff]  ;;  %v1087_v42 = vrot.slane %v5293_v5, %v4064_v15 }
 0x124   :  { %v341_v53 = vld [vmem:[%s6878_s1 + $0x9b0] sm:$0xff]  ;;  %v787_v54 = vld [vmem:[%s6878_s1 + $0x17a0] sm:$0xff]  ;;  %v3253_v55 = vpack.c.bf16 %v790_v48, %v788_v47  ;;  %v792_v60 = vld [vmem:[%s6878_s1 + $0x17c8] sm:$0xff] }
 0x125   :  { %2788 = vmatpush1.bf16.msra.mxu1 %v2787_v57  ;;  %v789_v57 = vld [vmem:[%s6878_s1 + $0x17b0] sm:$0xff]  ;;  %v794_v61 = vld [vmem:[%s6878_s1 + $0x17d8] sm:$0xff]  ;;  %v2807_v62 = vpack.c.bf16 %v341_v53, %v339_v52  ;;  %v343_v1 = vld [vmem:[%s6878_s1 + $0x9c0] sm:$0xff]  ;;  %v1043_v53 = vrot.slane %v5318_v19, %v4085_v27 }
 0x126   :  { %3236 = vmatpush1.bf16.msra.mxu0 %v3235_v45  ;;  %2790 = vmatprep.subr.bf16.mxu1 %v2789_v58  ;;  %v344_v45 = vld [vmem:[%s6878_s1 + $0x9c8] sm:$0xff]  ;;  %v346_v58 = vld [vmem:[%s6878_s1 + $0x9d8] sm:$0xff]  ;;  %v345_v2 = vld [vmem:[%s6878_s1 + $0x9d0] sm:$0xff]  ;;  %v3257_v4 = vpack.c.bf16 %v794_v61, %v792_v60 }
 0x127   :  { %3238 = vmatprep.subr.bf16.mxu0 %v3237_v63  ;;  %v3255_v63 = vpack.c.bf16 %v789_v57, %v787_v54  ;;  %v2809_v0 = vpack.c.bf16 %v346_v58, %v344_v45  ;;  %v791_v3 = vld [vmem:[%s6878_s1 + $0x17c0] sm:$0xff]  ;;  %v796_v9 = vld [vmem:[%s6878_s1 + $0x17e8] sm:$0xff]  ;;  %v798_v10 = vld [vmem:[%s6878_s1 + $0x17f8] sm:$0xff]  ;;  %v2811_v12 = vpack.c.bf16 %v345_v2, %v343_v1 }
 0x128   :  { %v347_v17 = vld [vmem:[%s6878_s1 + $0x9e0] sm:$0xff]  ;;  %v349_v18 = vld [vmem:[%s6878_s1 + $0x9f0] sm:$0xff]  ;;  %v3261_v22 = vpack.c.bf16 %v798_v10, %v796_v9  ;;  %v800_v59 = vld [vmem:[%s6878_s1 + $0x1808] sm:$0xff] }
 0x129   :  { %2792 = vmatpush1.bf16.msra.mxu1 %v2791_v6  ;;  %v793_v6 = vld [vmem:[%s6878_s1 + $0x17d0] sm:$0xff]  ;;  %v795_v21 = vld [vmem:[%s6878_s1 + $0x17e0] sm:$0xff]  ;;  %v802_v28 = vld [vmem:[%s6878_s1 + $0x1818] sm:$0xff]  ;;  %v2815_v29 = vpack.c.bf16 %v349_v18, %v347_v17 }
 0x12a   :  { %3240 = vmatpush1.bf16.msra.mxu0 %v3239_v31  ;;  %2794 = vmatprep.subr.bf16.mxu1 %v2793_v7  ;;  %v348_v31 = vld [vmem:[%s6878_s1 + $0x9e8] sm:$0xff]  ;;  %v350_v7 = vld [vmem:[%s6878_s1 + $0x9f8] sm:$0xff]  ;;  %v351_v32 = vld [vmem:[%s6878_s1 + $0xa00] sm:$0xff]  ;;  %v3265_v35 = vpack.c.bf16 %v802_v28, %v800_v59 }
 0x12b   :  { %3242 = vmatprep.subr.bf16.mxu0 %v3241_v14  ;;  %v3259_v14 = vpack.c.bf16 %v793_v6, %v791_v3  ;;  %v2813_v16 = vpack.c.bf16 %v350_v7, %v348_v31  ;;  %v353_v33 = vld [vmem:[%s6878_s1 + $0xa10] sm:$0xff]  ;;  %v799_v34 = vld [vmem:[%s6878_s1 + $0x1800] sm:$0xff]  ;;  %v804_v39 = vld [vmem:[%s6878_s1 + $0x1828] sm:$0xff] }
 0x12c   :  { %v806_v40 = vld [vmem:[%s6878_s1 + $0x1838] sm:$0xff]  ;;  %v355_v48 = vld [vmem:[%s6878_s1 + $0xa20] sm:$0xff]  ;;  %v808_v54 = vld [vmem:[%s6878_s1 + $0x1848] sm:$0xff] }
 0x12d   :  { %2796 = vmatpush1.bf16.msra.mxu1 %v2795_v23  ;;  %v797_v23 = vld [vmem:[%s6878_s1 + $0x17f0] sm:$0xff]  ;;  %v5697_v43 = vld [vmem:[%s6877_s0 + $0x18] sm:$0x3f]  ;;  %v803_v15 = vld [vmem:[%s6878_s1 + $0x1820] sm:$0xff]  ;;  %v3269_v5 = vpack.c.bf16 %v806_v40, %v804_v39 }
 0x12e   :  { %3244 = vmatpush1.bf16.msra.mxu0 %v3243_v25  ;;  %2798 = vmatprep.subr.bf16.mxu1 %v2797_v26  ;;  %v352_v25 = vld [vmem:[%s6878_s1 + $0xa08] sm:$0xff]  ;;  %v354_v26 = vld [vmem:[%s6878_s1 + $0xa18] sm:$0xff]  ;;  %v1099_v57 = vrot.slane %v5697_v43, %v3921_v8  ;;  %v359_v19 = vld [vmem:[%s6878_s1 + $0xa40] sm:$0xff] }
 0x12f   :  { %3246 = vmatprep.subr.bf16.mxu0 %v3245_v30  ;;  %v3263_v30 = vpack.c.bf16 %v797_v23, %v795_v21  ;;  %v2817_v11 = vpack.c.bf16 %v354_v26, %v352_v25  ;;  %v362_v52 = vld [vmem:[%s6878_s1 + $0xa58] sm:$0xff]  ;;  %v361_v61 = vld [vmem:[%s6878_s1 + $0xa50] sm:$0xff]  ;;  %v364_v1 = vld [vmem:[%s6878_s1 + $0xa68] sm:$0xff] }
 0x130   :  { %v366_v2 = vld [vmem:[%s6878_s1 + $0xa78] sm:$0xff]  ;;  %v812_v3 = vld [vmem:[%s6878_s1 + $0x1868] sm:$0xff]  ;;  %v2827_v6 = vpack.c.bf16 %v361_v61, %v359_v19  ;;  %v363_v9 = vld [vmem:[%s6878_s1 + $0xa60] sm:$0xff] }
 0x131   :  { %2800 = vmatpush1.bf16.msra.mxu1 %v2799_v36  ;;  %v801_v36 = vld [vmem:[%s6878_s1 + $0x1810] sm:$0xff]  ;;  %v2829_v7 = vpack.c.bf16 %v366_v2, %v364_v1  ;;  %v368_v17 = vld [vmem:[%s6878_s1 + $0xa88] sm:$0xff]  ;;  %v370_v18 = vld [vmem:[%s6878_s1 + $0xa98] sm:$0xff] }
 0x132   :  { %3248 = vmatpush1.bf16.msra.mxu0 %v3247_v37  ;;  %2802 = vmatprep.subr.bf16.mxu1 %v2801_v38  ;;  %v356_v37 = vld [vmem:[%s6878_s1 + $0xa28] sm:$0xff]  ;;  %v358_v38 = vld [vmem:[%s6878_s1 + $0xa38] sm:$0xff]  ;;  %v3267_v46 = vpack.c.bf16 %v801_v36, %v799_v34  ;;  %v365_v10 = vld [vmem:[%s6878_s1 + $0xa70] sm:$0xff]  ;;  %v2833_v26 = vpack.c.bf16 %v370_v18, %v368_v17 }
 0x133   :  { %3250 = vmatprep.subr.bf16.mxu0 %v3249_v41  ;;  %v2819_v41 = vpack.c.bf16 %v353_v33, %v351_v32  ;;  %v2821_v47 = vpack.c.bf16 %v358_v38, %v356_v37  ;;  %v816_v21 = vld [vmem:[%s6878_s1 + $0x1888] sm:$0xff]  ;;  %v2831_v23 = vpack.c.bf16 %v365_v10, %v363_v9  ;;  %v367_v59 = vld [vmem:[%s6878_s1 + $0xa80] sm:$0xff]  ;;  %v369_v28 = vld [vmem:[%s6878_s1 + $0xa90] sm:$0xff] }
 0x134   :  { %v372_v32 = vld [vmem:[%s6878_s1 + $0xaa8] sm:$0xff]  ;;  %v374_v33 = vld [vmem:[%s6878_s1 + $0xab8] sm:$0xff]  ;;  %v2835_v36 = vpack.c.bf16 %v369_v28, %v367_v59  ;;  %v373_v39 = vld [vmem:[%s6878_s1 + $0xab0] sm:$0xff] }
 0x135   :  { %2804 = vmatpush1.bf16.msra.mxu1 %v2803_v49  ;;  %v357_v49 = vld [vmem:[%s6878_s1 + $0xa30] sm:$0xff]  ;;  %v820_v34 = vld [vmem:[%s6878_s1 + $0x18a8] sm:$0xff]  ;;  %v2837_v38 = vpack.c.bf16 %v374_v33, %v372_v32  ;;  %v819_v40 = vld [vmem:[%s6878_s1 + $0x18a0] sm:$0xff] }
 0x136   :  { %3252 = vmatpush1.bf16.msra.mxu0 %v3251_v50  ;;  %2806 = vmatprep.subr.bf16.mxu1 %v2805_v51  ;;  %v805_v50 = vld [vmem:[%s6878_s1 + $0x1830] sm:$0xff]  ;;  %v360_v51 = vld [vmem:[%s6878_s1 + $0xa48] sm:$0xff]  ;;  %v2823_v45 = vpack.c.bf16 %v357_v49, %v355_v48  ;;  %v826_v49 = vld [vmem:[%s6878_s1 + $0x18d8] sm:$0xff] }
 0x137   :  { %3254 = vmatprep.subr.bf16.mxu0 %v3253_v55  ;;  %v810_v55 = vld [vmem:[%s6878_s1 + $0x1858] sm:$0xff]  ;;  %v3271_v58 = vpack.c.bf16 %v805_v50, %v803_v15  ;;  %v2825_v60 = vpack.c.bf16 %v362_v52, %v360_v51  ;;  %v824_v48 = vld [vmem:[%s6878_s1 + $0x18c8] sm:$0xff]  ;;  %v375_v51 = vld [vmem:[%s6878_s1 + $0xac0] sm:$0xff] }
 0x138   :  { %v377_v52 = vld [vmem:[%s6878_s1 + $0xad0] sm:$0xff]  ;;  %v827_v1 = vld [vmem:[%s6878_s1 + $0x18e0] sm:$0xff]  ;;  %vm3454_vm3 = vmpackc.low %vm1159_vm1, %vm3598_vm2 }
 0x139   :  { %2808 = vmatpush1.bf16.msra.mxu1 %v2807_v62  ;;  %v807_v62 = vld [vmem:[%s6878_s1 + $0x1840] sm:$0xff]  ;;  %v2843_v19 = vpack.c.bf16 %v377_v52, %v375_v51  ;;  %vm3492_vm5 = vmpackc.low %vm2283_vm4, %vm3598_vm2 }
 0x13a   :  { %3256 = vmatpush1.bf16.msra.mxu0 %v3255_v63  ;;  %2810 = vmatprep.subr.bf16.mxu1 %v2809_v0  ;;  %v3273_v63 = vpack.c.bf16 %v810_v55, %v808_v54  ;;  %v809_v0 = vld [vmem:[%s6878_s1 + $0x1850] sm:$0xff]  ;;  %v3289_v54 = vpack.c.bf16 %v826_v49, %v824_v48  ;;  %v831_v17 = vld [vmem:[%s6878_s1 + $0x1900] sm:$0xff]  ;;  %v396_v49 = vld [vmem:[%s6878_s1 + $0xb68] sm:$0xff] }
 0x13b   :  { %3258 = vmatprep.subr.bf16.mxu0 %v3257_v4  ;;  %v814_v4 = vld [vmem:[%s6878_s1 + $0x1878] sm:$0xff]  ;;  %v3275_v31 = vpack.c.bf16 %v809_v0, %v807_v62  ;;  %v825_v55 = vld [vmem:[%s6878_s1 + $0x18d0] sm:$0xff]  ;;  %v835_v32 = vld [vmem:[%s6878_s1 + $0x1920] sm:$0xff] }
 0x13c   :  { %v381_v0 = vld [vmem:[%s6878_s1 + $0xaf0] sm:$0xff] }
 0x13d   :  { %2812 = vmatpush1.bf16.msra.mxu1 %v2811_v12  ;;  %v811_v12 = vld [vmem:[%s6878_s1 + $0x1860] sm:$0xff]  ;;  %v841_v48 = vld [vmem:[%s6878_s1 + $0x1950] sm:$0xff] }
 0x13e   :  { %3260 = vmatpush1.bf16.msra.mxu0 %v3259_v14  ;;  %2814 = vmatprep.subr.bf16.mxu1 %v2813_v16  ;;  %v3277_v14 = vpack.c.bf16 %v814_v4, %v812_v3  ;;  %v813_v16 = vld [vmem:[%s6878_s1 + $0x1870] sm:$0xff]  ;;  %v384_v4 = vld [vmem:[%s6878_s1 + $0xb08] sm:$0xff] }
 0x13f   :  { %3262 = vmatprep.subr.bf16.mxu0 %v3261_v22  ;;  %v818_v22 = vld [vmem:[%s6878_s1 + $0x1898] sm:$0xff]  ;;  %v3279_v25 = vpack.c.bf16 %v813_v16, %v811_v12  ;;  %v829_v3 = vld [vmem:[%s6878_s1 + $0x18f0] sm:$0xff] }
 0x140   :  { %v3295_v10 = vpack.c.bf16 %v829_v3, %v827_v1  ;;  %v385_v16 = vld [vmem:[%s6878_s1 + $0xb10] sm:$0xff] }
 0x141   :  { %2816 = vmatpush1.bf16.msra.mxu1 %v2815_v29  ;;  %v815_v29 = vld [vmem:[%s6878_s1 + $0x1880] sm:$0xff]  ;;  %v401_v3 = vld [vmem:[%s6878_s1 + $0xb90] sm:$0xff] }
 0x142   :  { %3264 = vmatpush1.bf16.msra.mxu0 %v3263_v30  ;;  %2818 = vmatprep.subr.bf16.mxu1 %v2817_v11  ;;  %v3281_v30 = vpack.c.bf16 %v818_v22, %v816_v21  ;;  %v817_v11 = vld [vmem:[%s6878_s1 + $0x1890] sm:$0xff]  ;;  %v388_v22 = vld [vmem:[%s6878_s1 + $0xb28] sm:$0xff] }
 0x143   :  { %3266 = vmatprep.subr.bf16.mxu0 %v3265_v35  ;;  %v822_v35 = vld [vmem:[%s6878_s1 + $0x18b8] sm:$0xff]  ;;  %v3283_v37 = vpack.c.bf16 %v817_v11, %v815_v29  ;;  %v833_v21 = vld [vmem:[%s6878_s1 + $0x1910] sm:$0xff] }
 0x144   :  { %1515 = vmatmul.mubr.f32.vlgmr.msra.gmra.mrb[0].mxu1 %v1031_v24  ;;  %v371_v24 = vld [vmem:[%s6878_s1 + $0xaa0] sm:$0xff]  ;;  %v3299_v28 = vpack.c.bf16 %v833_v21, %v831_v17  ;;  %v389_v11 = vld [vmem:[%s6878_s1 + $0xb30] sm:$0xff] }
 0x145   :  { %2820 = vmatpush1.bf16.msra.mxu1 %v2819_v41  ;;  %2012 = vmatmul.mubr.f32.vlgmr.msra.gmra.mrb[0].mxu0 %v1087_v42  ;;  %v3285_v41 = vpack.c.bf16 %v822_v35, %v820_v34  ;;  %v821_v42 = vld [vmem:[%s6878_s1 + $0x18b0] sm:$0xff]  ;;  %v2839_v15 = vpack.c.bf16 %v373_v39, %v371_v24  ;;  %v392_v35 = vld [vmem:[%s6878_s1 + $0xb48] sm:$0xff] }
 0x146   :  { %3268 = vmatpush1.bf16.msra.mxu0 %v3267_v46  ;;  %2822 = vmatprep.subr.bf16.mxu1 %v2821_v47  ;;  %v376_v46 = vld [vmem:[%s6878_s1 + $0xac8] sm:$0xff]  ;;  %v378_v47 = vld [vmem:[%s6878_s1 + $0xad8] sm:$0xff]  ;;  %v837_v34 = vld [vmem:[%s6878_s1 + $0x1930] sm:$0xff] }
 0x147   :  { %3270 = vmatprep.subr.bf16.mxu0 %v3269_v5  ;;  %1585 = vmatprep.mubr.f32.mxu1 %v1043_v53  ;;  %v3287_v5 = vpack.c.bf16 %v821_v42, %v819_v40  ;;  %v2841_v50 = vpack.c.bf16 %v378_v47, %v376_v46  ;;  %v823_v53 = vld [vmem:[%s6878_s1 + $0x18c0] sm:$0xff]  ;;  %v3303_v39 = vpack.c.bf16 %v837_v34, %v835_v32  ;;  %v393_v42 = vld [vmem:[%s6878_s1 + $0xb50] sm:$0xff] }
 0x148   :  { %2082 = vmatprep.mubr.f32.mxu0 %v1099_v57  ;;  %v380_v57 = vld [vmem:[%s6878_s1 + $0xae8] sm:$0xff]  ;;  %v3291_v61 = vpack.c.bf16 %v825_v55, %v823_v53  ;;  %v839_v46 = vld [vmem:[%s6878_s1 + $0x1940] sm:$0xff]  ;;  %v397_v55 = vld [vmem:[%s6878_s1 + $0xb70] sm:$0xff] }
 0x149   :  { %2824 = vmatpush1.bf16.msra.mxu1 %v2823_v45  ;;  %v382_v45 = vld [vmem:[%s6878_s1 + $0xaf8] sm:$0xff]  ;;  %v3307_v52 = vpack.c.bf16 %v841_v48, %v839_v46  ;;  %v405_v21 = vld [vmem:[%s6878_s1 + $0xbb0] sm:$0xff] }
 0x14a   :  { %3272 = vmatpush1.bf16.msra.mxu0 %v3271_v58  ;;  %2826 = vmatprep.subr.bf16.mxu1 %v2825_v60  ;;  %v828_v58 = vld [vmem:[%s6878_s1 + $0x18e8] sm:$0xff]  ;;  %v830_v60 = vld [vmem:[%s6878_s1 + $0x18f8] sm:$0xff]  ;;  %v2845_v62 = vpack.c.bf16 %v382_v45, %v380_v57  ;;  %v843_v57 = vld [vmem:[%s6878_s1 + $0x1960] sm:$0xff] }
 0x14b   :  { %3274 = vmatprep.subr.bf16.mxu0 %v3273_v63  ;;  %v379_v63 = vld [vmem:[%s6878_s1 + $0xae0] sm:$0xff]  ;;  %v3293_v2 = vpack.c.bf16 %v830_v60, %v828_v58  ;;  %v845_v58 = vld [vmem:[%s6878_s1 + $0x1970] sm:$0xff]  ;;  %v400_v60 = vld [vmem:[%s6878_s1 + $0xb88] sm:$0xff] }
 0x14c   :  { %v2847_v9 = vpack.c.bf16 %v381_v0, %v379_v63  ;;  %v3311_v0 = vpack.c.bf16 %v845_v58, %v843_v57  ;;  %v409_v34 = vld [vmem:[%s6878_s1 + $0xbd0] sm:$0xff] }
 0x14d   :  { %2828 = vmatpush1.bf16.msra.mxu1 %v2827_v6  ;;  %v386_v6 = vld [vmem:[%s6878_s1 + $0xb18] sm:$0xff]  ;;  %v413_v48 = vld [vmem:[%s6878_s1 + $0xbf0] sm:$0xff] }
 0x14e   :  { %3276 = vmatpush1.bf16.msra.mxu0 %v3275_v31  ;;  %2830 = vmatprep.subr.bf16.mxu1 %v2829_v7  ;;  %v832_v31 = vld [vmem:[%s6878_s1 + $0x1908] sm:$0xff]  ;;  %v834_v7 = vld [vmem:[%s6878_s1 + $0x1918] sm:$0xff]  ;;  %v2849_v12 = vpack.c.bf16 %v386_v6, %v384_v4  ;;  %v847_v4 = vld [vmem:[%s6878_s1 + $0x1980] sm:$0xff] }
 0x14f   :  { %3278 = vmatprep.subr.bf16.mxu0 %v3277_v14  ;;  %v383_v14 = vld [vmem:[%s6878_s1 + $0xb00] sm:$0xff]  ;;  %v3297_v18 = vpack.c.bf16 %v834_v7, %v832_v31  ;;  %v849_v31 = vld [vmem:[%s6878_s1 + $0x1990] sm:$0xff]  ;;  %v404_v7 = vld [vmem:[%s6878_s1 + $0xba8] sm:$0xff] }
 0x150   :  { %v2851_v59 = vpack.c.bf16 %v385_v16, %v383_v14  ;;  %v3315_v16 = vpack.c.bf16 %v849_v31, %v847_v4  ;;  %v417_v58 = vld [vmem:[%s6878_s1 + $0xc10] sm:$0xff] }
 0x151   :  { %2832 = vmatpush1.bf16.msra.mxu1 %v2831_v23  ;;  %v390_v23 = vld [vmem:[%s6878_s1 + $0xb38] sm:$0xff] }
 0x152   :  { %3280 = vmatpush1.bf16.msra.mxu0 %v3279_v25  ;;  %2834 = vmatprep.subr.bf16.mxu1 %v2833_v26  ;;  %v836_v25 = vld [vmem:[%s6878_s1 + $0x1928] sm:$0xff]  ;;  %v838_v26 = vld [vmem:[%s6878_s1 + $0x1938] sm:$0xff]  ;;  %v2853_v29 = vpack.c.bf16 %v390_v23, %v388_v22  ;;  %v851_v22 = vld [vmem:[%s6878_s1 + $0x19a0] sm:$0xff] }
 0x153   :  { %3282 = vmatprep.subr.bf16.mxu0 %v3281_v30  ;;  %v387_v30 = vld [vmem:[%s6878_s1 + $0xb20] sm:$0xff]  ;;  %v3301_v33 = vpack.c.bf16 %v838_v26, %v836_v25  ;;  %v853_v25 = vld [vmem:[%s6878_s1 + $0x19b0] sm:$0xff]  ;;  %v408_v26 = vld [vmem:[%s6878_s1 + $0xbc8] sm:$0xff] }
 0x154   :  { %v2855_v24 = vpack.c.bf16 %v389_v11, %v387_v30  ;;  %v3319_v11 = vpack.c.bf16 %v853_v25, %v851_v22  ;;  %v872_v22 = vld [vmem:[%s6878_s1 + $0x1a48] sm:$0xff]  ;;  %v1107_v25 = vrot.slane %v5697_v43, %v4085_v27 }
 0x155   :  { %2836 = vmatpush1.bf16.msra.mxu1 %v2835_v36  ;;  %v394_v36 = vld [vmem:[%s6878_s1 + $0xb58] sm:$0xff] }
 0x156   :  { %3284 = vmatpush1.bf16.msra.mxu0 %v3283_v37  ;;  %2838 = vmatprep.subr.bf16.mxu1 %v2837_v38  ;;  %v840_v37 = vld [vmem:[%s6878_s1 + $0x1948] sm:$0xff]  ;;  %v842_v38 = vld [vmem:[%s6878_s1 + $0x1958] sm:$0xff]  ;;  %v2857_v40 = vpack.c.bf16 %v394_v36, %v392_v35  ;;  %v855_v35 = vld [vmem:[%s6878_s1 + $0x19c0] sm:$0xff] }
 0x157   :  { %3286 = vmatprep.subr.bf16.mxu0 %v3285_v41  ;;  %v391_v41 = vld [vmem:[%s6878_s1 + $0xb40] sm:$0xff]  ;;  %v3305_v47 = vpack.c.bf16 %v842_v38, %v840_v37  ;;  %v857_v37 = vld [vmem:[%s6878_s1 + $0x19d0] sm:$0xff]  ;;  %v412_v38 = vld [vmem:[%s6878_s1 + $0xbe8] sm:$0xff] }
 0x158   :  { %v2859_v51 = vpack.c.bf16 %v393_v42, %v391_v41  ;;  %v3323_v42 = vpack.c.bf16 %v857_v37, %v855_v35  ;;  %v878_v35 = vld [vmem:[%s6878_s1 + $0x1a78] sm:$0xff] }
 0x159   :  { %2840 = vmatpush1.bf16.msra.mxu1 %v2839_v15  ;;  %v398_v15 = vld [vmem:[%s6878_s1 + $0xb78] sm:$0xff] }
 0x15a   :  { %3288 = vmatpush1.bf16.msra.mxu0 %v3287_v5  ;;  %2842 = vmatprep.subr.bf16.mxu1 %v2841_v50  ;;  %v844_v5 = vld [vmem:[%s6878_s1 + $0x1968] sm:$0xff]  ;;  %v846_v50 = vld [vmem:[%s6878_s1 + $0x1978] sm:$0xff]  ;;  %v2861_v53 = vpack.c.bf16 %v398_v15, %v396_v49  ;;  %v859_v49 = vld [vmem:[%s6878_s1 + $0x19e0] sm:$0xff] }
 0x15b   :  { %3290 = vmatprep.subr.bf16.mxu0 %v3289_v54  ;;  %v395_v54 = vld [vmem:[%s6878_s1 + $0xb60] sm:$0xff]  ;;  %v3309_v45 = vpack.c.bf16 %v846_v50, %v844_v5  ;;  %v861_v5 = vld [vmem:[%s6878_s1 + $0x19f0] sm:$0xff]  ;;  %v416_v50 = vld [vmem:[%s6878_s1 + $0xc08] sm:$0xff] }
 0x15c   :  { %v2863_v63 = vpack.c.bf16 %v397_v55, %v395_v54  ;;  %v3327_v55 = vpack.c.bf16 %v861_v5, %v859_v49  ;;  %v882_v49 = vld [vmem:[%s6878_s1 + $0x1a98] sm:$0xff] }
 0x15d   :  { %2844 = vmatpush1.bf16.msra.mxu1 %v2843_v19  ;;  %v402_v19 = vld [vmem:[%s6878_s1 + $0xb98] sm:$0xff] }
 0x15e   :  { %3292 = vmatpush1.bf16.msra.mxu0 %v3291_v61  ;;  %2846 = vmatprep.subr.bf16.mxu1 %v2845_v62  ;;  %v848_v61 = vld [vmem:[%s6878_s1 + $0x1988] sm:$0xff]  ;;  %v850_v62 = vld [vmem:[%s6878_s1 + $0x1998] sm:$0xff]  ;;  %v2865_v1 = vpack.c.bf16 %v402_v19, %v400_v60  ;;  %v863_v60 = vld [vmem:[%s6878_s1 + $0x1a00] sm:$0xff] }
 0x15f   :  { %3294 = vmatprep.subr.bf16.mxu0 %v3293_v2  ;;  %v399_v2 = vld [vmem:[%s6878_s1 + $0xb80] sm:$0xff]  ;;  %v3313_v6 = vpack.c.bf16 %v850_v62, %v848_v61  ;;  %v865_v61 = vld [vmem:[%s6878_s1 + $0x1a10] sm:$0xff]  ;;  %v420_v62 = vld [vmem:[%s6878_s1 + $0xc28] sm:$0xff] }
 0x160   :  { %v2867_v14 = vpack.c.bf16 %v401_v3, %v399_v2  ;;  %v868_v2 = vld [vmem:[%s6878_s1 + $0x1a28] sm:$0xff]  ;;  %v870_v3 = vld [vmem:[%s6878_s1 + $0x1a38] sm:$0xff]  ;;  %v3331_v31 = vpack.c.bf16 %v865_v61, %v863_v60 }
 0x161   :  { %2848 = vmatpush1.bf16.msra.mxu1 %v2847_v9  ;;  %v406_v9 = vld [vmem:[%s6878_s1 + $0xbb8] sm:$0xff] }
 0x162   :  { %3296 = vmatpush1.bf16.msra.mxu0 %v3295_v10  ;;  %2850 = vmatprep.subr.bf16.mxu1 %v2849_v12  ;;  %v852_v10 = vld [vmem:[%s6878_s1 + $0x19a8] sm:$0xff]  ;;  %v854_v12 = vld [vmem:[%s6878_s1 + $0x19b8] sm:$0xff]  ;;  %v2869_v17 = vpack.c.bf16 %v406_v9, %v404_v7  ;;  %v419_v9 = vld [vmem:[%s6878_s1 + $0xc20] sm:$0xff] }
 0x163   :  { %3298 = vmatprep.subr.bf16.mxu0 %v3297_v18  ;;  %v403_v18 = vld [vmem:[%s6878_s1 + $0xba0] sm:$0xff]  ;;  %v3317_v23 = vpack.c.bf16 %v854_v12, %v852_v10  ;;  %v421_v10 = vld [vmem:[%s6878_s1 + $0xc30] sm:$0xff]  ;;  %v886_v60 = vld [vmem:[%s6878_s1 + $0x1ab8] sm:$0xff] }
 0x164   :  { %v2871_v30 = vpack.c.bf16 %v405_v21, %v403_v18  ;;  %v867_v12 = vld [vmem:[%s6878_s1 + $0x1a20] sm:$0xff]  ;;  %v426_v18 = vld [vmem:[%s6878_s1 + $0xc58] sm:$0xff] }
 0x165   :  { %2852 = vmatpush1.bf16.msra.mxu1 %v2851_v59  ;;  %v410_v59 = vld [vmem:[%s6878_s1 + $0xbd8] sm:$0xff] }
 0x166   :  { %3300 = vmatpush1.bf16.msra.mxu0 %v3299_v28  ;;  %2854 = vmatprep.subr.bf16.mxu1 %v2853_v29  ;;  %v856_v28 = vld [vmem:[%s6878_s1 + $0x19c8] sm:$0xff]  ;;  %v858_v29 = vld [vmem:[%s6878_s1 + $0x19d8] sm:$0xff]  ;;  %v2873_v32 = vpack.c.bf16 %v410_v59, %v408_v26  ;;  %v2887_v26 = vpack.c.bf16 %v421_v10, %v419_v9 }
 0x167   :  { %3302 = vmatprep.subr.bf16.mxu0 %v3301_v33  ;;  %v407_v33 = vld [vmem:[%s6878_s1 + $0xbc0] sm:$0xff]  ;;  %v3321_v36 = vpack.c.bf16 %v858_v29, %v856_v28  ;;  %v890_v9 = vld [vmem:[%s6878_s1 + $0x1ad8] sm:$0xff] }
 0x168   :  { %v2875_v41 = vpack.c.bf16 %v409_v34, %v407_v33  ;;  %v423_v29 = vld [vmem:[%s6878_s1 + $0xc40] sm:$0xff]  ;;  %v430_v33 = vld [vmem:[%s6878_s1 + $0xc78] sm:$0xff]  ;;  %v876_v34 = vld [vmem:[%s6878_s1 + $0x1a68] sm:$0xff] }
 0x169   :  { %2856 = vmatpush1.bf16.msra.mxu1 %v2855_v24  ;;  %v414_v24 = vld [vmem:[%s6878_s1 + $0xbf8] sm:$0xff] }
 0x16a   :  { %3304 = vmatpush1.bf16.msra.mxu0 %v3303_v39  ;;  %2858 = vmatprep.subr.bf16.mxu1 %v2857_v40  ;;  %v860_v39 = vld [vmem:[%s6878_s1 + $0x19e8] sm:$0xff]  ;;  %v862_v40 = vld [vmem:[%s6878_s1 + $0x19f8] sm:$0xff]  ;;  %v2877_v46 = vpack.c.bf16 %v414_v24, %v412_v38  ;;  %v427_v24 = vld [vmem:[%s6878_s1 + $0xc60] sm:$0xff] }
 0x16b   :  { %3306 = vmatprep.subr.bf16.mxu0 %v3305_v47  ;;  %v411_v47 = vld [vmem:[%s6878_s1 + $0xbe0] sm:$0xff]  ;;  %v3325_v15 = vpack.c.bf16 %v862_v40, %v860_v39  ;;  %v429_v39 = vld [vmem:[%s6878_s1 + $0xc70] sm:$0xff] }
 0x16c   :  { %v2879_v54 = vpack.c.bf16 %v413_v48, %v411_v47  ;;  %v875_v40 = vld [vmem:[%s6878_s1 + $0x1a60] sm:$0xff]  ;;  %v434_v47 = vld [vmem:[%s6878_s1 + $0xc98] sm:$0xff]  ;;  %v880_v48 = vld [vmem:[%s6878_s1 + $0x1a88] sm:$0xff] }
 0x16d   :  { %2860 = vmatpush1.bf16.msra.mxu1 %v2859_v51  ;;  %v418_v51 = vld [vmem:[%s6878_s1 + $0xc18] sm:$0xff] }
 0x16e   :  { %3308 = vmatpush1.bf16.msra.mxu0 %v3307_v52  ;;  %2862 = vmatprep.subr.bf16.mxu1 %v2861_v53  ;;  %v864_v52 = vld [vmem:[%s6878_s1 + $0x1a08] sm:$0xff]  ;;  %v866_v53 = vld [vmem:[%s6878_s1 + $0x1a18] sm:$0xff]  ;;  %v2881_v57 = vpack.c.bf16 %v418_v51, %v416_v50  ;;  %v431_v51 = vld [vmem:[%s6878_s1 + $0xc80] sm:$0xff] }
 0x16f   :  { %3310 = vmatprep.subr.bf16.mxu0 %v3309_v45  ;;  %v415_v45 = vld [vmem:[%s6878_s1 + $0xc00] sm:$0xff]  ;;  %v3329_v19 = vpack.c.bf16 %v866_v53, %v864_v52  ;;  %v433_v52 = vld [vmem:[%s6878_s1 + $0xc90] sm:$0xff] }
 0x170   :  { %v2883_v4 = vpack.c.bf16 %v417_v58, %v415_v45  ;;  %v879_v53 = vld [vmem:[%s6878_s1 + $0x1a80] sm:$0xff]  ;;  %v438_v45 = vld [vmem:[%s6878_s1 + $0xcb8] sm:$0xff]  ;;  %v884_v58 = vld [vmem:[%s6878_s1 + $0x1aa8] sm:$0xff] }
 0x171   :  { %2864 = vmatpush1.bf16.msra.mxu1 %v2863_v63  ;;  %v422_v63 = vld [vmem:[%s6878_s1 + $0xc38] sm:$0xff] }
 0x172   :  { %3312 = vmatpush1.bf16.msra.mxu0 %v3311_v0  ;;  %2866 = vmatprep.subr.bf16.mxu1 %v2865_v1  ;;  %v6084_v0 = vld [vmem:[%s6877_s0 + $0x8] sm:$0xff]  ;;  %v2885_v7 = vpack.c.bf16 %v422_v63, %v420_v62  ;;  %v435_v63 = vld [vmem:[%s6878_s1 + $0xca0] sm:$0xff] }
 0x173   :  { %3314 = vmatprep.subr.bf16.mxu0 %v3313_v6  ;;  %v1039_v1 = vrot.slane %v6084_v0, %v4467_v44  ;;  %v1095_v6 = vrot.slane %v5697_v43, %v4061_v13  ;;  %v1051_v21 = vrot.slane %v6084_v0, %v4488_v56  ;;  %v873_v43 = vld [vmem:[%s6878_s1 + $0x1a50] sm:$0xff] }
 0x175   :  { %2868 = vmatpush1.bf16.msra.mxu1 %v2867_v14  ;;  %v3333_v14 = vpack.c.bf16 %v870_v3, %v868_v2  ;;  %v883_v2 = vld [vmem:[%s6878_s1 + $0x1aa0] sm:$0xff]  ;;  %v3349_v3 = vpack.c.bf16 %v886_v60, %v884_v58  ;;  %v456_v58 = vld [vmem:[%s6878_s1 + $0xd48] sm:$0xff]  ;;  %v458_v60 = vld [vmem:[%s6878_s1 + $0xd58] sm:$0xff] }
 0x176   :  { %3316 = vmatpush1.bf16.msra.mxu0 %v3315_v16  ;;  %2870 = vmatprep.subr.bf16.mxu1 %v2869_v17  ;;  %v869_v16 = vld [vmem:[%s6878_s1 + $0x1a30] sm:$0xff]  ;;  %v424_v17 = vld [vmem:[%s6878_s1 + $0xc48] sm:$0xff] }
 0x177   :  { %3318 = vmatprep.subr.bf16.mxu0 %v3317_v23  ;;  %v874_v23 = vld [vmem:[%s6878_s1 + $0x1a58] sm:$0xff]  ;;  %v3335_v59 = vpack.c.bf16 %v869_v16, %v867_v12  ;;  %v2889_v28 = vpack.c.bf16 %v426_v18, %v424_v17  ;;  %v439_v16 = vld [vmem:[%s6878_s1 + $0xcc0] sm:$0xff]  ;;  %v441_v17 = vld [vmem:[%s6878_s1 + $0xcd0] sm:$0xff] }
 0x178   :  { %v3337_v27 = vpack.c.bf16 %v874_v23, %v872_v22  ;;  %v887_v18 = vld [vmem:[%s6878_s1 + $0x1ac0] sm:$0xff]  ;;  %v889_v22 = vld [vmem:[%s6878_s1 + $0x1ad0] sm:$0xff]  ;;  %v444_v23 = vld [vmem:[%s6878_s1 + $0xce8] sm:$0xff] }
 0x179   :  { %2872 = vmatpush1.bf16.msra.mxu1 %v2871_v30  ;;  %v425_v30 = vld [vmem:[%s6878_s1 + $0xc50] sm:$0xff] }
 0x17a   :  { %3320 = vmatpush1.bf16.msra.mxu0 %v3319_v11  ;;  %2874 = vmatprep.subr.bf16.mxu1 %v2873_v32  ;;  %v871_v11 = vld [vmem:[%s6878_s1 + $0x1a40] sm:$0xff]  ;;  %v428_v32 = vld [vmem:[%s6878_s1 + $0xc68] sm:$0xff] }
 0x17b   :  { %3322 = vmatprep.subr.bf16.mxu0 %v3321_v36  ;;  %v2891_v36 = vpack.c.bf16 %v425_v30, %v423_v29  ;;  %v3339_v37 = vpack.c.bf16 %v873_v43, %v871_v11  ;;  %v2893_v38 = vpack.c.bf16 %v430_v33, %v428_v32  ;;  %v3355_v29 = vpack.c.bf16 %v889_v22, %v887_v18  ;;  %v443_v11 = vld [vmem:[%s6878_s1 + $0xce0] sm:$0xff]  ;;  %v893_v33 = vld [vmem:[%s6878_s1 + $0x1af0] sm:$0xff] }
 0x17c   :  { %v891_v43 = vld [vmem:[%s6878_s1 + $0x1ae0] sm:$0xff] }
 0x17d   :  { %2876 = vmatpush1.bf16.msra.mxu1 %v2875_v41  ;;  %v3341_v41 = vpack.c.bf16 %v878_v35, %v876_v34  ;;  %v448_v34 = vld [vmem:[%s6878_s1 + $0xd08] sm:$0xff]  ;;  %v450_v35 = vld [vmem:[%s6878_s1 + $0xd18] sm:$0xff]  ;;  %v459_v18 = vld [vmem:[%s6878_s1 + $0xd60] sm:$0xff] }
 0x17e   :  { %3324 = vmatpush1.bf16.msra.mxu0 %v3323_v42  ;;  %2878 = vmatprep.subr.bf16.mxu1 %v2877_v46  ;;  %v877_v42 = vld [vmem:[%s6878_s1 + $0x1a70] sm:$0xff]  ;;  %v432_v46 = vld [vmem:[%s6878_s1 + $0xc88] sm:$0xff]  ;;  %v907_v22 = vld [vmem:[%s6878_s1 + $0x1b60] sm:$0xff] }
 0x17f   :  { %3326 = vmatprep.subr.bf16.mxu0 %v3325_v15  ;;  %v2895_v15 = vpack.c.bf16 %v429_v39, %v427_v24  ;;  %v3343_v5 = vpack.c.bf16 %v877_v42, %v875_v40  ;;  %v2897_v50 = vpack.c.bf16 %v434_v47, %v432_v46  ;;  %v3359_v24 = vpack.c.bf16 %v893_v33, %v891_v43  ;;  %v447_v40 = vld [vmem:[%s6878_s1 + $0xd00] sm:$0xff]  ;;  %v897_v47 = vld [vmem:[%s6878_s1 + $0x1b10] sm:$0xff] }
 0x180   :  { %v2913_v39 = vpack.c.bf16 %v450_v35, %v448_v34  ;;  %v895_v42 = vld [vmem:[%s6878_s1 + $0x1b00] sm:$0xff]  ;;  %v913_v35 = vld [vmem:[%s6878_s1 + $0x1b90] sm:$0xff] }
 0x181   :  { %2880 = vmatpush1.bf16.msra.mxu1 %v2879_v54  ;;  %v3345_v54 = vpack.c.bf16 %v882_v49, %v880_v48  ;;  %v452_v48 = vld [vmem:[%s6878_s1 + $0xd28] sm:$0xff]  ;;  %v454_v49 = vld [vmem:[%s6878_s1 + $0xd38] sm:$0xff]  ;;  %v463_v43 = vld [vmem:[%s6878_s1 + $0xd80] sm:$0xff] }
 0x182   :  { %3328 = vmatpush1.bf16.msra.mxu0 %v3327_v55  ;;  %2882 = vmatprep.subr.bf16.mxu1 %v2881_v57  ;;  %v881_v55 = vld [vmem:[%s6878_s1 + $0x1a90] sm:$0xff]  ;;  %v436_v57 = vld [vmem:[%s6878_s1 + $0xca8] sm:$0xff]  ;;  %v911_v33 = vld [vmem:[%s6878_s1 + $0x1b80] sm:$0xff] }
 0x183   :  { %3330 = vmatprep.subr.bf16.mxu0 %v3329_v19  ;;  %v2899_v19 = vpack.c.bf16 %v433_v52, %v431_v51  ;;  %v3347_v61 = vpack.c.bf16 %v881_v55, %v879_v53  ;;  %v2901_v62 = vpack.c.bf16 %v438_v45, %v436_v57  ;;  %v3363_v51 = vpack.c.bf16 %v897_v47, %v895_v42  ;;  %v451_v53 = vld [vmem:[%s6878_s1 + $0xd20] sm:$0xff]  ;;  %v901_v45 = vld [vmem:[%s6878_s1 + $0x1b30] sm:$0xff] }
 0x184   :  { %1586 = vmatmul.mubr.f32.vlgmr.msra.gmra.mrb[0].mxu1 %v1039_v1  ;;  %v437_v1 = vld [vmem:[%s6878_s1 + $0xcb0] sm:$0xff]  ;;  %v2917_v52 = vpack.c.bf16 %v454_v49, %v452_v48  ;;  %v899_v55 = vld [vmem:[%s6878_s1 + $0x1b20] sm:$0xff] }
 0x185   :  { %2884 = vmatpush1.bf16.msra.mxu1 %v2883_v4  ;;  %2083 = vmatmul.mubr.f32.vlgmr.msra.gmra.mrb[0].mxu0 %v1095_v6  ;;  %v885_v4 = vld [vmem:[%s6878_s1 + $0x1ab0] sm:$0xff]  ;;  %v440_v6 = vld [vmem:[%s6878_s1 + $0xcc8] sm:$0xff]  ;;  %v2903_v10 = vpack.c.bf16 %v437_v1, %v435_v63  ;;  %v3367_v63 = vpack.c.bf16 %v901_v45, %v899_v55  ;;  %v2921_v1 = vpack.c.bf16 %v458_v60, %v456_v58  ;;  %v467_v42 = vld [vmem:[%s6878_s1 + $0xda0] sm:$0xff] }
 0x186   :  { %3332 = vmatpush1.bf16.msra.mxu0 %v3331_v31  ;;  %2886 = vmatprep.subr.bf16.mxu1 %v2885_v7  ;;  %v442_v31 = vld [vmem:[%s6878_s1 + $0xcd8] sm:$0xff]  ;;  %v888_v7 = vld [vmem:[%s6878_s1 + $0x1ac8] sm:$0xff]  ;;  %v3351_v12 = vpack.c.bf16 %v885_v4, %v883_v2  ;;  %v455_v2 = vld [vmem:[%s6878_s1 + $0xd40] sm:$0xff] }
 0x187   :  { %3334 = vmatprep.subr.bf16.mxu0 %v3333_v14  ;;  %1656 = vmatprep.mubr.f32.mxu1 %v1051_v21  ;;  %v2905_v14 = vpack.c.bf16 %v442_v31, %v440_v6  ;;  %v3353_v21 = vpack.c.bf16 %v890_v9, %v888_v7  ;;  %v903_v4 = vld [vmem:[%s6878_s1 + $0x1b40] sm:$0xff]  ;;  %v905_v31 = vld [vmem:[%s6878_s1 + $0x1b50] sm:$0xff]  ;;  %v460_v7 = vld [vmem:[%s6878_s1 + $0xd68] sm:$0xff] }
 0x188   :  { %2153 = vmatprep.mubr.f32.mxu0 %v1107_v25  ;;  %v446_v25 = vld [vmem:[%s6878_s1 + $0xcf8] sm:$0xff]  ;;  %v915_v47 = vld [vmem:[%s6878_s1 + $0x1ba0] sm:$0xff]  ;;  %v917_v49 = vld [vmem:[%s6878_s1 + $0x1bb0] sm:$0xff] }
 0x189   :  { %2888 = vmatpush1.bf16.msra.mxu1 %v2887_v26  ;;  %v892_v26 = vld [vmem:[%s6878_s1 + $0x1ae8] sm:$0xff]  ;;  %v2909_v30 = vpack.c.bf16 %v446_v25, %v444_v23  ;;  %v462_v9 = vld [vmem:[%s6878_s1 + $0xd78] sm:$0xff]  ;;  %v909_v25 = vld [vmem:[%s6878_s1 + $0x1b70] sm:$0xff] }
 0x18a   :  { %3336 = vmatpush1.bf16.msra.mxu0 %v3335_v59  ;;  %2890 = vmatprep.subr.bf16.mxu1 %v2889_v28  ;;  %v894_v59 = vld [vmem:[%s6878_s1 + $0x1af8] sm:$0xff]  ;;  %v2907_v28 = vpack.c.bf16 %v441_v17, %v439_v16  ;;  %v3371_v16 = vpack.c.bf16 %v905_v31, %v903_v4  ;;  %v2925_v17 = vpack.c.bf16 %v462_v9, %v460_v7  ;;  %v471_v55 = vld [vmem:[%s6878_s1 + $0xdc0] sm:$0xff]  ;;  %v921_v60 = vld [vmem:[%s6878_s1 + $0x1bd0] sm:$0xff] }
 0x18b   :  { %3338 = vmatprep.subr.bf16.mxu0 %v3337_v27  ;;  %v445_v27 = vld [vmem:[%s6878_s1 + $0xcf0] sm:$0xff]  ;;  %v3357_v32 = vpack.c.bf16 %v894_v59, %v892_v26  ;;  %v464_v26 = vld [vmem:[%s6878_s1 + $0xd88] sm:$0xff]  ;;  %v466_v59 = vld [vmem:[%s6878_s1 + $0xd98] sm:$0xff] }
 0x18c   :  { %v919_v45 = vld [vmem:[%s6878_s1 + $0x1bc0] sm:$0xff]  ;;  %v925_v9 = vld [vmem:[%s6878_s1 + $0x1bf0] sm:$0xff] }
 0x18d   :  { %2892 = vmatpush1.bf16.msra.mxu1 %v2891_v36  ;;  %v896_v36 = vld [vmem:[%s6878_s1 + $0x1b08] sm:$0xff]  ;;  %v475_v4 = vld [vmem:[%s6878_s1 + $0xde0] sm:$0xff] }
 0x18e   :  { %3340 = vmatpush1.bf16.msra.mxu0 %v3339_v37  ;;  %2894 = vmatprep.subr.bf16.mxu1 %v2893_v38  ;;  %v898_v37 = vld [vmem:[%s6878_s1 + $0x1b18] sm:$0xff]  ;;  %v2911_v38 = vpack.c.bf16 %v445_v27, %v443_v11  ;;  %v3375_v11 = vpack.c.bf16 %v909_v25, %v907_v22  ;;  %v2929_v27 = vpack.c.bf16 %v466_v59, %v464_v26  ;;  %v923_v7 = vld [vmem:[%s6878_s1 + $0x1be0] sm:$0xff] }
 0x18f   :  { %3342 = vmatprep.subr.bf16.mxu0 %v3341_v41  ;;  %v449_v41 = vld [vmem:[%s6878_s1 + $0xd10] sm:$0xff]  ;;  %v3361_v46 = vpack.c.bf16 %v898_v37, %v896_v36  ;;  %v468_v36 = vld [vmem:[%s6878_s1 + $0xda8] sm:$0xff]  ;;  %v470_v37 = vld [vmem:[%s6878_s1 + $0xdb8] sm:$0xff]  ;;  %v1047_v22 = vrot.slane %v6084_v0, %v4865_v20 }
 0x190   :  { %v934_v25 = vld [vmem:[%s6878_s1 + $0x1c38] sm:$0xff] }
 0x191   :  { %2896 = vmatpush1.bf16.msra.mxu1 %v2895_v15  ;;  %v900_v15 = vld [vmem:[%s6878_s1 + $0x1b28] sm:$0xff]  ;;  %v6471_v26 = vld [vmem:[%s6877_s0 + $0x18] sm:$0x3f] }
 0x192   :  { %3344 = vmatpush1.bf16.msra.mxu0 %v3343_v5  ;;  %2898 = vmatprep.subr.bf16.mxu1 %v2897_v50  ;;  %v902_v5 = vld [vmem:[%s6878_s1 + $0x1b38] sm:$0xff]  ;;  %v2915_v50 = vpack.c.bf16 %v449_v41, %v447_v40  ;;  %v3379_v40 = vpack.c.bf16 %v913_v35, %v911_v33  ;;  %v2933_v41 = vpack.c.bf16 %v470_v37, %v468_v36  ;;  %v937_v33 = vld [vmem:[%s6878_s1 + $0x1c50] sm:$0xff] }
 0x193   :  { %3346 = vmatprep.subr.bf16.mxu0 %v3345_v54  ;;  %v453_v54 = vld [vmem:[%s6878_s1 + $0xd30] sm:$0xff]  ;;  %v3365_v57 = vpack.c.bf16 %v902_v5, %v900_v15  ;;  %v472_v15 = vld [vmem:[%s6878_s1 + $0xdc8] sm:$0xff]  ;;  %v474_v5 = vld [vmem:[%s6878_s1 + $0xdd8] sm:$0xff]  ;;  %v1103_v59 = vrot.slane %v6471_v26, %v4467_v44  ;;  %v1115_v0 = vrot.slane %v6471_v26, %v4488_v56 }
 0x194   :  { %v936_v44 = vld [vmem:[%s6878_s1 + $0x1c48] sm:$0xff]  ;;  %v938_v56 = vld [vmem:[%s6878_s1 + $0x1c58] sm:$0xff] }
 0x195   :  { %2900 = vmatpush1.bf16.msra.mxu1 %v2899_v19  ;;  %v904_v19 = vld [vmem:[%s6878_s1 + $0x1b48] sm:$0xff]  ;;  %v942_v35 = vld [vmem:[%s6878_s1 + $0x1c78] sm:$0xff] }
 0x196   :  { %3348 = vmatpush1.bf16.msra.mxu0 %v3347_v61  ;;  %2902 = vmatprep.subr.bf16.mxu1 %v2901_v62  ;;  %v906_v61 = vld [vmem:[%s6878_s1 + $0x1b58] sm:$0xff]  ;;  %v2919_v62 = vpack.c.bf16 %v453_v54, %v451_v53  ;;  %v3383_v53 = vpack.c.bf16 %v917_v49, %v915_v47  ;;  %v2937_v54 = vpack.c.bf16 %v474_v5, %v472_v15  ;;  %v945_v47 = vld [vmem:[%s6878_s1 + $0x1c90] sm:$0xff] }
 0x197   :  { %3350 = vmatprep.subr.bf16.mxu0 %v3349_v3  ;;  %v457_v3 = vld [vmem:[%s6878_s1 + $0xd50] sm:$0xff]  ;;  %v3369_v6 = vpack.c.bf16 %v906_v61, %v904_v19  ;;  %v476_v19 = vld [vmem:[%s6878_s1 + $0xde8] sm:$0xff]  ;;  %v478_v61 = vld [vmem:[%s6878_s1 + $0xdf8] sm:$0xff] }
 0x198   :  { %v950_v49 = vld [vmem:[%s6878_s1 + $0x1cb8] sm:$0xff] }
 0x199   :  { %2904 = vmatpush1.bf16.msra.mxu1 %v2903_v10  ;;  %v908_v10 = vld [vmem:[%s6878_s1 + $0x1b68] sm:$0xff] }
 0x19a   :  { %3352 = vmatpush1.bf16.msra.mxu0 %v3351_v12  ;;  %2906 = vmatprep.subr.bf16.mxu1 %v2905_v14  ;;  %v910_v12 = vld [vmem:[%s6878_s1 + $0x1b78] sm:$0xff]  ;;  %v2923_v14 = vpack.c.bf16 %v457_v3, %v455_v2  ;;  %v3387_v2 = vpack.c.bf16 %v921_v60, %v919_v45  ;;  %v2941_v3 = vpack.c.bf16 %v478_v61, %v476_v19  ;;  %v953_v45 = vld [vmem:[%s6878_s1 + $0x1cd0] sm:$0xff] }
 0x19b   :  { %3354 = vmatprep.subr.bf16.mxu0 %v3353_v21  ;;  %v461_v21 = vld [vmem:[%s6878_s1 + $0xd70] sm:$0xff]  ;;  %v3373_v23 = vpack.c.bf16 %v910_v12, %v908_v10  ;;  %v928_v10 = vld [vmem:[%s6878_s1 + $0x1c08] sm:$0xff]  ;;  %v930_v12 = vld [vmem:[%s6878_s1 + $0x1c18] sm:$0xff] }
 0x19c   :  { %v958_v60 = vld [vmem:[%s6878_s1 + $0x1cf8] sm:$0xff] }
 0x19d   :  { %2908 = vmatpush1.bf16.msra.mxu1 %v2907_v28  ;;  %v912_v28 = vld [vmem:[%s6878_s1 + $0x1b88] sm:$0xff] }
 0x19e   :  { %3356 = vmatpush1.bf16.msra.mxu0 %v3355_v29  ;;  %2910 = vmatprep.subr.bf16.mxu1 %v2909_v30  ;;  %v914_v29 = vld [vmem:[%s6878_s1 + $0x1b98] sm:$0xff]  ;;  %v2927_v30 = vpack.c.bf16 %v461_v21, %v459_v18  ;;  %v927_v18 = vld [vmem:[%s6878_s1 + $0x1c00] sm:$0xff]  ;;  %v929_v21 = vld [vmem:[%s6878_s1 + $0x1c10] sm:$0xff] }
 0x19f   :  { %3358 = vmatprep.subr.bf16.mxu0 %v3357_v32  ;;  %v465_v32 = vld [vmem:[%s6878_s1 + $0xd90] sm:$0xff]  ;;  %v3377_v34 = vpack.c.bf16 %v914_v29, %v912_v28  ;;  %v3395_v28 = vpack.c.bf16 %v929_v21, %v927_v18  ;;  %v970_v18 = vld [vmem:[%s6878_s1 + $0x1d58] sm:$0xff] }
 0x1a1   :  { %2912 = vmatpush1.bf16.msra.mxu1 %v2911_v38  ;;  %v916_v38 = vld [vmem:[%s6878_s1 + $0x1ba8] sm:$0xff] }
 0x1a2   :  { %3360 = vmatpush1.bf16.msra.mxu0 %v3359_v24  ;;  %2914 = vmatprep.subr.bf16.mxu1 %v2913_v39  ;;  %v918_v24 = vld [vmem:[%s6878_s1 + $0x1bb8] sm:$0xff]  ;;  %v2931_v39 = vpack.c.bf16 %v465_v32, %v463_v43  ;;  %v3401_v43 = vpack.c.bf16 %v938_v56, %v936_v44  ;;  %v935_v32 = vld [vmem:[%s6878_s1 + $0x1c40] sm:$0xff]  ;;  %v976_v44 = vld [vmem:[%s6878_s1 + $0x1d88] sm:$0xff] }
 0x1a3   :  { %3362 = vmatprep.subr.bf16.mxu0 %v3361_v46  ;;  %v469_v46 = vld [vmem:[%s6878_s1 + $0xdb0] sm:$0xff]  ;;  %v3381_v48 = vpack.c.bf16 %v918_v24, %v916_v38  ;;  %v3403_v36 = vpack.c.bf16 %v937_v33, %v935_v32  ;;  %v939_v38 = vld [vmem:[%s6878_s1 + $0x1c60] sm:$0xff]  ;;  %v978_v56 = vld [vmem:[%s6878_s1 + $0x1d98] sm:$0xff] }
 0x1a4   :  { %v941_v24 = vld [vmem:[%s6878_s1 + $0x1c70] sm:$0xff]  ;;  %v975_v32 = vld [vmem:[%s6878_s1 + $0x1d80] sm:$0xff] }
 0x1a5   :  { %2916 = vmatpush1.bf16.msra.mxu1 %v2915_v50  ;;  %v920_v50 = vld [vmem:[%s6878_s1 + $0x1bc8] sm:$0xff]  ;;  %v977_v33 = vld [vmem:[%s6878_s1 + $0x1d90] sm:$0xff] }
 0x1a6   :  { %3364 = vmatpush1.bf16.msra.mxu0 %v3363_v51  ;;  %2918 = vmatprep.subr.bf16.mxu1 %v2917_v52  ;;  %v922_v51 = vld [vmem:[%s6878_s1 + $0x1bd8] sm:$0xff]  ;;  %v2935_v52 = vpack.c.bf16 %v469_v46, %v467_v42  ;;  %v943_v46 = vld [vmem:[%s6878_s1 + $0x1c80] sm:$0xff] }
 0x1a7   :  { %3366 = vmatprep.subr.bf16.mxu0 %v3365_v57  ;;  %v473_v57 = vld [vmem:[%s6878_s1 + $0xdd0] sm:$0xff]  ;;  %v3385_v58 = vpack.c.bf16 %v922_v51, %v920_v50  ;;  %v3411_v15 = vpack.c.bf16 %v945_v47, %v943_v46  ;;  %v947_v50 = vld [vmem:[%s6878_s1 + $0x1ca0] sm:$0xff] }
 0x1a8   :  { %v949_v51 = vld [vmem:[%s6878_s1 + $0x1cb0] sm:$0xff]  ;;  %v983_v46 = vld [vmem:[%s6878_s1 + $0x1dc0] sm:$0xff] }
 0x1a9   :  { %2920 = vmatpush1.bf16.msra.mxu1 %v2919_v62  ;;  %v924_v62 = vld [vmem:[%s6878_s1 + $0x1be8] sm:$0xff]  ;;  %v985_v47 = vld [vmem:[%s6878_s1 + $0x1dd0] sm:$0xff] }
 0x1aa   :  { %3368 = vmatpush1.bf16.msra.mxu0 %v3367_v63  ;;  %2922 = vmatprep.subr.bf16.mxu1 %v2921_v1  ;;  %v926_v63 = vld [vmem:[%s6878_s1 + $0x1bf8] sm:$0xff]  ;;  %v2939_v1 = vpack.c.bf16 %v473_v57, %v471_v55  ;;  %v951_v57 = vld [vmem:[%s6878_s1 + $0x1cc0] sm:$0xff] }
 0x1ab   :  { %3370 = vmatprep.subr.bf16.mxu0 %v3369_v6  ;;  %v477_v6 = vld [vmem:[%s6878_s1 + $0xdf0] sm:$0xff]  ;;  %v3389_v31 = vpack.c.bf16 %v926_v63, %v924_v62  ;;  %v3419_v19 = vpack.c.bf16 %v953_v45, %v951_v57  ;;  %v955_v62 = vld [vmem:[%s6878_s1 + $0x1ce0] sm:$0xff] }
 0x1ac   :  { %v957_v63 = vld [vmem:[%s6878_s1 + $0x1cf0] sm:$0xff]  ;;  %v2231_v57 = vld [vmem:[%s6880_s3] sm:$0xff] }
 0x1ad   :  { %2924 = vmatpush1.bf16.msra.mxu1 %v2923_v14  ;;  %v2943_v14 = vpack.c.bf16 %v477_v6, %v475_v4  ;;  %v959_v6 = vld [vmem:[%s6878_s1 + $0x1d00] sm:$0xff] }
 0x1ae   :  { %3372 = vmatpush1.bf16.msra.mxu0 %v3371_v16  ;;  %2926 = vmatprep.subr.bf16.mxu1 %v2925_v17  ;;  %v3391_v16 = vpack.c.bf16 %v925_v9, %v923_v7  ;;  %v3393_v17 = vpack.c.bf16 %v930_v12, %v928_v10  ;;  %v964_v7 = vld [vmem:[%s6878_s1 + $0x1d28] sm:$0xff]  ;;  %v966_v9 = vld [vmem:[%s6878_s1 + $0x1d38] sm:$0xff] }
 0x1af   :  { %3374 = vmatprep.subr.bf16.mxu0 %v3373_v23  ;;  %v932_v23 = vld [vmem:[%s6878_s1 + $0x1c28] sm:$0xff]  ;;  %v3429_v12 = vpack.c.bf16 %v966_v9, %v964_v7  ;;  %v2246_v7 = vld [vmem:[%s6880_s3 + $0x78] sm:$0xff] }
 0x1b0   :  { %v3397_v29 = vpack.c.bf16 %v934_v25, %v932_v23  ;;  %v967_v23 = vld [vmem:[%s6878_s1 + $0x1d40] sm:$0xff]  ;;  %v969_v25 = vld [vmem:[%s6878_s1 + $0x1d50] sm:$0xff] }
 0x1b1   :  { %2928 = vmatpush1.bf16.msra.mxu1 %v2927_v30  ;;  %v931_v30 = vld [vmem:[%s6878_s1 + $0x1c20] sm:$0xff] }
 0x1b2   :  { %3376 = vmatpush1.bf16.msra.mxu0 %v3375_v11  ;;  %2930 = vmatprep.subr.bf16.mxu1 %v2929_v27  ;;  %v933_v11 = vld [vmem:[%s6878_s1 + $0x1c30] sm:$0xff] }
 0x1b3   :  { %3378 = vmatprep.subr.bf16.mxu0 %v3377_v34  ;;  %v3399_v27 = vpack.c.bf16 %v933_v11, %v931_v30  ;;  %v940_v34 = vld [vmem:[%s6878_s1 + $0x1c68] sm:$0xff]  ;;  %v971_v30 = vld [vmem:[%s6878_s1 + $0x1d60] sm:$0xff]  ;;  %v973_v11 = vld [vmem:[%s6878_s1 + $0x1d70] sm:$0xff] }
 0x1b4   :  { %v3405_v37 = vpack.c.bf16 %v942_v35, %v940_v34  ;;  %v980_v34 = vld [vmem:[%s6878_s1 + $0x1da8] sm:$0xff]  ;;  %v982_v35 = vld [vmem:[%s6878_s1 + $0x1db8] sm:$0xff] }
 0x1b5   :  { %2932 = vmatpush1.bf16.msra.mxu1 %v2931_v39  ;;  %v944_v39 = vld [vmem:[%s6878_s1 + $0x1c88] sm:$0xff] }
 0x1b6   :  { %3380 = vmatpush1.bf16.msra.mxu0 %v3379_v40  ;;  %2934 = vmatprep.subr.bf16.mxu1 %v2933_v41  ;;  %v946_v40 = vld [vmem:[%s6878_s1 + $0x1c98] sm:$0xff]  ;;  %v3407_v41 = vpack.c.bf16 %v941_v24, %v939_v38  ;;  %v979_v38 = vld [vmem:[%s6878_s1 + $0x1da0] sm:$0xff]  ;;  %v981_v24 = vld [vmem:[%s6878_s1 + $0x1db0] sm:$0xff] }
 0x1b7   :  { %3382 = vmatprep.subr.bf16.mxu0 %v3381_v48  ;;  %v3409_v42 = vpack.c.bf16 %v946_v40, %v944_v39  ;;  %v948_v48 = vld [vmem:[%s6878_s1 + $0x1ca8] sm:$0xff]  ;;  %v986_v40 = vld [vmem:[%s6878_s1 + $0x1dd8] sm:$0xff] }
 0x1b8   :  { %v3413_v5 = vpack.c.bf16 %v950_v49, %v948_v48  ;;  %v984_v39 = vld [vmem:[%s6878_s1 + $0x1dc8] sm:$0xff]  ;;  %v990_v49 = vld [vmem:[%s6878_s1 + $0x1df8] sm:$0x3] }
 0x1b9   :  { %2936 = vmatpush1.bf16.msra.mxu1 %v2935_v52  ;;  %v952_v52 = vld [vmem:[%s6878_s1 + $0x1cc8] sm:$0xff] }
 0x1ba   :  { %3384 = vmatpush1.bf16.msra.mxu0 %v3383_v53  ;;  %2938 = vmatprep.subr.bf16.mxu1 %v2937_v54  ;;  %v954_v53 = vld [vmem:[%s6878_s1 + $0x1cd8] sm:$0xff]  ;;  %v3415_v54 = vpack.c.bf16 %v949_v51, %v947_v50  ;;  %v988_v48 = vld [vmem:[%s6878_s1 + $0x1de8] sm:$0xff]  ;;  %v987_v50 = vld [vmem:[%s6878_s1 + $0x1de0] sm:$0xff] }
 0x1bb   :  { %3386 = vmatprep.subr.bf16.mxu0 %v3385_v58  ;;  %v3417_v55 = vpack.c.bf16 %v954_v53, %v952_v52  ;;  %v956_v58 = vld [vmem:[%s6878_s1 + $0x1ce8] sm:$0xff]  ;;  %v989_v51 = vld [vmem:[%s6878_s1 + $0x1df0] sm:$0x3]  ;;  %v1111_v53 = vrot.slane %v6471_v26, %v4865_v20  ;;  %v2238_v26 = vld [vmem:[%s6880_s3 + $0x38] sm:$0xff] }
 0x1bc   :  { %v3421_v61 = vpack.c.bf16 %v958_v60, %v956_v58  ;;  %v3456_v52 = vpack.c.bf16 %v989_v51, %v987_v50  ;;  %v2233_v58 = vld [vmem:[%s6880_s3 + $0x10] sm:$0xff]  ;;  %v2236_v20 = vld [vmem:[%s6880_s3 + $0x28] sm:$0xff] }
 0x1bd   :  { %2940 = vmatpush1.bf16.msra.mxu1 %v2939_v1  ;;  %v960_v1 = vld [vmem:[%s6878_s1 + $0x1d08] sm:$0xff]  ;;  %v3461_v60 = vpack.c.bf16 %v2233_v58, %v2231_v57 }
 0x1be   :  { %3388 = vmatpush1.bf16.msra.mxu0 %v3387_v2  ;;  %2942 = vmatprep.subr.bf16.mxu1 %v2941_v3  ;;  %v962_v2 = vld [vmem:[%s6878_s1 + $0x1d18] sm:$0xff]  ;;  %v3423_v3 = vpack.c.bf16 %v957_v63, %v955_v62  ;;  %v2237_v62 = vld [vmem:[%s6880_s3 + $0x30] sm:$0xff]  ;;  %v2240_v63 = vld [vmem:[%s6880_s3 + $0x48] sm:$0xff] }
 0x1bf   :  { %3390 = vmatprep.subr.bf16.mxu0 %v3389_v31  ;;  %v3425_v4 = vpack.c.bf16 %v962_v2, %v960_v1  ;;  %v961_v31 = vld [vmem:[%s6878_s1 + $0x1d10] sm:$0xff]  ;;  %v2242_v1 = vld [vmem:[%s6880_s3 + $0x58] sm:$0xff] }
 0x1c0   :  { %v3427_v10 = vpack.c.bf16 %v961_v31, %v959_v6  ;;  %v2241_v6 = vld [vmem:[%s6880_s3 + $0x50] sm:$0xff]  ;;  %v2244_v31 = vld [vmem:[%s6880_s3 + $0x68] sm:$0xff] }
 0x1c1   :  { %2944 = vmatpush1.bf16.msra.mxu1 %v2943_v14  ;;  %v963_v14 = vld [vmem:[%s6878_s1 + $0x1d20] sm:$0xff] }
 0x1c2   :  { %3392 = vmatpush1.bf16.msra.mxu0 %v3391_v16  ;;  %v965_v16 = vld [vmem:[%s6878_s1 + $0x1d30] sm:$0xff] }
 0x1c3   :  { %3394 = vmatprep.subr.bf16.mxu0 %v3393_v17  ;;  %v968_v17 = vld [vmem:[%s6878_s1 + $0x1d48] sm:$0xff]  ;;  %v3431_v21 = vpack.c.bf16 %v965_v16, %v963_v14  ;;  %v2245_v14 = vld [vmem:[%s6880_s3 + $0x70] sm:$0xff] }
 0x1c4   :  { %1657 = vmatmul.mubr.f32.vlgmr.msra.gmra.mrb[0].mxu1 %v1047_v22  ;;  %v3433_v22 = vpack.c.bf16 %v970_v18, %v968_v17  ;;  %v2248_v16 = vld [vmem:[%s6880_s3 + $0x88] sm:$0xff]  ;;  %v2250_v17 = vld [vmem:[%s6880_s3 + $0x98] sm:$0xff] }
 0x1c5   :  { %2154 = vmatmul.mubr.f32.vlgmr.msra.gmra.mrb[0].mxu0 %v1103_v59  ;;  %v972_v59 = vld [vmem:[%s6878_s1 + $0x1d68] sm:$0xff] }
 0x1c6   :  { %3396 = vmatpush1.bf16.msra.mxu0 %v3395_v28  ;;  %2491 = vmatprep.mubr.msk.f32.mxu0 %vm1156_vm0, %v1115_v0  ;;  %v974_v28 = vld [vmem:[%s6878_s1 + $0x1d78] sm:$0xff]  ;;  %v3435_v0 = vpack.c.bf16 %v969_v25, %v967_v23  ;;  %v2249_v23 = vld [vmem:[%s6880_s3 + $0x90] sm:$0xff]  ;;  %v2252_v25 = vld [vmem:[%s6880_s3 + $0xa8] sm:$0xff] }
 0x1c7   :  { %3398 = vmatprep.subr.bf16.mxu0 %v3397_v29  ;;  %v3437_v29 = vpack.c.bf16 %v974_v28, %v972_v59  ;;  %v2254_v59 = vld [vmem:[%s6880_s3 + $0xb8] sm:$0xff] }
 0x1ca   :  { %3400 = vmatpush1.bf16.msra.mxu0 %v3399_v27  ;;  %v3439_v27 = vpack.c.bf16 %v973_v11, %v971_v30  ;;  %v2253_v30 = vld [vmem:[%s6880_s3 + $0xb0] sm:$0xff]  ;;  %v2256_v11 = vld [vmem:[%s6880_s3 + $0xc8] sm:$0xff] }
 0x1cb   :  { %3402 = vmatprep.subr.bf16.mxu0 %v3401_v43  ;;  %v3441_v43 = vpack.c.bf16 %v978_v56, %v976_v44  ;;  %v2258_v44 = vld [vmem:[%s6880_s3 + $0xd8] sm:$0xff] }
 0x1ce   :  { %3404 = vmatpush1.bf16.msra.mxu0 %v3403_v36  ;;  %v3443_v36 = vpack.c.bf16 %v977_v33, %v975_v32  ;;  %v2257_v32 = vld [vmem:[%s6880_s3 + $0xd0] sm:$0xff]  ;;  %v2260_v33 = vld [vmem:[%s6880_s3 + $0xe8] sm:$0xff] }
 0x1cf   :  { %3406 = vmatprep.subr.bf16.mxu0 %v3405_v37  ;;  %v3445_v37 = vpack.c.bf16 %v982_v35, %v980_v34  ;;  %v2262_v34 = vld [vmem:[%s6880_s3 + $0xf8] sm:$0xff] }
 0x1d2   :  { %3408 = vmatpush1.bf16.msra.mxu0 %v3407_v41  ;;  %v3447_v41 = vpack.c.bf16 %v981_v24, %v979_v38  ;;  %v2261_v38 = vld [vmem:[%s6880_s3 + $0xf0] sm:$0xff] }
 0x1d3   :  { %3410 = vmatprep.subr.bf16.mxu0 %v3409_v42  ;;  %v3449_v42 = vpack.c.bf16 %v986_v40, %v984_v39  ;;  %v2264_v39 = vld [vmem:[%s6880_s3 + $0x108] sm:$0xff]  ;;  %v2266_v40 = vld [vmem:[%s6880_s3 + $0x118] sm:$0xf] }
 0x1d6   :  { %3412 = vmatpush1.bf16.msra.mxu0 %v3411_v15  ;;  %v3451_v15 = vpack.c.bf16 %v985_v47, %v983_v46  ;;  %v2265_v46 = vld [vmem:[%s6880_s3 + $0x110] sm:$0xf] }
 0x1d7   :  { %3414 = vmatprep.subr.bf16.mxu0 %v3413_v5  ;;  %v3453_v5 = vpack.c.bf16 %v990_v49, %v988_v48  ;;  %v3599_v48 = vmov 0.0|0.0  }
 0x1da   :  { %3416 = vmatpush1.bf16.msra.mxu0 %v3415_v54  ;;  %v2232_v54 = vld [vmem:[%s6880_s3 + $0x8] sm:$0xff] }
 0x1db   :  { %3418 = vmatprep.subr.bf16.mxu0 %v3417_v55  ;;  %v2234_v55 = vld [vmem:[%s6880_s3 + $0x18] sm:$0xff] }
 0x1dc   :  { %v3459_v45 = vpack.c.bf16 %v2234_v55, %v2232_v54  ;;  %v2362_v54 = vld [vmem:[%s6882_s5 + $0x8] sm:$0xff] }
 0x1de   :  { %3420 = vmatpush1.bf16.msra.mxu0 %v3419_v19  ;;  %v3463_v19 = vpack.c.bf16 %v2238_v26, %v2236_v20  ;;  %3460 = vmatprep.subr.bf16.mxu1 %v3459_v45 }
 0x1df   :  { %3422 = vmatprep.subr.bf16.mxu0 %v3421_v61  ;;  %v2235_v61 = vld [vmem:[%s6880_s3 + $0x20] sm:$0xff]  ;;  %3462 = vmatpush1.bf16.msra.mxu1 %v3461_v60  ;;  %v2363_v60 = vld [vmem:[%s6882_s5 + $0x10] sm:$0xff] }
 0x1e0   :  { %v3465_v2 = vpack.c.bf16 %v2237_v62, %v2235_v61  ;;  %3464 = vmatprep.subr.bf16.mxu1 %v3463_v19  ;;  %v2364_v19 = vld [vmem:[%s6882_s5 + $0x18] sm:$0xff]  ;;  %v2365_v62 = vld [vmem:[%s6882_s5 + $0x20] sm:$0xff] }
 0x1e1   :  { %v3501_v61 = vpack.c.bf16 %v2364_v19, %v2363_v60 }
 0x1e2   :  { %3424 = vmatpush1.bf16.msra.mxu0 %v3423_v3  ;;  %v3467_v3 = vpack.c.bf16 %v2242_v1, %v2240_v63  ;;  %v2366_v63 = vld [vmem:[%s6882_s5 + $0x28] sm:$0xff] }
 0x1e3   :  { %3426 = vmatprep.subr.bf16.mxu0 %v3425_v4  ;;  %v2239_v4 = vld [vmem:[%s6880_s3 + $0x40] sm:$0xff]  ;;  %3466 = vmatpush1.bf16.msra.mxu1 %v3465_v2  ;;  %v3504_v1 = vpack.c.bf16 %v2366_v63, %v2365_v62  ;;  %v2367_v2 = vld [vmem:[%s6882_s5 + $0x30] sm:$0xff] }
 0x1e4   :  { %v3469_v9 = vpack.c.bf16 %v2241_v6, %v2239_v4  ;;  %3468 = vmatprep.subr.bf16.mxu1 %v3467_v3  ;;  %v2368_v3 = vld [vmem:[%s6882_s5 + $0x38] sm:$0xff]  ;;  %v2369_v6 = vld [vmem:[%s6882_s5 + $0x40] sm:$0xff] }
 0x1e5   :  { %v3507_v4 = vpack.c.bf16 %v2368_v3, %v2367_v2 }
 0x1e6   :  { %3428 = vmatpush1.bf16.msra.mxu0 %v3427_v10  ;;  %v3471_v10 = vpack.c.bf16 %v2246_v7, %v2244_v31  ;;  %v2370_v31 = vld [vmem:[%s6882_s5 + $0x48] sm:$0xff] }
 0x1e7   :  { %3430 = vmatprep.subr.bf16.mxu0 %v3429_v12  ;;  %v2243_v12 = vld [vmem:[%s6880_s3 + $0x60] sm:$0xff]  ;;  %3470 = vmatpush1.bf16.msra.mxu1 %v3469_v9  ;;  %v3510_v7 = vpack.c.bf16 %v2370_v31, %v2369_v6  ;;  %v2371_v9 = vld [vmem:[%s6882_s5 + $0x50] sm:$0xff] }
 0x1e8   :  { %v3473_v18 = vpack.c.bf16 %v2245_v14, %v2243_v12  ;;  %3472 = vmatprep.subr.bf16.mxu1 %v3471_v10  ;;  %v2372_v10 = vld [vmem:[%s6882_s5 + $0x58] sm:$0xff]  ;;  %v2373_v14 = vld [vmem:[%s6882_s5 + $0x60] sm:$0xff] }
 0x1e9   :  { %v3513_v12 = vpack.c.bf16 %v2372_v10, %v2371_v9 }
 0x1ea   :  { %3432 = vmatpush1.bf16.msra.mxu0 %v3431_v21  ;;  %v3475_v21 = vpack.c.bf16 %v2250_v17, %v2248_v16  ;;  %v2374_v16 = vld [vmem:[%s6882_s5 + $0x68] sm:$0xff] }
 0x1eb   :  { %3434 = vmatprep.subr.bf16.mxu0 %v3433_v22  ;;  %v2247_v22 = vld [vmem:[%s6880_s3 + $0x80] sm:$0xff]  ;;  %3474 = vmatpush1.bf16.msra.mxu1 %v3473_v18  ;;  %v3516_v17 = vpack.c.bf16 %v2374_v16, %v2373_v14  ;;  %v2375_v18 = vld [vmem:[%s6882_s5 + $0x70] sm:$0xff] }
 0x1ec   :  { %v3477_v28 = vpack.c.bf16 %v2249_v23, %v2247_v22  ;;  %3476 = vmatprep.subr.bf16.mxu1 %v3475_v21  ;;  %v2376_v21 = vld [vmem:[%s6882_s5 + $0x78] sm:$0xff]  ;;  %v2377_v23 = vld [vmem:[%s6882_s5 + $0x80] sm:$0xff] }
 0x1ed   :  { %v3519_v22 = vpack.c.bf16 %v2376_v21, %v2375_v18 }
 0x1ee   :  { %3436 = vmatpush1.bf16.msra.mxu0 %v3435_v0  ;;  %v3479_v0 = vpack.c.bf16 %v2254_v59, %v2252_v25  ;;  %v2378_v25 = vld [vmem:[%s6882_s5 + $0x88] sm:$0xff] }
 0x1ef   :  { %3438 = vmatprep.subr.bf16.mxu0 %v3437_v29  ;;  %v2251_v29 = vld [vmem:[%s6880_s3 + $0xa0] sm:$0xff]  ;;  %3478 = vmatpush1.bf16.msra.mxu1 %v3477_v28  ;;  %v3522_v59 = vpack.c.bf16 %v2378_v25, %v2377_v23  ;;  %v2379_v28 = vld [vmem:[%s6882_s5 + $0x90] sm:$0xff] }
 0x1f0   :  { %v3481_v56 = vpack.c.bf16 %v2253_v30, %v2251_v29  ;;  %3480 = vmatprep.subr.bf16.mxu1 %v3479_v0  ;;  %v2380_v0 = vld [vmem:[%s6882_s5 + $0x98] sm:$0xff]  ;;  %v2381_v30 = vld [vmem:[%s6882_s5 + $0xa0] sm:$0xff] }
 0x1f1   :  { %v3525_v29 = vpack.c.bf16 %v2380_v0, %v2379_v28 }
 0x1f2   :  { %3440 = vmatpush1.bf16.msra.mxu0 %v3439_v27  ;;  %v3483_v27 = vpack.c.bf16 %v2258_v44, %v2256_v11  ;;  %v2382_v11 = vld [vmem:[%s6882_s5 + $0xa8] sm:$0xff] }
 0x1f3   :  { %3442 = vmatprep.subr.bf16.mxu0 %v3441_v43  ;;  %v2255_v43 = vld [vmem:[%s6880_s3 + $0xc0] sm:$0xff]  ;;  %3482 = vmatpush1.bf16.msra.mxu1 %v3481_v56  ;;  %v3528_v44 = vpack.c.bf16 %v2382_v11, %v2381_v30  ;;  %v2383_v56 = vld [vmem:[%s6882_s5 + $0xb0] sm:$0xff] }
 0x1f4   :  { %v3485_v35 = vpack.c.bf16 %v2257_v32, %v2255_v43  ;;  %3484 = vmatprep.subr.bf16.mxu1 %v3483_v27  ;;  %v2384_v27 = vld [vmem:[%s6882_s5 + $0xb8] sm:$0xff]  ;;  %v2385_v32 = vld [vmem:[%s6882_s5 + $0xc0] sm:$0xf] }
 0x1f5   :  { %v3531_v43 = vpack.c.bf16 %v2384_v27, %v2383_v56 }
 0x1f6   :  { %3444 = vmatpush1.bf16.msra.mxu0 %v3443_v36  ;;  %v3487_v36 = vpack.c.bf16 %v2262_v34, %v2260_v33  ;;  %v3600_v33 = vmov 0.0   ;;  %v2267_v34 = vld [vmem:[%s6881_s4] sm:$0x3]  ;;  %s3601_s4 = smov [#allocation2]  }
 0x1f7   :  { %3446 = vmatprep.subr.bf16.mxu0 %v3445_v37  ;;  %v2259_v37 = vld [vmem:[%s6880_s3 + $0xe0] sm:$0xff]  ;;  %3486 = vmatpush1.bf16.msra.mxu1 %v3485_v35  ;;  %v2276_v35 = vrot.slane %v2267_v34, %v3921_v8  ;;  %s2481_s23 = sshll.u32 %s3601_s4, 4  ;;  %s2482_s23 = int_to_ptr.vmem [resolvable:$true] %s2481_s23 }
 0x1f8   :  { %v3489_v24 = vpack.c.bf16 %v2261_v38, %v2259_v37  ;;  %3488 = vmatprep.subr.bf16.mxu1 %v3487_v36  ;;  %v2272_v36 = vrot.slane %v2267_v34, %v4061_v13  ;;  %p3579_p1 = scmp.lt.s32.totalorder %s2482_s23, %s2482_s23 }
 0x1fa   :  { %3448 = vmatpush1.bf16.msra.mxu0 %v3447_v41  ;;  %v3491_v41 = vpack.c.bf16 %v2266_v40, %v2264_v39  ;;  %v2386_v40 = vld [vmem:[%s6883_s6] sm:$0x1]  ;;  %s3578_s6 = scalar_lea.vmem %s2482_s23, 32 }
 0x1fb   :  { %3450 = vmatprep.subr.bf16.mxu0 %v3449_v42  ;;  %3490 = vmatpush1.bf16.msra.mxu1 %v3489_v24  ;;  %v2263_v42 = vld [vmem:[%s6880_s3 + $0x100] sm:$0xff]  ;;  %s3574_s3 = scalar_lea.vmem %s2482_s23, 16 }
 0x1fc   :  { %v3494_v47 = vpack.c.bf16 %v2265_v46, %v2263_v42  ;;  %3493 = vmatprep.subr.msk.bf16.mxu1 %vm3492_vm5, %v3491_v41  ;;  %p3575_p0 = scmp.ne.s32.totalorder %s2482_s23, %s3574_s3  ;;  %p3580_p2 = scmp.lt.s32.totalorder %s3578_s6, %s3574_s3 }
 0x1fe   :  { %3452 = vmatpush1.bf16.msra.mxu0 %v3451_v15  ;;  %p3581_p3 = por %p3580_p2, %p3579_p1 }
 0x1ff   :  { %3455 = vmatprep.subr.msk.bf16.mxu0 %vm3454_vm3, %v3453_v5  ;;  %3496 = vmatpush1.bf16.msk.msra.mxu1 %vm3492_vm5, %v3494_v47  ;;  %v991_v5 = vld [vmem:[%s6879_s2] sm:$0x3] }
 0x200   :  { %3497 = vmatprep.subr.bf16.mxu1 %v3599_v48  ;;  %v1149_v50 = vrot.slane %v991_v5, %v4061_v13  ;;  %v1153_v51 = vrot.slane %v991_v5, %v3921_v8  ;;  %p3582_p4 = pnand %p3581_p3, %p3575_p0 }
 0x202   :  { %3458 = vmatpush1.bf16.msk.msra.mxu0 %vm3454_vm3, %v3456_v52 }
 0x205   :  { %2225 = vmatmul.mubr.f32.vlgmr.msra.gmra.mrb[0].mxu0 %v1111_v53  ;;  %v2361_v53 = vld [vmem:[%s6882_s5] sm:$0xff] }
 0x206   :  { %v3498_v26 = vpack.c.bf16 %v2362_v54, %v2361_v53 }
 0x297   :  { %v1658_v49 = vpop.f32.mrb[0].mxu1 }
 0x298   :  { %v1660_v15 = vpop.f32.mrb[1].mxu1  ;;  %v3533_v52 = vadd.f32 %v1658_v49, %v1149_v50 }
 0x299   :  { %v3535_v55 = vadd.f32 %v1660_v15, %v1153_v51 }
 0x2d8   :  { %v2226_v57 = vpop.f32.mrb[0].mxu0 }
 0x2d9   :  { %v3534_v45 = vadd.f32 %v3533_v52, %v2226_v57  ;;  %v2228_v58 = vpop.f32.mrb[1].mxu0 }
 0x2da   :  { %v3536_v20 = vadd.f32 %v3535_v55, %v2228_v58 }
 0x2dc   :  { %2494 = vmatprep.mubr.msk.f32.mxu1 %vm2279_vm6, %v3536_v20 }
 0x2dd   :  { %2355 = vmatmul.mubr.f32.vlgmr.msra.gmra.mrb[2].mxu1 %v3534_v45 }
 0x2de   :  { %3499 = vmatpush1.bf16.msra.mxu1 %v3498_v26 }
 0x2df   :  { %3500 = vmatprep.subr.bf16.mxu1 %v3599_v48 }
 0x2e2   :  { %3502 = vmatpush1.bf16.msra.mxu1 %v3501_v61 }
 0x2e3   :  { %3503 = vmatprep.subr.bf16.mxu1 %v3599_v48 }
 0x2e6   :  { %3505 = vmatpush1.bf16.msra.mxu1 %v3504_v1 }
 0x2e7   :  { %3506 = vmatprep.subr.bf16.mxu1 %v3599_v48 }
 0x2ea   :  { %3508 = vmatpush1.bf16.msra.mxu1 %v3507_v4 }
 0x2eb   :  { %3509 = vmatprep.subr.bf16.mxu1 %v3599_v48 }
 0x2ee   :  { %3511 = vmatpush1.bf16.msra.mxu1 %v3510_v7 }
 0x2ef   :  { %3512 = vmatprep.subr.bf16.mxu1 %v3599_v48 }
 0x2f2   :  { %3514 = vmatpush1.bf16.msra.mxu1 %v3513_v12 }
 0x2f3   :  { %3515 = vmatprep.subr.bf16.mxu1 %v3599_v48 }
 0x2f6   :  { %3517 = vmatpush1.bf16.msra.mxu1 %v3516_v17 }
 0x2f7   :  { %3518 = vmatprep.subr.bf16.mxu1 %v3599_v48 }
 0x2fa   :  { %3520 = vmatpush1.bf16.msra.mxu1 %v3519_v22 }
 0x2fb   :  { %3521 = vmatprep.subr.bf16.mxu1 %v3599_v48 }
 0x2fe   :  { %3523 = vmatpush1.bf16.msra.mxu1 %v3522_v59 }
 0x2ff   :  { %3524 = vmatprep.subr.bf16.mxu1 %v3599_v48 }
 0x302   :  { %3526 = vmatpush1.bf16.msra.mxu1 %v3525_v29 }
 0x303   :  { %3527 = vmatprep.subr.bf16.mxu1 %v3599_v48 }
 0x306   :  { %3529 = vmatpush1.bf16.msra.mxu1 %v3528_v44 }
 0x307   :  { %3530 = vmatprep.subr.bf16.mxu1 %v3599_v48 }
 0x30a   :  { %3532 = vmatpush1.bf16.msra.mxu1 %v3531_v43 }
 0x30b   :  { %2442 = vmatprep.subr.mxu1 %v3600_v33 }
 0x30e   :  { %2495 = vmatpush1.msk.msra.mxu1 %vm2283_vm4, %v2385_v32 }
 0x3b0   :  { %v2356_v37 = vpop.f32.mrb[2].mxu1 }
 0x3b1   :  { %v2358_v38 = vpop.f32.mrb[3].mxu1  ;;  %v2357_v39 = vadd.f32 %v2356_v37, %v2272_v36 }
 0x3b2   :  { %v2359_v24 = vadd.f32 %v2358_v38, %v2276_v35 }
 0x3b4   :  { %2496 = vmatprep.mubr.msk.f32.mxu1 %vm2387_vm7, %v2359_v24 }
 0x3b5   :  { %2459 = vmatmul.mubr.f32.vlgmr.msra.gmra.mrb[4].mxu1 %v2357_v39 }
 0x488   :  { %v2460_v41 = vpop.f32.mrb[4].mxu1 }
 0x489   :  { %v2461_v42 = vadd.f32 %v2460_v41, %v2386_v40  ;;  %v2462_v46 = vpop.f32.mrb[5].mxu1 }
 0x48b   :  { %v2465_v47 = vmul.f32 %v2461_v42, %v2461_v42  ;;  %v2464_v5 = vmul.f32 0.5, %v2461_v42 }
 0x48d   :  { %v2466_v48 = vmul.f32 %v2465_v47, %v2461_v42 }
 0x48f   :  { %v2467_v49 = vmul.f32 0.044715, %v2466_v48 }
 0x491   :  { %v2468_v8 = vadd.f32 %v2467_v49, %v2461_v42 }
 0x493   :  { %v2469_v15 = vmul.f32 0.7978846, %v2468_v8 }
 0x495   :  { %3567 = vtanh.f32 %v2469_v15 }
 0x49f   :  { %v3568_v13 = vpop.eup %3567 }
 0x4a0   :  { %v2471_v50 = vadd.f32 1.0, %v3568_v13 }
 0x4a2   :  { %v2472_v51 = vmul.f32 %v2471_v50, %v2464_v5 }
 0x4a4   :  { %2474 = vst.msk [vmem:[#allocation2] sm:$0x1] %vm2473_vm8, %v2472_v51 }
 0x4a5   :  { %3585 = shalt.err (!%p3582_p4)
}
 0x4a6   :  { %s3586_s26 = scalar_lea.hbm %s6884_s7, 16 }
 0x4a7   :  { %p3587_p5 = scmp.ne.s32.totalorder %s6884_s7, %s3586_s26  ;;  %p3590_p6 = scmp.lt.u32.totalorder %s3586_s26, %s6884_s7 }
 0x4a9   :  { %p3592_p7 = pnand %p3590_p6, %p3587_p5 }
 0x4ab   :  { %3595 = shalt.err (!%p3592_p7)
}
 0x4ac   :  { %2484 = dma.vmem_to_hbm [thread:$0]  %s2482_s23, 16, %s6884_s7, [#allocation3]  }
 0x4ad   :  { %3596 = dma.done.wait [#allocation3], 16  }
 0x4ae   :  { %3597 = vsyncadd [#allocation3], 4294967280 }
 0x4af   :  { %2488 = vsyncpa [#allocation3], 1 }

// kernel: _forward_impl.2
= control target key start
LH: loop header
LB: loop body
LE: loop exit
PB: predicated region body
PF: predicated region fallthrough
CT: control target
= control target key end

     0   :  { %s13354_s12 = smov 0   ;;  %s13356_s13 = smov 0   ;;  %s15239_s0 = inlined_call_operand.vmem [shape: bf16[54,87552], index: 0, kind: input, shape index: {}]   ;;  %s15240_s1 = inlined_call_operand.vmem [shape: bf16[87552,71], index: 1, kind: input, shape index: {}]   ;;  %s15241_s2 = inlined_call_operand.vmem [shape: f32[1,71], index: 2, kind: input, shape index: {}]   ;;  %s15242_s3 = inlined_call_operand.vmem [shape: f32[54,71], index: 3, kind: output, shape index: {}]  }
   0x1   :  { %s13358_s14 = smov 0  }
   0x2 LB: > { %s13370_s15 = sadd.s32 4294967295, %s13331_s14   ;;  %s13373_s16 = sadd.s32 1, %s13331_s14   ;;  %s13331_s14 = sphi %s13358_s14, %s15245_s14   ;;  %s13327_s13 = sphi %s13356_s13, %s15244_s13   ;;  %s13323_s12 = sphi %s13354_s12, %s15243_s12  }
   0x3   : > { %s17_s17 = ssub.s32 %s13331_s14, %s13373_s16  ;;  %s20_s18 = sadd.s32 1, %s13327_s13 }
   0x4   : > { %p18_p0 = scmp.eq.s32.totalorder %s17_s17, 0  ;;  %p27_p1 = scmp.ne.s32.totalorder %s13327_s13, %s13323_s12 }
   0x5   : > { %p28_p2 = scmp.eq.s32.totalorder %s13331_s14, 0  ;;  %p9814_p4 = scmp.ge.s32.totalorder %s13331_s14, 9 }
   0x6   : > { %s13382_s19 = scalar_select %p18_p0, %s13327_s13, %s20_s18  }
   0x7   : > { %p29_p3 = por %p28_p2, %p27_p1  ;;  %124 = sbr.rel (%p9814_p4) target bundleno = 152 (0x98), region = 20 }
   0xe   : > { %127 = sbr.rel (!%p29_p3) target bundleno = 152 (0x98), region = 24  ;;  %s129_s20 = sand.u32 (%p29_p3), 1, %s13327_s13  }
   0xf   : > { %s10735_s21 = smul.u32 (%p29_p3), 304, %s13331_s14 }
  0x10   : > { %s12256_s22 = smul.u32 (%p29_p3), 2128, %s129_s20 }
  0x11   : > { %s13390_s25 = scalar_lea.vmem (%p29_p3), %s15239_s0, %s10735_s21 }
  0x12   : > { %v147_v0 = vld [vmem:[%s13390_s25] sm:$0xff] (%p29_p3)  ;;  %v149_v1 = vld [vmem:[%s13390_s25 + $0x8] sm:$0xff] (%p29_p3)  ;;  %v151_v2 = vld [vmem:[%s13390_s25 + $0x10] sm:$0xff] (%p29_p3)  ;;  %s13395_s26 = scalar_lea.vmem (%p29_p3), [#allocation2], %s12256_s22 }
  0x13   : > { %148 = vst [vmem:[%s13395_s26] sm:$0xff] (%p29_p3), %v147_v0  ;;  %150 = vst [vmem:[%s13395_s26 + $0x8] sm:$0xff] (%p29_p3), %v149_v1  ;;  %v153_v3 = vld [vmem:[%s13390_s25 + $0x18] sm:$0xff] (%p29_p3)  ;;  %v155_v4 = vld [vmem:[%s13390_s25 + $0x20] sm:$0xff] (%p29_p3) }
  0x14   : > { %152 = vst [vmem:[%s13395_s26 + $0x10] sm:$0xff] (%p29_p3), %v151_v2  ;;  %v157_v5 = vld [vmem:[%s13390_s25 + $0x28] sm:$0xff] (%p29_p3)  ;;  %154 = vst [vmem:[%s13395_s26 + $0x18] sm:$0xff] (%p29_p3), %v153_v3  ;;  %v159_v6 = vld [vmem:[%s13390_s25 + $0x30] sm:$0xff] (%p29_p3) }
  0x15   : > { %156 = vst [vmem:[%s13395_s26 + $0x20] sm:$0xff] %v155_v4  ;;  %158 = vst [vmem:[%s13395_s26 + $0x28] sm:$0xff] %v157_v5  ;;  %v161_v7 = vld [vmem:[%s13390_s25 + $0x38] sm:$0xff]  ;;  %v163_v8 = vld [vmem:[%s13390_s25 + $0x40] sm:$0xff] }
  0x16   : > { %160 = vst [vmem:[%s13395_s26 + $0x30] sm:$0xff] %v159_v6  ;;  %162 = vst [vmem:[%s13395_s26 + $0x38] sm:$0xff] %v161_v7  ;;  %v165_v9 = vld [vmem:[%s13390_s25 + $0x48] sm:$0xff]  ;;  %v167_v10 = vld [vmem:[%s13390_s25 + $0x50] sm:$0xff] }
  0x17   : > { %164 = vst [vmem:[%s13395_s26 + $0x40] sm:$0xff] %v163_v8  ;;  %v169_v11 = vld [vmem:[%s13390_s25 + $0x58] sm:$0xff]  ;;  %166 = vst [vmem:[%s13395_s26 + $0x48] sm:$0xff] %v165_v9  ;;  %v171_v12 = vld [vmem:[%s13390_s25 + $0x60] sm:$0xff] }
  0x18   : > { %168 = vst [vmem:[%s13395_s26 + $0x50] sm:$0xff] %v167_v10  ;;  %170 = vst [vmem:[%s13395_s26 + $0x58] sm:$0xff] %v169_v11  ;;  %v173_v13 = vld [vmem:[%s13390_s25 + $0x68] sm:$0xff]  ;;  %v175_v14 = vld [vmem:[%s13390_s25 + $0x70] sm:$0xff] }
  0x19   : > { %172 = vst [vmem:[%s13395_s26 + $0x60] sm:$0xff] %v171_v12  ;;  %174 = vst [vmem:[%s13395_s26 + $0x68] sm:$0xff] %v173_v13  ;;  %v177_v15 = vld [vmem:[%s13390_s25 + $0x78] sm:$0xff]  ;;  %v179_v16 = vld [vmem:[%s13390_s25 + $0x80] sm:$0xff] }
  0x1a   : > { %176 = vst [vmem:[%s13395_s26 + $0x70] sm:$0xff] %v175_v14  ;;  %v181_v17 = vld [vmem:[%s13390_s25 + $0x88] sm:$0xff]  ;;  %178 = vst [vmem:[%s13395_s26 + $0x78] sm:$0xff] %v177_v15  ;;  %v183_v18 = vld [vmem:[%s13390_s25 + $0x90] sm:$0xff] }
  0x1b   : > { %180 = vst [vmem:[%s13395_s26 + $0x80] sm:$0xff] %v179_v16  ;;  %182 = vst [vmem:[%s13395_s26 + $0x88] sm:$0xff] %v181_v17  ;;  %v185_v19 = vld [vmem:[%s13390_s25 + $0x98] sm:$0xff]  ;;  %v187_v20 = vld [vmem:[%s13390_s25 + $0xa0] sm:$0xff] }
  0x1c   : > { %184 = vst [vmem:[%s13395_s26 + $0x90] sm:$0xff] %v183_v18  ;;  %186 = vst [vmem:[%s13395_s26 + $0x98] sm:$0xff] %v185_v19  ;;  %v189_v21 = vld [vmem:[%s13390_s25 + $0xa8] sm:$0xff]  ;;  %v191_v22 = vld [vmem:[%s13390_s25 + $0xb0] sm:$0xff] }
  0x1d   : > { %188 = vst [vmem:[%s13395_s26 + $0xa0] sm:$0xff] %v187_v20  ;;  %v193_v23 = vld [vmem:[%s13390_s25 + $0xb8] sm:$0xff]  ;;  %190 = vst [vmem:[%s13395_s26 + $0xa8] sm:$0xff] %v189_v21  ;;  %v195_v24 = vld [vmem:[%s13390_s25 + $0xc0] sm:$0xff] }
  0x1e   : > { %192 = vst [vmem:[%s13395_s26 + $0xb0] sm:$0xff] %v191_v22  ;;  %194 = vst [vmem:[%s13395_s26 + $0xb8] sm:$0xff] %v193_v23  ;;  %v197_v25 = vld [vmem:[%s13390_s25 + $0xc8] sm:$0xff]  ;;  %v199_v26 = vld [vmem:[%s13390_s25 + $0xd0] sm:$0xff] }
  0x1f   : > { %196 = vst [vmem:[%s13395_s26 + $0xc0] sm:$0xff] %v195_v24  ;;  %198 = vst [vmem:[%s13395_s26 + $0xc8] sm:$0xff] %v197_v25  ;;  %v201_v27 = vld [vmem:[%s13390_s25 + $0xd8] sm:$0xff]  ;;  %v203_v28 = vld [vmem:[%s13390_s25 + $0xe0] sm:$0xff] }
  0x20   : > { %200 = vst [vmem:[%s13395_s26 + $0xd0] sm:$0xff] %v199_v26  ;;  %v205_v29 = vld [vmem:[%s13390_s25 + $0xe8] sm:$0xff]  ;;  %202 = vst [vmem:[%s13395_s26 + $0xd8] sm:$0xff] %v201_v27  ;;  %v207_v30 = vld [vmem:[%s13390_s25 + $0xf0] sm:$0xff] }
  0x21   : > { %204 = vst [vmem:[%s13395_s26 + $0xe0] sm:$0xff] %v203_v28  ;;  %206 = vst [vmem:[%s13395_s26 + $0xe8] sm:$0xff] %v205_v29  ;;  %v209_v31 = vld [vmem:[%s13390_s25 + $0xf8] sm:$0xff]  ;;  %v211_v32 = vld [vmem:[%s13390_s25 + $0x100] sm:$0xff] }
  0x22   : > { %208 = vst [vmem:[%s13395_s26 + $0xf0] sm:$0xff] %v207_v30  ;;  %210 = vst [vmem:[%s13395_s26 + $0xf8] sm:$0xff] %v209_v31  ;;  %v213_v33 = vld [vmem:[%s13390_s25 + $0x108] sm:$0xff]  ;;  %v215_v34 = vld [vmem:[%s13390_s25 + $0x110] sm:$0xff] }
  0x23   : > { %212 = vst [vmem:[%s13395_s26 + $0x100] sm:$0xff] %v211_v32  ;;  %v217_v35 = vld [vmem:[%s13390_s25 + $0x118] sm:$0xff]  ;;  %214 = vst [vmem:[%s13395_s26 + $0x108] sm:$0xff] %v213_v33  ;;  %v219_v36 = vld [vmem:[%s13390_s25 + $0x120] sm:$0xff] }
  0x24   : > { %216 = vst [vmem:[%s13395_s26 + $0x110] sm:$0xff] %v215_v34  ;;  %218 = vst [vmem:[%s13395_s26 + $0x118] sm:$0xff] %v217_v35  ;;  %v221_v37 = vld [vmem:[%s13390_s25 + $0x128] sm:$0xff]  ;;  %v223_v38 = vld [vmem:[%s13390_s25 + $0xab0] sm:$0xff] }
  0x25   : > { %220 = vst [vmem:[%s13395_s26 + $0x120] sm:$0xff] %v219_v36  ;;  %222 = vst [vmem:[%s13395_s26 + $0x128] sm:$0xff] %v221_v37  ;;  %v225_v39 = vld [vmem:[%s13390_s25 + $0xab8] sm:$0xff]  ;;  %v227_v40 = vld [vmem:[%s13390_s25 + $0xac0] sm:$0xff] }
  0x26   : > { %224 = vst [vmem:[%s13395_s26 + $0x130] sm:$0xff] %v223_v38  ;;  %v229_v41 = vld [vmem:[%s13390_s25 + $0xac8] sm:$0xff]  ;;  %226 = vst [vmem:[%s13395_s26 + $0x138] sm:$0xff] %v225_v39  ;;  %v231_v42 = vld [vmem:[%s13390_s25 + $0xad0] sm:$0xff] }
  0x27   : > { %228 = vst [vmem:[%s13395_s26 + $0x140] sm:$0xff] %v227_v40  ;;  %230 = vst [vmem:[%s13395_s26 + $0x148] sm:$0xff] %v229_v41  ;;  %v233_v43 = vld [vmem:[%s13390_s25 + $0xad8] sm:$0xff]  ;;  %v235_v44 = vld [vmem:[%s13390_s25 + $0xae0] sm:$0xff] }
  0x28   : > { %232 = vst [vmem:[%s13395_s26 + $0x150] sm:$0xff] %v231_v42  ;;  %234 = vst [vmem:[%s13395_s26 + $0x158] sm:$0xff] %v233_v43  ;;  %v237_v45 = vld [vmem:[%s13390_s25 + $0xae8] sm:$0xff]  ;;  %v239_v46 = vld [vmem:[%s13390_s25 + $0xaf0] sm:$0xff] }
  0x29   : > { %236 = vst [vmem:[%s13395_s26 + $0x160] sm:$0xff] %v235_v44  ;;  %v241_v47 = vld [vmem:[%s13390_s25 + $0xaf8] sm:$0xff]  ;;  %238 = vst [vmem:[%s13395_s26 + $0x168] sm:$0xff] %v237_v45  ;;  %v243_v48 = vld [vmem:[%s13390_s25 + $0xb00] sm:$0xff] }
  0x2a   : > { %240 = vst [vmem:[%s13395_s26 + $0x170] sm:$0xff] %v239_v46  ;;  %242 = vst [vmem:[%s13395_s26 + $0x178] sm:$0xff] %v241_v47  ;;  %v245_v49 = vld [vmem:[%s13390_s25 + $0xb08] sm:$0xff]  ;;  %v247_v50 = vld [vmem:[%s13390_s25 + $0xb10] sm:$0xff] }
  0x2b   : > { %244 = vst [vmem:[%s13395_s26 + $0x180] sm:$0xff] %v243_v48  ;;  %246 = vst [vmem:[%s13395_s26 + $0x188] sm:$0xff] %v245_v49  ;;  %v249_v51 = vld [vmem:[%s13390_s25 + $0xb18] sm:$0xff]  ;;  %v251_v52 = vld [vmem:[%s13390_s25 + $0xb20] sm:$0xff] }
  0x2c   : > { %248 = vst [vmem:[%s13395_s26 + $0x190] sm:$0xff] %v247_v50  ;;  %v253_v53 = vld [vmem:[%s13390_s25 + $0xb28] sm:$0xff]  ;;  %250 = vst [vmem:[%s13395_s26 + $0x198] sm:$0xff] %v249_v51  ;;  %v255_v54 = vld [vmem:[%s13390_s25 + $0xb30] sm:$0xff] }
  0x2d   : > { %252 = vst [vmem:[%s13395_s26 + $0x1a0] sm:$0xff] %v251_v52  ;;  %254 = vst [vmem:[%s13395_s26 + $0x1a8] sm:$0xff] %v253_v53  ;;  %v257_v55 = vld [vmem:[%s13390_s25 + $0xb38] sm:$0xff]  ;;  %v259_v56 = vld [vmem:[%s13390_s25 + $0xb40] sm:$0xff] }
  0x2e   : > { %256 = vst [vmem:[%s13395_s26 + $0x1b0] sm:$0xff] %v255_v54  ;;  %258 = vst [vmem:[%s13395_s26 + $0x1b8] sm:$0xff] %v257_v55  ;;  %v261_v57 = vld [vmem:[%s13390_s25 + $0xb48] sm:$0xff]  ;;  %v263_v58 = vld [vmem:[%s13390_s25 + $0xb50] sm:$0xff] }
  0x2f   : > { %260 = vst [vmem:[%s13395_s26 + $0x1c0] sm:$0xff] %v259_v56  ;;  %v265_v59 = vld [vmem:[%s13390_s25 + $0xb58] sm:$0xff]  ;;  %262 = vst [vmem:[%s13395_s26 + $0x1c8] sm:$0xff] %v261_v57  ;;  %v267_v60 = vld [vmem:[%s13390_s25 + $0xb60] sm:$0xff] }
  0x30   : > { %264 = vst [vmem:[%s13395_s26 + $0x1d0] sm:$0xff] %v263_v58  ;;  %266 = vst [vmem:[%s13395_s26 + $0x1d8] sm:$0xff] %v265_v59  ;;  %v269_v61 = vld [vmem:[%s13390_s25 + $0xb68] sm:$0xff]  ;;  %v271_v62 = vld [vmem:[%s13390_s25 + $0xb70] sm:$0xff] }
  0x31   : > { %268 = vst [vmem:[%s13395_s26 + $0x1e0] sm:$0xff] %v267_v60  ;;  %270 = vst [vmem:[%s13395_s26 + $0x1e8] sm:$0xff] %v269_v61  ;;  %v273_v63 = vld [vmem:[%s13390_s25 + $0xb78] sm:$0xff]  ;;  %v275_v0 = vld [vmem:[%s13390_s25 + $0xb80] sm:$0xff] }
  0x32   : > { %272 = vst [vmem:[%s13395_s26 + $0x1f0] sm:$0xff] %v271_v62  ;;  %v277_v1 = vld [vmem:[%s13390_s25 + $0xb88] sm:$0xff]  ;;  %274 = vst [vmem:[%s13395_s26 + $0x1f8] sm:$0xff] %v273_v63  ;;  %v279_v2 = vld [vmem:[%s13390_s25 + $0xb90] sm:$0xff] }
  0x33   : > { %276 = vst [vmem:[%s13395_s26 + $0x200] sm:$0xff] %v275_v0  ;;  %278 = vst [vmem:[%s13395_s26 + $0x208] sm:$0xff] %v277_v1  ;;  %v281_v3 = vld [vmem:[%s13390_s25 + $0xb98] sm:$0xff]  ;;  %v283_v4 = vld [vmem:[%s13390_s25 + $0xba0] sm:$0xff] }
  0x34   : > { %280 = vst [vmem:[%s13395_s26 + $0x210] sm:$0xff] %v279_v2  ;;  %282 = vst [vmem:[%s13395_s26 + $0x218] sm:$0xff] %v281_v3  ;;  %v285_v5 = vld [vmem:[%s13390_s25 + $0xba8] sm:$0xff]  ;;  %v287_v6 = vld [vmem:[%s13390_s25 + $0xbb0] sm:$0xff] }
  0x35   : > { %284 = vst [vmem:[%s13395_s26 + $0x220] sm:$0xff] %v283_v4  ;;  %v289_v7 = vld [vmem:[%s13390_s25 + $0xbb8] sm:$0xff]  ;;  %286 = vst [vmem:[%s13395_s26 + $0x228] sm:$0xff] %v285_v5  ;;  %v291_v8 = vld [vmem:[%s13390_s25 + $0xbc0] sm:$0xff] }
  0x36   : > { %288 = vst [vmem:[%s13395_s26 + $0x230] sm:$0xff] %v287_v6  ;;  %290 = vst [vmem:[%s13395_s26 + $0x238] sm:$0xff] %v289_v7  ;;  %v293_v9 = vld [vmem:[%s13390_s25 + $0xbc8] sm:$0xff]  ;;  %v295_v10 = vld [vmem:[%s13390_s25 + $0xbd0] sm:$0xff] }
  0x37   : > { %292 = vst [vmem:[%s13395_s26 + $0x240] sm:$0xff] %v291_v8  ;;  %294 = vst [vmem:[%s13395_s26 + $0x248] sm:$0xff] %v293_v9  ;;  %v297_v11 = vld [vmem:[%s13390_s25 + $0xbd8] sm:$0xff]  ;;  %v299_v12 = vld [vmem:[%s13390_s25 + $0x1560] sm:$0xff] }
  0x38   : > { %296 = vst [vmem:[%s13395_s26 + $0x250] sm:$0xff] %v295_v10  ;;  %v301_v13 = vld [vmem:[%s13390_s25 + $0x1568] sm:$0xff]  ;;  %298 = vst [vmem:[%s13395_s26 + $0x258] sm:$0xff] %v297_v11  ;;  %v303_v14 = vld [vmem:[%s13390_s25 + $0x1570] sm:$0xff] }
  0x39   : > { %300 = vst [vmem:[%s13395_s26 + $0x260] sm:$0xff] %v299_v12  ;;  %302 = vst [vmem:[%s13395_s26 + $0x268] sm:$0xff] %v301_v13  ;;  %v305_v15 = vld [vmem:[%s13390_s25 + $0x1578] sm:$0xff]  ;;  %v307_v16 = vld [vmem:[%s13390_s25 + $0x1580] sm:$0xff] }
  0x3a   : > { %304 = vst [vmem:[%s13395_s26 + $0x270] sm:$0xff] %v303_v14  ;;  %306 = vst [vmem:[%s13395_s26 + $0x278] sm:$0xff] %v305_v15  ;;  %v309_v17 = vld [vmem:[%s13390_s25 + $0x1588] sm:$0xff]  ;;  %v311_v18 = vld [vmem:[%s13390_s25 + $0x1590] sm:$0xff] }
  0x3b   : > { %308 = vst [vmem:[%s13395_s26 + $0x280] sm:$0xff] %v307_v16  ;;  %v313_v19 = vld [vmem:[%s13390_s25 + $0x1598] sm:$0xff]  ;;  %310 = vst [vmem:[%s13395_s26 + $0x288] sm:$0xff] %v309_v17  ;;  %v315_v20 = vld [vmem:[%s13390_s25 + $0x15a0] sm:$0xff] }
  0x3c   : > { %312 = vst [vmem:[%s13395_s26 + $0x290] sm:$0xff] %v311_v18  ;;  %314 = vst [vmem:[%s13395_s26 + $0x298] sm:$0xff] %v313_v19  ;;  %v317_v21 = vld [vmem:[%s13390_s25 + $0x15a8] sm:$0xff]  ;;  %v319_v22 = vld [vmem:[%s13390_s25 + $0x15b0] sm:$0xff] }
  0x3d   : > { %316 = vst [vmem:[%s13395_s26 + $0x2a0] sm:$0xff] %v315_v20  ;;  %318 = vst [vmem:[%s13395_s26 + $0x2a8] sm:$0xff] %v317_v21  ;;  %v321_v23 = vld [vmem:[%s13390_s25 + $0x15b8] sm:$0xff]  ;;  %v323_v24 = vld [vmem:[%s13390_s25 + $0x15c0] sm:$0xff] }
  0x3e   : > { %320 = vst [vmem:[%s13395_s26 + $0x2b0] sm:$0xff] %v319_v22  ;;  %v325_v25 = vld [vmem:[%s13390_s25 + $0x15c8] sm:$0xff]  ;;  %322 = vst [vmem:[%s13395_s26 + $0x2b8] sm:$0xff] %v321_v23  ;;  %v327_v26 = vld [vmem:[%s13390_s25 + $0x15d0] sm:$0xff] }
  0x3f   : > { %324 = vst [vmem:[%s13395_s26 + $0x2c0] sm:$0xff] %v323_v24  ;;  %326 = vst [vmem:[%s13395_s26 + $0x2c8] sm:$0xff] %v325_v25  ;;  %v329_v27 = vld [vmem:[%s13390_s25 + $0x15d8] sm:$0xff]  ;;  %v331_v28 = vld [vmem:[%s13390_s25 + $0x15e0] sm:$0xff] }
  0x40   : > { %328 = vst [vmem:[%s13395_s26 + $0x2d0] sm:$0xff] %v327_v26  ;;  %330 = vst [vmem:[%s13395_s26 + $0x2d8] sm:$0xff] %v329_v27  ;;  %v333_v29 = vld [vmem:[%s13390_s25 + $0x15e8] sm:$0xff]  ;;  %v335_v30 = vld [vmem:[%s13390_s25 + $0x15f0] sm:$0xff] }
  0x41   : > { %332 = vst [vmem:[%s13395_s26 + $0x2e0] sm:$0xff] %v331_v28  ;;  %v337_v31 = vld [vmem:[%s13390_s25 + $0x15f8] sm:$0xff]  ;;  %334 = vst [vmem:[%s13395_s26 + $0x2e8] sm:$0xff] %v333_v29  ;;  %v339_v32 = vld [vmem:[%s13390_s25 + $0x1600] sm:$0xff] }
  0x42   : > { %336 = vst [vmem:[%s13395_s26 + $0x2f0] sm:$0xff] %v335_v30  ;;  %338 = vst [vmem:[%s13395_s26 + $0x2f8] sm:$0xff] %v337_v31  ;;  %v341_v33 = vld [vmem:[%s13390_s25 + $0x1608] sm:$0xff]  ;;  %v343_v34 = vld [vmem:[%s13390_s25 + $0x1610] sm:$0xff] }
  0x43   : > { %340 = vst [vmem:[%s13395_s26 + $0x300] sm:$0xff] %v339_v32  ;;  %342 = vst [vmem:[%s13395_s26 + $0x308] sm:$0xff] %v341_v33  ;;  %v345_v35 = vld [vmem:[%s13390_s25 + $0x1618] sm:$0xff]  ;;  %v347_v36 = vld [vmem:[%s13390_s25 + $0x1620] sm:$0xff] }
  0x44   : > { %344 = vst [vmem:[%s13395_s26 + $0x310] sm:$0xff] %v343_v34  ;;  %v349_v37 = vld [vmem:[%s13390_s25 + $0x1628] sm:$0xff]  ;;  %346 = vst [vmem:[%s13395_s26 + $0x318] sm:$0xff] %v345_v35  ;;  %v351_v38 = vld [vmem:[%s13390_s25 + $0x1630] sm:$0xff] }
  0x45   : > { %348 = vst [vmem:[%s13395_s26 + $0x320] sm:$0xff] %v347_v36  ;;  %350 = vst [vmem:[%s13395_s26 + $0x328] sm:$0xff] %v349_v37  ;;  %v353_v39 = vld [vmem:[%s13390_s25 + $0x1638] sm:$0xff]  ;;  %v355_v40 = vld [vmem:[%s13390_s25 + $0x1640] sm:$0xff] }
  0x46   : > { %352 = vst [vmem:[%s13395_s26 + $0x330] sm:$0xff] %v351_v38  ;;  %354 = vst [vmem:[%s13395_s26 + $0x338] sm:$0xff] %v353_v39  ;;  %v357_v41 = vld [vmem:[%s13390_s25 + $0x1648] sm:$0xff]  ;;  %v359_v42 = vld [vmem:[%s13390_s25 + $0x1650] sm:$0xff] }
  0x47   : > { %356 = vst [vmem:[%s13395_s26 + $0x340] sm:$0xff] %v355_v40  ;;  %v361_v43 = vld [vmem:[%s13390_s25 + $0x1658] sm:$0xff]  ;;  %358 = vst [vmem:[%s13395_s26 + $0x348] sm:$0xff] %v357_v41  ;;  %v363_v44 = vld [vmem:[%s13390_s25 + $0x1660] sm:$0xff] }
  0x48   : > { %360 = vst [vmem:[%s13395_s26 + $0x350] sm:$0xff] %v359_v42  ;;  %362 = vst [vmem:[%s13395_s26 + $0x358] sm:$0xff] %v361_v43  ;;  %v365_v45 = vld [vmem:[%s13390_s25 + $0x1668] sm:$0xff]  ;;  %v367_v46 = vld [vmem:[%s13390_s25 + $0x1670] sm:$0xff] }
  0x49   : > { %364 = vst [vmem:[%s13395_s26 + $0x360] sm:$0xff] %v363_v44  ;;  %366 = vst [vmem:[%s13395_s26 + $0x368] sm:$0xff] %v365_v45  ;;  %v369_v47 = vld [vmem:[%s13390_s25 + $0x1678] sm:$0xff]  ;;  %v371_v48 = vld [vmem:[%s13390_s25 + $0x1680] sm:$0xff] }
  0x4a   : > { %368 = vst [vmem:[%s13395_s26 + $0x370] sm:$0xff] %v367_v46  ;;  %v373_v49 = vld [vmem:[%s13390_s25 + $0x1688] sm:$0xff]  ;;  %370 = vst [vmem:[%s13395_s26 + $0x378] sm:$0xff] %v369_v47  ;;  %v375_v50 = vld [vmem:[%s13390_s25 + $0x2010] sm:$0xff] }
  0x4b   : > { %372 = vst [vmem:[%s13395_s26 + $0x380] sm:$0xff] %v371_v48  ;;  %374 = vst [vmem:[%s13395_s26 + $0x388] sm:$0xff] %v373_v49  ;;  %v377_v51 = vld [vmem:[%s13390_s25 + $0x2018] sm:$0xff]  ;;  %v379_v52 = vld [vmem:[%s13390_s25 + $0x2020] sm:$0xff] }
  0x4c   : > { %376 = vst [vmem:[%s13395_s26 + $0x390] sm:$0xff] %v375_v50  ;;  %378 = vst [vmem:[%s13395_s26 + $0x398] sm:$0xff] %v377_v51  ;;  %v381_v53 = vld [vmem:[%s13390_s25 + $0x2028] sm:$0xff]  ;;  %v383_v54 = vld [vmem:[%s13390_s25 + $0x2030] sm:$0xff] }
  0x4d   : > { %380 = vst [vmem:[%s13395_s26 + $0x3a0] sm:$0xff] %v379_v52  ;;  %v385_v55 = vld [vmem:[%s13390_s25 + $0x2038] sm:$0xff]  ;;  %382 = vst [vmem:[%s13395_s26 + $0x3a8] sm:$0xff] %v381_v53  ;;  %v387_v56 = vld [vmem:[%s13390_s25 + $0x2040] sm:$0xff] }
  0x4e   : > { %384 = vst [vmem:[%s13395_s26 + $0x3b0] sm:$0xff] %v383_v54  ;;  %386 = vst [vmem:[%s13395_s26 + $0x3b8] sm:$0xff] %v385_v55  ;;  %v389_v57 = vld [vmem:[%s13390_s25 + $0x2048] sm:$0xff]  ;;  %v391_v58 = vld [vmem:[%s13390_s25 + $0x2050] sm:$0xff] }
  0x4f   : > { %388 = vst [vmem:[%s13395_s26 + $0x3c0] sm:$0xff] %v387_v56  ;;  %390 = vst [vmem:[%s13395_s26 + $0x3c8] sm:$0xff] %v389_v57  ;;  %v393_v59 = vld [vmem:[%s13390_s25 + $0x2058] sm:$0xff]  ;;  %v395_v60 = vld [vmem:[%s13390_s25 + $0x2060] sm:$0xff] }
  0x50   : > { %392 = vst [vmem:[%s13395_s26 + $0x3d0] sm:$0xff] %v391_v58  ;;  %v397_v61 = vld [vmem:[%s13390_s25 + $0x2068] sm:$0xff]  ;;  %394 = vst [vmem:[%s13395_s26 + $0x3d8] sm:$0xff] %v393_v59  ;;  %v399_v62 = vld [vmem:[%s13390_s25 + $0x2070] sm:$0xff] }
  0x51   : > { %396 = vst [vmem:[%s13395_s26 + $0x3e0] sm:$0xff] %v395_v60  ;;  %398 = vst [vmem:[%s13395_s26 + $0x3e8] sm:$0xff] %v397_v61  ;;  %v401_v63 = vld [vmem:[%s13390_s25 + $0x2078] sm:$0xff]  ;;  %v403_v0 = vld [vmem:[%s13390_s25 + $0x2080] sm:$0xff] }
  0x52   : > { %400 = vst [vmem:[%s13395_s26 + $0x3f0] sm:$0xff] %v399_v62  ;;  %402 = vst [vmem:[%s13395_s26 + $0x3f8] sm:$0xff] %v401_v63  ;;  %v405_v1 = vld [vmem:[%s13390_s25 + $0x2088] sm:$0xff]  ;;  %v407_v2 = vld [vmem:[%s13390_s25 + $0x2090] sm:$0xff] }
  0x53   : > { %404 = vst [vmem:[%s13395_s26 + $0x400] sm:$0xff] %v403_v0  ;;  %v409_v3 = vld [vmem:[%s13390_s25 + $0x2098] sm:$0xff]  ;;  %406 = vst [vmem:[%s13395_s26 + $0x408] sm:$0xff] %v405_v1  ;;  %v411_v4 = vld [vmem:[%s13390_s25 + $0x20a0] sm:$0xff] }
  0x54   : > { %408 = vst [vmem:[%s13395_s26 + $0x410] sm:$0xff] %v407_v2  ;;  %410 = vst [vmem:[%s13395_s26 + $0x418] sm:$0xff] %v409_v3  ;;  %v413_v5 = vld [vmem:[%s13390_s25 + $0x20a8] sm:$0xff]  ;;  %v415_v6 = vld [vmem:[%s13390_s25 + $0x20b0] sm:$0xff] }
  0x55   : > { %412 = vst [vmem:[%s13395_s26 + $0x420] sm:$0xff] %v411_v4  ;;  %414 = vst [vmem:[%s13395_s26 + $0x428] sm:$0xff] %v413_v5  ;;  %v417_v7 = vld [vmem:[%s13390_s25 + $0x20b8] sm:$0xff]  ;;  %v419_v8 = vld [vmem:[%s13390_s25 + $0x20c0] sm:$0xff] }
  0x56   : > { %416 = vst [vmem:[%s13395_s26 + $0x430] sm:$0xff] %v415_v6  ;;  %v421_v9 = vld [vmem:[%s13390_s25 + $0x20c8] sm:$0xff]  ;;  %418 = vst [vmem:[%s13395_s26 + $0x438] sm:$0xff] %v417_v7  ;;  %v423_v10 = vld [vmem:[%s13390_s25 + $0x20d0] sm:$0xff] }
  0x57   : > { %420 = vst [vmem:[%s13395_s26 + $0x440] sm:$0xff] %v419_v8  ;;  %422 = vst [vmem:[%s13395_s26 + $0x448] sm:$0xff] %v421_v9  ;;  %v425_v11 = vld [vmem:[%s13390_s25 + $0x20d8] sm:$0xff]  ;;  %v427_v12 = vld [vmem:[%s13390_s25 + $0x20e0] sm:$0xff] }
  0x58   : > { %424 = vst [vmem:[%s13395_s26 + $0x450] sm:$0xff] %v423_v10  ;;  %426 = vst [vmem:[%s13395_s26 + $0x458] sm:$0xff] %v425_v11  ;;  %v429_v13 = vld [vmem:[%s13390_s25 + $0x20e8] sm:$0xff]  ;;  %v431_v14 = vld [vmem:[%s13390_s25 + $0x20f0] sm:$0xff] }
  0x59   : > { %428 = vst [vmem:[%s13395_s26 + $0x460] sm:$0xff] %v427_v12  ;;  %v433_v15 = vld [vmem:[%s13390_s25 + $0x20f8] sm:$0xff]  ;;  %430 = vst [vmem:[%s13395_s26 + $0x468] sm:$0xff] %v429_v13  ;;  %v435_v16 = vld [vmem:[%s13390_s25 + $0x2100] sm:$0xff] }
  0x5a   : > { %432 = vst [vmem:[%s13395_s26 + $0x470] sm:$0xff] %v431_v14  ;;  %434 = vst [vmem:[%s13395_s26 + $0x478] sm:$0xff] %v433_v15  ;;  %v437_v17 = vld [vmem:[%s13390_s25 + $0x2108] sm:$0xff]  ;;  %v439_v18 = vld [vmem:[%s13390_s25 + $0x2110] sm:$0xff] }
  0x5b   : > { %436 = vst [vmem:[%s13395_s26 + $0x480] sm:$0xff] %v435_v16  ;;  %438 = vst [vmem:[%s13395_s26 + $0x488] sm:$0xff] %v437_v17  ;;  %v441_v19 = vld [vmem:[%s13390_s25 + $0x2118] sm:$0xff]  ;;  %v443_v20 = vld [vmem:[%s13390_s25 + $0x2120] sm:$0xff] }
  0x5c   : > { %440 = vst [vmem:[%s13395_s26 + $0x490] sm:$0xff] %v439_v18  ;;  %v445_v21 = vld [vmem:[%s13390_s25 + $0x2128] sm:$0xff]  ;;  %442 = vst [vmem:[%s13395_s26 + $0x498] sm:$0xff] %v441_v19  ;;  %v447_v22 = vld [vmem:[%s13390_s25 + $0x2130] sm:$0xff] }
  0x5d   : > { %444 = vst [vmem:[%s13395_s26 + $0x4a0] sm:$0xff] %v443_v20  ;;  %446 = vst [vmem:[%s13395_s26 + $0x4a8] sm:$0xff] %v445_v21  ;;  %v449_v23 = vld [vmem:[%s13390_s25 + $0x2138] sm:$0xff]  ;;  %v451_v24 = vld [vmem:[%s13390_s25 + $0x2ac0] sm:$0xff] }
  0x5e   : > { %448 = vst [vmem:[%s13395_s26 + $0x4b0] sm:$0xff] %v447_v22  ;;  %450 = vst [vmem:[%s13395_s26 + $0x4b8] sm:$0xff] %v449_v23  ;;  %v453_v25 = vld [vmem:[%s13390_s25 + $0x2ac8] sm:$0xff]  ;;  %v455_v26 = vld [vmem:[%s13390_s25 + $0x2ad0] sm:$0xff] }
  0x5f   : > { %452 = vst [vmem:[%s13395_s26 + $0x4c0] sm:$0xff] %v451_v24  ;;  %v457_v27 = vld [vmem:[%s13390_s25 + $0x2ad8] sm:$0xff]  ;;  %454 = vst [vmem:[%s13395_s26 + $0x4c8] sm:$0xff] %v453_v25  ;;  %v459_v28 = vld [vmem:[%s13390_s25 + $0x2ae0] sm:$0xff] }
  0x60   : > { %456 = vst [vmem:[%s13395_s26 + $0x4d0] sm:$0xff] %v455_v26  ;;  %458 = vst [vmem:[%s13395_s26 + $0x4d8] sm:$0xff] %v457_v27  ;;  %v461_v29 = vld [vmem:[%s13390_s25 + $0x2ae8] sm:$0xff]  ;;  %v463_v30 = vld [vmem:[%s13390_s25 + $0x2af0] sm:$0xff] }
  0x61   : > { %460 = vst [vmem:[%s13395_s26 + $0x4e0] sm:$0xff] %v459_v28  ;;  %462 = vst [vmem:[%s13395_s26 + $0x4e8] sm:$0xff] %v461_v29  ;;  %v465_v31 = vld [vmem:[%s13390_s25 + $0x2af8] sm:$0xff]  ;;  %v467_v32 = vld [vmem:[%s13390_s25 + $0x2b00] sm:$0xff] }
  0x62   : > { %464 = vst [vmem:[%s13395_s26 + $0x4f0] sm:$0xff] %v463_v30  ;;  %v469_v33 = vld [vmem:[%s13390_s25 + $0x2b08] sm:$0xff]  ;;  %466 = vst [vmem:[%s13395_s26 + $0x4f8] sm:$0xff] %v465_v31  ;;  %v471_v34 = vld [vmem:[%s13390_s25 + $0x2b10] sm:$0xff] }
  0x63   : > { %468 = vst [vmem:[%s13395_s26 + $0x500] sm:$0xff] %v467_v32  ;;  %470 = vst [vmem:[%s13395_s26 + $0x508] sm:$0xff] %v469_v33  ;;  %v473_v35 = vld [vmem:[%s13390_s25 + $0x2b18] sm:$0xff]  ;;  %v475_v36 = vld [vmem:[%s13390_s25 + $0x2b20] sm:$0xff] }
  0x64   : > { %472 = vst [vmem:[%s13395_s26 + $0x510] sm:$0xff] %v471_v34  ;;  %474 = vst [vmem:[%s13395_s26 + $0x518] sm:$0xff] %v473_v35  ;;  %v477_v37 = vld [vmem:[%s13390_s25 + $0x2b28] sm:$0xff]  ;;  %v479_v38 = vld [vmem:[%s13390_s25 + $0x2b30] sm:$0xff] }
  0x65   : > { %476 = vst [vmem:[%s13395_s26 + $0x520] sm:$0xff] %v475_v36  ;;  %v481_v39 = vld [vmem:[%s13390_s25 + $0x2b38] sm:$0xff]  ;;  %478 = vst [vmem:[%s13395_s26 + $0x528] sm:$0xff] %v477_v37  ;;  %v483_v40 = vld [vmem:[%s13390_s25 + $0x2b40] sm:$0xff] }
  0x66   : > { %480 = vst [vmem:[%s13395_s26 + $0x530] sm:$0xff] %v479_v38  ;;  %482 = vst [vmem:[%s13395_s26 + $0x538] sm:$0xff] %v481_v39  ;;  %v485_v41 = vld [vmem:[%s13390_s25 + $0x2b48] sm:$0xff]  ;;  %v487_v42 = vld [vmem:[%s13390_s25 + $0x2b50] sm:$0xff] }
  0x67   : > { %484 = vst [vmem:[%s13395_s26 + $0x540] sm:$0xff] %v483_v40  ;;  %486 = vst [vmem:[%s13395_s26 + $0x548] sm:$0xff] %v485_v41  ;;  %v489_v43 = vld [vmem:[%s13390_s25 + $0x2b58] sm:$0xff]  ;;  %v491_v44 = vld [vmem:[%s13390_s25 + $0x2b60] sm:$0xff] }
  0x68   : > { %488 = vst [vmem:[%s13395_s26 + $0x550] sm:$0xff] %v487_v42  ;;  %v493_v45 = vld [vmem:[%s13390_s25 + $0x2b68] sm:$0xff]  ;;  %490 = vst [vmem:[%s13395_s26 + $0x558] sm:$0xff] %v489_v43  ;;  %v495_v46 = vld [vmem:[%s13390_s25 + $0x2b70] sm:$0xff] }
  0x69   : > { %492 = vst [vmem:[%s13395_s26 + $0x560] sm:$0xff] %v491_v44  ;;  %494 = vst [vmem:[%s13395_s26 + $0x568] sm:$0xff] %v493_v45  ;;  %v497_v47 = vld [vmem:[%s13390_s25 + $0x2b78] sm:$0xff]  ;;  %v499_v48 = vld [vmem:[%s13390_s25 + $0x2b80] sm:$0xff] }
  0x6a   : > { %496 = vst [vmem:[%s13395_s26 + $0x570] sm:$0xff] %v495_v46  ;;  %498 = vst [vmem:[%s13395_s26 + $0x578] sm:$0xff] %v497_v47  ;;  %v501_v49 = vld [vmem:[%s13390_s25 + $0x2b88] sm:$0xff]  ;;  %v503_v50 = vld [vmem:[%s13390_s25 + $0x2b90] sm:$0xff] }
  0x6b   : > { %500 = vst [vmem:[%s13395_s26 + $0x580] sm:$0xff] %v499_v48  ;;  %v505_v51 = vld [vmem:[%s13390_s25 + $0x2b98] sm:$0xff]  ;;  %502 = vst [vmem:[%s13395_s26 + $0x588] sm:$0xff] %v501_v49  ;;  %v507_v52 = vld [vmem:[%s13390_s25 + $0x2ba0] sm:$0xff] }
  0x6c   : > { %504 = vst [vmem:[%s13395_s26 + $0x590] sm:$0xff] %v503_v50  ;;  %506 = vst [vmem:[%s13395_s26 + $0x598] sm:$0xff] %v505_v51  ;;  %v509_v53 = vld [vmem:[%s13390_s25 + $0x2ba8] sm:$0xff]  ;;  %v511_v54 = vld [vmem:[%s13390_s25 + $0x2bb0] sm:$0xff] }
  0x6d   : > { %508 = vst [vmem:[%s13395_s26 + $0x5a0] sm:$0xff] %v507_v52  ;;  %510 = vst [vmem:[%s13395_s26 + $0x5a8] sm:$0xff] %v509_v53  ;;  %v513_v55 = vld [vmem:[%s13390_s25 + $0x2bb8] sm:$0xff]  ;;  %v515_v56 = vld [vmem:[%s13390_s25 + $0x2bc0] sm:$0xff] }
  0x6e   : > { %512 = vst [vmem:[%s13395_s26 + $0x5b0] sm:$0xff] %v511_v54  ;;  %v517_v57 = vld [vmem:[%s13390_s25 + $0x2bc8] sm:$0xff]  ;;  %514 = vst [vmem:[%s13395_s26 + $0x5b8] sm:$0xff] %v513_v55  ;;  %v519_v58 = vld [vmem:[%s13390_s25 + $0x2bd0] sm:$0xff] }
  0x6f   : > { %516 = vst [vmem:[%s13395_s26 + $0x5c0] sm:$0xff] %v515_v56  ;;  %518 = vst [vmem:[%s13395_s26 + $0x5c8] sm:$0xff] %v517_v57  ;;  %v521_v59 = vld [vmem:[%s13390_s25 + $0x2bd8] sm:$0xff]  ;;  %v523_v60 = vld [vmem:[%s13390_s25 + $0x2be0] sm:$0xff] }
  0x70   : > { %520 = vst [vmem:[%s13395_s26 + $0x5d0] sm:$0xff] %v519_v58  ;;  %522 = vst [vmem:[%s13395_s26 + $0x5d8] sm:$0xff] %v521_v59  ;;  %v525_v61 = vld [vmem:[%s13390_s25 + $0x2be8] sm:$0xff]  ;;  %v527_v62 = vld [vmem:[%s13390_s25 + $0x3570] sm:$0xff] }
  0x71   : > { %524 = vst [vmem:[%s13395_s26 + $0x5e0] sm:$0xff] %v523_v60  ;;  %v529_v63 = vld [vmem:[%s13390_s25 + $0x3578] sm:$0xff]  ;;  %526 = vst [vmem:[%s13395_s26 + $0x5e8] sm:$0xff] %v525_v61  ;;  %v531_v0 = vld [vmem:[%s13390_s25 + $0x3580] sm:$0xff] }
  0x72   : > { %528 = vst [vmem:[%s13395_s26 + $0x5f0] sm:$0xff] %v527_v62  ;;  %530 = vst [vmem:[%s13395_s26 + $0x5f8] sm:$0xff] %v529_v63  ;;  %v533_v1 = vld [vmem:[%s13390_s25 + $0x3588] sm:$0xff]  ;;  %v535_v2 = vld [vmem:[%s13390_s25 + $0x3590] sm:$0xff] }
  0x73   : > { %532 = vst [vmem:[%s13395_s26 + $0x600] sm:$0xff] %v531_v0  ;;  %534 = vst [vmem:[%s13395_s26 + $0x608] sm:$0xff] %v533_v1  ;;  %v537_v3 = vld [vmem:[%s13390_s25 + $0x3598] sm:$0xff]  ;;  %v539_v4 = vld [vmem:[%s13390_s25 + $0x35a0] sm:$0xff] }
  0x74   : > { %536 = vst [vmem:[%s13395_s26 + $0x610] sm:$0xff] %v535_v2  ;;  %v541_v5 = vld [vmem:[%s13390_s25 + $0x35a8] sm:$0xff]  ;;  %538 = vst [vmem:[%s13395_s26 + $0x618] sm:$0xff] %v537_v3  ;;  %v543_v6 = vld [vmem:[%s13390_s25 + $0x35b0] sm:$0xff] }
  0x75   : > { %540 = vst [vmem:[%s13395_s26 + $0x620] sm:$0xff] %v539_v4  ;;  %542 = vst [vmem:[%s13395_s26 + $0x628] sm:$0xff] %v541_v5  ;;  %v545_v7 = vld [vmem:[%s13390_s25 + $0x35b8] sm:$0xff]  ;;  %v547_v8 = vld [vmem:[%s13390_s25 + $0x35c0] sm:$0xff] }
  0x76   : > { %544 = vst [vmem:[%s13395_s26 + $0x630] sm:$0xff] %v543_v6  ;;  %546 = vst [vmem:[%s13395_s26 + $0x638] sm:$0xff] %v545_v7  ;;  %v549_v9 = vld [vmem:[%s13390_s25 + $0x35c8] sm:$0xff]  ;;  %v551_v10 = vld [vmem:[%s13390_s25 + $0x35d0] sm:$0xff] }
  0x77   : > { %548 = vst [vmem:[%s13395_s26 + $0x640] sm:$0xff] %v547_v8  ;;  %v553_v11 = vld [vmem:[%s13390_s25 + $0x35d8] sm:$0xff]  ;;  %550 = vst [vmem:[%s13395_s26 + $0x648] sm:$0xff] %v549_v9  ;;  %v555_v12 = vld [vmem:[%s13390_s25 + $0x35e0] sm:$0xff] }
  0x78   : > { %552 = vst [vmem:[%s13395_s26 + $0x650] sm:$0xff] %v551_v10  ;;  %554 = vst [vmem:[%s13395_s26 + $0x658] sm:$0xff] %v553_v11  ;;  %v557_v13 = vld [vmem:[%s13390_s25 + $0x35e8] sm:$0xff]  ;;  %v559_v14 = vld [vmem:[%s13390_s25 + $0x35f0] sm:$0xff] }
  0x79   : > { %556 = vst [vmem:[%s13395_s26 + $0x660] sm:$0xff] %v555_v12  ;;  %558 = vst [vmem:[%s13395_s26 + $0x668] sm:$0xff] %v557_v13  ;;  %v561_v15 = vld [vmem:[%s13390_s25 + $0x35f8] sm:$0xff]  ;;  %v563_v16 = vld [vmem:[%s13390_s25 + $0x3600] sm:$0xff] }
  0x7a   : > { %560 = vst [vmem:[%s13395_s26 + $0x670] sm:$0xff] %v559_v14  ;;  %v565_v17 = vld [vmem:[%s13390_s25 + $0x3608] sm:$0xff]  ;;  %562 = vst [vmem:[%s13395_s26 + $0x678] sm:$0xff] %v561_v15  ;;  %v567_v18 = vld [vmem:[%s13390_s25 + $0x3610] sm:$0xff] }
  0x7b   : > { %564 = vst [vmem:[%s13395_s26 + $0x680] sm:$0xff] %v563_v16  ;;  %566 = vst [vmem:[%s13395_s26 + $0x688] sm:$0xff] %v565_v17  ;;  %v569_v19 = vld [vmem:[%s13390_s25 + $0x3618] sm:$0xff]  ;;  %v571_v20 = vld [vmem:[%s13390_s25 + $0x3620] sm:$0xff] }
  0x7c   : > { %568 = vst [vmem:[%s13395_s26 + $0x690] sm:$0xff] %v567_v18  ;;  %570 = vst [vmem:[%s13395_s26 + $0x698] sm:$0xff] %v569_v19  ;;  %v573_v21 = vld [vmem:[%s13390_s25 + $0x3628] sm:$0xff]  ;;  %v575_v22 = vld [vmem:[%s13390_s25 + $0x3630] sm:$0xff] }
  0x7d   : > { %572 = vst [vmem:[%s13395_s26 + $0x6a0] sm:$0xff] %v571_v20  ;;  %v577_v23 = vld [vmem:[%s13390_s25 + $0x3638] sm:$0xff]  ;;  %574 = vst [vmem:[%s13395_s26 + $0x6a8] sm:$0xff] %v573_v21  ;;  %v579_v24 = vld [vmem:[%s13390_s25 + $0x3640] sm:$0xff] }
  0x7e   : > { %576 = vst [vmem:[%s13395_s26 + $0x6b0] sm:$0xff] %v575_v22  ;;  %578 = vst [vmem:[%s13395_s26 + $0x6b8] sm:$0xff] %v577_v23  ;;  %v581_v25 = vld [vmem:[%s13390_s25 + $0x3648] sm:$0xff]  ;;  %v583_v26 = vld [vmem:[%s13390_s25 + $0x3650] sm:$0xff] }
  0x7f   : > { %580 = vst [vmem:[%s13395_s26 + $0x6c0] sm:$0xff] %v579_v24  ;;  %582 = vst [vmem:[%s13395_s26 + $0x6c8] sm:$0xff] %v581_v25  ;;  %v585_v27 = vld [vmem:[%s13390_s25 + $0x3658] sm:$0xff]  ;;  %v587_v28 = vld [vmem:[%s13390_s25 + $0x3660] sm:$0xff] }
  0x80   : > { %584 = vst [vmem:[%s13395_s26 + $0x6d0] sm:$0xff] %v583_v26  ;;  %v589_v29 = vld [vmem:[%s13390_s25 + $0x3668] sm:$0xff]  ;;  %586 = vst [vmem:[%s13395_s26 + $0x6d8] sm:$0xff] %v585_v27  ;;  %v591_v30 = vld [vmem:[%s13390_s25 + $0x3670] sm:$0xff] }
  0x81   : > { %588 = vst [vmem:[%s13395_s26 + $0x6e0] sm:$0xff] %v587_v28  ;;  %590 = vst [vmem:[%s13395_s26 + $0x6e8] sm:$0xff] %v589_v29  ;;  %v593_v31 = vld [vmem:[%s13390_s25 + $0x3678] sm:$0xff]  ;;  %v595_v32 = vld [vmem:[%s13390_s25 + $0x3680] sm:$0xff] }
  0x82   : > { %592 = vst [vmem:[%s13395_s26 + $0x6f0] sm:$0xff] %v591_v30  ;;  %594 = vst [vmem:[%s13395_s26 + $0x6f8] sm:$0xff] %v593_v31  ;;  %v597_v33 = vld [vmem:[%s13390_s25 + $0x3688] sm:$0xff]  ;;  %v599_v34 = vld [vmem:[%s13390_s25 + $0x3690] sm:$0xff] }
  0x83   : > { %596 = vst [vmem:[%s13395_s26 + $0x700] sm:$0xff] %v595_v32  ;;  %v601_v35 = vld [vmem:[%s13390_s25 + $0x3698] sm:$0xff]  ;;  %598 = vst [vmem:[%s13395_s26 + $0x708] sm:$0xff] %v597_v33  ;;  %v603_v36 = vld [vmem:[%s13390_s25 + $0x4020] sm:$0xff] }
  0x84   : > { %600 = vst [vmem:[%s13395_s26 + $0x710] sm:$0xff] %v599_v34  ;;  %602 = vst [vmem:[%s13395_s26 + $0x718] sm:$0xff] %v601_v35  ;;  %v605_v37 = vld [vmem:[%s13390_s25 + $0x4028] sm:$0xff]  ;;  %v607_v38 = vld [vmem:[%s13390_s25 + $0x4030] sm:$0xff] }
  0x85   : > { %604 = vst [vmem:[%s13395_s26 + $0x720] sm:$0xff] %v603_v36  ;;  %606 = vst [vmem:[%s13395_s26 + $0x728] sm:$0xff] %v605_v37  ;;  %v609_v39 = vld [vmem:[%s13390_s25 + $0x4038] sm:$0xff]  ;;  %v611_v40 = vld [vmem:[%s13390_s25 + $0x4040] sm:$0xff] }
  0x86   : > { %608 = vst [vmem:[%s13395_s26 + $0x730] sm:$0xff] %v607_v38  ;;  %v613_v41 = vld [vmem:[%s13390_s25 + $0x4048] sm:$0xff]  ;;  %610 = vst [vmem:[%s13395_s26 + $0x738] sm:$0xff] %v609_v39  ;;  %v615_v42 = vld [vmem:[%s13390_s25 + $0x4050] sm:$0xff] }
  0x87   : > { %612 = vst [vmem:[%s13395_s26 + $0x740] sm:$0xff] %v611_v40  ;;  %614 = vst [vmem:[%s13395_s26 + $0x748] sm:$0xff] %v613_v41  ;;  %v617_v43 = vld [vmem:[%s13390_s25 + $0x4058] sm:$0xff]  ;;  %v619_v44 = vld [vmem:[%s13390_s25 + $0x4060] sm:$0xff] }
  0x88   : > { %616 = vst [vmem:[%s13395_s26 + $0x750] sm:$0xff] %v615_v42  ;;  %618 = vst [vmem:[%s13395_s26 + $0x758] sm:$0xff] %v617_v43  ;;  %v621_v45 = vld [vmem:[%s13390_s25 + $0x4068] sm:$0xff]  ;;  %v623_v46 = vld [vmem:[%s13390_s25 + $0x4070] sm:$0xff] }
  0x89   : > { %620 = vst [vmem:[%s13395_s26 + $0x760] sm:$0xff] %v619_v44  ;;  %v625_v47 = vld [vmem:[%s13390_s25 + $0x4078] sm:$0xff]  ;;  %622 = vst [vmem:[%s13395_s26 + $0x768] sm:$0xff] %v621_v45  ;;  %v627_v48 = vld [vmem:[%s13390_s25 + $0x4080] sm:$0xff] }
  0x8a   : > { %624 = vst [vmem:[%s13395_s26 + $0x770] sm:$0xff] %v623_v46  ;;  %626 = vst [vmem:[%s13395_s26 + $0x778] sm:$0xff] %v625_v47  ;;  %v629_v49 = vld [vmem:[%s13390_s25 + $0x4088] sm:$0xff]  ;;  %v631_v50 = vld [vmem:[%s13390_s25 + $0x4090] sm:$0xff] }
  0x8b   : > { %628 = vst [vmem:[%s13395_s26 + $0x780] sm:$0xff] %v627_v48  ;;  %630 = vst [vmem:[%s13395_s26 + $0x788] sm:$0xff] %v629_v49  ;;  %v633_v51 = vld [vmem:[%s13390_s25 + $0x4098] sm:$0xff]  ;;  %v635_v52 = vld [vmem:[%s13390_s25 + $0x40a0] sm:$0xff] }
  0x8c   : > { %632 = vst [vmem:[%s13395_s26 + $0x790] sm:$0xff] %v631_v50  ;;  %v637_v53 = vld [vmem:[%s13390_s25 + $0x40a8] sm:$0xff]  ;;  %634 = vst [vmem:[%s13395_s26 + $0x798] sm:$0xff] %v633_v51  ;;  %v639_v54 = vld [vmem:[%s13390_s25 + $0x40b0] sm:$0xff] }
  0x8d   : > { %636 = vst [vmem:[%s13395_s26 + $0x7a0] sm:$0xff] %v635_v52  ;;  %638 = vst [vmem:[%s13395_s26 + $0x7a8] sm:$0xff] %v637_v53  ;;  %v641_v55 = vld [vmem:[%s13390_s25 + $0x40b8] sm:$0xff]  ;;  %v643_v56 = vld [vmem:[%s13390_s25 + $0x40c0] sm:$0xff] }
  0x8e   : > { %640 = vst [vmem:[%s13395_s26 + $0x7b0] sm:$0xff] %v639_v54  ;;  %642 = vst [vmem:[%s13395_s26 + $0x7b8] sm:$0xff] %v641_v55  ;;  %v645_v57 = vld [vmem:[%s13390_s25 + $0x40c8] sm:$0xff]  ;;  %v647_v58 = vld [vmem:[%s13390_s25 + $0x40d0] sm:$0xff] }
  0x8f   : > { %644 = vst [vmem:[%s13395_s26 + $0x7c0] sm:$0xff] %v643_v56  ;;  %v649_v59 = vld [vmem:[%s13390_s25 + $0x40d8] sm:$0xff]  ;;  %646 = vst [vmem:[%s13395_s26 + $0x7c8] sm:$0xff] %v645_v57  ;;  %v651_v60 = vld [vmem:[%s13390_s25 + $0x40e0] sm:$0xff] }
  0x90   : > { %648 = vst [vmem:[%s13395_s26 + $0x7d0] sm:$0xff] %v647_v58  ;;  %650 = vst [vmem:[%s13395_s26 + $0x7d8] sm:$0xff] %v649_v59  ;;  %v653_v61 = vld [vmem:[%s13390_s25 + $0x40e8] sm:$0xff]  ;;  %v655_v62 = vld [vmem:[%s13390_s25 + $0x40f0] sm:$0xff] }
  0x91   : > { %652 = vst [vmem:[%s13395_s26 + $0x7e0] sm:$0xff] %v651_v60  ;;  %654 = vst [vmem:[%s13395_s26 + $0x7e8] sm:$0xff] %v653_v61  ;;  %v657_v63 = vld [vmem:[%s13390_s25 + $0x40f8] sm:$0xff]  ;;  %v659_v0 = vld [vmem:[%s13390_s25 + $0x4100] sm:$0xff] }
  0x92   : > { %656 = vst [vmem:[%s13395_s26 + $0x7f0] sm:$0xff] %v655_v62  ;;  %v661_v1 = vld [vmem:[%s13390_s25 + $0x4108] sm:$0xff]  ;;  %658 = vst [vmem:[%s13395_s26 + $0x7f8] sm:$0xff] %v657_v63  ;;  %v663_v2 = vld [vmem:[%s13390_s25 + $0x4110] sm:$0xff] }
  0x93   : > { %660 = vst [vmem:[%s13395_s26 + $0x800] sm:$0xff] %v659_v0  ;;  %662 = vst [vmem:[%s13395_s26 + $0x808] sm:$0xff] %v661_v1  ;;  %v665_v3 = vld [vmem:[%s13390_s25 + $0x4118] sm:$0xff]  ;;  %v667_v4 = vld [vmem:[%s13390_s25 + $0x4120] sm:$0xff] }
  0x94   : > { %664 = vst [vmem:[%s13395_s26 + $0x810] sm:$0xff] %v663_v2  ;;  %666 = vst [vmem:[%s13395_s26 + $0x818] sm:$0xff] %v665_v3  ;;  %v669_v5 = vld [vmem:[%s13390_s25 + $0x4128] sm:$0xff]  ;;  %v671_v6 = vld [vmem:[%s13390_s25 + $0x4130] sm:$0xff] }
  0x95   : > { %668 = vst [vmem:[%s13395_s26 + $0x820] sm:$0xff] %v667_v4  ;;  %v673_v7 = vld [vmem:[%s13390_s25 + $0x4138] sm:$0xff]  ;;  %670 = vst [vmem:[%s13395_s26 + $0x828] sm:$0xff] %v669_v5  ;;  %v675_v8 = vld [vmem:[%s13390_s25 + $0x4140] sm:$0xff] }
  0x96   : > { %672 = vst [vmem:[%s13395_s26 + $0x830] sm:$0xff] %v671_v6  ;;  %674 = vst [vmem:[%s13395_s26 + $0x838] sm:$0xff] %v673_v7  ;;  %v677_v9 = vld [vmem:[%s13390_s25 + $0x4148] sm:$0xff] }
  0x97   : > { %676 = vst [vmem:[%s13395_s26 + $0x840] sm:$0xff] %v675_v8  ;;  %678 = vst [vmem:[%s13395_s26 + $0x848] sm:$0xff] %v677_v9 }
  0x98 PF: > { %p9816_p5 = scmp.ge.s32.totalorder %s13331_s14, 1  ;;  %p692_p6 = scmp.lt.s32.totalorder %s13331_s14, 10 }
  0x9a   : > { %p693_p7 = pnand %p9816_p5, %p692_p6 }
  0x9b   : > { %s699_s27 = sand.u32 (!%p693_p7), 1, %s13323_s12   ;;  %s723_s28 = smul.u32 (!%p693_p7), 1216, %s13370_s15 }
  0x9c   : > { %696 = sbr.rel (%p693_p7) target bundleno = 1159 (0x487), region = 51  ;;  %p9818_p9 = scmp.ne.s32.totalorder (!%p693_p7), %s13370_s15, 0 }
  0x9d   : > { %s12257_s29 = smul.u32 (!%p693_p7), 2128, %s699_s27  ;;  %p724_p8 = scmp.lt.s32.totalorder (!%p693_p7), %s723_s28, 10943 }
  0x9f   : > { %s13935_s7 = scalar_lea.vmem (!%p693_p7), [#allocation2], %s12257_s29 }
  0xa3   : > { %s15247_s28 = smov (!%p724_p8, %s723_s28), 10943  ;;  %733 = sbr.rel (%p9818_p9) target bundleno = 170 (0xaa), region = 59 }
  0xa4   : > { %s9817_s30 = sshll.u32 %s15247_s28, 2  ;;  %vm734_vm0 = vcmask (!%p9818_p9), 580608   ;;  %vm741_vm1 = vcmask (!%p9818_p9), 578560   ;;  %v13333_v10 = vmov (!%p9818_p9), 0.0  }
  0xa5   : > { %s13933_s6 = scalar_lea.vmem %s15240_s1, %s9817_s30  ;;  %735 = vst.msk [vmem:[%s15242_s3] sm:$0xff] (!%p9818_p9), %vm734_vm0, %v13333_v10  ;;  %736 = vst.msk [vmem:[%s15242_s3 + $0x8] sm:$0xff] (!%p9818_p9), %vm734_vm0, %v13333_v10 }
  0xa6   : > { %737 = vst.msk [vmem:[%s15242_s3 + $0x10] sm:$0xff] (!%p9818_p9), %vm734_vm0, %v13333_v10  ;;  %738 = vst.msk [vmem:[%s15242_s3 + $0x18] sm:$0xff] (!%p9818_p9), %vm734_vm0, %v13333_v10 }
  0xa7   : > { %739 = vst.msk [vmem:[%s15242_s3 + $0x20] sm:$0xff] (!%p9818_p9), %vm734_vm0, %v13333_v10  ;;  %740 = vst.msk [vmem:[%s15242_s3 + $0x28] sm:$0xff] (!%p9818_p9), %vm734_vm0, %v13333_v10 }
  0xa8   : > { %742 = vst.msk [vmem:[%s15242_s3 + $0x30] sm:$0x3f] (!%p9818_p9), %vm741_vm1, %v13333_v10 }
  0xaa PF: > { %v12283_v11 = vld [vmem:[%s13933_s6 + $0x40] sm:$0xff]   ;;  %v12287_v15 = vld [vmem:[%s13933_s6 + $0x48] sm:$0xff]   ;;  %v12291_v19 = vld [vmem:[%s13933_s6 + $0x50] sm:$0xff]   ;;  %vm9725_vm2 = vcmask 580608   ;;  %vm9732_vm3 = vcmask 578560   ;;  %p10731_p10 = scmp.ne.s32.totalorder %s13370_s15, 8 }
  0xab   : > { %v12284_v12 = vld [vmem:[%s13933_s6 + $0xc0] sm:$0xff]   ;;  %10736 = vmatprep.subr.bf16.mxu0 %v12283_v11  ;;  %v12288_v16 = vld [vmem:[%s13933_s6 + $0xc8] sm:$0xff]   ;;  %v12292_v20 = vld [vmem:[%s13933_s6 + $0xd0] sm:$0xff]  }
  0xac   : > { %v12285_v13 = vld [vmem:[%s13933_s6] sm:$0xff]   ;;  %10776 = vmatprep.subr.bf16.mxu1 %v12284_v12  ;;  %v12289_v17 = vld [vmem:[%s13933_s6 + $0x8] sm:$0xff]   ;;  %v12293_v21 = vld [vmem:[%s13933_s6 + $0x10] sm:$0xff]  }
  0xad   : > { %v12286_v14 = vld [vmem:[%s13933_s6 + $0x80] sm:$0xff]   ;;  %10737 = vmatpush3.bf16.msra.mxu0 %v12285_v13  ;;  %v12290_v18 = vld [vmem:[%s13933_s6 + $0x88] sm:$0xff]   ;;  %v12294_v22 = vld [vmem:[%s13933_s6 + $0x90] sm:$0xff]  }
  0xae   : > { %10777 = vmatpush3.bf16.msra.mxu1 %v12286_v14  ;;  %10738 = vmatprep.subr.bf16.mxu0 %v12287_v15  ;;  %v12295_v23 = vld [vmem:[%s13933_s6 + $0x58] sm:$0xff]   ;;  %v12299_v27 = vld [vmem:[%s13933_s6 + $0x60] sm:$0xff]   ;;  %v12303_v31 = vld [vmem:[%s13933_s6 + $0x68] sm:$0xff]  }
  0xaf   : > { %10778 = vmatprep.subr.bf16.mxu1 %v12288_v16  ;;  %v12296_v24 = vld [vmem:[%s13933_s6 + $0xd8] sm:$0xff]   ;;  %v12300_v28 = vld [vmem:[%s13933_s6 + $0xe0] sm:$0xff]   ;;  %v12304_v32 = vld [vmem:[%s13933_s6 + $0xe8] sm:$0xff]  }
  0xb0   : > { %v12297_v25 = vld [vmem:[%s13933_s6 + $0x18] sm:$0xff]   ;;  %v12301_v29 = vld [vmem:[%s13933_s6 + $0x20] sm:$0xff]   ;;  %v12305_v33 = vld [vmem:[%s13933_s6 + $0x28] sm:$0xff]  }
  0xb1   : > { %10739 = vmatpush3.bf16.msra.mxu0 %v12289_v17  ;;  %v12298_v26 = vld [vmem:[%s13933_s6 + $0x98] sm:$0xff]   ;;  %v12302_v30 = vld [vmem:[%s13933_s6 + $0xa0] sm:$0xff]   ;;  %v12306_v34 = vld [vmem:[%s13933_s6 + $0xa8] sm:$0xff]  }
  0xb2   : > { %10779 = vmatpush3.bf16.msra.mxu1 %v12290_v18  ;;  %10740 = vmatprep.subr.bf16.mxu0 %v12291_v19  ;;  %v12307_v35 = vld [vmem:[%s13933_s6 + $0x70] sm:$0xff]   ;;  %v12311_v39 = vld [vmem:[%s13933_s6 + $0x78] sm:$0xff]   ;;  %v12321_v47 = vld [vmem:[%s13933_s6 + $0x140] sm:$0xff]  }
  0xb3   : > { %10780 = vmatprep.subr.bf16.mxu1 %v12292_v20  ;;  %v12308_v36 = vld [vmem:[%s13933_s6 + $0xf0] sm:$0xff]   ;;  %v12312_v40 = vld [vmem:[%s13933_s6 + $0xf8] sm:$0xff]   ;;  %v12322_v48 = vld [vmem:[%s13933_s6 + $0x1c0] sm:$0xff]  }
  0xb4   : > { %v12309_v37 = vld [vmem:[%s13933_s6 + $0x30] sm:$0xff]   ;;  %v12313_v41 = vld [vmem:[%s13933_s6 + $0x38] sm:$0xff]   ;;  %v12323_v49 = vld [vmem:[%s13933_s6 + $0x100] sm:$0xff]  }
  0xb5   : > { %10741 = vmatpush3.bf16.msra.mxu0 %v12293_v21  ;;  %v12310_v38 = vld [vmem:[%s13933_s6 + $0xb0] sm:$0xff]   ;;  %v12314_v42 = vld [vmem:[%s13933_s6 + $0xb8] sm:$0xff]   ;;  %v12324_v50 = vld [vmem:[%s13933_s6 + $0x180] sm:$0xff]  }
  0xb6   : > { %10781 = vmatpush3.bf16.msra.mxu1 %v12294_v22  ;;  %10742 = vmatprep.subr.bf16.mxu0 %v12295_v23  ;;  %v12315_v43 = vld [vmem:[%s13935_s7] ss:$304 sps:$4 sm:$0xff]   ;;  %v12317_v44 = vld [vmem:[%s13935_s7 + $0x4] ss:$304 sps:$4 sm:$0xff]   ;;  %v12318_v45 = vld [vmem:[%s13935_s7 + $0x8] ss:$304 sps:$4 sm:$0xff]  }
  0xb7   : > { %10782 = vmatprep.subr.bf16.mxu1 %v12296_v24  ;;  %v12320_v46 = vld [vmem:[%s13935_s7 + $0xc] ss:$304 sps:$4 sm:$0xff]   ;;  %7318 = vmatprep.mubr.bf16.mxu0 %v12317_v44  ;;  %v12329_v55 = vld [vmem:[%s13935_s7 + $0x264] ss:$304 sps:$4 sm:$0xff]   ;;  %v12333_v57 = vld [vmem:[%s13935_s7 + $0x260] ss:$304 sps:$4 sm:$0xff]  }
  0xb8   : > { %7382 = vmatprep.mubr.bf16.mxu1 %v12320_v46  ;;  %v12325_v51 = vld [vmem:[%s13933_s6 + $0x148] sm:$0xff]   ;;  %v12335_v59 = vld [vmem:[%s13933_s6 + $0x150] sm:$0xff]   ;;  %v12339_v63 = vld [vmem:[%s13933_s6 + $0x158] sm:$0xff]  }
  0xb9   : > { %10743 = vmatpush3.bf16.msra.mxu0 %v12297_v25  ;;  %v12326_v52 = vld [vmem:[%s13933_s6 + $0x1c8] sm:$0xff]   ;;  %v12336_v60 = vld [vmem:[%s13933_s6 + $0x1d0] sm:$0xff]   ;;  %v12340_v0 = vld [vmem:[%s13933_s6 + $0x1d8] sm:$0xff]  }
  0xba   : > { %10783 = vmatpush3.bf16.msra.mxu1 %v12298_v26  ;;  %10744 = vmatprep.subr.bf16.mxu0 %v12299_v27  ;;  %v12327_v53 = vld [vmem:[%s13933_s6 + $0x108] sm:$0xff]   ;;  %v12337_v61 = vld [vmem:[%s13933_s6 + $0x110] sm:$0xff]   ;;  %v12341_v1 = vld [vmem:[%s13933_s6 + $0x118] sm:$0xff]  }
  0xbb   : > { %10784 = vmatprep.subr.bf16.mxu1 %v12300_v28  ;;  %v12328_v54 = vld [vmem:[%s13933_s6 + $0x188] sm:$0xff]   ;;  %v12338_v62 = vld [vmem:[%s13933_s6 + $0x190] sm:$0xff]   ;;  %v12342_v2 = vld [vmem:[%s13933_s6 + $0x198] sm:$0xff]  }
  0xbc   : > { %v12331_v56 = vld [vmem:[%s13935_s7 + $0x26c] ss:$304 sps:$4 sm:$0xff]   ;;  %v12334_v58 = vld [vmem:[%s13935_s7 + $0x268] ss:$304 sps:$4 sm:$0xff]   ;;  %v12343_v3 = vld [vmem:[%s13935_s7 + $0x4c4] ss:$304 sps:$4 sm:$0xff]  }
  0xbd   : > { %10745 = vmatpush3.bf16.msra.mxu0 %v12301_v29  ;;  %v12345_v4 = vld [vmem:[%s13935_s7 + $0x4cc] ss:$304 sps:$4 sm:$0xff]   ;;  %v12347_v5 = vld [vmem:[%s13935_s7 + $0x4c0] ss:$304 sps:$4 sm:$0xff]   ;;  %v12348_v6 = vld [vmem:[%s13935_s7 + $0x4c8] ss:$304 sps:$4 sm:$0xff]  }
  0xbe   : > { %10785 = vmatpush3.bf16.msra.mxu1 %v12302_v30  ;;  %10746 = vmatprep.subr.bf16.mxu0 %v12303_v31  ;;  %v12349_v7 = vld [vmem:[%s13933_s6 + $0x160] sm:$0xff]   ;;  %v12353_v11 = vld [vmem:[%s13933_s6 + $0x168] sm:$0xff]   ;;  %v12361_v21 = vld [vmem:[%s13933_s6 + $0x170] sm:$0xff]  }
  0xbf   : > { %10786 = vmatprep.subr.bf16.mxu1 %v12304_v32  ;;  %v12350_v8 = vld [vmem:[%s13933_s6 + $0x1e0] sm:$0xff]   ;;  %v12354_v12 = vld [vmem:[%s13933_s6 + $0x1e8] sm:$0xff]   ;;  %v12362_v22 = vld [vmem:[%s13933_s6 + $0x1f0] sm:$0xff]  }
  0xc0   : > { %v12351_v9 = vld [vmem:[%s13933_s6 + $0x120] sm:$0xff]   ;;  %v12355_v13 = vld [vmem:[%s13933_s6 + $0x128] sm:$0xff]   ;;  %v12363_v23 = vld [vmem:[%s13933_s6 + $0x130] sm:$0xff]  }
  0xc1   : > { %10747 = vmatpush3.bf16.msra.mxu0 %v12305_v33  ;;  %v12352_v10 = vld [vmem:[%s13933_s6 + $0x1a0] sm:$0xff]   ;;  %v12356_v14 = vld [vmem:[%s13933_s6 + $0x1a8] sm:$0xff]   ;;  %v12364_v24 = vld [vmem:[%s13933_s6 + $0x1b0] sm:$0xff]  }
  0xc2   : > { %10787 = vmatpush3.bf16.msra.mxu1 %v12306_v34  ;;  %10748 = vmatprep.subr.bf16.mxu0 %v12307_v35  ;;  %v978_v15 = vld [vmem:[%s13935_s7 + $0x720] sm:$0x77]  ;;  %v979_v16 = vld [vmem:[%s13935_s7 + $0x728] sm:$0x77] }
  0xc3   : > { %10788 = vmatprep.subr.bf16.mxu1 %v12308_v36  ;;  %v10048_v17 = vcombine.high %v978_v15, %v978_v15  ;;  %v10050_v18 = vcombine.high %v979_v16, %v979_v16  ;;  %v10047_v19 = vcombine.low %v978_v15, %v978_v15  ;;  %v10049_v20 = vcombine.low %v979_v16, %v979_v16  ;;  %v12365_v25 = vld [vmem:[%s13933_s6 + $0x178] sm:$0xff]   ;;  %v12369_v29 = vld [vmem:[%s13935_s7 + $0x10] ss:$304 sps:$4 sm:$0xff]   ;;  %v12371_v30 = vld [vmem:[%s13935_s7 + $0x14] ss:$304 sps:$4 sm:$0xff]  }
  0xc4   : > { %v12366_v26 = vld [vmem:[%s13933_s6 + $0x1f8] sm:$0xff]   ;;  %v12375_v33 = vld [vmem:[%s13933_s6 + $0x240] sm:$0xff]   ;;  %v12390_v46 = vld [vmem:[%s13933_s6 + $0x2d0] sm:$0xff]  }
  0xc5   : > { %10749 = vmatpush3.bf16.msra.mxu0 %v12309_v37  ;;  %v12367_v27 = vld [vmem:[%s13933_s6 + $0x138] sm:$0xff]   ;;  %v12376_v34 = vld [vmem:[%s13933_s6 + $0x2c0] sm:$0xff]   ;;  %v12379_v37 = vld [vmem:[%s13933_s6 + $0x248] sm:$0xff]  }
  0xc6   : > { %10789 = vmatpush3.bf16.msra.mxu1 %v12310_v38  ;;  %10750 = vmatprep.subr.bf16.mxu0 %v12311_v39  ;;  %v12368_v28 = vld [vmem:[%s13933_s6 + $0x1b8] sm:$0xff]   ;;  %v12377_v35 = vld [vmem:[%s13933_s6 + $0x200] sm:$0xff]   ;;  %v12380_v38 = vld [vmem:[%s13933_s6 + $0x2c8] sm:$0xff]  }
  0xc7   : > { %10790 = vmatprep.subr.bf16.mxu1 %v12312_v40  ;;  %v12372_v31 = vld [vmem:[%s13935_s7 + $0x18] ss:$304 sps:$4 sm:$0xff]   ;;  %v12374_v32 = vld [vmem:[%s13935_s7 + $0x1c] ss:$304 sps:$4 sm:$0xff]   ;;  %v12378_v36 = vld [vmem:[%s13933_s6 + $0x280] sm:$0xff]  }
  0xc8   : > { %v12381_v39 = vld [vmem:[%s13933_s6 + $0x208] sm:$0xff]   ;;  %v12423_v15 = vld [vmem:[%s13935_s7 + $0x20] ss:$304 sps:$4 sm:$0xff]   ;;  %v12425_v16 = vld [vmem:[%s13935_s7 + $0x24] ss:$304 sps:$4 sm:$0xff]  }
  0xc9   : > { %10751 = vmatpush3.bf16.msra.mxu0 %v12313_v41  ;;  %v12382_v40 = vld [vmem:[%s13933_s6 + $0x288] sm:$0xff]   ;;  %v12383_v41 = vld [vmem:[%s13935_s7 + $0x274] ss:$304 sps:$4 sm:$0xff]  }
  0xca   : > { %10791 = vmatpush3.bf16.msra.mxu1 %v12314_v42  ;;  %10816 = vmatprep.subr.bf16.mxu0 %v12321_v47  ;;  %v12385_v42 = vld [vmem:[%s13935_s7 + $0x27c] ss:$304 sps:$4 sm:$0xff]   ;;  %v12388_v44 = vld [vmem:[%s13935_s7 + $0x278] ss:$304 sps:$4 sm:$0xff]   ;;  %v12391_v47 = vld [vmem:[%s13933_s6 + $0x210] sm:$0xff]  }
  0xcb   : > { %10856 = vmatprep.subr.bf16.mxu1 %v12322_v48  ;;  %v12392_v48 = vld [vmem:[%s13933_s6 + $0x290] sm:$0xff]  }
  0xcc   : > { %7319 = vmatmul.mubr.bf16.vlgmr.msra.gmra.mrb[0].mxu0 %v12315_v43  ;;  %v12387_v43 = vld [vmem:[%s13935_s7 + $0x270] ss:$304 sps:$4 sm:$0xff]  }
  0xcd   : > { %7383 = vmatmul.mubr.bf16.vlgmr.msra.gmra.mrb[0].mxu1 %v12318_v45  ;;  %10817 = vmatpush3.bf16.msra.mxu0 %v12323_v49  ;;  %v12389_v45 = vld [vmem:[%s13933_s6 + $0x250] sm:$0xff]   ;;  %v12393_v49 = vld [vmem:[%s13933_s6 + $0x258] sm:$0xff]  }
  0xce   : > { %10857 = vmatpush3.bf16.msra.mxu1 %v12324_v50  ;;  %10818 = vmatprep.subr.bf16.mxu0 %v12325_v51  ;;  %v12394_v50 = vld [vmem:[%s13933_s6 + $0x2d8] sm:$0xff]  }
  0xcf   : > { %10858 = vmatprep.subr.bf16.mxu1 %v12326_v52  ;;  %7326 = vmatprep.mubr.bf16.mxu0 %v12329_v55  ;;  %v12395_v51 = vld [vmem:[%s13933_s6 + $0x218] sm:$0xff]   ;;  %v12401_v55 = vld [vmem:[%s13935_s7 + $0x4d0] ss:$304 sps:$4 sm:$0xff]  }
  0xd0   : > { %7390 = vmatprep.mubr.bf16.mxu1 %v12331_v56  ;;  %v12396_v52 = vld [vmem:[%s13933_s6 + $0x298] sm:$0xff]  }
  0xd1   : > { %10819 = vmatpush3.bf16.msra.mxu0 %v12327_v53  ;;  %v12397_v53 = vld [vmem:[%s13935_s7 + $0x4d4] ss:$304 sps:$4 sm:$0xff]   ;;  %v12402_v56 = vld [vmem:[%s13935_s7 + $0x4d8] ss:$304 sps:$4 sm:$0xff]  }
  0xd2   : > { %10859 = vmatpush3.bf16.msra.mxu1 %v12328_v54  ;;  %10820 = vmatprep.subr.bf16.mxu0 %v12335_v59  ;;  %v12399_v54 = vld [vmem:[%s13935_s7 + $0x4dc] ss:$304 sps:$4 sm:$0xff]   ;;  %v12405_v59 = vld [vmem:[%s13933_s6 + $0x220] sm:$0xff]  }
  0xd3   : > { %10860 = vmatprep.subr.bf16.mxu1 %v12336_v60  ;;  %v12406_v60 = vld [vmem:[%s13933_s6 + $0x2a0] sm:$0xff]  }
  0xd4   : > { %7327 = vmatmul.mubr.bf16.gmra.mrb[4].mxu0 %v12333_v57  ;;  %v12403_v57 = vld [vmem:[%s13933_s6 + $0x260] sm:$0xff]  }
  0xd5   : > { %7391 = vmatmul.mubr.bf16.gmra.mrb[4].mxu1 %v12334_v58  ;;  %10821 = vmatpush3.bf16.msra.mxu0 %v12337_v61  ;;  %v12404_v58 = vld [vmem:[%s13933_s6 + $0x2e0] sm:$0xff]   ;;  %v12407_v61 = vld [vmem:[%s13933_s6 + $0x268] sm:$0xff]  }
  0xd6   : > { %10861 = vmatpush3.bf16.msra.mxu1 %v12338_v62  ;;  %10822 = vmatprep.subr.bf16.mxu0 %v12339_v63  ;;  %v12408_v62 = vld [vmem:[%s13933_s6 + $0x2e8] sm:$0xff]  }
  0xd7   : > { %10862 = vmatprep.subr.bf16.mxu1 %v12340_v0  ;;  %7334 = vmatprep.mubr.bf16.mxu0 %v12343_v3  ;;  %v12409_v63 = vld [vmem:[%s13933_s6 + $0x228] sm:$0xff]  }
  0xd8   : > { %7398 = vmatprep.mubr.bf16.mxu1 %v12345_v4  ;;  %v12410_v0 = vld [vmem:[%s13933_s6 + $0x2a8] sm:$0xff]  }
  0xd9   : > { %10823 = vmatpush3.bf16.msra.mxu0 %v12341_v1  ;;  %v980_v1 = vld [vmem:[%s13935_s7 + $0x730] sm:$0x77]  ;;  %v981_v3 = vld [vmem:[%s13935_s7 + $0x738] sm:$0x77] }
  0xda   : > { %10863 = vmatpush3.bf16.msra.mxu1 %v12342_v2  ;;  %10824 = vmatprep.subr.bf16.mxu0 %v12349_v7  ;;  %v10052_v2 = vcombine.high %v980_v1, %v980_v1  ;;  %v10051_v4 = vcombine.low %v980_v1, %v980_v1  ;;  %v12415_v7 = vld [vmem:[%s13933_s6 + $0x270] sm:$0xff]  }
  0xdb   : > { %10864 = vmatprep.subr.bf16.mxu1 %v12350_v8  ;;  %v12416_v8 = vld [vmem:[%s13933_s6 + $0x2f0] sm:$0xff]  }
  0xdc   : > { %7335 = vmatmul.mubr.bf16.gmra.mrb[8].mxu0 %v12347_v5  ;;  %v10054_v5 = vcombine.high %v981_v3, %v981_v3  ;;  %v12477_v1 = vld [vmem:[%s13935_s7 + $0x30] ss:$304 sps:$4 sm:$0xff]  }
  0xdd   : > { %7399 = vmatmul.mubr.bf16.gmra.mrb[8].mxu1 %v12348_v6  ;;  %10825 = vmatpush3.bf16.msra.mxu0 %v12351_v9  ;;  %v10053_v6 = vcombine.low %v981_v3, %v981_v3  ;;  %v12417_v9 = vld [vmem:[%s13933_s6 + $0x230] sm:$0xff]   ;;  %v12480_v3 = vld [vmem:[%s13935_s7 + $0x38] ss:$304 sps:$4 sm:$0xff]  }
  0xde   : > { %10865 = vmatpush3.bf16.msra.mxu1 %v12352_v10  ;;  %10826 = vmatprep.subr.bf16.mxu0 %v12353_v11  ;;  %v12418_v10 = vld [vmem:[%s13933_s6 + $0x2b0] sm:$0xff]   ;;  %v12419_v11 = vld [vmem:[%s13933_s6 + $0x278] sm:$0xff]  }
  0xdf   : > { %10866 = vmatprep.subr.bf16.mxu1 %v12354_v12  ;;  %7342 = vmatprep.mubr.bf16.mxu0 %v10048_v17  ;;  %v12420_v12 = vld [vmem:[%s13933_s6 + $0x2f8] sm:$0xff]  }
  0xe0   : > { %7406 = vmatprep.mubr.bf16.mxu1 %v10050_v18  ;;  %v12426_v17 = vld [vmem:[%s13935_s7 + $0x28] ss:$304 sps:$4 sm:$0xff]   ;;  %v12428_v18 = vld [vmem:[%s13935_s7 + $0x2c] ss:$304 sps:$4 sm:$0xff]  }
  0xe1   : > { %10827 = vmatpush3.bf16.msra.mxu0 %v12355_v13  ;;  %v12421_v13 = vld [vmem:[%s13933_s6 + $0x238] sm:$0xff]  }
  0xe2   : > { %10867 = vmatpush3.bf16.msra.mxu1 %v12356_v14  ;;  %10828 = vmatprep.subr.bf16.mxu0 %v12361_v21  ;;  %v12422_v14 = vld [vmem:[%s13933_s6 + $0x2b8] sm:$0xff]   ;;  %v12431_v21 = vld [vmem:[%s13933_s6 + $0x300] sm:$0xff]  }
  0xe3   : > { %10868 = vmatprep.subr.bf16.mxu1 %v12362_v22  ;;  %v12432_v22 = vld [vmem:[%s13933_s6 + $0x380] sm:$0xff]  }
  0xe4   : > { %7343 = vmatmul.mubr.bf16.gmra.mrb[12].mxu0 %v10047_v19  ;;  %v12429_v19 = vld [vmem:[%s13933_s6 + $0x340] sm:$0xff]  }
  0xe5   : > { %7407 = vmatmul.mubr.bf16.gmra.mrb[12].mxu1 %v10049_v20  ;;  %10829 = vmatpush3.bf16.msra.mxu0 %v12363_v23  ;;  %v12430_v20 = vld [vmem:[%s13933_s6 + $0x3c0] sm:$0xff]   ;;  %v12433_v23 = vld [vmem:[%s13933_s6 + $0x348] sm:$0xff]  }
  0xe6   : > { %10869 = vmatpush3.bf16.msra.mxu1 %v12364_v24  ;;  %10830 = vmatprep.subr.bf16.mxu0 %v12365_v25  ;;  %v12434_v24 = vld [vmem:[%s13933_s6 + $0x3c8] sm:$0xff]  }
  0xe7   : > { %10870 = vmatprep.subr.bf16.mxu1 %v12366_v26  ;;  %7446 = vmatprep.mubr.bf16.mxu0 %v12371_v30  ;;  %v12435_v25 = vld [vmem:[%s13933_s6 + $0x308] sm:$0xff]  }
  0xe8   : > { %7510 = vmatprep.mubr.bf16.mxu1 %v12374_v32  ;;  %v12436_v26 = vld [vmem:[%s13933_s6 + $0x388] sm:$0xff]   ;;  %v12444_v32 = vld [vmem:[%s13933_s6 + $0x3d0] sm:$0xff]  }
  0xe9   : > { %10831 = vmatpush3.bf16.msra.mxu0 %v12367_v27  ;;  %v12437_v27 = vld [vmem:[%s13935_s7 + $0x284] ss:$304 sps:$4 sm:$0xff]   ;;  %v12442_v30 = vld [vmem:[%s13935_s7 + $0x288] ss:$304 sps:$4 sm:$0xff]  }
  0xea   : > { %10871 = vmatpush3.bf16.msra.mxu1 %v12368_v28  ;;  %10896 = vmatprep.subr.bf16.mxu0 %v12375_v33  ;;  %v12439_v28 = vld [vmem:[%s13935_s7 + $0x28c] ss:$304 sps:$4 sm:$0xff]   ;;  %v12445_v33 = vld [vmem:[%s13933_s6 + $0x310] sm:$0xff]  }
  0xeb   : > { %10936 = vmatprep.subr.bf16.mxu1 %v12376_v34  ;;  %v12446_v34 = vld [vmem:[%s13933_s6 + $0x390] sm:$0xff]  }
  0xec   : > { %7447 = vmatmul.mubr.bf16.vlgmr.msra.gmra.mrb[16].mxu0 %v12369_v29  ;;  %v12441_v29 = vld [vmem:[%s13935_s7 + $0x280] ss:$304 sps:$4 sm:$0xff]  }
  0xed   : > { %7511 = vmatmul.mubr.bf16.vlgmr.msra.gmra.mrb[16].mxu1 %v12372_v31  ;;  %10897 = vmatpush3.bf16.msra.mxu0 %v12377_v35  ;;  %v12443_v31 = vld [vmem:[%s13933_s6 + $0x350] sm:$0xff]   ;;  %v12447_v35 = vld [vmem:[%s13933_s6 + $0x358] sm:$0xff]  }
  0xee   : > { %10937 = vmatpush3.bf16.msra.mxu1 %v12378_v36  ;;  %10898 = vmatprep.subr.bf16.mxu0 %v12379_v37  ;;  %v12448_v36 = vld [vmem:[%s13933_s6 + $0x3d8] sm:$0xff]  }
  0xef   : > { %10938 = vmatprep.subr.bf16.mxu1 %v12380_v38  ;;  %7454 = vmatprep.mubr.bf16.mxu0 %v12383_v41  ;;  %v12449_v37 = vld [vmem:[%s13933_s6 + $0x318] sm:$0xff]   ;;  %v12455_v41 = vld [vmem:[%s13935_s7 + $0x4e0] ss:$304 sps:$4 sm:$0xff]  }
  0xf0   : > { %7518 = vmatprep.mubr.bf16.mxu1 %v12385_v42  ;;  %v12450_v38 = vld [vmem:[%s13933_s6 + $0x398] sm:$0xff]  }
  0xf1   : > { %10899 = vmatpush3.bf16.msra.mxu0 %v12381_v39  ;;  %v12451_v39 = vld [vmem:[%s13935_s7 + $0x4e4] ss:$304 sps:$4 sm:$0xff]   ;;  %v12456_v42 = vld [vmem:[%s13935_s7 + $0x4e8] ss:$304 sps:$4 sm:$0xff]  }
  0xf2   : > { %10939 = vmatpush3.bf16.msra.mxu1 %v12382_v40  ;;  %10900 = vmatprep.subr.bf16.mxu0 %v12389_v45  ;;  %v12453_v40 = vld [vmem:[%s13935_s7 + $0x4ec] ss:$304 sps:$4 sm:$0xff]   ;;  %v12459_v45 = vld [vmem:[%s13933_s6 + $0x320] sm:$0xff]  }
  0xf3   : > { %10940 = vmatprep.subr.bf16.mxu1 %v12390_v46  ;;  %v12460_v46 = vld [vmem:[%s13933_s6 + $0x3a0] sm:$0xff]  }
  0xf4   : > { %7455 = vmatmul.mubr.bf16.gmra.mrb[20].mxu0 %v12387_v43  ;;  %v12457_v43 = vld [vmem:[%s13933_s6 + $0x360] sm:$0xff]  }
  0xf5   : > { %7519 = vmatmul.mubr.bf16.gmra.mrb[20].mxu1 %v12388_v44  ;;  %10901 = vmatpush3.bf16.msra.mxu0 %v12391_v47  ;;  %v12458_v44 = vld [vmem:[%s13933_s6 + $0x3e0] sm:$0xff]   ;;  %v12461_v47 = vld [vmem:[%s13933_s6 + $0x368] sm:$0xff]  }
  0xf6   : > { %10941 = vmatpush3.bf16.msra.mxu1 %v12392_v48  ;;  %10902 = vmatprep.subr.bf16.mxu0 %v12393_v49  ;;  %v12462_v48 = vld [vmem:[%s13933_s6 + $0x3e8] sm:$0xff]  }
  0xf7   : > { %10942 = vmatprep.subr.bf16.mxu1 %v12394_v50  ;;  %7462 = vmatprep.mubr.bf16.mxu0 %v12397_v53  ;;  %v12463_v49 = vld [vmem:[%s13933_s6 + $0x328] sm:$0xff]  }
  0xf8   : > { %7526 = vmatprep.mubr.bf16.mxu1 %v12399_v54  ;;  %v12464_v50 = vld [vmem:[%s13933_s6 + $0x3a8] sm:$0xff]  }
  0xf9   : > { %10903 = vmatpush3.bf16.msra.mxu0 %v12395_v51  ;;  %v982_v51 = vld [vmem:[%s13935_s7 + $0x740] sm:$0x77] }
  0xfa   : > { %10943 = vmatpush3.bf16.msra.mxu1 %v12396_v52  ;;  %10904 = vmatprep.subr.bf16.mxu0 %v12403_v57  ;;  %v983_v52 = vld [vmem:[%s13935_s7 + $0x748] sm:$0x77]  ;;  %v10056_v53 = vcombine.high %v982_v51, %v982_v51  ;;  %v12469_v57 = vld [vmem:[%s13933_s6 + $0x370] sm:$0xff]  }
  0xfb   : > { %10944 = vmatprep.subr.bf16.mxu1 %v12404_v58  ;;  %v10058_v54 = vcombine.high %v983_v52, %v983_v52  ;;  %v12470_v58 = vld [vmem:[%s13933_s6 + $0x3f0] sm:$0xff]  }
  0xfc   : > { %7463 = vmatmul.mubr.bf16.gmra.mrb[24].mxu0 %v12401_v55  ;;  %v10055_v55 = vcombine.low %v982_v51, %v982_v51  ;;  %v12531_v51 = vld [vmem:[%s13935_s7 + $0x40] ss:$304 sps:$4 sm:$0xff]  }
  0xfd   : > { %7527 = vmatmul.mubr.bf16.gmra.mrb[24].mxu1 %v12402_v56  ;;  %10905 = vmatpush3.bf16.msra.mxu0 %v12405_v59  ;;  %v10057_v56 = vcombine.low %v983_v52, %v983_v52  ;;  %v12471_v59 = vld [vmem:[%s13933_s6 + $0x330] sm:$0xff]  }
  0xfe   : > { %10945 = vmatpush3.bf16.msra.mxu1 %v12406_v60  ;;  %10906 = vmatprep.subr.bf16.mxu0 %v12407_v61  ;;  %v12472_v60 = vld [vmem:[%s13933_s6 + $0x3b0] sm:$0xff]   ;;  %v12473_v61 = vld [vmem:[%s13933_s6 + $0x378] sm:$0xff]  }
  0xff   : > { %10946 = vmatprep.subr.bf16.mxu1 %v12408_v62  ;;  %7470 = vmatprep.mubr.bf16.mxu0 %v10052_v2  ;;  %v12474_v62 = vld [vmem:[%s13933_s6 + $0x3f8] sm:$0xff]   ;;  %v12479_v2 = vld [vmem:[%s13935_s7 + $0x34] ss:$304 sps:$4 sm:$0xff]  }
 0x100   : > { %7534 = vmatprep.mubr.bf16.mxu1 %v10054_v5  ;;  %v12483_v5 = vld [vmem:[%s13933_s6 + $0x440] sm:$0xff]  }
 0x101   : > { %10907 = vmatpush3.bf16.msra.mxu0 %v12409_v63  ;;  %v12475_v63 = vld [vmem:[%s13933_s6 + $0x338] sm:$0xff]   ;;  %v12533_v52 = vld [vmem:[%s13935_s7 + $0x44] ss:$304 sps:$4 sm:$0xff]  }
 0x102   : > { %10947 = vmatpush3.bf16.msra.mxu1 %v12410_v0  ;;  %10908 = vmatprep.subr.bf16.mxu0 %v12415_v7  ;;  %v12476_v0 = vld [vmem:[%s13933_s6 + $0x3b8] sm:$0xff]   ;;  %v12485_v7 = vld [vmem:[%s13933_s6 + $0x400] sm:$0xff]  }
 0x103   : > { %10948 = vmatprep.subr.bf16.mxu1 %v12416_v8  ;;  %v12486_v8 = vld [vmem:[%s13933_s6 + $0x480] sm:$0xff]  }
 0x104   : > { %7471 = vmatmul.mubr.bf16.gmra.mrb[28].mxu0 %v10051_v4  ;;  %v12482_v4 = vld [vmem:[%s13935_s7 + $0x3c] ss:$304 sps:$4 sm:$0xff]  }
 0x105   : > { %7535 = vmatmul.mubr.bf16.gmra.mrb[28].mxu1 %v10053_v6  ;;  %10909 = vmatpush3.bf16.msra.mxu0 %v12417_v9  ;;  %v12484_v6 = vld [vmem:[%s13933_s6 + $0x4c0] sm:$0xff]   ;;  %v12487_v9 = vld [vmem:[%s13933_s6 + $0x448] sm:$0xff]  }
 0x106   : > { %10949 = vmatpush3.bf16.msra.mxu1 %v12418_v10  ;;  %10910 = vmatprep.subr.bf16.mxu0 %v12419_v11  ;;  %v12488_v10 = vld [vmem:[%s13933_s6 + $0x4c8] sm:$0xff]  }
 0x107   : > { %10950 = vmatprep.subr.bf16.mxu1 %v12420_v12  ;;  %7574 = vmatprep.mubr.bf16.mxu0 %v12425_v16  ;;  %v12489_v11 = vld [vmem:[%s13933_s6 + $0x408] sm:$0xff]  }
 0x108   : > { %7638 = vmatprep.mubr.bf16.mxu1 %v12428_v18  ;;  %v12490_v12 = vld [vmem:[%s13933_s6 + $0x488] sm:$0xff]   ;;  %v12498_v18 = vld [vmem:[%s13933_s6 + $0x4d0] sm:$0xff]  }
 0x109   : > { %10911 = vmatpush3.bf16.msra.mxu0 %v12421_v13  ;;  %v12491_v13 = vld [vmem:[%s13935_s7 + $0x294] ss:$304 sps:$4 sm:$0xff]   ;;  %v12496_v16 = vld [vmem:[%s13935_s7 + $0x298] ss:$304 sps:$4 sm:$0xff]  }
 0x10a   : > { %10951 = vmatpush3.bf16.msra.mxu1 %v12422_v14  ;;  %10976 = vmatprep.subr.bf16.mxu0 %v12429_v19  ;;  %v12493_v14 = vld [vmem:[%s13935_s7 + $0x29c] ss:$304 sps:$4 sm:$0xff]   ;;  %v12499_v19 = vld [vmem:[%s13933_s6 + $0x410] sm:$0xff]  }
 0x10b   : > { %11016 = vmatprep.subr.bf16.mxu1 %v12430_v20  ;;  %v12500_v20 = vld [vmem:[%s13933_s6 + $0x490] sm:$0xff]  }
 0x10c   : > { %7575 = vmatmul.mubr.bf16.vlgmr.msra.gmra.mrb[32].mxu0 %v12423_v15  ;;  %v12495_v15 = vld [vmem:[%s13935_s7 + $0x290] ss:$304 sps:$4 sm:$0xff]  }
 0x10d   : > { %7639 = vmatmul.mubr.bf16.vlgmr.msra.gmra.mrb[32].mxu1 %v12426_v17  ;;  %10977 = vmatpush3.bf16.msra.mxu0 %v12431_v21  ;;  %v12497_v17 = vld [vmem:[%s13933_s6 + $0x450] sm:$0xff]   ;;  %v12501_v21 = vld [vmem:[%s13933_s6 + $0x458] sm:$0xff]  }
 0x10e   : > { %11017 = vmatpush3.bf16.msra.mxu1 %v12432_v22  ;;  %10978 = vmatprep.subr.bf16.mxu0 %v12433_v23  ;;  %v12502_v22 = vld [vmem:[%s13933_s6 + $0x4d8] sm:$0xff]  }
 0x10f   : > { %11018 = vmatprep.subr.bf16.mxu1 %v12434_v24  ;;  %7582 = vmatprep.mubr.bf16.mxu0 %v12437_v27  ;;  %v12503_v23 = vld [vmem:[%s13933_s6 + $0x418] sm:$0xff]   ;;  %v12509_v27 = vld [vmem:[%s13935_s7 + $0x4f0] ss:$304 sps:$4 sm:$0xff]  }
 0x110   : > { %7646 = vmatprep.mubr.bf16.mxu1 %v12439_v28  ;;  %v12504_v24 = vld [vmem:[%s13933_s6 + $0x498] sm:$0xff]  }
 0x111   : > { %10979 = vmatpush3.bf16.msra.mxu0 %v12435_v25  ;;  %v12505_v25 = vld [vmem:[%s13935_s7 + $0x4f4] ss:$304 sps:$4 sm:$0xff]   ;;  %v12510_v28 = vld [vmem:[%s13935_s7 + $0x4f8] ss:$304 sps:$4 sm:$0xff]  }
 0x112   : > { %11019 = vmatpush3.bf16.msra.mxu1 %v12436_v26  ;;  %10980 = vmatprep.subr.bf16.mxu0 %v12443_v31  ;;  %v12507_v26 = vld [vmem:[%s13935_s7 + $0x4fc] ss:$304 sps:$4 sm:$0xff]   ;;  %v12513_v31 = vld [vmem:[%s13933_s6 + $0x420] sm:$0xff]  }
 0x113   : > { %11020 = vmatprep.subr.bf16.mxu1 %v12444_v32  ;;  %v12514_v32 = vld [vmem:[%s13933_s6 + $0x4a0] sm:$0xff]  }
 0x114   : > { %7583 = vmatmul.mubr.bf16.gmra.mrb[36].mxu0 %v12441_v29  ;;  %v12511_v29 = vld [vmem:[%s13933_s6 + $0x460] sm:$0xff]  }
 0x115   : > { %7647 = vmatmul.mubr.bf16.gmra.mrb[36].mxu1 %v12442_v30  ;;  %10981 = vmatpush3.bf16.msra.mxu0 %v12445_v33  ;;  %v12512_v30 = vld [vmem:[%s13933_s6 + $0x4e0] sm:$0xff]   ;;  %v12515_v33 = vld [vmem:[%s13933_s6 + $0x468] sm:$0xff]  }
 0x116   : > { %11021 = vmatpush3.bf16.msra.mxu1 %v12446_v34  ;;  %10982 = vmatprep.subr.bf16.mxu0 %v12447_v35  ;;  %v12516_v34 = vld [vmem:[%s13933_s6 + $0x4e8] sm:$0xff]  }
 0x117   : > { %11022 = vmatprep.subr.bf16.mxu1 %v12448_v36  ;;  %7590 = vmatprep.mubr.bf16.mxu0 %v12451_v39  ;;  %v12517_v35 = vld [vmem:[%s13933_s6 + $0x428] sm:$0xff]  }
 0x118   : > { %7654 = vmatprep.mubr.bf16.mxu1 %v12453_v40  ;;  %v12518_v36 = vld [vmem:[%s13933_s6 + $0x4a8] sm:$0xff]  }
 0x119   : > { %10983 = vmatpush3.bf16.msra.mxu0 %v12449_v37  ;;  %v984_v37 = vld [vmem:[%s13935_s7 + $0x750] sm:$0x77] }
 0x11a   : > { %11023 = vmatpush3.bf16.msra.mxu1 %v12450_v38  ;;  %10984 = vmatprep.subr.bf16.mxu0 %v12457_v43  ;;  %v985_v38 = vld [vmem:[%s13935_s7 + $0x758] sm:$0x77]  ;;  %v10060_v39 = vcombine.high %v984_v37, %v984_v37  ;;  %v12523_v43 = vld [vmem:[%s13933_s6 + $0x470] sm:$0xff]  }
 0x11b   : > { %11024 = vmatprep.subr.bf16.mxu1 %v12458_v44  ;;  %v10062_v40 = vcombine.high %v985_v38, %v985_v38  ;;  %v12524_v44 = vld [vmem:[%s13933_s6 + $0x4f0] sm:$0xff]  }
 0x11c   : > { %7591 = vmatmul.mubr.bf16.gmra.mrb[40].mxu0 %v12455_v41  ;;  %v10059_v41 = vcombine.low %v984_v37, %v984_v37  ;;  %v12585_v37 = vld [vmem:[%s13935_s7 + $0x50] ss:$304 sps:$4 sm:$0xff]  }
 0x11d   : > { %7655 = vmatmul.mubr.bf16.gmra.mrb[40].mxu1 %v12456_v42  ;;  %10985 = vmatpush3.bf16.msra.mxu0 %v12459_v45  ;;  %v10061_v42 = vcombine.low %v985_v38, %v985_v38  ;;  %v12525_v45 = vld [vmem:[%s13933_s6 + $0x430] sm:$0xff]  }
 0x11e   : > { %11025 = vmatpush3.bf16.msra.mxu1 %v12460_v46  ;;  %10986 = vmatprep.subr.bf16.mxu0 %v12461_v47  ;;  %v12526_v46 = vld [vmem:[%s13933_s6 + $0x4b0] sm:$0xff]   ;;  %v12527_v47 = vld [vmem:[%s13933_s6 + $0x478] sm:$0xff]  }
 0x11f   : > { %11026 = vmatprep.subr.bf16.mxu1 %v12462_v48  ;;  %7598 = vmatprep.mubr.bf16.mxu0 %v10056_v53  ;;  %v12528_v48 = vld [vmem:[%s13933_s6 + $0x4f8] sm:$0xff]   ;;  %v12587_v38 = vld [vmem:[%s13935_s7 + $0x54] ss:$304 sps:$4 sm:$0xff]  }
 0x120   : > { %7662 = vmatprep.mubr.bf16.mxu1 %v10058_v54  ;;  %v12534_v53 = vld [vmem:[%s13935_s7 + $0x48] ss:$304 sps:$4 sm:$0xff]   ;;  %v12536_v54 = vld [vmem:[%s13935_s7 + $0x4c] ss:$304 sps:$4 sm:$0xff]  }
 0x121   : > { %10987 = vmatpush3.bf16.msra.mxu0 %v12463_v49  ;;  %v12529_v49 = vld [vmem:[%s13933_s6 + $0x438] sm:$0xff]  }
 0x122   : > { %11027 = vmatpush3.bf16.msra.mxu1 %v12464_v50  ;;  %10988 = vmatprep.subr.bf16.mxu0 %v12469_v57  ;;  %v12530_v50 = vld [vmem:[%s13933_s6 + $0x4b8] sm:$0xff]   ;;  %v12539_v57 = vld [vmem:[%s13933_s6 + $0x500] sm:$0xff]  }
 0x123   : > { %11028 = vmatprep.subr.bf16.mxu1 %v12470_v58  ;;  %v12540_v58 = vld [vmem:[%s13933_s6 + $0x580] sm:$0xff]  }
 0x124   : > { %7599 = vmatmul.mubr.bf16.gmra.mrb[44].mxu0 %v10055_v55  ;;  %v12537_v55 = vld [vmem:[%s13933_s6 + $0x540] sm:$0xff]  }
 0x125   : > { %7663 = vmatmul.mubr.bf16.gmra.mrb[44].mxu1 %v10057_v56  ;;  %10989 = vmatpush3.bf16.msra.mxu0 %v12471_v59  ;;  %v12538_v56 = vld [vmem:[%s13933_s6 + $0x5c0] sm:$0xff]   ;;  %v12541_v59 = vld [vmem:[%s13933_s6 + $0x548] sm:$0xff]  }
 0x126   : > { %11029 = vmatpush3.bf16.msra.mxu1 %v12472_v60  ;;  %10990 = vmatprep.subr.bf16.mxu0 %v12473_v61  ;;  %v12542_v60 = vld [vmem:[%s13933_s6 + $0x5c8] sm:$0xff]  }
 0x127   : > { %11030 = vmatprep.subr.bf16.mxu1 %v12474_v62  ;;  %7702 = vmatprep.mubr.bf16.mxu0 %v12479_v2  ;;  %v12543_v61 = vld [vmem:[%s13933_s6 + $0x508] sm:$0xff]  }
 0x128   : > { %7766 = vmatprep.mubr.bf16.mxu1 %v12482_v4  ;;  %v12544_v62 = vld [vmem:[%s13933_s6 + $0x588] sm:$0xff]   ;;  %v12552_v4 = vld [vmem:[%s13933_s6 + $0x5d0] sm:$0xff]  }
 0x129   : > { %10991 = vmatpush3.bf16.msra.mxu0 %v12475_v63  ;;  %v12545_v63 = vld [vmem:[%s13935_s7 + $0x2a4] ss:$304 sps:$4 sm:$0xff]   ;;  %v12550_v2 = vld [vmem:[%s13935_s7 + $0x2a8] ss:$304 sps:$4 sm:$0xff]  }
 0x12a   : > { %11031 = vmatpush3.bf16.msra.mxu1 %v12476_v0  ;;  %11056 = vmatprep.subr.bf16.mxu0 %v12483_v5  ;;  %v12547_v0 = vld [vmem:[%s13935_s7 + $0x2ac] ss:$304 sps:$4 sm:$0xff]   ;;  %v12553_v5 = vld [vmem:[%s13933_s6 + $0x510] sm:$0xff]  }
 0x12b   : > { %11096 = vmatprep.subr.bf16.mxu1 %v12484_v6  ;;  %v12554_v6 = vld [vmem:[%s13933_s6 + $0x590] sm:$0xff]  }
 0x12c   : > { %7703 = vmatmul.mubr.bf16.vlgmr.msra.gmra.mrb[48].mxu0 %v12477_v1  ;;  %v12549_v1 = vld [vmem:[%s13935_s7 + $0x2a0] ss:$304 sps:$4 sm:$0xff]  }
 0x12d   : > { %7767 = vmatmul.mubr.bf16.vlgmr.msra.gmra.mrb[48].mxu1 %v12480_v3  ;;  %11057 = vmatpush3.bf16.msra.mxu0 %v12485_v7  ;;  %v12551_v3 = vld [vmem:[%s13933_s6 + $0x550] sm:$0xff]   ;;  %v12555_v7 = vld [vmem:[%s13933_s6 + $0x558] sm:$0xff]  }
 0x12e   : > { %11097 = vmatpush3.bf16.msra.mxu1 %v12486_v8  ;;  %11058 = vmatprep.subr.bf16.mxu0 %v12487_v9  ;;  %v12556_v8 = vld [vmem:[%s13933_s6 + $0x5d8] sm:$0xff]  }
 0x12f   : > { %11098 = vmatprep.subr.bf16.mxu1 %v12488_v10  ;;  %7710 = vmatprep.mubr.bf16.mxu0 %v12491_v13  ;;  %v12557_v9 = vld [vmem:[%s13933_s6 + $0x518] sm:$0xff]   ;;  %v12563_v13 = vld [vmem:[%s13935_s7 + $0x500] ss:$304 sps:$4 sm:$0xff]  }
 0x130   : > { %7774 = vmatprep.mubr.bf16.mxu1 %v12493_v14  ;;  %v12558_v10 = vld [vmem:[%s13933_s6 + $0x598] sm:$0xff]  }
 0x131   : > { %11059 = vmatpush3.bf16.msra.mxu0 %v12489_v11  ;;  %v12559_v11 = vld [vmem:[%s13935_s7 + $0x504] ss:$304 sps:$4 sm:$0xff]   ;;  %v12564_v14 = vld [vmem:[%s13935_s7 + $0x508] ss:$304 sps:$4 sm:$0xff]  }
 0x132   : > { %11099 = vmatpush3.bf16.msra.mxu1 %v12490_v12  ;;  %11060 = vmatprep.subr.bf16.mxu0 %v12497_v17  ;;  %v12561_v12 = vld [vmem:[%s13935_s7 + $0x50c] ss:$304 sps:$4 sm:$0xff]   ;;  %v12567_v17 = vld [vmem:[%s13933_s6 + $0x520] sm:$0xff]  }
 0x133   : > { %11100 = vmatprep.subr.bf16.mxu1 %v12498_v18  ;;  %v12568_v18 = vld [vmem:[%s13933_s6 + $0x5a0] sm:$0xff]  }
 0x134   : > { %7711 = vmatmul.mubr.bf16.gmra.mrb[52].mxu0 %v12495_v15  ;;  %v12565_v15 = vld [vmem:[%s13933_s6 + $0x560] sm:$0xff]  }
 0x135   : > { %7775 = vmatmul.mubr.bf16.gmra.mrb[52].mxu1 %v12496_v16  ;;  %11061 = vmatpush3.bf16.msra.mxu0 %v12499_v19  ;;  %v12566_v16 = vld [vmem:[%s13933_s6 + $0x5e0] sm:$0xff]   ;;  %v12569_v19 = vld [vmem:[%s13933_s6 + $0x568] sm:$0xff]  }
 0x136   : > { %11101 = vmatpush3.bf16.msra.mxu1 %v12500_v20  ;;  %11062 = vmatprep.subr.bf16.mxu0 %v12501_v21  ;;  %v12570_v20 = vld [vmem:[%s13933_s6 + $0x5e8] sm:$0xff]  }
 0x137   : > { %11102 = vmatprep.subr.bf16.mxu1 %v12502_v22  ;;  %7718 = vmatprep.mubr.bf16.mxu0 %v12505_v25  ;;  %v12571_v21 = vld [vmem:[%s13933_s6 + $0x528] sm:$0xff]  }
 0x138   : > { %7782 = vmatprep.mubr.bf16.mxu1 %v12507_v26  ;;  %v12572_v22 = vld [vmem:[%s13933_s6 + $0x5a8] sm:$0xff]  }
 0x139   : > { %11063 = vmatpush3.bf16.msra.mxu0 %v12503_v23  ;;  %v986_v23 = vld [vmem:[%s13935_s7 + $0x760] sm:$0x77]  ;;  %v987_v25 = vld [vmem:[%s13935_s7 + $0x768] sm:$0x77] }
 0x13a   : > { %11103 = vmatpush3.bf16.msra.mxu1 %v12504_v24  ;;  %11064 = vmatprep.subr.bf16.mxu0 %v12511_v29  ;;  %v10064_v24 = vcombine.high %v986_v23, %v986_v23  ;;  %v10063_v26 = vcombine.low %v986_v23, %v986_v23  ;;  %v12577_v29 = vld [vmem:[%s13933_s6 + $0x570] sm:$0xff]  }
 0x13b   : > { %11104 = vmatprep.subr.bf16.mxu1 %v12512_v30  ;;  %v12578_v30 = vld [vmem:[%s13933_s6 + $0x5f0] sm:$0xff]  }
 0x13c   : > { %7719 = vmatmul.mubr.bf16.gmra.mrb[56].mxu0 %v12509_v27  ;;  %v10066_v27 = vcombine.high %v987_v25, %v987_v25 }
 0x13d   : > { %7783 = vmatmul.mubr.bf16.gmra.mrb[56].mxu1 %v12510_v28  ;;  %11065 = vmatpush3.bf16.msra.mxu0 %v12513_v31  ;;  %v10065_v28 = vcombine.low %v987_v25, %v987_v25  ;;  %v12579_v31 = vld [vmem:[%s13933_s6 + $0x530] sm:$0xff]   ;;  %v12622_v25 = vld [vmem:[%s13933_s6 + $0x6a0] sm:$0xff]  }
 0x13e   : > { %11105 = vmatpush3.bf16.msra.mxu1 %v12514_v32  ;;  %11066 = vmatprep.subr.bf16.mxu0 %v12515_v33  ;;  %v12580_v32 = vld [vmem:[%s13933_s6 + $0x5b0] sm:$0xff]   ;;  %v12581_v33 = vld [vmem:[%s13933_s6 + $0x578] sm:$0xff]  }
 0x13f   : > { %11106 = vmatprep.subr.bf16.mxu1 %v12516_v34  ;;  %7726 = vmatprep.mubr.bf16.mxu0 %v10060_v39  ;;  %v12582_v34 = vld [vmem:[%s13933_s6 + $0x5f8] sm:$0xff]  }
 0x140   : > { %7790 = vmatprep.mubr.bf16.mxu1 %v10062_v40  ;;  %v12588_v39 = vld [vmem:[%s13935_s7 + $0x58] ss:$304 sps:$4 sm:$0xff]   ;;  %v12590_v40 = vld [vmem:[%s13935_s7 + $0x5c] ss:$304 sps:$4 sm:$0xff]  }
 0x141   : > { %11067 = vmatpush3.bf16.msra.mxu0 %v12517_v35  ;;  %v12583_v35 = vld [vmem:[%s13933_s6 + $0x538] sm:$0xff]  }
 0x142   : > { %11107 = vmatpush3.bf16.msra.mxu1 %v12518_v36  ;;  %11068 = vmatprep.subr.bf16.mxu0 %v12523_v43  ;;  %v12584_v36 = vld [vmem:[%s13933_s6 + $0x5b8] sm:$0xff]   ;;  %v12593_v43 = vld [vmem:[%s13933_s6 + $0x600] sm:$0xff]  }
 0x143   : > { %11108 = vmatprep.subr.bf16.mxu1 %v12524_v44  ;;  %v12594_v44 = vld [vmem:[%s13933_s6 + $0x680] sm:$0xff]  }
 0x144   : > { %7727 = vmatmul.mubr.bf16.gmra.mrb[60].mxu0 %v10059_v41  ;;  %v12591_v41 = vld [vmem:[%s13933_s6 + $0x640] sm:$0xff]  }
 0x145   : > { %7791 = vmatmul.mubr.bf16.gmra.mrb[60].mxu1 %v10061_v42  ;;  %11069 = vmatpush3.bf16.msra.mxu0 %v12525_v45  ;;  %v12592_v42 = vld [vmem:[%s13933_s6 + $0x6c0] sm:$0xff]   ;;  %v12595_v45 = vld [vmem:[%s13933_s6 + $0x648] sm:$0xff]  }
 0x146   : > { %11109 = vmatpush3.bf16.msra.mxu1 %v12526_v46  ;;  %11070 = vmatprep.subr.bf16.mxu0 %v12527_v47  ;;  %v12596_v46 = vld [vmem:[%s13933_s6 + $0x6c8] sm:$0xff]  }
 0x147   : > { %11110 = vmatprep.subr.bf16.mxu1 %v12528_v48  ;;  %7830 = vmatprep.mubr.bf16.mxu0 %v12533_v52  ;;  %v12597_v47 = vld [vmem:[%s13933_s6 + $0x608] sm:$0xff]   ;;  %v12603_v52 = vld [vmem:[%s13935_s7 + $0x2b0] ss:$304 sps:$4 sm:$0xff]  }
 0x148   : > { %7894 = vmatprep.mubr.bf16.mxu1 %v12536_v54  ;;  %v12598_v48 = vld [vmem:[%s13933_s6 + $0x688] sm:$0xff]   ;;  %v12605_v54 = vld [vmem:[%s13933_s6 + $0x650] sm:$0xff]  }
 0x149   : > { %11071 = vmatpush3.bf16.msra.mxu0 %v12529_v49  ;;  %v12599_v49 = vld [vmem:[%s13935_s7 + $0x2b4] ss:$304 sps:$4 sm:$0xff]  }
 0x14a   : > { %11111 = vmatpush3.bf16.msra.mxu1 %v12530_v50  ;;  %11136 = vmatprep.subr.bf16.mxu0 %v12537_v55  ;;  %v12601_v50 = vld [vmem:[%s13935_s7 + $0x2bc] ss:$304 sps:$4 sm:$0xff]  }
 0x14b   : > { %11176 = vmatprep.subr.bf16.mxu1 %v12538_v56  ;;  %v12606_v56 = vld [vmem:[%s13933_s6 + $0x6d0] sm:$0xff]  }
 0x14c   : > { %7831 = vmatmul.mubr.bf16.vlgmr.msra.gmra.mrb[64].mxu0 %v12531_v51 }
 0x14d   : > { %7895 = vmatmul.mubr.bf16.vlgmr.msra.gmra.mrb[64].mxu1 %v12534_v53  ;;  %11137 = vmatpush3.bf16.msra.mxu0 %v12539_v57  ;;  %v12604_v53 = vld [vmem:[%s13935_s7 + $0x2b8] ss:$304 sps:$4 sm:$0xff]  }
 0x14e   : > { %11177 = vmatpush3.bf16.msra.mxu1 %v12540_v58  ;;  %11138 = vmatprep.subr.bf16.mxu0 %v12541_v59  ;;  %v12607_v58 = vld [vmem:[%s13933_s6 + $0x610] sm:$0xff]  }
 0x14f   : > { %11178 = vmatprep.subr.bf16.mxu1 %v12542_v60  ;;  %7838 = vmatprep.mubr.bf16.mxu0 %v12545_v63 }
 0x150   : > { %7902 = vmatprep.mubr.bf16.mxu1 %v12547_v0  ;;  %v12609_v0 = vld [vmem:[%s13933_s6 + $0x658] sm:$0xff]  }
 0x151   : > { %11139 = vmatpush3.bf16.msra.mxu0 %v12543_v61  ;;  %v12608_v61 = vld [vmem:[%s13933_s6 + $0x690] sm:$0xff]  }
 0x152   : > { %11179 = vmatpush3.bf16.msra.mxu1 %v12544_v62  ;;  %11140 = vmatprep.subr.bf16.mxu0 %v12551_v3 }
 0x153   : > { %11180 = vmatprep.subr.bf16.mxu1 %v12552_v4 }
 0x154   : > { %7839 = vmatmul.mubr.bf16.gmra.mrb[68].mxu0 %v12549_v1 }
 0x155   : > { %7903 = vmatmul.mubr.bf16.gmra.mrb[68].mxu1 %v12550_v2  ;;  %11141 = vmatpush3.bf16.msra.mxu0 %v12553_v5  ;;  %v12610_v2 = vld [vmem:[%s13933_s6 + $0x6d8] sm:$0xff]  }
 0x156   : > { %11181 = vmatpush3.bf16.msra.mxu1 %v12554_v6  ;;  %11142 = vmatprep.subr.bf16.mxu0 %v12555_v7  ;;  %v12611_v5 = vld [vmem:[%s13933_s6 + $0x618] sm:$0xff]  }
 0x157   : > { %11182 = vmatprep.subr.bf16.mxu1 %v12556_v8  ;;  %7846 = vmatprep.mubr.bf16.mxu0 %v12559_v11  ;;  %v12612_v8 = vld [vmem:[%s13933_s6 + $0x698] sm:$0xff]  }
 0x158   : > { %7910 = vmatprep.mubr.bf16.mxu1 %v12561_v12  ;;  %v12615_v12 = vld [vmem:[%s13935_s7 + $0x51c] ss:$304 sps:$4 sm:$0xff]  }
 0x159   : > { %11143 = vmatpush3.bf16.msra.mxu0 %v12557_v9 }
 0x15a   : > { %11183 = vmatpush3.bf16.msra.mxu1 %v12558_v10  ;;  %11144 = vmatprep.subr.bf16.mxu0 %v12565_v15  ;;  %v12613_v10 = vld [vmem:[%s13935_s7 + $0x514] ss:$304 sps:$4 sm:$0xff]  }
 0x15b   : > { %11184 = vmatprep.subr.bf16.mxu1 %v12566_v16  ;;  %v12618_v16 = vld [vmem:[%s13935_s7 + $0x518] ss:$304 sps:$4 sm:$0xff]  }
 0x15c   : > { %7847 = vmatmul.mubr.bf16.gmra.mrb[72].mxu0 %v12563_v13  ;;  %v12617_v13 = vld [vmem:[%s13935_s7 + $0x510] ss:$304 sps:$4 sm:$0xff]  }
 0x15d   : > { %7911 = vmatmul.mubr.bf16.gmra.mrb[72].mxu1 %v12564_v14  ;;  %11145 = vmatpush3.bf16.msra.mxu0 %v12567_v17  ;;  %v12619_v17 = vld [vmem:[%s13933_s6 + $0x660] sm:$0xff]  }
 0x15e   : > { %11185 = vmatpush3.bf16.msra.mxu1 %v12568_v18  ;;  %11146 = vmatprep.subr.bf16.mxu0 %v12569_v19  ;;  %v12620_v19 = vld [vmem:[%s13933_s6 + $0x6e0] sm:$0xff]  }
 0x15f   : > { %11186 = vmatprep.subr.bf16.mxu1 %v12570_v20  ;;  %7854 = vmatprep.mubr.bf16.mxu0 %v10064_v24 }
 0x160   : > { %7918 = vmatprep.mubr.bf16.mxu1 %v10066_v27  ;;  %v12623_v27 = vld [vmem:[%s13933_s6 + $0x668] sm:$0xff]  }
 0x161   : > { %11147 = vmatpush3.bf16.msra.mxu0 %v12571_v21 }
 0x162   : > { %11187 = vmatpush3.bf16.msra.mxu1 %v12572_v22  ;;  %11148 = vmatprep.subr.bf16.mxu0 %v12577_v29  ;;  %v12621_v22 = vld [vmem:[%s13933_s6 + $0x620] sm:$0xff]  }
 0x163   : > { %11188 = vmatprep.subr.bf16.mxu1 %v12578_v30  ;;  %v12624_v30 = vld [vmem:[%s13933_s6 + $0x6e8] sm:$0xff]  }
 0x164   : > { %7855 = vmatmul.mubr.bf16.gmra.mrb[76].mxu0 %v10063_v26 }
 0x165   : > { %7919 = vmatmul.mubr.bf16.gmra.mrb[76].mxu1 %v10065_v28  ;;  %11149 = vmatpush3.bf16.msra.mxu0 %v12579_v31 }
 0x166   : > { %11189 = vmatpush3.bf16.msra.mxu1 %v12580_v32  ;;  %11150 = vmatprep.subr.bf16.mxu0 %v12581_v33  ;;  %v12625_v33 = vld [vmem:[%s13933_s6 + $0x628] sm:$0xff]  }
 0x167   : > { %11190 = vmatprep.subr.bf16.mxu1 %v12582_v34  ;;  %7958 = vmatprep.mubr.bf16.mxu0 %v12587_v38 }
 0x168   : > { %8022 = vmatprep.mubr.bf16.mxu1 %v12590_v40 }
 0x169   : > { %11151 = vmatpush3.bf16.msra.mxu0 %v12583_v35  ;;  %v12626_v35 = vld [vmem:[%s13933_s6 + $0x6a8] sm:$0xff]  }
 0x16a   : > { %11191 = vmatpush3.bf16.msra.mxu1 %v12584_v36  ;;  %11216 = vmatprep.subr.bf16.mxu0 %v12591_v41  ;;  %v988_v36 = vld [vmem:[%s13935_s7 + $0x770] sm:$0x77] }
 0x16b   : > { %11256 = vmatprep.subr.bf16.mxu1 %v12592_v42  ;;  %v10068_v38 = vcombine.high %v988_v36, %v988_v36  ;;  %v10067_v40 = vcombine.low %v988_v36, %v988_v36  ;;  %v12631_v42 = vld [vmem:[%s13933_s6 + $0x670] sm:$0xff]  }
 0x16c   : > { %7959 = vmatmul.mubr.bf16.vlgmr.msra.gmra.mrb[80].mxu0 %v12585_v37  ;;  %v989_v37 = vld [vmem:[%s13935_s7 + $0x778] sm:$0x77]  ;;  %v12661_v36 = vld [vmem:[%s13933_s6 + $0x710] sm:$0xff]  }
 0x16d   : > { %8023 = vmatmul.mubr.bf16.vlgmr.msra.gmra.mrb[80].mxu1 %v12588_v39  ;;  %11217 = vmatpush3.bf16.msra.mxu0 %v12593_v43  ;;  %v10070_v39 = vcombine.high %v989_v37, %v989_v37  ;;  %v10069_v41 = vcombine.low %v989_v37, %v989_v37 }
 0x16e   : > { %11257 = vmatpush3.bf16.msra.mxu1 %v12594_v44  ;;  %11218 = vmatprep.subr.bf16.mxu0 %v12595_v45  ;;  %v12632_v44 = vld [vmem:[%s13933_s6 + $0x6f0] sm:$0xff]  }
 0x16f   : > { %11258 = vmatprep.subr.bf16.mxu1 %v12596_v46  ;;  %7966 = vmatprep.mubr.bf16.mxu0 %v12599_v49  ;;  %v12634_v49 = vld [vmem:[%s13933_s6 + $0x6b0] sm:$0xff]  }
 0x170   : > { %8030 = vmatprep.mubr.bf16.mxu1 %v12601_v50 }
 0x171   : > { %11219 = vmatpush3.bf16.msra.mxu0 %v12597_v47  ;;  %v12633_v47 = vld [vmem:[%s13933_s6 + $0x630] sm:$0xff]  }
 0x172   : > { %11259 = vmatpush3.bf16.msra.mxu1 %v12598_v48  ;;  %11220 = vmatprep.subr.bf16.mxu0 %v12605_v54 }
 0x173   : > { %11260 = vmatprep.subr.bf16.mxu1 %v12606_v56 }
 0x174   : > { %7967 = vmatmul.mubr.bf16.gmra.mrb[84].mxu0 %v12603_v52  ;;  %v12635_v52 = vld [vmem:[%s13933_s6 + $0x678] sm:$0xff]  }
 0x175   : > { %8031 = vmatmul.mubr.bf16.gmra.mrb[84].mxu1 %v12604_v53  ;;  %11221 = vmatpush3.bf16.msra.mxu0 %v12607_v58 }
 0x176   : > { %11261 = vmatpush3.bf16.msra.mxu1 %v12608_v61  ;;  %11222 = vmatprep.subr.bf16.mxu0 %v12609_v0 }
 0x177   : > { %11262 = vmatprep.subr.bf16.mxu1 %v12610_v2  ;;  %7974 = vmatprep.mubr.bf16.mxu0 %v12613_v10  ;;  %v12642_v2 = vld [vmem:[%s13935_s7 + $0x68] ss:$304 sps:$4 sm:$0xff]   ;;  %v12647_v10 = vld [vmem:[%s13933_s6 + $0x700] sm:$0xff]  }
 0x178   : > { %8038 = vmatprep.mubr.bf16.mxu1 %v12615_v12  ;;  %v12648_v12 = vld [vmem:[%s13933_s6 + $0x780] sm:$0xff]  }
 0x179   : > { %11223 = vmatpush3.bf16.msra.mxu0 %v12611_v5 }
 0x17a   : > { %11263 = vmatpush3.bf16.msra.mxu1 %v12612_v8  ;;  %11224 = vmatprep.subr.bf16.mxu0 %v12619_v17  ;;  %v12646_v8 = vld [vmem:[%s13933_s6 + $0x7c0] sm:$0xff]  }
 0x17b   : > { %11264 = vmatprep.subr.bf16.mxu1 %v12620_v19  ;;  %v12650_v19 = vld [vmem:[%s13933_s6 + $0x7c8] sm:$0xff]  }
 0x17c   : > { %7975 = vmatmul.mubr.bf16.gmra.mrb[88].mxu0 %v12617_v13 }
 0x17d   : > { %8039 = vmatmul.mubr.bf16.gmra.mrb[88].mxu1 %v12618_v16  ;;  %11225 = vmatpush3.bf16.msra.mxu0 %v12621_v22  ;;  %v12649_v16 = vld [vmem:[%s13933_s6 + $0x748] sm:$0xff]  }
 0x17e   : > { %11265 = vmatpush3.bf16.msra.mxu1 %v12622_v25  ;;  %11226 = vmatprep.subr.bf16.mxu0 %v12623_v27  ;;  %v12655_v27 = vld [vmem:[%s13935_s7 + $0x2cc] ss:$304 sps:$4 sm:$0xff]  }
 0x17f   : > { %11266 = vmatprep.subr.bf16.mxu1 %v12624_v30  ;;  %7982 = vmatprep.mubr.bf16.mxu0 %v10068_v38 }
 0x180   : > { %8046 = vmatprep.mubr.bf16.mxu1 %v10070_v39  ;;  %v12662_v39 = vld [vmem:[%s13933_s6 + $0x790] sm:$0xff]  }
 0x181   : > { %11227 = vmatpush3.bf16.msra.mxu0 %v12625_v33 }
 0x182   : > { %11267 = vmatpush3.bf16.msra.mxu1 %v12626_v35  ;;  %11228 = vmatprep.subr.bf16.mxu0 %v12631_v42  ;;  %v12663_v42 = vld [vmem:[%s13933_s6 + $0x758] sm:$0xff]  }
 0x183   : > { %11268 = vmatprep.subr.bf16.mxu1 %v12632_v44 }
 0x184   : > { %7983 = vmatmul.mubr.bf16.gmra.mrb[92].mxu0 %v10067_v40 }
 0x185   : > { %8047 = vmatmul.mubr.bf16.gmra.mrb[92].mxu1 %v10069_v41  ;;  %11229 = vmatpush3.bf16.msra.mxu0 %v12633_v47 }
 0x186   : > { %11269 = vmatpush3.bf16.msra.mxu1 %v12634_v49  ;;  %11230 = vmatprep.subr.bf16.mxu0 %v12635_v52  ;;  %v12666_v52 = vld [vmem:[%s13933_s6 + $0x798] sm:$0xff]  }
 0x19f   : > { %v10752_v51 = vpop.f32.mrb[0].mxu0 }
 0x1a0   : > { %v10792_v55 = vpop.f32.mrb[0].mxu1  ;;  %v10753_v57 = vpop.f32.mrb[1].mxu0 }
 0x1a1   : > { %v10754_v59 = vadd.f32 %v10753_v57, %v10752_v51  ;;  %v10793_v60 = vpop.f32.mrb[1].mxu1  ;;  %v10755_v63 = vpop.f32.mrb[2].mxu0  ;;  %v12637_v57 = vld [vmem:[%s13933_s6 + $0x638] sm:$0xff]  }
 0x1a2   : > { %v10794_v62 = vadd.f32 %v10793_v60, %v10792_v55  ;;  %v10795_v1 = vpop.f32.mrb[2].mxu1  ;;  %v10756_v4 = vpop.f32.mrb[3].mxu0  ;;  %v12636_v55 = vld [vmem:[%s13933_s6 + $0x6f8] sm:$0xff]   ;;  %11231 = vmatpush3.bf16.msra.mxu0 %v12637_v57  ;;  %v12671_v57 = vld [vmem:[%s13935_s7 + $0x520] ss:$304 sps:$4 sm:$0xff]  }
 0x1a3   : > { %v10757_v6 = vadd.f32 %v10756_v4, %v10755_v63  ;;  %v10796_v7 = vpop.f32.mrb[3].mxu1  ;;  %11270 = vmatprep.subr.bf16.mxu1 %v12636_v55  ;;  %v12638_v60 = vld [vmem:[%s13933_s6 + $0x6b8] sm:$0xff]   ;;  %v12639_v63 = vld [vmem:[%s13935_s7 + $0x60] ss:$304 sps:$4 sm:$0xff]  }
 0x1a4   : > { %v14243_v3 = vadd.f32 %v10794_v62, %v10754_v59  ;;  %v10797_v9 = vadd.f32 %v10796_v7, %v10795_v1  ;;  %11271 = vmatpush3.bf16.msra.mxu1 %v12638_v60  ;;  %v12641_v1 = vld [vmem:[%s13935_s7 + $0x64] ss:$304 sps:$4 sm:$0xff]   ;;  %v12644_v4 = vld [vmem:[%s13935_s7 + $0x6c] ss:$304 sps:$4 sm:$0xff]  }
 0x1a5   : > { %8086 = vmatprep.mubr.bf16.mxu0 %v12641_v1  ;;  %8150 = vmatprep.mubr.bf16.mxu1 %v12644_v4  ;;  %v12673_v60 = vld [vmem:[%s13933_s6 + $0x760] sm:$0xff]  }
 0x1a6   : > { %v14250_v14 = vadd.f32 %v10797_v9, %v10757_v6  ;;  %v12645_v6 = vld [vmem:[%s13933_s6 + $0x740] sm:$0xff]   ;;  %8087 = vmatmul.mubr.bf16.vlgmr.msra.gmra.mrb[96].mxu0 %v12639_v63  ;;  %11336 = vmatprep.subr.bf16.mxu1 %v12646_v8  ;;  %v12677_v8 = vld [vmem:[%s13933_s6 + $0x768] sm:$0xff]  }
 0x1a7   : > { %v10758_v11 = vpop.f32.mrb[4].mxu0  ;;  %8151 = vmatmul.mubr.bf16.vlgmr.msra.gmra.mrb[96].mxu1 %v12642_v2  ;;  %11296 = vmatprep.subr.bf16.mxu0 %v12645_v6  ;;  %v12674_v63 = vld [vmem:[%s13933_s6 + $0x7e0] sm:$0xff]  }
 0x1a8   : > { %v10798_v15 = vpop.f32.mrb[4].mxu1  ;;  %v10759_v18 = vpop.f32.mrb[5].mxu0  ;;  %11297 = vmatpush3.bf16.msra.mxu0 %v12647_v10  ;;  %11337 = vmatpush3.bf16.msra.mxu1 %v12648_v12  ;;  %v12676_v4 = vld [vmem:[%s13933_s6 + $0x7a0] sm:$0xff]  }
 0x1a9   : > { %v10760_v20 = vadd.f32 %v10759_v18, %v10758_v11  ;;  %v10799_v21 = vpop.f32.mrb[5].mxu1  ;;  %v10761_v24 = vpop.f32.mrb[6].mxu0  ;;  %11298 = vmatprep.subr.bf16.mxu0 %v12649_v16  ;;  %11338 = vmatprep.subr.bf16.mxu1 %v12650_v19 }
 0x1aa   : > { %v10800_v23 = vadd.f32 %v10799_v21, %v10798_v15  ;;  %v10801_v26 = vpop.f32.mrb[6].mxu1  ;;  %v10762_v29 = vpop.f32.mrb[7].mxu0  ;;  %v12651_v21 = vld [vmem:[%s13933_s6 + $0x708] sm:$0xff]   ;;  %8158 = vmatprep.mubr.bf16.mxu1 %v12655_v27  ;;  %v12685_v27 = vld [vmem:[%s13933_s6 + $0x770] sm:$0xff]  }
 0x1ab   : > { %v10763_v31 = vadd.f32 %v10762_v29, %v10761_v24  ;;  %v10802_v32 = vpop.f32.mrb[7].mxu1  ;;  %v12652_v24 = vld [vmem:[%s13933_s6 + $0x788] sm:$0xff]   ;;  %v12657_v29 = vld [vmem:[%s13935_s7 + $0x2c0] ss:$304 sps:$4 sm:$0xff]  }
 0x1ac   : > { %v14258_v28 = vadd.f32 %v10800_v23, %v10760_v20  ;;  %v10803_v34 = vadd.f32 %v10802_v32, %v10801_v26  ;;  %11299 = vmatpush3.bf16.msra.mxu0 %v12651_v21  ;;  %v12653_v26 = vld [vmem:[%s13935_s7 + $0x2c4] ss:$304 sps:$4 sm:$0xff]   ;;  %11339 = vmatpush3.bf16.msra.mxu1 %v12652_v24  ;;  %v991_v21 = vld [vmem:[%s13935_s7 + $0x788] sm:$0x77] }
 0x1ad   : > { %8094 = vmatprep.mubr.bf16.mxu0 %v12653_v26  ;;  %v12659_v32 = vld [vmem:[%s13933_s6 + $0x750] sm:$0xff]   ;;  %v10074_v24 = vcombine.high %v991_v21, %v991_v21  ;;  %v10073_v26 = vcombine.low %v991_v21, %v991_v21 }
 0x1ae   : > { %v14267_v45 = vadd.f32 %v10803_v34, %v10763_v31  ;;  %v12658_v31 = vld [vmem:[%s13935_s7 + $0x2c8] ss:$304 sps:$4 sm:$0xff]   ;;  %8095 = vmatmul.mubr.bf16.gmra.mrb[100].mxu0 %v12657_v29  ;;  %v12660_v34 = vld [vmem:[%s13933_s6 + $0x7d0] sm:$0xff]   ;;  %11300 = vmatprep.subr.bf16.mxu0 %v12659_v32 }
 0x1af   : > { %v10764_v43 = vpop.f32.mrb[8].mxu0  ;;  %8159 = vmatmul.mubr.bf16.gmra.mrb[100].mxu1 %v12658_v31  ;;  %11340 = vmatprep.subr.bf16.mxu1 %v12660_v34 }
 0x1b0   : > { %v10804_v46 = vpop.f32.mrb[8].mxu1  ;;  %v10765_v48 = vpop.f32.mrb[9].mxu0  ;;  %11301 = vmatpush3.bf16.msra.mxu0 %v12661_v36  ;;  %11341 = vmatpush3.bf16.msra.mxu1 %v12662_v39 }
 0x1b1   : > { %v10766_v50 = vadd.f32 %v10765_v48, %v10764_v43  ;;  %v10805_v51 = vpop.f32.mrb[9].mxu1  ;;  %v10767_v54 = vpop.f32.mrb[10].mxu0  ;;  %11302 = vmatprep.subr.bf16.mxu0 %v12663_v42  ;;  %v12665_v48 = vld [vmem:[%s13933_s6 + $0x718] sm:$0xff]  }
 0x1b2   : > { %v10806_v53 = vadd.f32 %v10805_v51, %v10804_v46  ;;  %v10807_v56 = vpop.f32.mrb[10].mxu1  ;;  %v10768_v59 = vpop.f32.mrb[11].mxu0  ;;  %v12664_v46 = vld [vmem:[%s13933_s6 + $0x7d8] sm:$0xff]  }
 0x1b3   : > { %v10769_v61 = vadd.f32 %v10768_v59, %v10767_v54  ;;  %v10808_v62 = vpop.f32.mrb[11].mxu1  ;;  %11342 = vmatprep.subr.bf16.mxu1 %v12664_v46  ;;  %v12672_v59 = vld [vmem:[%s13935_s7 + $0x528] ss:$304 sps:$4 sm:$0xff]  }
 0x1b4   : > { %v14274_v58 = vadd.f32 %v10806_v53, %v10766_v50  ;;  %v10809_v0 = vadd.f32 %v10808_v62, %v10807_v56  ;;  %11303 = vmatpush3.bf16.msra.mxu0 %v12665_v48  ;;  %11343 = vmatpush3.bf16.msra.mxu1 %v12666_v52  ;;  %v12669_v56 = vld [vmem:[%s13935_s7 + $0x52c] ss:$304 sps:$4 sm:$0xff]   ;;  %v12695_v52 = vld [vmem:[%s13935_s7 + $0x74] ss:$304 sps:$4 sm:$0xff]  }
 0x1b5   : > { %8166 = vmatprep.mubr.bf16.mxu1 %v12669_v56  ;;  %11304 = vmatprep.subr.bf16.mxu0 %v12673_v60  ;;  %v12692_v46 = vld [vmem:[%s13933_s6 + $0x7b8] sm:$0xff]  }
 0x1b6   : > { %v14281_v5 = vadd.f32 %v10809_v0, %v10769_v61  ;;  %11344 = vmatprep.subr.bf16.mxu1 %v12674_v63 }
 0x1b7   : > { %v10770_v7 = vpop.f32.mrb[12].mxu0  ;;  %8167 = vmatmul.mubr.bf16.gmra.mrb[104].mxu1 %v12672_v59  ;;  %v12700_v59 = vld [vmem:[%s13933_s6 + $0x8c0] sm:$0xff]  }
 0x1b8   : > { %v10810_v9 = vpop.f32.mrb[12].mxu1  ;;  %v10771_v11 = vpop.f32.mrb[13].mxu0  ;;  %11345 = vmatpush3.bf16.msra.mxu1 %v12676_v4  ;;  %8174 = vmatprep.mubr.bf16.mxu1 %v10074_v24  ;;  %v12715_v24 = vld [vmem:[%s13933_s6 + $0x810] sm:$0xff]  }
 0x1b9   : > { %v10772_v13 = vadd.f32 %v10771_v11, %v10770_v7  ;;  %v10811_v15 = vpop.f32.mrb[13].mxu1  ;;  %v10773_v18 = vpop.f32.mrb[14].mxu0  ;;  %v12678_v11 = vld [vmem:[%s13933_s6 + $0x7e8] sm:$0xff]  }
 0x1ba   : > { %v10812_v17 = vadd.f32 %v10811_v15, %v10810_v9  ;;  %v10813_v20 = vpop.f32.mrb[14].mxu1  ;;  %v10774_v23 = vpop.f32.mrb[15].mxu0  ;;  %11346 = vmatprep.subr.bf16.mxu1 %v12678_v11  ;;  %v12680_v18 = vld [vmem:[%s13933_s6 + $0x7a8] sm:$0xff]  }
 0x1bb   : > { %v10814_v25 = vpop.f32.mrb[15].mxu1  ;;  %v990_v20 = vld [vmem:[%s13935_s7 + $0x780] sm:$0x77]  ;;  %v12706_v11 = vld [vmem:[%s13933_s6 + $0x888] sm:$0xff]  }
 0x1bc   : > { %v14290_v22 = vadd.f32 %v10812_v17, %v10772_v13  ;;  %v12679_v13 = vld [vmem:[%s13933_s6 + $0x728] sm:$0xff]   ;;  %11347 = vmatpush3.bf16.msra.mxu1 %v12680_v18  ;;  %v10072_v23 = vcombine.high %v990_v20, %v990_v20  ;;  %v10071_v25 = vcombine.low %v990_v20, %v990_v20  ;;  %v12713_v20 = vld [vmem:[%s13933_s6 + $0x850] sm:$0xff]  }
 0x1bd   : > { %v12709_v18 = vld [vmem:[%s13935_s7 + $0x2dc] ss:$304 sps:$4 sm:$0xff]  }
 0x1bf   : > { %v10832_v30 = vpop.f32.mrb[16].mxu0  ;;  %8175 = vmatmul.mubr.bf16.gmra.mrb[108].mxu1 %v10073_v26 }
 0x1c0   : > { %v10872_v33 = vpop.f32.mrb[16].mxu1  ;;  %v10833_v35 = vpop.f32.mrb[17].mxu0 }
 0x1c1   : > { %v10834_v37 = vadd.f32 %v10833_v35, %v10832_v30  ;;  %v10873_v38 = vpop.f32.mrb[17].mxu1  ;;  %v10835_v41 = vpop.f32.mrb[18].mxu0  ;;  %v12686_v30 = vld [vmem:[%s13933_s6 + $0x7f0] sm:$0xff]  }
 0x1c2   : > { %v10874_v40 = vadd.f32 %v10873_v38, %v10872_v33  ;;  %v10875_v44 = vpop.f32.mrb[18].mxu1  ;;  %v10836_v47 = vpop.f32.mrb[19].mxu0  ;;  %v12687_v33 = vld [vmem:[%s13933_s6 + $0x730] sm:$0xff]   ;;  %11348 = vmatprep.subr.bf16.mxu1 %v12686_v30 }
 0x1c3   : > { %v7449_v43 = vadd.f32 %v10834_v37, %v14243_v3  ;;  %v10837_v50 = vadd.f32 %v10836_v47, %v10835_v41  ;;  %v10876_v51 = vpop.f32.mrb[19].mxu1  ;;  %v12667_v3 = vld [vmem:[%s13935_s7 + $0x524] ss:$304 sps:$4 sm:$0xff]   ;;  %v12689_v37 = vld [vmem:[%s13933_s6 + $0x778] sm:$0xff]  }
 0x1c4   : > { %v10877_v53 = vadd.f32 %v10876_v51, %v10875_v44  ;;  %8102 = vmatprep.mubr.bf16.mxu0 %v12667_v3  ;;  %v12693_v51 = vld [vmem:[%s13935_s7 + $0x70] ss:$304 sps:$4 sm:$0xff]  }
 0x1c5   : > { %v14305_v49 = vadd.f32 %v10874_v40, %v7449_v43  ;;  %v7452_v54 = vadd.f32 %v10837_v50, %v14250_v14  ;;  %8103 = vmatmul.mubr.bf16.gmra.mrb[104].mxu0 %v12671_v57  ;;  %v12675_v14 = vld [vmem:[%s13933_s6 + $0x720] sm:$0xff]   ;;  %v12690_v40 = vld [vmem:[%s13933_s6 + $0x7f8] sm:$0xff]  }
 0x1c6   : > { %11305 = vmatpush3.bf16.msra.mxu0 %v12675_v14  ;;  %8110 = vmatprep.mubr.bf16.mxu0 %v10072_v23  ;;  %v12691_v43 = vld [vmem:[%s13933_s6 + $0x738] sm:$0xff]  }
 0x1c7   : > { %v10838_v55 = vpop.f32.mrb[20].mxu0  ;;  %v14314_v61 = vadd.f32 %v10877_v53, %v7452_v54  ;;  %11306 = vmatprep.subr.bf16.mxu0 %v12677_v8  ;;  %v12698_v54 = vld [vmem:[%s13935_s7 + $0x7c] ss:$304 sps:$4 sm:$0xff]  }
 0x1c8   : > { %v10878_v62 = vpop.f32.mrb[20].mxu1  ;;  %v10839_v0 = vpop.f32.mrb[21].mxu0  ;;  %8278 = vmatprep.mubr.bf16.mxu1 %v12698_v54  ;;  %v12729_v54 = vld [vmem:[%s13933_s6 + $0x820] sm:$0xff]  }
 0x1c9   : > { %v10840_v1 = vadd.f32 %v10839_v0, %v10838_v55  ;;  %v10879_v2 = vpop.f32.mrb[21].mxu1  ;;  %v10841_v7 = vpop.f32.mrb[22].mxu0  ;;  %v12699_v55 = vld [vmem:[%s13933_s6 + $0x840] sm:$0xff]  }
 0x1ca   : > { %v10880_v6 = vadd.f32 %v10879_v2, %v10878_v62  ;;  %v10881_v10 = vpop.f32.mrb[22].mxu1  ;;  %v10842_v12 = vpop.f32.mrb[23].mxu0  ;;  %11307 = vmatpush3.bf16.msra.mxu0 %v12679_v13  ;;  %v12701_v62 = vld [vmem:[%s13933_s6 + $0x800] sm:$0xff]  }
 0x1cb   : > { %v7457_v9 = vadd.f32 %v10840_v1, %v14258_v28  ;;  %v10843_v16 = vadd.f32 %v10842_v12, %v10841_v7  ;;  %v10882_v17 = vpop.f32.mrb[23].mxu1  ;;  %11308 = vmatprep.subr.bf16.mxu0 %v12685_v27  ;;  %v12703_v1 = vld [vmem:[%s13933_s6 + $0x848] sm:$0xff]   ;;  %v12716_v27 = vld [vmem:[%s13933_s6 + $0x890] sm:$0xff]  }
 0x1cc   : > { %v10883_v19 = vadd.f32 %v10882_v17, %v10881_v10 }
 0x1cd   : > { %v14323_v15 = vadd.f32 %v10880_v6, %v7457_v9  ;;  %v7460_v28 = vadd.f32 %v10843_v16, %v14267_v45  ;;  %8111 = vmatmul.mubr.bf16.gmra.mrb[108].mxu0 %v10071_v25  ;;  %v12688_v45 = vld [vmem:[%s13933_s6 + $0x7b0] sm:$0xff]   ;;  %v12704_v6 = vld [vmem:[%s13933_s6 + $0x8c8] sm:$0xff]  }
 0x1ce   : > { %11309 = vmatpush3.bf16.msra.mxu0 %v12687_v33  ;;  %11349 = vmatpush3.bf16.msra.mxu1 %v12688_v45  ;;  %v12705_v9 = vld [vmem:[%s13933_s6 + $0x808] sm:$0xff]   ;;  %v12707_v16 = vld [vmem:[%s13935_s7 + $0x2d4] ss:$304 sps:$4 sm:$0xff]   ;;  %v12718_v45 = vld [vmem:[%s13933_s6 + $0x8d8] sm:$0xff]  }
 0x1cf   : > { %v10844_v29 = vpop.f32.mrb[24].mxu0  ;;  %v14331_v31 = vadd.f32 %v10883_v19, %v7460_v28  ;;  %11310 = vmatprep.subr.bf16.mxu0 %v12689_v37  ;;  %11350 = vmatprep.subr.bf16.mxu1 %v12690_v40  ;;  %v12711_v19 = vld [vmem:[%s13935_s7 + $0x2d0] ss:$304 sps:$4 sm:$0xff]   ;;  %v12720_v40 = vld [vmem:[%s13933_s6 + $0x898] sm:$0xff]  }
 0x1d0   : > { %v10884_v32 = vpop.f32.mrb[24].mxu1  ;;  %v10845_v34 = vpop.f32.mrb[25].mxu0  ;;  %8214 = vmatprep.mubr.bf16.mxu0 %v12695_v52  ;;  %v12714_v28 = vld [vmem:[%s13933_s6 + $0x8d0] sm:$0xff]   ;;  %v12727_v52 = vld [vmem:[%s13933_s6 + $0x860] sm:$0xff]  }
 0x1d1   : > { %v10846_v35 = vadd.f32 %v10845_v34, %v10844_v29  ;;  %v10885_v36 = vpop.f32.mrb[25].mxu1  ;;  %v10847_v39 = vpop.f32.mrb[26].mxu0 }
 0x1d2   : > { %v10886_v38 = vadd.f32 %v10885_v36, %v10884_v32  ;;  %v10887_v42 = vpop.f32.mrb[26].mxu1  ;;  %v10848_v44 = vpop.f32.mrb[27].mxu0  ;;  %11311 = vmatpush3.bf16.msra.mxu0 %v12691_v43  ;;  %11351 = vmatpush3.bf16.msra.mxu1 %v12692_v46  ;;  %v12717_v32 = vld [vmem:[%s13933_s6 + $0x858] sm:$0xff]  }
 0x1d3   : > { %v7465_v41 = vadd.f32 %v10846_v35, %v14274_v58  ;;  %v10849_v48 = vadd.f32 %v10848_v44, %v10847_v39  ;;  %v10888_v50 = vpop.f32.mrb[27].mxu1  ;;  %v12696_v58 = vld [vmem:[%s13935_s7 + $0x78] ss:$304 sps:$4 sm:$0xff]   ;;  %11376 = vmatprep.subr.bf16.mxu0 %v12699_v55  ;;  %11416 = vmatprep.subr.bf16.mxu1 %v12700_v59  ;;  %v12723_v43 = vld [vmem:[%s13935_s7 + $0x53c] ss:$304 sps:$4 sm:$0xff]   ;;  %v12730_v59 = vld [vmem:[%s13933_s6 + $0x8a0] sm:$0xff]  }
 0x1d4   : > { %v10889_v53 = vadd.f32 %v10888_v50, %v10887_v42  ;;  %v12719_v36 = vld [vmem:[%s13933_s6 + $0x818] sm:$0xff]  }
 0x1d5   : > { %v14340_v47 = vadd.f32 %v10886_v38, %v7465_v41  ;;  %v7468_v3 = vadd.f32 %v10849_v48, %v14281_v5  ;;  %8215 = vmatmul.mubr.bf16.vlgmr.msra.gmra.mrb[112].mxu0 %v12693_v51  ;;  %8279 = vmatmul.mubr.bf16.vlgmr.msra.gmra.mrb[112].mxu1 %v12696_v58  ;;  %v12702_v5 = vld [vmem:[%s13933_s6 + $0x880] sm:$0xff]   ;;  %v12726_v50 = vld [vmem:[%s13935_s7 + $0x538] ss:$304 sps:$4 sm:$0xff]  }
 0x1d6   : > { %11377 = vmatpush3.bf16.msra.mxu0 %v12701_v62  ;;  %11417 = vmatpush3.bf16.msra.mxu1 %v12702_v5  ;;  %v12725_v48 = vld [vmem:[%s13935_s7 + $0x530] ss:$304 sps:$4 sm:$0xff]  }
 0x1d7   : > { %v14348_v56 = vadd.f32 %v10889_v53, %v7468_v3  ;;  %v10850_v57 = vpop.f32.mrb[28].mxu0  ;;  %11378 = vmatprep.subr.bf16.mxu0 %v12703_v1  ;;  %11418 = vmatprep.subr.bf16.mxu1 %v12704_v6  ;;  %v12728_v58 = vld [vmem:[%s13933_s6 + $0x8e0] sm:$0xff]  }
 0x1d8   : > { %v10890_v60 = vpop.f32.mrb[28].mxu1  ;;  %v10851_v63 = vpop.f32.mrb[29].mxu0  ;;  %8222 = vmatprep.mubr.bf16.mxu0 %v12707_v16  ;;  %8286 = vmatprep.mubr.bf16.mxu1 %v12709_v18 }
 0x1d9   : > { %v10852_v0 = vadd.f32 %v10851_v63, %v10850_v57  ;;  %v10891_v14 = vpop.f32.mrb[29].mxu1  ;;  %v10853_v4 = vpop.f32.mrb[30].mxu0  ;;  %v12731_v63 = vld [vmem:[%s13933_s6 + $0x868] sm:$0xff]  }
 0x1da   : > { %v10892_v2 = vadd.f32 %v10891_v14, %v10890_v60  ;;  %v10893_v8 = vpop.f32.mrb[30].mxu1  ;;  %v10854_v10 = vpop.f32.mrb[31].mxu0  ;;  %11379 = vmatpush3.bf16.msra.mxu0 %v12705_v9  ;;  %11419 = vmatpush3.bf16.msra.mxu1 %v12706_v11  ;;  %v12733_v4 = vld [vmem:[%s13933_s6 + $0x828] sm:$0xff]  }
 0x1db   : > { %v7473_v7 = vadd.f32 %v10852_v0, %v14290_v22  ;;  %v10894_v13 = vpop.f32.mrb[31].mxu1  ;;  %v12712_v22 = vld [vmem:[%s13935_s7 + $0x2d8] ss:$304 sps:$4 sm:$0xff]   ;;  %11380 = vmatprep.subr.bf16.mxu0 %v12713_v20  ;;  %11420 = vmatprep.subr.bf16.mxu1 %v12714_v28  ;;  %v992_v8 = vld [vmem:[%s13935_s7 + $0x790] sm:$0x77] }
 0x1dc   : > { %v12732_v0 = vld [vmem:[%s13933_s6 + $0x8e8] sm:$0xff]   ;;  %v10076_v9 = vcombine.high %v992_v8, %v992_v8  ;;  %v10075_v11 = vcombine.low %v992_v8, %v992_v8  ;;  %v12742_v28 = vld [vmem:[%s13933_s6 + $0x8b0] sm:$0xff]  }
 0x1dd   : > { %v14358_v12 = vadd.f32 %v10892_v2, %v7473_v7  ;;  %8223 = vmatmul.mubr.bf16.gmra.mrb[116].mxu0 %v12711_v19  ;;  %8287 = vmatmul.mubr.bf16.gmra.mrb[116].mxu1 %v12712_v22  ;;  %v12734_v7 = vld [vmem:[%s13933_s6 + $0x8a8] sm:$0xff]   ;;  %v12740_v22 = vld [vmem:[%s13933_s6 + $0x8f0] sm:$0xff]  }
 0x1de   : > { %11381 = vmatpush3.bf16.msra.mxu0 %v12715_v24  ;;  %11421 = vmatpush3.bf16.msra.mxu1 %v12716_v27  ;;  %v993_v10 = vld [vmem:[%s13935_s7 + $0x798] sm:$0x77]  ;;  %v12767_v8 = vld [vmem:[%s13933_s6 + $0x950] sm:$0xff]  }
 0x1df   : > { %v10912_v17 = vpop.f32.mrb[32].mxu0  ;;  %11382 = vmatprep.subr.bf16.mxu0 %v12717_v32  ;;  %11422 = vmatprep.subr.bf16.mxu1 %v12718_v45  ;;  %v10078_v13 = vcombine.high %v993_v10, %v993_v10  ;;  %v10077_v16 = vcombine.low %v993_v10, %v993_v10  ;;  %v12746_v45 = vld [vmem:[%s13933_s6 + $0x8b8] sm:$0xff]  }
 0x1e0   : > { %v10952_v21 = vpop.f32.mrb[32].mxu1  ;;  %v10913_v23 = vpop.f32.mrb[33].mxu0  ;;  %8294 = vmatprep.mubr.bf16.mxu1 %v12723_v43  ;;  %v12753_v43 = vld [vmem:[%s13933_s6 + $0x940] sm:$0xff]  }
 0x1e1   : > { %v10914_v25 = vadd.f32 %v10913_v23, %v10912_v17  ;;  %v10953_v26 = vpop.f32.mrb[33].mxu1  ;;  %v10915_v30 = vpop.f32.mrb[34].mxu0  ;;  %v12739_v17 = vld [vmem:[%s13933_s6 + $0x870] sm:$0xff]  }
 0x1e2   : > { %v10954_v29 = vadd.f32 %v10953_v26, %v10952_v21  ;;  %v10955_v34 = vpop.f32.mrb[34].mxu1  ;;  %v10916_v35 = vpop.f32.mrb[35].mxu0  ;;  %11383 = vmatpush3.bf16.msra.mxu0 %v12719_v36  ;;  %11423 = vmatpush3.bf16.msra.mxu1 %v12720_v40  ;;  %v12749_v40 = vld [vmem:[%s13935_s7 + $0x84] ss:$304 sps:$4 sm:$0xff]  }
 0x1e3   : > { %v7577_v33 = vadd.f32 %v10914_v25, %v14305_v49  ;;  %v10917_v38 = vadd.f32 %v10916_v35, %v10915_v30  ;;  %v10956_v39 = vpop.f32.mrb[35].mxu1  ;;  %v12721_v49 = vld [vmem:[%s13935_s7 + $0x534] ss:$304 sps:$4 sm:$0xff]   ;;  %11384 = vmatprep.subr.bf16.mxu0 %v12727_v52  ;;  %11424 = vmatprep.subr.bf16.mxu1 %v12728_v58  ;;  %v12743_v25 = vld [vmem:[%s13933_s6 + $0x878] sm:$0xff]  }
 0x1e4   : > { %v10957_v41 = vadd.f32 %v10956_v39, %v10955_v34  ;;  %8230 = vmatprep.mubr.bf16.mxu0 %v12721_v49  ;;  %v12747_v39 = vld [vmem:[%s13935_s7 + $0x80] ss:$304 sps:$4 sm:$0xff]   ;;  %v12752_v49 = vld [vmem:[%s13935_s7 + $0x8c] ss:$304 sps:$4 sm:$0xff]  }
 0x1e5   : > { %v14372_v37 = vadd.f32 %v10954_v29, %v7577_v33  ;;  %v7580_v42 = vadd.f32 %v10917_v38, %v14314_v61  ;;  %8231 = vmatmul.mubr.bf16.gmra.mrb[120].mxu0 %v12725_v48  ;;  %8295 = vmatmul.mubr.bf16.gmra.mrb[120].mxu1 %v12726_v50  ;;  %v12744_v29 = vld [vmem:[%s13933_s6 + $0x8f8] sm:$0xff]   ;;  %v12755_v52 = vld [vmem:[%s13933_s6 + $0x900] sm:$0xff]  }
 0x1e6   : > { %11385 = vmatpush3.bf16.msra.mxu0 %v12729_v54  ;;  %11425 = vmatpush3.bf16.msra.mxu1 %v12730_v59  ;;  %v12745_v33 = vld [vmem:[%s13933_s6 + $0x838] sm:$0xff]   ;;  %v12756_v58 = vld [vmem:[%s13933_s6 + $0x980] sm:$0xff]  }
 0x1e7   : > { %v10918_v44 = vpop.f32.mrb[36].mxu0  ;;  %v14380_v51 = vadd.f32 %v10957_v41, %v7580_v42  ;;  %11386 = vmatprep.subr.bf16.mxu0 %v12731_v63  ;;  %11426 = vmatprep.subr.bf16.mxu1 %v12732_v0 }
 0x1e8   : > { %v10958_v46 = vpop.f32.mrb[36].mxu1  ;;  %v10919_v53 = vpop.f32.mrb[37].mxu0  ;;  %8238 = vmatprep.mubr.bf16.mxu0 %v10076_v9  ;;  %8302 = vmatprep.mubr.bf16.mxu1 %v10078_v13  ;;  %v12768_v9 = vld [vmem:[%s13933_s6 + $0x9d0] sm:$0xff]  }
 0x1e9   : > { %v10920_v61 = vadd.f32 %v10919_v53, %v10918_v44  ;;  %v10959_v3 = vpop.f32.mrb[37].mxu1  ;;  %v10921_v57 = vpop.f32.mrb[38].mxu0 }
 0x1ea   : > { %v10960_v55 = vadd.f32 %v10959_v3, %v10958_v46  ;;  %v10961_v62 = vpop.f32.mrb[38].mxu1  ;;  %v10922_v5 = vpop.f32.mrb[39].mxu0  ;;  %11387 = vmatpush3.bf16.msra.mxu0 %v12733_v4  ;;  %11427 = vmatpush3.bf16.msra.mxu1 %v12734_v7  ;;  %v12754_v46 = vld [vmem:[%s13933_s6 + $0x9c0] sm:$0xff]   ;;  %v12757_v3 = vld [vmem:[%s13933_s6 + $0x948] sm:$0xff]  }
 0x1eb   : > { %v7585_v60 = vadd.f32 %v10920_v61, %v14323_v15  ;;  %v10923_v1 = vadd.f32 %v10922_v5, %v10921_v57  ;;  %v10962_v2 = vpop.f32.mrb[39].mxu1  ;;  %11388 = vmatprep.subr.bf16.mxu0 %v12739_v17  ;;  %11428 = vmatprep.subr.bf16.mxu1 %v12740_v22  ;;  %v12758_v57 = vld [vmem:[%s13933_s6 + $0x9c8] sm:$0xff]   ;;  %v12770_v17 = vld [vmem:[%s13933_s6 + $0x990] sm:$0xff]  }
 0x1ec   : > { %v10963_v6 = vadd.f32 %v10962_v2, %v10961_v62  ;;  %v12759_v62 = vld [vmem:[%s13933_s6 + $0x908] sm:$0xff]   ;;  %v12761_v2 = vld [vmem:[%s13935_s7 + $0x2e4] ss:$304 sps:$4 sm:$0xff]  }
 0x1ed   : > { %v14389_v14 = vadd.f32 %v10960_v55, %v7585_v60  ;;  %v7588_v15 = vadd.f32 %v10923_v1, %v14331_v31  ;;  %8239 = vmatmul.mubr.bf16.gmra.mrb[124].mxu0 %v10075_v11  ;;  %v12741_v31 = vld [vmem:[%s13933_s6 + $0x830] sm:$0xff]   ;;  %8303 = vmatmul.mubr.bf16.gmra.mrb[124].mxu1 %v10077_v16  ;;  %v12760_v5 = vld [vmem:[%s13933_s6 + $0x988] sm:$0xff]  }
 0x1ee   : > { %11389 = vmatpush3.bf16.msra.mxu0 %v12741_v31  ;;  %11429 = vmatpush3.bf16.msra.mxu1 %v12742_v28  ;;  %v12763_v4 = vld [vmem:[%s13935_s7 + $0x2ec] ss:$304 sps:$4 sm:$0xff]   ;;  %v12766_v7 = vld [vmem:[%s13935_s7 + $0x2e8] ss:$304 sps:$4 sm:$0xff]   ;;  %v12769_v11 = vld [vmem:[%s13933_s6 + $0x910] sm:$0xff]  }
 0x1ef   : > { %v14397_v18 = vadd.f32 %v10963_v6, %v7588_v15  ;;  %v10924_v19 = vpop.f32.mrb[40].mxu0  ;;  %11390 = vmatprep.subr.bf16.mxu0 %v12743_v25  ;;  %11430 = vmatprep.subr.bf16.mxu1 %v12744_v29  ;;  %v12772_v28 = vld [vmem:[%s13933_s6 + $0x9d8] sm:$0xff]  }
 0x1f0   : > { %v10964_v20 = vpop.f32.mrb[40].mxu1  ;;  %v10925_v21 = vpop.f32.mrb[41].mxu0  ;;  %8342 = vmatprep.mubr.bf16.mxu0 %v12749_v40  ;;  %8406 = vmatprep.mubr.bf16.mxu1 %v12752_v49  ;;  %v12774_v29 = vld [vmem:[%s13933_s6 + $0x998] sm:$0xff]   ;;  %v12781_v40 = vld [vmem:[%s13933_s6 + $0x960] sm:$0xff]  }
 0x1f1   : > { %v10926_v23 = vadd.f32 %v10925_v21, %v10924_v19  ;;  %v10965_v24 = vpop.f32.mrb[41].mxu1  ;;  %v10927_v27 = vpop.f32.mrb[42].mxu0 }
 0x1f2   : > { %v10966_v26 = vadd.f32 %v10965_v24, %v10964_v20  ;;  %v10967_v32 = vpop.f32.mrb[42].mxu1  ;;  %v10928_v34 = vpop.f32.mrb[43].mxu0  ;;  %11391 = vmatpush3.bf16.msra.mxu0 %v12745_v33  ;;  %11431 = vmatpush3.bf16.msra.mxu1 %v12746_v45  ;;  %v12771_v20 = vld [vmem:[%s13933_s6 + $0x958] sm:$0xff]   ;;  %v12779_v45 = vld [vmem:[%s13935_s7 + $0x540] ss:$304 sps:$4 sm:$0xff]  }
 0x1f3   : > { %v7593_v30 = vadd.f32 %v10926_v23, %v14340_v47  ;;  %v10929_v36 = vadd.f32 %v10928_v34, %v10927_v27  ;;  %v10968_v38 = vpop.f32.mrb[43].mxu1  ;;  %v12750_v47 = vld [vmem:[%s13935_s7 + $0x88] ss:$304 sps:$4 sm:$0xff]   ;;  %11456 = vmatprep.subr.bf16.mxu0 %v12753_v43  ;;  %11496 = vmatprep.subr.bf16.mxu1 %v12754_v46  ;;  %v12777_v34 = vld [vmem:[%s13935_s7 + $0x54c] ss:$304 sps:$4 sm:$0xff]   ;;  %v12784_v46 = vld [vmem:[%s13933_s6 + $0x9a0] sm:$0xff]  }
 0x1f4   : > { %v10969_v41 = vadd.f32 %v10968_v38, %v10967_v32  ;;  %v12773_v24 = vld [vmem:[%s13933_s6 + $0x918] sm:$0xff]  }
 0x1f5   : > { %v14407_v35 = vadd.f32 %v10966_v26, %v7593_v30  ;;  %v7596_v42 = vadd.f32 %v10929_v36, %v14348_v56  ;;  %8343 = vmatmul.mubr.bf16.vlgmr.msra.gmra.mrb[128].mxu0 %v12747_v39  ;;  %8407 = vmatmul.mubr.bf16.vlgmr.msra.gmra.mrb[128].mxu1 %v12750_v47  ;;  %v12780_v38 = vld [vmem:[%s13935_s7 + $0x548] ss:$304 sps:$4 sm:$0xff]   ;;  %v12782_v47 = vld [vmem:[%s13933_s6 + $0x9e0] sm:$0xff]  }
 0x1f6   : > { %11457 = vmatpush3.bf16.msra.mxu0 %v12755_v52  ;;  %11497 = vmatpush3.bf16.msra.mxu1 %v12756_v58 }
 0x1f7   : > { %v10930_v44 = vpop.f32.mrb[44].mxu0  ;;  %v14416_v48 = vadd.f32 %v10969_v41, %v7596_v42  ;;  %11458 = vmatprep.subr.bf16.mxu0 %v12757_v3  ;;  %11498 = vmatprep.subr.bf16.mxu1 %v12758_v57  ;;  %v12783_v42 = vld [vmem:[%s13933_s6 + $0x920] sm:$0xff]  }
 0x1f8   : > { %v10970_v50 = vpop.f32.mrb[44].mxu1  ;;  %v10931_v53 = vpop.f32.mrb[45].mxu0  ;;  %8350 = vmatprep.mubr.bf16.mxu0 %v12761_v2  ;;  %8414 = vmatprep.mubr.bf16.mxu1 %v12763_v4  ;;  %v12793_v4 = vld [vmem:[%s13933_s6 + $0x970] sm:$0xff]  }
 0x1f9   : > { %v10932_v56 = vadd.f32 %v10931_v53, %v10930_v44  ;;  %v10971_v61 = vpop.f32.mrb[45].mxu1  ;;  %v10933_v55 = vpop.f32.mrb[46].mxu0  ;;  %v12785_v53 = vld [vmem:[%s13933_s6 + $0x968] sm:$0xff]  }
 0x1fa   : > { %v10972_v54 = vadd.f32 %v10971_v61, %v10970_v50  ;;  %v10973_v60 = vpop.f32.mrb[46].mxu1  ;;  %v10934_v63 = vpop.f32.mrb[47].mxu0  ;;  %11459 = vmatpush3.bf16.msra.mxu0 %v12759_v62  ;;  %11499 = vmatpush3.bf16.msra.mxu1 %v12760_v5  ;;  %v12787_v55 = vld [vmem:[%s13933_s6 + $0x928] sm:$0xff]  }
 0x1fb   : > { %v7601_v59 = vadd.f32 %v10932_v56, %v14358_v12  ;;  %v10974_v1 = vpop.f32.mrb[47].mxu1  ;;  %v12765_v12 = vld [vmem:[%s13935_s7 + $0x2e0] ss:$304 sps:$4 sm:$0xff]   ;;  %11460 = vmatprep.subr.bf16.mxu0 %v12767_v8  ;;  %11500 = vmatprep.subr.bf16.mxu1 %v12768_v9  ;;  %v12786_v56 = vld [vmem:[%s13933_s6 + $0x9e8] sm:$0xff]  }
 0x1fc   : > { %v994_v60 = vld [vmem:[%s13935_s7 + $0x7a0] sm:$0x77] }
 0x1fd   : > { %v14425_v0 = vadd.f32 %v10972_v54, %v7601_v59  ;;  %8351 = vmatmul.mubr.bf16.gmra.mrb[132].mxu0 %v12765_v12  ;;  %8415 = vmatmul.mubr.bf16.gmra.mrb[132].mxu1 %v12766_v7  ;;  %v12788_v59 = vld [vmem:[%s13933_s6 + $0x9a8] sm:$0xff]   ;;  %v10080_v63 = vcombine.high %v994_v60, %v994_v60  ;;  %v10079_v1 = vcombine.low %v994_v60, %v994_v60  ;;  %v12794_v12 = vld [vmem:[%s13933_s6 + $0x9f0] sm:$0xff]  }
 0x1fe   : > { %11461 = vmatpush3.bf16.msra.mxu0 %v12769_v11  ;;  %11501 = vmatpush3.bf16.msra.mxu1 %v12770_v17  ;;  %v12821_v60 = vld [vmem:[%s13933_s6 + $0xa50] sm:$0xff]  }
 0x1ff   : > { %v10992_v6 = vpop.f32.mrb[48].mxu0  ;;  %11462 = vmatprep.subr.bf16.mxu0 %v12771_v20  ;;  %11502 = vmatprep.subr.bf16.mxu1 %v12772_v28  ;;  %v12800_v28 = vld [vmem:[%s13933_s6 + $0x9b8] sm:$0xff]  }
 0x200   : > { %v11032_v15 = vpop.f32.mrb[48].mxu1  ;;  %v10993_v10 = vpop.f32.mrb[49].mxu0  ;;  %8422 = vmatprep.mubr.bf16.mxu1 %v12777_v34 }
 0x201   : > { %v10994_v13 = vadd.f32 %v10993_v10, %v10992_v6  ;;  %v11033_v16 = vpop.f32.mrb[49].mxu1  ;;  %v10995_v22 = vpop.f32.mrb[50].mxu0 }
 0x202   : > { %v11034_v19 = vadd.f32 %v11033_v16, %v11032_v15  ;;  %v11035_v21 = vpop.f32.mrb[50].mxu1  ;;  %v10996_v23 = vpop.f32.mrb[51].mxu0  ;;  %11463 = vmatpush3.bf16.msra.mxu0 %v12773_v24  ;;  %11503 = vmatpush3.bf16.msra.mxu1 %v12774_v29  ;;  %v12795_v15 = vld [vmem:[%s13933_s6 + $0x930] sm:$0xff]  }
 0x203   : > { %v7705_v31 = vadd.f32 %v10994_v13, %v14372_v37  ;;  %v10997_v26 = vadd.f32 %v10996_v23, %v10995_v22  ;;  %v11036_v27 = vpop.f32.mrb[51].mxu1  ;;  %v12775_v37 = vld [vmem:[%s13935_s7 + $0x544] ss:$304 sps:$4 sm:$0xff]   ;;  %11464 = vmatprep.subr.bf16.mxu0 %v12781_v40  ;;  %11504 = vmatprep.subr.bf16.mxu1 %v12782_v47  ;;  %v12797_v13 = vld [vmem:[%s13933_s6 + $0x978] sm:$0xff]  }
 0x204   : > { %v11037_v30 = vadd.f32 %v11036_v27, %v11035_v21  ;;  %8358 = vmatprep.mubr.bf16.mxu0 %v12775_v37  ;;  %v12801_v27 = vld [vmem:[%s13935_s7 + $0x90] ss:$304 sps:$4 sm:$0xff]   ;;  %v12804_v37 = vld [vmem:[%s13935_s7 + $0x98] ss:$304 sps:$4 sm:$0xff]  }
 0x205   : > { %v14439_v25 = vadd.f32 %v11034_v19, %v7705_v31  ;;  %v7708_v32 = vadd.f32 %v10997_v26, %v14380_v51  ;;  %8359 = vmatmul.mubr.bf16.gmra.mrb[136].mxu0 %v12779_v45  ;;  %8423 = vmatmul.mubr.bf16.gmra.mrb[136].mxu1 %v12780_v38  ;;  %v12798_v19 = vld [vmem:[%s13933_s6 + $0x9f8] sm:$0xff]   ;;  %v12809_v40 = vld [vmem:[%s13933_s6 + $0xa00] sm:$0xff]  }
 0x206   : > { %11465 = vmatpush3.bf16.msra.mxu0 %v12783_v42  ;;  %11505 = vmatpush3.bf16.msra.mxu1 %v12784_v46  ;;  %v12799_v31 = vld [vmem:[%s13933_s6 + $0x938] sm:$0xff]  }
 0x207   : > { %v10998_v33 = vpop.f32.mrb[52].mxu0  ;;  %v14447_v39 = vadd.f32 %v11037_v30, %v7708_v32  ;;  %11466 = vmatprep.subr.bf16.mxu0 %v12785_v53  ;;  %11506 = vmatprep.subr.bf16.mxu1 %v12786_v56  ;;  %v12806_v32 = vld [vmem:[%s13935_s7 + $0x9c] ss:$304 sps:$4 sm:$0xff]  }
 0x208   : > { %v11038_v36 = vpop.f32.mrb[52].mxu1  ;;  %v10999_v41 = vpop.f32.mrb[53].mxu0  ;;  %8366 = vmatprep.mubr.bf16.mxu0 %v10080_v63 }
 0x209   : > { %v11000_v51 = vadd.f32 %v10999_v41, %v10998_v33  ;;  %v11039_v49 = vpop.f32.mrb[53].mxu1  ;;  %v11001_v44 = vpop.f32.mrb[54].mxu0  ;;  %v12807_v33 = vld [vmem:[%s13933_s6 + $0xa40] sm:$0xff]  }
 0x20a   : > { %v11040_v43 = vadd.f32 %v11039_v49, %v11038_v36  ;;  %v11041_v52 = vpop.f32.mrb[54].mxu1  ;;  %v11002_v58 = vpop.f32.mrb[55].mxu0  ;;  %11467 = vmatpush3.bf16.msra.mxu0 %v12787_v55  ;;  %11507 = vmatpush3.bf16.msra.mxu1 %v12788_v59  ;;  %v12808_v36 = vld [vmem:[%s13933_s6 + $0xac0] sm:$0xff]   ;;  %v12811_v49 = vld [vmem:[%s13933_s6 + $0xa48] sm:$0xff]  }
 0x20b   : > { %v7713_v50 = vadd.f32 %v11000_v51, %v14389_v14  ;;  %v11003_v3 = vadd.f32 %v11002_v58, %v11001_v44  ;;  %v11042_v54 = vpop.f32.mrb[55].mxu1  ;;  %v995_v14 = vld [vmem:[%s13935_s7 + $0x7a8] sm:$0x77]  ;;  %11468 = vmatprep.subr.bf16.mxu0 %v12793_v4  ;;  %11508 = vmatprep.subr.bf16.mxu1 %v12794_v12  ;;  %v12824_v4 = vld [vmem:[%s13933_s6 + $0xa90] sm:$0xff]  }
 0x20c   : > { %v11043_v57 = vadd.f32 %v11042_v54, %v11041_v52  ;;  %v10082_v5 = vcombine.high %v995_v14, %v995_v14  ;;  %v10081_v2 = vcombine.low %v995_v14, %v995_v14  ;;  %v12812_v44 = vld [vmem:[%s13933_s6 + $0xac8] sm:$0xff]   ;;  %v12815_v54 = vld [vmem:[%s13935_s7 + $0x2f4] ss:$304 sps:$4 sm:$0xff]  }
 0x20d   : > { %v14456_v61 = vadd.f32 %v11040_v43, %v7713_v50  ;;  %v7716_v62 = vadd.f32 %v11003_v3, %v14397_v18  ;;  %8367 = vmatmul.mubr.bf16.gmra.mrb[140].mxu0 %v10079_v1  ;;  %v12796_v18 = vld [vmem:[%s13933_s6 + $0x9b0] sm:$0xff]   ;;  %v12813_v52 = vld [vmem:[%s13933_s6 + $0xa08] sm:$0xff]  }
 0x20e   : > { %8430 = vmatprep.mubr.bf16.mxu1 %v10082_v5  ;;  %11469 = vmatpush3.bf16.msra.mxu0 %v12795_v15  ;;  %v12814_v58 = vld [vmem:[%s13933_s6 + $0xa88] sm:$0xff]   ;;  %v12823_v5 = vld [vmem:[%s13933_s6 + $0xa10] sm:$0xff]  }
 0x20f   : > { %v11004_v6 = vpop.f32.mrb[56].mxu0  ;;  %v14465_v7 = vadd.f32 %v11043_v57, %v7716_v62  ;;  %8431 = vmatmul.mubr.bf16.gmra.mrb[140].mxu1 %v10081_v2  ;;  %11470 = vmatprep.subr.bf16.mxu0 %v12797_v13  ;;  %v12817_v55 = vld [vmem:[%s13935_s7 + $0x2fc] ss:$304 sps:$4 sm:$0xff]   ;;  %v12819_v57 = vld [vmem:[%s13935_s7 + $0x2f0] ss:$304 sps:$4 sm:$0xff]  }
 0x210   : > { %v11044_v8 = vpop.f32.mrb[56].mxu1  ;;  %v11005_v9 = vpop.f32.mrb[57].mxu0  ;;  %11509 = vmatpush3.bf16.msra.mxu1 %v12796_v18  ;;  %8534 = vmatprep.mubr.bf16.mxu1 %v12806_v32  ;;  %v12820_v59 = vld [vmem:[%s13935_s7 + $0x2f8] ss:$304 sps:$4 sm:$0xff]   ;;  %v12822_v62 = vld [vmem:[%s13933_s6 + $0xad0] sm:$0xff]  }
 0x211   : > { %v11006_v10 = vadd.f32 %v11005_v9, %v11004_v6  ;;  %v11045_v11 = vpop.f32.mrb[57].mxu1  ;;  %v11007_v17 = vpop.f32.mrb[58].mxu0  ;;  %11510 = vmatprep.subr.bf16.mxu1 %v12798_v19  ;;  %v12826_v18 = vld [vmem:[%s13933_s6 + $0xad8] sm:$0xff]  }
 0x212   : > { %v11046_v16 = vadd.f32 %v11045_v11, %v11044_v8  ;;  %v11047_v20 = vpop.f32.mrb[58].mxu1  ;;  %v11008_v21 = vpop.f32.mrb[59].mxu0  ;;  %11471 = vmatpush3.bf16.msra.mxu0 %v12799_v31  ;;  %v12825_v8 = vld [vmem:[%s13933_s6 + $0xa58] sm:$0xff]  }
 0x213   : > { %v7721_v22 = vadd.f32 %v11006_v10, %v14407_v35  ;;  %v11009_v24 = vadd.f32 %v11008_v21, %v11007_v17  ;;  %v11048_v26 = vpop.f32.mrb[59].mxu1  ;;  %v12803_v35 = vld [vmem:[%s13935_s7 + $0x94] ss:$304 sps:$4 sm:$0xff]   ;;  %11536 = vmatprep.subr.bf16.mxu0 %v12807_v33  ;;  %v12827_v11 = vld [vmem:[%s13933_s6 + $0xa18] sm:$0xff]  }
 0x214   : > { %v11049_v29 = vadd.f32 %v11048_v26, %v11047_v20  ;;  %11511 = vmatpush3.bf16.msra.mxu1 %v12800_v28  ;;  %8470 = vmatprep.mubr.bf16.mxu0 %v12803_v35  ;;  %v12828_v19 = vld [vmem:[%s13933_s6 + $0xa98] sm:$0xff]   ;;  %v12833_v28 = vld [vmem:[%s13935_s7 + $0x550] ss:$304 sps:$4 sm:$0xff]  }
 0x215   : > { %v14474_v23 = vadd.f32 %v11046_v16, %v7721_v22  ;;  %v7724_v30 = vadd.f32 %v11009_v24, %v14416_v48  ;;  %8471 = vmatmul.mubr.bf16.vlgmr.msra.gmra.mrb[144].mxu0 %v12801_v27  ;;  %11576 = vmatprep.subr.bf16.mxu1 %v12808_v36  ;;  %v12810_v48 = vld [vmem:[%s13933_s6 + $0xa80] sm:$0xff]   ;;  %v12831_v21 = vld [vmem:[%s13935_s7 + $0x55c] ss:$304 sps:$4 sm:$0xff]   ;;  %v12834_v24 = vld [vmem:[%s13935_s7 + $0x558] ss:$304 sps:$4 sm:$0xff]  }
 0x216   : > { %11537 = vmatpush3.bf16.msra.mxu0 %v12809_v40  ;;  %8478 = vmatprep.mubr.bf16.mxu0 %v12815_v54  ;;  %v12835_v26 = vld [vmem:[%s13933_s6 + $0xa60] sm:$0xff]  }
 0x217   : > { %v14482_v34 = vadd.f32 %v11049_v29, %v7724_v30  ;;  %v11010_v45 = vpop.f32.mrb[60].mxu0  ;;  %8535 = vmatmul.mubr.bf16.vlgmr.msra.gmra.mrb[144].mxu1 %v12804_v37  ;;  %11538 = vmatprep.subr.bf16.mxu0 %v12811_v49  ;;  %v12836_v35 = vld [vmem:[%s13933_s6 + $0xae0] sm:$0xff]  }
 0x218   : > { %v11050_v38 = vpop.f32.mrb[60].mxu1  ;;  %v11011_v41 = vpop.f32.mrb[61].mxu0  ;;  %11577 = vmatpush3.bf16.msra.mxu1 %v12810_v48  ;;  %8542 = vmatprep.mubr.bf16.mxu1 %v12817_v55  ;;  %v12838_v33 = vld [vmem:[%s13933_s6 + $0xaa0] sm:$0xff]   ;;  %v12840_v48 = vld [vmem:[%s13933_s6 + $0xae8] sm:$0xff]   ;;  %v12847_v55 = vld [vmem:[%s13933_s6 + $0xa70] sm:$0xff]  }
 0x219   : > { %v11012_v47 = vadd.f32 %v11011_v41, %v11010_v45  ;;  %v11051_v51 = vpop.f32.mrb[61].mxu1  ;;  %v11013_v43 = vpop.f32.mrb[62].mxu0  ;;  %11578 = vmatprep.subr.bf16.mxu1 %v12812_v44  ;;  %v12842_v44 = vld [vmem:[%s13933_s6 + $0xaa8] sm:$0xff]  }
 0x21a   : > { %v11052_v42 = vadd.f32 %v11051_v51, %v11050_v38  ;;  %v11053_v50 = vpop.f32.mrb[62].mxu1  ;;  %v11014_v53 = vpop.f32.mrb[63].mxu0  ;;  %11539 = vmatpush3.bf16.msra.mxu0 %v12813_v52  ;;  %v12839_v38 = vld [vmem:[%s13933_s6 + $0xa68] sm:$0xff]  }
 0x21b   : > { %v7729_v46 = vadd.f32 %v11012_v47, %v14425_v0  ;;  %v11054_v3 = vpop.f32.mrb[63].mxu1  ;;  %11540 = vmatprep.subr.bf16.mxu0 %v12821_v60  ;;  %v12841_v51 = vld [vmem:[%s13933_s6 + $0xa28] sm:$0xff]   ;;  %v996_v50 = vld [vmem:[%s13935_s7 + $0x7b0] sm:$0x77] }
 0x21c   : > { %11579 = vmatpush3.bf16.msra.mxu1 %v12814_v58  ;;  %v997_v52 = vld [vmem:[%s13935_s7 + $0x7b8] sm:$0x77]  ;;  %v10084_v53 = vcombine.high %v996_v50, %v996_v50  ;;  %v10083_v3 = vcombine.low %v996_v50, %v996_v50  ;;  %v12875_v50 = vld [vmem:[%s13933_s6 + $0xb50] sm:$0xff]  }
 0x21d   : > { %v14492_v56 = vadd.f32 %v11052_v42, %v7729_v46  ;;  %8479 = vmatmul.mubr.bf16.gmra.mrb[148].mxu0 %v12819_v57  ;;  %11580 = vmatprep.subr.bf16.mxu1 %v12822_v62  ;;  %v10086_v58 = vcombine.high %v997_v52, %v997_v52  ;;  %v10085_v54 = vcombine.low %v997_v52, %v997_v52 }
 0x21e   : > { %11541 = vmatpush3.bf16.msra.mxu0 %v12823_v5 }
 0x21f   : > { %v11072_v0 = vpop.f32.mrb[64].mxu0  ;;  %8543 = vmatmul.mubr.bf16.gmra.mrb[148].mxu1 %v12820_v59  ;;  %11542 = vmatprep.subr.bf16.mxu0 %v12825_v8 }
 0x220   : > { %v11112_v14 = vpop.f32.mrb[64].mxu1  ;;  %v11073_v63 = vpop.f32.mrb[65].mxu0  ;;  %11581 = vmatpush3.bf16.msra.mxu1 %v12824_v4  ;;  %8550 = vmatprep.mubr.bf16.mxu1 %v12831_v21 }
 0x221   : > { %v11074_v1 = vadd.f32 %v11073_v63, %v11072_v0  ;;  %v11113_v2 = vpop.f32.mrb[65].mxu1  ;;  %v11075_v12 = vpop.f32.mrb[66].mxu0  ;;  %11582 = vmatprep.subr.bf16.mxu1 %v12826_v18  ;;  %v12848_v0 = vld [vmem:[%s13933_s6 + $0xaf0] sm:$0xff]   ;;  %v12854_v18 = vld [vmem:[%s13933_s6 + $0xab8] sm:$0xff]  }
 0x222   : > { %v11114_v6 = vadd.f32 %v11113_v2, %v11112_v14  ;;  %v11115_v9 = vpop.f32.mrb[66].mxu1  ;;  %v11076_v10 = vpop.f32.mrb[67].mxu0  ;;  %11543 = vmatpush3.bf16.msra.mxu0 %v12827_v11  ;;  %v12849_v14 = vld [vmem:[%s13933_s6 + $0xa30] sm:$0xff]  }
 0x223   : > { %v7833_v15 = vadd.f32 %v11074_v1, %v14439_v25  ;;  %v11077_v16 = vadd.f32 %v11076_v10, %v11075_v12  ;;  %v11116_v17 = vpop.f32.mrb[67].mxu1  ;;  %v12829_v25 = vld [vmem:[%s13935_s7 + $0x554] ss:$304 sps:$4 sm:$0xff]   ;;  %11544 = vmatprep.subr.bf16.mxu0 %v12835_v26  ;;  %v12851_v1 = vld [vmem:[%s13933_s6 + $0xa78] sm:$0xff]  }
 0x224   : > { %v11117_v22 = vadd.f32 %v11116_v17, %v11115_v9  ;;  %11583 = vmatpush3.bf16.msra.mxu1 %v12828_v19  ;;  %8486 = vmatprep.mubr.bf16.mxu0 %v12829_v25  ;;  %v12855_v17 = vld [vmem:[%s13935_s7 + $0xa0] ss:$304 sps:$4 sm:$0xff]   ;;  %v12857_v19 = vld [vmem:[%s13935_s7 + $0xa4] ss:$304 sps:$4 sm:$0xff]  }
 0x225   : > { %v14506_v13 = vadd.f32 %v11114_v6, %v7833_v15  ;;  %v7836_v20 = vadd.f32 %v11077_v16, %v14447_v39  ;;  %8487 = vmatmul.mubr.bf16.gmra.mrb[152].mxu0 %v12833_v28  ;;  %v12837_v39 = vld [vmem:[%s13933_s6 + $0xa20] sm:$0xff]   ;;  %11584 = vmatprep.subr.bf16.mxu1 %v12836_v35  ;;  %v12852_v6 = vld [vmem:[%s13933_s6 + $0xaf8] sm:$0xff]  }
 0x226   : > { %11545 = vmatpush3.bf16.msra.mxu0 %v12837_v39  ;;  %8494 = vmatprep.mubr.bf16.mxu0 %v10084_v53  ;;  %v12853_v15 = vld [vmem:[%s13933_s6 + $0xa38] sm:$0xff]  }
 0x227   : > { %v11078_v31 = vpop.f32.mrb[68].mxu0  ;;  %v14515_v27 = vadd.f32 %v11117_v22, %v7836_v20  ;;  %8551 = vmatmul.mubr.bf16.gmra.mrb[152].mxu1 %v12834_v24  ;;  %11546 = vmatprep.subr.bf16.mxu0 %v12839_v38  ;;  %v12860_v20 = vld [vmem:[%s13935_s7 + $0xac] ss:$304 sps:$4 sm:$0xff]   ;;  %v12862_v24 = vld [vmem:[%s13933_s6 + $0xbc0] sm:$0xff]  }
 0x228   : > { %v11118_v29 = vpop.f32.mrb[68].mxu1  ;;  %v11079_v30 = vpop.f32.mrb[69].mxu0  ;;  %11585 = vmatpush3.bf16.msra.mxu1 %v12838_v33  ;;  %8558 = vmatprep.mubr.bf16.mxu1 %v10086_v58  ;;  %v12877_v58 = vld [vmem:[%s13933_s6 + $0xb10] sm:$0xff]  }
 0x229   : > { %v11080_v37 = vadd.f32 %v11079_v30, %v11078_v31  ;;  %v11119_v32 = vpop.f32.mrb[69].mxu1  ;;  %v11081_v36 = vpop.f32.mrb[70].mxu0  ;;  %11586 = vmatprep.subr.bf16.mxu1 %v12840_v48  ;;  %v12861_v31 = vld [vmem:[%s13933_s6 + $0xb40] sm:$0xff]   ;;  %v12868_v48 = vld [vmem:[%s13933_s6 + $0xb88] sm:$0xff]  }
 0x22a   : > { %v11120_v45 = vadd.f32 %v11119_v32, %v11118_v29  ;;  %v11121_v41 = vpop.f32.mrb[70].mxu1  ;;  %v11082_v47 = vpop.f32.mrb[71].mxu0  ;;  %11547 = vmatpush3.bf16.msra.mxu0 %v12841_v51  ;;  %v12863_v29 = vld [vmem:[%s13933_s6 + $0xb00] sm:$0xff]  }
 0x22b   : > { %v7841_v40 = vadd.f32 %v11080_v37, %v14456_v61  ;;  %v11083_v42 = vadd.f32 %v11082_v47, %v11081_v36  ;;  %v11122_v43 = vpop.f32.mrb[71].mxu1  ;;  %11548 = vmatprep.subr.bf16.mxu0 %v12847_v55  ;;  %v12865_v37 = vld [vmem:[%s13933_s6 + $0xb48] sm:$0xff]   ;;  %v12878_v55 = vld [vmem:[%s13933_s6 + $0xb90] sm:$0xff]  }
 0x22c   : > { %v11123_v46 = vadd.f32 %v11122_v43, %v11121_v41  ;;  %11587 = vmatpush3.bf16.msra.mxu1 %v12842_v44  ;;  %v12871_v44 = vld [vmem:[%s13935_s7 + $0x30c] ss:$304 sps:$4 sm:$0xff]  }
 0x22d   : > { %v14524_v49 = vadd.f32 %v11120_v45, %v7841_v40  ;;  %v7844_v61 = vadd.f32 %v11083_v42, %v14465_v7  ;;  %8495 = vmatmul.mubr.bf16.gmra.mrb[156].mxu0 %v10083_v3  ;;  %v12850_v7 = vld [vmem:[%s13933_s6 + $0xab0] sm:$0xff]   ;;  %11588 = vmatprep.subr.bf16.mxu1 %v12848_v0  ;;  %v12866_v45 = vld [vmem:[%s13933_s6 + $0xbc8] sm:$0xff]  }
 0x22e   : > { %11549 = vmatpush3.bf16.msra.mxu0 %v12849_v14  ;;  %8598 = vmatprep.mubr.bf16.mxu0 %v12857_v19  ;;  %v12867_v40 = vld [vmem:[%s13933_s6 + $0xb08] sm:$0xff]   ;;  %v12869_v42 = vld [vmem:[%s13935_s7 + $0x304] ss:$304 sps:$4 sm:$0xff]  }
 0x22f   : > { %v11084_v57 = vpop.f32.mrb[72].mxu0  ;;  %v14532_v59 = vadd.f32 %v11123_v46, %v7844_v61  ;;  %8559 = vmatmul.mubr.bf16.gmra.mrb[156].mxu1 %v10085_v54  ;;  %11550 = vmatprep.subr.bf16.mxu0 %v12851_v1  ;;  %v12873_v46 = vld [vmem:[%s13935_s7 + $0x300] ss:$304 sps:$4 sm:$0xff]  }
 0x230   : > { %v11124_v60 = vpop.f32.mrb[72].mxu1  ;;  %v11085_v62 = vpop.f32.mrb[73].mxu0  ;;  %11589 = vmatpush3.bf16.msra.mxu1 %v12850_v7  ;;  %8662 = vmatprep.mubr.bf16.mxu1 %v12860_v20  ;;  %v12876_v61 = vld [vmem:[%s13933_s6 + $0xbd0] sm:$0xff]   ;;  %v12880_v7 = vld [vmem:[%s13933_s6 + $0xbd8] sm:$0xff]   ;;  %v12889_v19 = vld [vmem:[%s13933_s6 + $0xb60] sm:$0xff]  }
 0x231   : > { %v11086_v63 = vadd.f32 %v11085_v62, %v11084_v57  ;;  %v11125_v5 = vpop.f32.mrb[73].mxu1  ;;  %v11087_v4 = vpop.f32.mrb[74].mxu0  ;;  %11590 = vmatprep.subr.bf16.mxu1 %v12852_v6  ;;  %v12882_v6 = vld [vmem:[%s13933_s6 + $0xb98] sm:$0xff]   ;;  %v12891_v20 = vld [vmem:[%s13933_s6 + $0xb20] sm:$0xff]  }
 0x232   : > { %v11126_v2 = vadd.f32 %v11125_v5, %v11124_v60  ;;  %v11127_v8 = vpop.f32.mrb[74].mxu1  ;;  %v11088_v9 = vpop.f32.mrb[75].mxu0  ;;  %11551 = vmatpush3.bf16.msra.mxu0 %v12853_v15  ;;  %v12879_v60 = vld [vmem:[%s13933_s6 + $0xb58] sm:$0xff]  }
 0x233   : > { %v7849_v12 = vadd.f32 %v11086_v63, %v14474_v23  ;;  %v11089_v11 = vadd.f32 %v11088_v9, %v11087_v4  ;;  %v11128_v16 = vpop.f32.mrb[75].mxu1  ;;  %v12858_v23 = vld [vmem:[%s13935_s7 + $0xa8] ss:$304 sps:$4 sm:$0xff]   ;;  %11616 = vmatprep.subr.bf16.mxu0 %v12861_v31  ;;  %v12885_v15 = vld [vmem:[%s13935_s7 + $0x56c] ss:$304 sps:$4 sm:$0xff]  }
 0x234   : > { %v11129_v22 = vadd.f32 %v11128_v16, %v11127_v8  ;;  %11591 = vmatpush3.bf16.msra.mxu1 %v12854_v18  ;;  %v12881_v5 = vld [vmem:[%s13933_s6 + $0xb18] sm:$0xff]  }
 0x235   : > { %v14541_v10 = vadd.f32 %v11126_v2, %v7849_v12  ;;  %v7852_v25 = vadd.f32 %v11089_v11, %v14482_v34  ;;  %8599 = vmatmul.mubr.bf16.vlgmr.msra.gmra.mrb[160].mxu0 %v12855_v17  ;;  %11656 = vmatprep.subr.bf16.mxu1 %v12862_v24  ;;  %v12864_v34 = vld [vmem:[%s13933_s6 + $0xb80] sm:$0xff]   ;;  %v12888_v16 = vld [vmem:[%s13935_s7 + $0x568] ss:$304 sps:$4 sm:$0xff]  }
 0x236   : > { %11617 = vmatpush3.bf16.msra.mxu0 %v12863_v29  ;;  %8606 = vmatprep.mubr.bf16.mxu0 %v12869_v42  ;;  %v12887_v11 = vld [vmem:[%s13935_s7 + $0x560] ss:$304 sps:$4 sm:$0xff]  }
 0x237   : > { %v14549_v21 = vadd.f32 %v11129_v22, %v7852_v25  ;;  %v11090_v28 = vpop.f32.mrb[76].mxu0  ;;  %8663 = vmatmul.mubr.bf16.vlgmr.msra.gmra.mrb[160].mxu1 %v12858_v23  ;;  %11618 = vmatprep.subr.bf16.mxu0 %v12865_v37  ;;  %v12890_v23 = vld [vmem:[%s13933_s6 + $0xbe0] sm:$0xff]  }
 0x238   : > { %v11130_v26 = vpop.f32.mrb[76].mxu1  ;;  %v11091_v35 = vpop.f32.mrb[77].mxu0  ;;  %11657 = vmatpush3.bf16.msra.mxu1 %v12864_v34  ;;  %8670 = vmatprep.mubr.bf16.mxu1 %v12871_v44  ;;  %v12892_v24 = vld [vmem:[%s13933_s6 + $0xba0] sm:$0xff]  }
 0x239   : > { %v11092_v30 = vadd.f32 %v11091_v35, %v11090_v28  ;;  %v11131_v39 = vpop.f32.mrb[77].mxu1  ;;  %v11093_v33 = vpop.f32.mrb[78].mxu0  ;;  %11658 = vmatprep.subr.bf16.mxu1 %v12866_v45  ;;  %v12893_v35 = vld [vmem:[%s13933_s6 + $0xb68] sm:$0xff]  }
 0x23a   : > { %v11132_v32 = vadd.f32 %v11131_v39, %v11130_v26  ;;  %v11133_v38 = vpop.f32.mrb[78].mxu1  ;;  %v11094_v41 = vpop.f32.mrb[79].mxu0  ;;  %11619 = vmatpush3.bf16.msra.mxu0 %v12867_v40  ;;  %v12895_v33 = vld [vmem:[%s13933_s6 + $0xb28] sm:$0xff]  }
 0x23b   : > { %v7857_v36 = vadd.f32 %v11092_v30, %v14492_v56  ;;  %v11134_v51 = vpop.f32.mrb[79].mxu1  ;;  %v12874_v56 = vld [vmem:[%s13935_s7 + $0x308] ss:$304 sps:$4 sm:$0xff]   ;;  %11620 = vmatprep.subr.bf16.mxu0 %v12875_v50  ;;  %v998_v38 = vld [vmem:[%s13935_s7 + $0x7c0] sm:$0x77] }
 0x23c   : > { %11659 = vmatpush3.bf16.msra.mxu1 %v12868_v48  ;;  %v12894_v30 = vld [vmem:[%s13933_s6 + $0xbe8] sm:$0xff]   ;;  %v10088_v40 = vcombine.high %v998_v38, %v998_v38  ;;  %v10087_v48 = vcombine.low %v998_v38, %v998_v38  ;;  %v12929_v38 = vld [vmem:[%s13933_s6 + $0xc50] sm:$0xff]  }
 0x23d   : > { %v14559_v47 = vadd.f32 %v11132_v32, %v7857_v36  ;;  %8607 = vmatmul.mubr.bf16.gmra.mrb[164].mxu0 %v12873_v46  ;;  %11660 = vmatprep.subr.bf16.mxu1 %v12876_v61  ;;  %v12896_v36 = vld [vmem:[%s13933_s6 + $0xba8] sm:$0xff]   ;;  %v12904_v61 = vld [vmem:[%s13933_s6 + $0xbb0] sm:$0xff]  }
 0x23e   : > { %11621 = vmatpush3.bf16.msra.mxu0 %v12877_v58  ;;  %v999_v41 = vld [vmem:[%s13935_s7 + $0x7c8] sm:$0x77] }
 0x23f   : > { %v11152_v43 = vpop.f32.mrb[80].mxu0  ;;  %8671 = vmatmul.mubr.bf16.gmra.mrb[164].mxu1 %v12874_v56  ;;  %11622 = vmatprep.subr.bf16.mxu0 %v12879_v60  ;;  %v10090_v51 = vcombine.high %v999_v41, %v999_v41  ;;  %v10089_v42 = vcombine.low %v999_v41, %v999_v41  ;;  %v12902_v56 = vld [vmem:[%s13933_s6 + $0xbf0] sm:$0xff]  }
 0x240   : > { %v11192_v52 = vpop.f32.mrb[80].mxu1  ;;  %v11153_v53 = vpop.f32.mrb[81].mxu0  ;;  %11661 = vmatpush3.bf16.msra.mxu1 %v12878_v55  ;;  %8678 = vmatprep.mubr.bf16.mxu1 %v12885_v15  ;;  %v12915_v15 = vld [vmem:[%s13933_s6 + $0xc40] sm:$0xff]  }
 0x241   : > { %v11154_v3 = vadd.f32 %v11153_v53, %v11152_v43  ;;  %v11193_v54 = vpop.f32.mrb[81].mxu1  ;;  %v11155_v0 = vpop.f32.mrb[82].mxu0  ;;  %11662 = vmatprep.subr.bf16.mxu1 %v12880_v7  ;;  %v12901_v43 = vld [vmem:[%s13933_s6 + $0xb70] sm:$0xff]   ;;  %v12908_v7 = vld [vmem:[%s13933_s6 + $0xbb8] sm:$0xff]  }
 0x242   : > { %v11194_v57 = vadd.f32 %v11193_v54, %v11192_v52  ;;  %v11195_v62 = vpop.f32.mrb[82].mxu1  ;;  %v11156_v63 = vpop.f32.mrb[83].mxu0  ;;  %11623 = vmatpush3.bf16.msra.mxu0 %v12881_v5 }
 0x243   : > { %v7961_v14 = vadd.f32 %v11154_v3, %v14506_v13  ;;  %v11157_v2 = vadd.f32 %v11156_v63, %v11155_v0  ;;  %v11196_v4 = vpop.f32.mrb[83].mxu1  ;;  %v12883_v13 = vld [vmem:[%s13935_s7 + $0x564] ss:$304 sps:$4 sm:$0xff]   ;;  %11624 = vmatprep.subr.bf16.mxu0 %v12889_v19  ;;  %v12905_v3 = vld [vmem:[%s13933_s6 + $0xb78] sm:$0xff]  }
 0x244   : > { %v11197_v12 = vadd.f32 %v11196_v4, %v11195_v62  ;;  %11663 = vmatpush3.bf16.msra.mxu1 %v12882_v6  ;;  %8614 = vmatprep.mubr.bf16.mxu0 %v12883_v13  ;;  %v12909_v4 = vld [vmem:[%s13935_s7 + $0xb0] ss:$304 sps:$4 sm:$0xff]   ;;  %v12911_v6 = vld [vmem:[%s13935_s7 + $0xb4] ss:$304 sps:$4 sm:$0xff]   ;;  %v12914_v13 = vld [vmem:[%s13935_s7 + $0xbc] ss:$304 sps:$4 sm:$0xff]  }
 0x245   : > { %v14573_v1 = vadd.f32 %v11194_v57, %v7961_v14  ;;  %v7964_v8 = vadd.f32 %v11157_v2, %v14515_v27  ;;  %8615 = vmatmul.mubr.bf16.gmra.mrb[168].mxu0 %v12887_v11  ;;  %11664 = vmatprep.subr.bf16.mxu1 %v12890_v23  ;;  %v12906_v57 = vld [vmem:[%s13933_s6 + $0xbf8] sm:$0xff]   ;;  %v12917_v19 = vld [vmem:[%s13933_s6 + $0xc00] sm:$0xff]  }
 0x246   : > { %11625 = vmatpush3.bf16.msra.mxu0 %v12891_v20  ;;  %8622 = vmatprep.mubr.bf16.mxu0 %v10088_v40  ;;  %v12907_v14 = vld [vmem:[%s13933_s6 + $0xb38] sm:$0xff]   ;;  %v12918_v23 = vld [vmem:[%s13933_s6 + $0xc80] sm:$0xff]   ;;  %v12930_v40 = vld [vmem:[%s13933_s6 + $0xcd0] sm:$0xff]  }
 0x247   : > { %v11158_v9 = vpop.f32.mrb[84].mxu0  ;;  %v14581_v17 = vadd.f32 %v11197_v12, %v7964_v8  ;;  %8679 = vmatmul.mubr.bf16.gmra.mrb[168].mxu1 %v12888_v16  ;;  %11626 = vmatprep.subr.bf16.mxu0 %v12893_v35 }
 0x248   : > { %v11198_v18 = vpop.f32.mrb[84].mxu1  ;;  %v11159_v22 = vpop.f32.mrb[85].mxu0  ;;  %11665 = vmatpush3.bf16.msra.mxu1 %v12892_v24  ;;  %8686 = vmatprep.mubr.bf16.mxu1 %v10090_v51 }
 0x249   : > { %v11160_v27 = vadd.f32 %v11159_v22, %v11158_v9  ;;  %v11199_v25 = vpop.f32.mrb[85].mxu1  ;;  %v11161_v28 = vpop.f32.mrb[86].mxu0  ;;  %11666 = vmatprep.subr.bf16.mxu1 %v12894_v30 }
 0x24a   : > { %v11200_v31 = vadd.f32 %v11199_v25, %v11198_v18  ;;  %v11201_v29 = vpop.f32.mrb[86].mxu1  ;;  %v11162_v34 = vpop.f32.mrb[87].mxu0  ;;  %11627 = vmatpush3.bf16.msra.mxu0 %v12895_v33  ;;  %v12916_v18 = vld [vmem:[%s13933_s6 + $0xcc0] sm:$0xff]   ;;  %v12919_v25 = vld [vmem:[%s13933_s6 + $0xc48] sm:$0xff]  }
 0x24b   : > { %v7969_v26 = vadd.f32 %v11160_v27, %v14524_v49  ;;  %v11163_v37 = vadd.f32 %v11162_v34, %v11161_v28  ;;  %v11202_v32 = vpop.f32.mrb[87].mxu1  ;;  %11628 = vmatprep.subr.bf16.mxu0 %v12901_v43  ;;  %v12920_v28 = vld [vmem:[%s13933_s6 + $0xcc8] sm:$0xff]   ;;  %v12932_v43 = vld [vmem:[%s13933_s6 + $0xc90] sm:$0xff]  }
 0x24c   : > { %v11203_v45 = vadd.f32 %v11202_v32, %v11201_v29  ;;  %11667 = vmatpush3.bf16.msra.mxu1 %v12896_v36  ;;  %v12921_v29 = vld [vmem:[%s13933_s6 + $0xc08] sm:$0xff]   ;;  %v12923_v32 = vld [vmem:[%s13935_s7 + $0x314] ss:$304 sps:$4 sm:$0xff]  }
 0x24d   : > { %v14590_v39 = vadd.f32 %v11200_v31, %v7969_v26  ;;  %v7972_v49 = vadd.f32 %v11163_v37, %v14532_v59  ;;  %8623 = vmatmul.mubr.bf16.gmra.mrb[172].mxu0 %v10087_v48  ;;  %v12903_v59 = vld [vmem:[%s13933_s6 + $0xb30] sm:$0xff]   ;;  %11668 = vmatprep.subr.bf16.mxu1 %v12902_v56  ;;  %v12922_v34 = vld [vmem:[%s13933_s6 + $0xc88] sm:$0xff]  }
 0x24e   : > { %11629 = vmatpush3.bf16.msra.mxu0 %v12903_v59  ;;  %8726 = vmatprep.mubr.bf16.mxu0 %v12911_v6  ;;  %v12925_v33 = vld [vmem:[%s13935_s7 + $0x31c] ss:$304 sps:$4 sm:$0xff]   ;;  %v12928_v36 = vld [vmem:[%s13935_s7 + $0x318] ss:$304 sps:$4 sm:$0xff]   ;;  %v12931_v48 = vld [vmem:[%s13933_s6 + $0xc10] sm:$0xff]  }
 0x24f   : > { %v14598_v44 = vadd.f32 %v11203_v45, %v7972_v49  ;;  %v11164_v46 = vpop.f32.mrb[88].mxu0  ;;  %8687 = vmatmul.mubr.bf16.gmra.mrb[172].mxu1 %v10089_v42  ;;  %11630 = vmatprep.subr.bf16.mxu0 %v12905_v3  ;;  %v12943_v6 = vld [vmem:[%s13933_s6 + $0xc60] sm:$0xff]  }
 0x250   : > { %v11204_v50 = vpop.f32.mrb[88].mxu1  ;;  %v11165_v52 = vpop.f32.mrb[89].mxu0  ;;  %11669 = vmatpush3.bf16.msra.mxu1 %v12904_v61  ;;  %8790 = vmatprep.mubr.bf16.mxu1 %v12914_v13  ;;  %v12934_v61 = vld [vmem:[%s13933_s6 + $0xcd8] sm:$0xff]  }
 0x251   : > { %v11166_v53 = vadd.f32 %v11165_v52, %v11164_v46  ;;  %v11205_v58 = vpop.f32.mrb[89].mxu1  ;;  %v11167_v55 = vpop.f32.mrb[90].mxu0  ;;  %11670 = vmatprep.subr.bf16.mxu1 %v12906_v57  ;;  %v12936_v57 = vld [vmem:[%s13933_s6 + $0xc98] sm:$0xff]  }
 0x252   : > { %v11206_v54 = vadd.f32 %v11205_v58, %v11204_v50  ;;  %v11207_v60 = vpop.f32.mrb[90].mxu1  ;;  %v11168_v62 = vpop.f32.mrb[91].mxu0  ;;  %11631 = vmatpush3.bf16.msra.mxu0 %v12907_v14  ;;  %v12933_v50 = vld [vmem:[%s13933_s6 + $0xc58] sm:$0xff]  }
 0x253   : > { %v7977_v0 = vadd.f32 %v11166_v53, %v14541_v10  ;;  %v11169_v5 = vadd.f32 %v11168_v62, %v11167_v55  ;;  %v11208_v2 = vpop.f32.mrb[91].mxu1  ;;  %v12912_v10 = vld [vmem:[%s13935_s7 + $0xb8] ss:$304 sps:$4 sm:$0xff]   ;;  %11696 = vmatprep.subr.bf16.mxu0 %v12915_v15  ;;  %v12939_v62 = vld [vmem:[%s13935_s7 + $0x57c] ss:$304 sps:$4 sm:$0xff]  }
 0x254   : > { %v11209_v12 = vadd.f32 %v11208_v2, %v11207_v60  ;;  %11671 = vmatpush3.bf16.msra.mxu1 %v12908_v7  ;;  %v12935_v58 = vld [vmem:[%s13933_s6 + $0xc18] sm:$0xff]   ;;  %v12941_v7 = vld [vmem:[%s13935_s7 + $0x570] ss:$304 sps:$4 sm:$0xff]  }
 0x255   : > { %v14608_v63 = vadd.f32 %v11206_v54, %v7977_v0  ;;  %v7980_v8 = vadd.f32 %v11169_v5, %v14549_v21  ;;  %8727 = vmatmul.mubr.bf16.vlgmr.msra.gmra.mrb[176].mxu0 %v12909_v4  ;;  %11736 = vmatprep.subr.bf16.mxu1 %v12916_v18  ;;  %v12942_v2 = vld [vmem:[%s13935_s7 + $0x578] ss:$304 sps:$4 sm:$0xff]   ;;  %v12946_v18 = vld [vmem:[%s13933_s6 + $0xca0] sm:$0xff]  }
 0x256   : > { %11697 = vmatpush3.bf16.msra.mxu0 %v12917_v19  ;;  %8734 = vmatprep.mubr.bf16.mxu0 %v12923_v32 }
 0x257   : > { %v11170_v9 = vpop.f32.mrb[92].mxu0  ;;  %v14617_v11 = vadd.f32 %v11209_v12, %v7980_v8  ;;  %8791 = vmatmul.mubr.bf16.vlgmr.msra.gmra.mrb[176].mxu1 %v12912_v10  ;;  %11698 = vmatprep.subr.bf16.mxu0 %v12919_v25  ;;  %v12944_v10 = vld [vmem:[%s13933_s6 + $0xce0] sm:$0xff]  }
 0x258   : > { %v11210_v16 = vpop.f32.mrb[92].mxu1  ;;  %v11171_v22 = vpop.f32.mrb[93].mxu0  ;;  %11737 = vmatpush3.bf16.msra.mxu1 %v12918_v23  ;;  %8798 = vmatprep.mubr.bf16.mxu1 %v12925_v33  ;;  %v12945_v8 = vld [vmem:[%s13933_s6 + $0xc20] sm:$0xff]   ;;  %v12955_v33 = vld [vmem:[%s13933_s6 + $0xc70] sm:$0xff]  }
 0x259   : > { %v11172_v21 = vadd.f32 %v11171_v22, %v11170_v9  ;;  %v11211_v27 = vpop.f32.mrb[93].mxu1  ;;  %v11173_v31 = vpop.f32.mrb[94].mxu0  ;;  %11738 = vmatprep.subr.bf16.mxu1 %v12920_v28  ;;  %v12947_v22 = vld [vmem:[%s13933_s6 + $0xc68] sm:$0xff]  }
 0x25a   : > { %v11212_v20 = vadd.f32 %v11211_v27, %v11210_v16  ;;  %v11213_v26 = vpop.f32.mrb[94].mxu1  ;;  %v11174_v35 = vpop.f32.mrb[95].mxu0  ;;  %11699 = vmatpush3.bf16.msra.mxu0 %v12921_v29  ;;  %v12949_v31 = vld [vmem:[%s13933_s6 + $0xc28] sm:$0xff]  }
 0x25b   : > { %v7985_v24 = vadd.f32 %v11172_v21, %v14559_v47  ;;  %v11214_v37 = vpop.f32.mrb[95].mxu1  ;;  %v12927_v47 = vld [vmem:[%s13935_s7 + $0x310] ss:$304 sps:$4 sm:$0xff]   ;;  %11700 = vmatprep.subr.bf16.mxu0 %v12929_v38  ;;  %v12948_v21 = vld [vmem:[%s13933_s6 + $0xce8] sm:$0xff]  }
 0x25c   : > { %11739 = vmatpush3.bf16.msra.mxu1 %v12922_v34  ;;  %v1000_v26 = vld [vmem:[%s13935_s7 + $0x7d0] sm:$0x77] }
 0x25d   : > { %v14626_v30 = vadd.f32 %v11212_v20, %v7985_v24  ;;  %8735 = vmatmul.mubr.bf16.gmra.mrb[180].mxu0 %v12927_v47  ;;  %11740 = vmatprep.subr.bf16.mxu1 %v12930_v40  ;;  %v12950_v24 = vld [vmem:[%s13933_s6 + $0xca8] sm:$0xff]   ;;  %v10092_v35 = vcombine.high %v1000_v26, %v1000_v26  ;;  %v10091_v37 = vcombine.low %v1000_v26, %v1000_v26  ;;  %v12956_v47 = vld [vmem:[%s13933_s6 + $0xcf0] sm:$0xff]  }
 0x25e   : > { %11701 = vmatpush3.bf16.msra.mxu0 %v12931_v48  ;;  %v12983_v26 = vld [vmem:[%s13933_s6 + $0xd50] sm:$0xff]  }
 0x25f   : > { %8799 = vmatmul.mubr.bf16.gmra.mrb[180].mxu1 %v12928_v36  ;;  %11702 = vmatprep.subr.bf16.mxu0 %v12933_v50 }
 0x260   : > { %11741 = vmatpush3.bf16.msra.mxu1 %v12932_v43  ;;  %8806 = vmatprep.mubr.bf16.mxu1 %v12939_v62 }
 0x261   : > { %11742 = vmatprep.subr.bf16.mxu1 %v12934_v61  ;;  %v12962_v61 = vld [vmem:[%s13933_s6 + $0xcb8] sm:$0xff]  }
 0x262   : > { %11703 = vmatpush3.bf16.msra.mxu0 %v12935_v58 }
 0x263   : > { %11704 = vmatprep.subr.bf16.mxu0 %v12943_v6  ;;  %v12971_v6 = vld [vmem:[%s13933_s6 + $0xd00] sm:$0xff]  }
 0x264   : > { %11743 = vmatpush3.bf16.msra.mxu1 %v12936_v57 }
 0x265   : > { %11744 = vmatprep.subr.bf16.mxu1 %v12944_v10 }
 0x266   : > { %11705 = vmatpush3.bf16.msra.mxu0 %v12945_v8 }
 0x267   : > { %8807 = vmatmul.mubr.bf16.gmra.mrb[184].mxu1 %v12942_v2  ;;  %11706 = vmatprep.subr.bf16.mxu0 %v12947_v22 }
 0x268   : > { %11745 = vmatpush3.bf16.msra.mxu1 %v12946_v18 }
 0x269   : > { %11746 = vmatprep.subr.bf16.mxu1 %v12948_v21 }
 0x26a   : > { %11707 = vmatpush3.bf16.msra.mxu0 %v12949_v31  ;;  %v12979_v31 = vld [vmem:[%s13935_s7 + $0x32c] ss:$304 sps:$4 sm:$0xff]  }
 0x26b   : > { %11708 = vmatprep.subr.bf16.mxu0 %v12955_v33  ;;  %v12986_v33 = vld [vmem:[%s13933_s6 + $0xd90] sm:$0xff]  }
 0x26c   : > { %11747 = vmatpush3.bf16.msra.mxu1 %v12950_v24  ;;  %v12982_v24 = vld [vmem:[%s13935_s7 + $0x328] ss:$304 sps:$4 sm:$0xff]  }
 0x26d   : > { %11748 = vmatprep.subr.bf16.mxu1 %v12956_v47 }
 0x279   : > { %v11232_v45 = vpop.f32.mrb[96].mxu0 }
 0x27a   : > { %v11272_v49 = vpop.f32.mrb[96].mxu1  ;;  %v11233_v41 = vpop.f32.mrb[97].mxu0 }
 0x27b   : > { %v11234_v51 = vadd.f32 %v11233_v41, %v11232_v45  ;;  %v11273_v42 = vpop.f32.mrb[97].mxu1  ;;  %v11235_v56 = vpop.f32.mrb[98].mxu0 }
 0x27c   : > { %v11274_v46 = vadd.f32 %v11273_v42, %v11272_v49  ;;  %v11275_v52 = vpop.f32.mrb[98].mxu1  ;;  %v11236_v53 = vpop.f32.mrb[99].mxu0  ;;  %v12957_v49 = vld [vmem:[%s13933_s6 + $0xc30] sm:$0xff]  }
 0x27d   : > { %v8089_v59 = vadd.f32 %v11234_v51, %v14573_v1  ;;  %v11237_v54 = vadd.f32 %v11236_v53, %v11235_v56  ;;  %v11276_v55 = vpop.f32.mrb[99].mxu1  ;;  %v12937_v1 = vld [vmem:[%s13935_s7 + $0x574] ss:$304 sps:$4 sm:$0xff]   ;;  %v12959_v51 = vld [vmem:[%s13933_s6 + $0xc78] sm:$0xff]   ;;  %11709 = vmatpush3.bf16.msra.mxu0 %v12957_v49 }
 0x27e   : > { %v11277_v0 = vadd.f32 %v11276_v55, %v11275_v52  ;;  %8742 = vmatprep.mubr.bf16.mxu0 %v12937_v1  ;;  %11710 = vmatprep.subr.bf16.mxu0 %v12959_v51  ;;  %v12963_v55 = vld [vmem:[%s13935_s7 + $0xc0] ss:$304 sps:$4 sm:$0xff]   ;;  %v12966_v1 = vld [vmem:[%s13935_s7 + $0xc8] ss:$304 sps:$4 sm:$0xff]  }
 0x27f   : > { %v14640_v3 = vadd.f32 %v11274_v46, %v8089_v59  ;;  %v8092_v60 = vadd.f32 %v11237_v54, %v14581_v17  ;;  %8743 = vmatmul.mubr.bf16.gmra.mrb[184].mxu0 %v12941_v7  ;;  %v12960_v46 = vld [vmem:[%s13933_s6 + $0xcf8] sm:$0xff]  }
 0x280   : > { %8750 = vmatprep.mubr.bf16.mxu0 %v10092_v35  ;;  %v12961_v59 = vld [vmem:[%s13933_s6 + $0xc38] sm:$0xff]  }
 0x281   : > { %v11238_v14 = vpop.f32.mrb[100].mxu0  ;;  %v14648_v4 = vadd.f32 %v11277_v0, %v8092_v60  ;;  %11711 = vmatpush3.bf16.msra.mxu0 %v12961_v59  ;;  %v12968_v60 = vld [vmem:[%s13935_s7 + $0xcc] ss:$304 sps:$4 sm:$0xff]  }
 0x282   : > { %v11278_v5 = vpop.f32.mrb[100].mxu1  ;;  %v11239_v12 = vpop.f32.mrb[101].mxu0 }
 0x283   : > { %v11240_v17 = vadd.f32 %v11239_v12, %v11238_v14  ;;  %v11279_v13 = vpop.f32.mrb[101].mxu1  ;;  %v11241_v9 = vpop.f32.mrb[102].mxu0  ;;  %v12969_v14 = vld [vmem:[%s13933_s6 + $0xd40] sm:$0xff]  }
 0x284   : > { %v11280_v15 = vadd.f32 %v11279_v13, %v11278_v5  ;;  %v11281_v19 = vpop.f32.mrb[102].mxu1  ;;  %v11242_v23 = vpop.f32.mrb[103].mxu0  ;;  %v12970_v5 = vld [vmem:[%s13933_s6 + $0xdc0] sm:$0xff]   ;;  %11776 = vmatprep.subr.bf16.mxu0 %v12969_v14  ;;  %v12973_v13 = vld [vmem:[%s13933_s6 + $0xd48] sm:$0xff]  }
 0x285   : > { %v8097_v16 = vadd.f32 %v11240_v17, %v14590_v39  ;;  %v11243_v25 = vadd.f32 %v11242_v23, %v11241_v9  ;;  %v11282_v20 = vpop.f32.mrb[103].mxu1  ;;  %v1001_v39 = vld [vmem:[%s13935_s7 + $0x7d8] sm:$0x77]  ;;  %v13000_v14 = vld [vmem:[%s13933_s6 + $0xda0] sm:$0xff]  }
 0x286   : > { %v11283_v28 = vadd.f32 %v11282_v20, %v11281_v19  ;;  %v10094_v34 = vcombine.high %v1001_v39, %v1001_v39  ;;  %v10093_v32 = vcombine.low %v1001_v39, %v1001_v39  ;;  %v12974_v9 = vld [vmem:[%s13933_s6 + $0xdc8] sm:$0xff]   ;;  %v12977_v20 = vld [vmem:[%s13935_s7 + $0x324] ss:$304 sps:$4 sm:$0xff]  }
 0x287   : > { %v14657_v27 = vadd.f32 %v11280_v15, %v8097_v16  ;;  %v8100_v29 = vadd.f32 %v11243_v25, %v14598_v44  ;;  %8751 = vmatmul.mubr.bf16.gmra.mrb[188].mxu0 %v10091_v37  ;;  %v12958_v44 = vld [vmem:[%s13933_s6 + $0xcb0] sm:$0xff]   ;;  %v12975_v19 = vld [vmem:[%s13933_s6 + $0xd08] sm:$0xff]  }
 0x288   : > { %8814 = vmatprep.mubr.bf16.mxu1 %v10094_v34  ;;  %11749 = vmatpush3.bf16.msra.mxu1 %v12958_v44  ;;  %v12976_v23 = vld [vmem:[%s13933_s6 + $0xd88] sm:$0xff]   ;;  %v12985_v34 = vld [vmem:[%s13933_s6 + $0xd10] sm:$0xff]   ;;  %v12988_v44 = vld [vmem:[%s13933_s6 + $0xdd8] sm:$0xff]  }
 0x289   : > { %v14666_v36 = vadd.f32 %v11283_v28, %v8100_v29  ;;  %8815 = vmatmul.mubr.bf16.gmra.mrb[188].mxu1 %v10093_v32  ;;  %11750 = vmatprep.subr.bf16.mxu1 %v12960_v46  ;;  %v12981_v28 = vld [vmem:[%s13935_s7 + $0x320] ss:$304 sps:$4 sm:$0xff]   ;;  %v12990_v46 = vld [vmem:[%s13933_s6 + $0xd98] sm:$0xff]  }
 0x28a   : > { %v11284_v38 = vpop.f32.mrb[104].mxu1  ;;  %8918 = vmatprep.mubr.bf16.mxu1 %v12968_v60  ;;  %v12984_v29 = vld [vmem:[%s13933_s6 + $0xdd0] sm:$0xff]  }
 0x28b   : > { %v11285_v48 = vpop.f32.mrb[105].mxu1 }
 0x28c   : > { %v11286_v42 = vadd.f32 %v11285_v48, %v11284_v38  ;;  %v11287_v50 = vpop.f32.mrb[106].mxu1  ;;  %11751 = vmatpush3.bf16.msra.mxu1 %v12962_v61  ;;  %v12987_v38 = vld [vmem:[%s13933_s6 + $0xd58] sm:$0xff]   ;;  %v12995_v61 = vld [vmem:[%s13935_s7 + $0x580] ss:$304 sps:$4 sm:$0xff]  }
 0x28d   : > { %v11288_v54 = vpop.f32.mrb[107].mxu1  ;;  %11816 = vmatprep.subr.bf16.mxu1 %v12970_v5  ;;  %v12989_v48 = vld [vmem:[%s13933_s6 + $0xd18] sm:$0xff]  }
 0x28e   : > { %v11289_v57 = vadd.f32 %v11288_v54, %v11287_v50  ;;  %v12997_v54 = vld [vmem:[%s13933_s6 + $0xd60] sm:$0xff]  }
 0x291   : > { %8919 = vmatmul.mubr.bf16.vlgmr.msra.gmra.mrb[192].mxu1 %v12966_v1 }
 0x292   : > { %v11290_v2 = vpop.f32.mrb[108].mxu1  ;;  %8926 = vmatprep.mubr.bf16.mxu1 %v12979_v31  ;;  %v13009_v31 = vld [vmem:[%s13933_s6 + $0xd70] sm:$0xff]  }
 0x293   : > { %v11291_v17 = vpop.f32.mrb[109].mxu1 }
 0x294   : > { %v11292_v8 = vadd.f32 %v11291_v17, %v11290_v2  ;;  %v11293_v16 = vpop.f32.mrb[110].mxu1  ;;  %v13001_v2 = vld [vmem:[%s13933_s6 + $0xd68] sm:$0xff]  }
 0x295   : > { %v11294_v25 = vpop.f32.mrb[111].mxu1  ;;  %v13003_v17 = vld [vmem:[%s13933_s6 + $0xd28] sm:$0xff]   ;;  %v1002_v16 = vld [vmem:[%s13935_s7 + $0x7e0] sm:$0x77] }
 0x296   : > { %v10095_v25 = vcombine.low %v1002_v16, %v1002_v16 }
 0x298   : > { %v11244_v45 = vpop.f32.mrb[104].mxu0 }
 0x299   : > { %v11245_v40 = vpop.f32.mrb[105].mxu0  ;;  %8927 = vmatmul.mubr.bf16.gmra.mrb[196].mxu1 %v12982_v24 }
 0x29a   : > { %v11246_v41 = vadd.f32 %v11245_v40, %v11244_v45  ;;  %v11247_v43 = vpop.f32.mrb[106].mxu0 }
 0x29b   : > { %v11248_v52 = vpop.f32.mrb[107].mxu0 }
 0x29c   : > { %v8105_v56 = vadd.f32 %v11246_v41, %v14608_v63  ;;  %v11249_v58 = vadd.f32 %v11248_v52, %v11247_v43  ;;  %v12965_v63 = vld [vmem:[%s13935_s7 + $0xc4] ss:$304 sps:$4 sm:$0xff]   ;;  %v12993_v52 = vld [vmem:[%s13935_s7 + $0x58c] ss:$304 sps:$4 sm:$0xff]  }
 0x29d   : > { %8854 = vmatprep.mubr.bf16.mxu0 %v12965_v63  ;;  %8934 = vmatprep.mubr.bf16.mxu1 %v12993_v52  ;;  %v12998_v63 = vld [vmem:[%s13933_s6 + $0xde0] sm:$0xff]  }
 0x29e   : > { %v14675_v53 = vadd.f32 %v11286_v42, %v8105_v56  ;;  %v8108_v0 = vadd.f32 %v11249_v58, %v14617_v11  ;;  %8855 = vmatmul.mubr.bf16.vlgmr.msra.gmra.mrb[192].mxu0 %v12963_v55  ;;  %v12972_v11 = vld [vmem:[%s13933_s6 + $0xd80] sm:$0xff]   ;;  %v12996_v58 = vld [vmem:[%s13935_s7 + $0x588] ss:$304 sps:$4 sm:$0xff]  }
 0x29f   : > { %11777 = vmatpush3.bf16.msra.mxu0 %v12971_v6  ;;  %11817 = vmatpush3.bf16.msra.mxu1 %v12972_v11  ;;  %v13002_v11 = vld [vmem:[%s13933_s6 + $0xde8] sm:$0xff]  }
 0x2a0   : > { %v14683_v62 = vadd.f32 %v11289_v57, %v8108_v0  ;;  %v11250_v7 = vpop.f32.mrb[108].mxu0  ;;  %11778 = vmatprep.subr.bf16.mxu0 %v12973_v13  ;;  %11818 = vmatprep.subr.bf16.mxu1 %v12974_v9  ;;  %v13004_v9 = vld [vmem:[%s13933_s6 + $0xda8] sm:$0xff]  }
 0x2a1   : > { %v11251_v12 = vpop.f32.mrb[109].mxu0  ;;  %8862 = vmatprep.mubr.bf16.mxu0 %v12977_v20  ;;  %8935 = vmatmul.mubr.bf16.gmra.mrb[200].mxu1 %v12996_v58  ;;  %v13024_v58 = vld [vmem:[%s13933_s6 + $0xec0] sm:$0xff]  }
 0x2a2   : > { %v11252_v10 = vadd.f32 %v11251_v12, %v11250_v7  ;;  %v11253_v15 = vpop.f32.mrb[110].mxu0 }
 0x2a3   : > { %v11254_v22 = vpop.f32.mrb[111].mxu0  ;;  %11779 = vmatpush3.bf16.msra.mxu0 %v12975_v19  ;;  %11819 = vmatpush3.bf16.msra.mxu1 %v12976_v23  ;;  %v1003_v19 = vld [vmem:[%s13935_s7 + $0x7e8] sm:$0x77] }
 0x2a4   : > { %v8113_v18 = vadd.f32 %v11252_v10, %v14626_v30  ;;  %11780 = vmatprep.subr.bf16.mxu0 %v12983_v26  ;;  %11820 = vmatprep.subr.bf16.mxu1 %v12984_v29  ;;  %v10096_v22 = vcombine.high %v1002_v16, %v1002_v16  ;;  %v10098_v23 = vcombine.high %v1003_v19, %v1003_v19  ;;  %v13037_v16 = vld [vmem:[%s13933_s6 + $0xe50] sm:$0xff]  }
 0x2a5   : > { %v10097_v20 = vcombine.low %v1003_v19, %v1003_v19 }
 0x2a6   : > { %v14693_v21 = vadd.f32 %v11292_v8, %v8113_v18  ;;  %8863 = vmatmul.mubr.bf16.gmra.mrb[196].mxu0 %v12981_v28  ;;  %8942 = vmatprep.mubr.bf16.mxu1 %v10098_v23  ;;  %v13039_v23 = vld [vmem:[%s13933_s6 + $0xe10] sm:$0xff]  }
 0x2a7   : > { %11781 = vmatpush3.bf16.msra.mxu0 %v12985_v34  ;;  %11821 = vmatpush3.bf16.msra.mxu1 %v12986_v33 }
 0x2a8   : > { %v11312_v30 = vpop.f32.mrb[112].mxu0  ;;  %v11352_v39 = vpop.f32.mrb[112].mxu1  ;;  %11782 = vmatprep.subr.bf16.mxu0 %v12987_v38  ;;  %11822 = vmatprep.subr.bf16.mxu1 %v12988_v44  ;;  %v13016_v44 = vld [vmem:[%s13933_s6 + $0xdb8] sm:$0xff]  }
 0x2a9   : > { %v11313_v35 = vpop.f32.mrb[113].mxu0  ;;  %v11353_v32 = vpop.f32.mrb[113].mxu1  ;;  %8943 = vmatmul.mubr.bf16.gmra.mrb[204].mxu1 %v10097_v20 }
 0x2aa   : > { %v11314_v37 = vadd.f32 %v11313_v35, %v11312_v30  ;;  %v11354_v45 = vadd.f32 %v11353_v32, %v11352_v39  ;;  %v11315_v47 = vpop.f32.mrb[114].mxu0  ;;  %v11355_v40 = vpop.f32.mrb[114].mxu1  ;;  %v13010_v30 = vld [vmem:[%s13933_s6 + $0xdf0] sm:$0xff]  }
 0x2ab   : > { %v11316_v41 = vpop.f32.mrb[115].mxu0  ;;  %v11356_v43 = vpop.f32.mrb[115].mxu1  ;;  %11783 = vmatpush3.bf16.msra.mxu0 %v12989_v48  ;;  %11823 = vmatpush3.bf16.msra.mxu1 %v12990_v46  ;;  %v13011_v39 = vld [vmem:[%s13933_s6 + $0xd30] sm:$0xff]  }
 0x2ac   : > { %v8217_v49 = vadd.f32 %v11314_v37, %v14640_v3  ;;  %v11317_v42 = vadd.f32 %v11316_v41, %v11315_v47  ;;  %v11357_v56 = vadd.f32 %v11356_v43, %v11355_v40  ;;  %v12991_v3 = vld [vmem:[%s13935_s7 + $0x584] ss:$304 sps:$4 sm:$0xff]   ;;  %11784 = vmatprep.subr.bf16.mxu0 %v12997_v54  ;;  %11824 = vmatprep.subr.bf16.mxu1 %v12998_v63  ;;  %v13013_v37 = vld [vmem:[%s13933_s6 + $0xd78] sm:$0xff]   ;;  %v13017_v43 = vld [vmem:[%s13935_s7 + $0xd0] ss:$304 sps:$4 sm:$0xff]  }
 0x2ad   : > { %8870 = vmatprep.mubr.bf16.mxu0 %v12991_v3  ;;  %v13019_v46 = vld [vmem:[%s13935_s7 + $0xd4] ss:$304 sps:$4 sm:$0xff]  }
 0x2ae   : > { %v14707_v51 = vadd.f32 %v11354_v45, %v8217_v49  ;;  %v8220_v50 = vadd.f32 %v11317_v42, %v14648_v4  ;;  %8871 = vmatmul.mubr.bf16.gmra.mrb[200].mxu0 %v12995_v61  ;;  %v12999_v4 = vld [vmem:[%s13933_s6 + $0xd20] sm:$0xff]   ;;  %v13014_v45 = vld [vmem:[%s13933_s6 + $0xdf8] sm:$0xff]  }
 0x2af   : > { %11785 = vmatpush3.bf16.msra.mxu0 %v12999_v4  ;;  %11825 = vmatpush3.bf16.msra.mxu1 %v13000_v14  ;;  %v13015_v49 = vld [vmem:[%s13933_s6 + $0xd38] sm:$0xff]  }
 0x2b0   : > { %v11318_v59 = vpop.f32.mrb[116].mxu0  ;;  %v14716_v55 = vadd.f32 %v11357_v56, %v8220_v50  ;;  %v11358_v57 = vpop.f32.mrb[116].mxu1  ;;  %11786 = vmatprep.subr.bf16.mxu0 %v13001_v2  ;;  %11826 = vmatprep.subr.bf16.mxu1 %v13002_v11  ;;  %v13022_v50 = vld [vmem:[%s13935_s7 + $0xdc] ss:$304 sps:$4 sm:$0xff]  }
 0x2b1   : > { %v11319_v0 = vpop.f32.mrb[117].mxu0  ;;  %v11359_v60 = vpop.f32.mrb[117].mxu1  ;;  %8878 = vmatprep.mubr.bf16.mxu0 %v10096_v22  ;;  %9046 = vmatprep.mubr.bf16.mxu1 %v13022_v50  ;;  %v13030_v11 = vld [vmem:[%s13933_s6 + $0xe88] sm:$0xff]   ;;  %v13053_v50 = vld [vmem:[%s13933_s6 + $0xe20] sm:$0xff]  }
 0x2b2   : > { %v11320_v1 = vadd.f32 %v11319_v0, %v11318_v59  ;;  %v11360_v7 = vadd.f32 %v11359_v60, %v11358_v57  ;;  %v11321_v5 = vpop.f32.mrb[118].mxu0  ;;  %v11361_v12 = vpop.f32.mrb[118].mxu1  ;;  %v13023_v59 = vld [vmem:[%s13933_s6 + $0xe40] sm:$0xff]  }
 0x2b3   : > { %v11322_v10 = vpop.f32.mrb[119].mxu0  ;;  %v11362_v15 = vpop.f32.mrb[119].mxu1  ;;  %11787 = vmatpush3.bf16.msra.mxu0 %v13003_v17  ;;  %11827 = vmatpush3.bf16.msra.mxu1 %v13004_v9  ;;  %v13025_v57 = vld [vmem:[%s13933_s6 + $0xe00] sm:$0xff]   ;;  %v13033_v9 = vld [vmem:[%s13935_s7 + $0x33c] ss:$304 sps:$4 sm:$0xff]  }
 0x2b4   : > { %v8225_v6 = vadd.f32 %v11320_v1, %v14657_v27  ;;  %v11323_v8 = vadd.f32 %v11322_v10, %v11321_v5  ;;  %v11363_v18 = vadd.f32 %v11362_v15, %v11361_v12  ;;  %11788 = vmatprep.subr.bf16.mxu0 %v13009_v31  ;;  %11828 = vmatprep.subr.bf16.mxu1 %v13010_v30  ;;  %v13027_v1 = vld [vmem:[%s13933_s6 + $0xe48] sm:$0xff]   ;;  %v13040_v31 = vld [vmem:[%s13933_s6 + $0xe90] sm:$0xff]  }
 0x2b6   : > { %v14725_v13 = vadd.f32 %v11360_v7, %v8225_v6  ;;  %v8228_v27 = vadd.f32 %v11323_v8, %v14666_v36  ;;  %8879 = vmatmul.mubr.bf16.gmra.mrb[204].mxu0 %v10095_v25  ;;  %v13012_v36 = vld [vmem:[%s13933_s6 + $0xdb0] sm:$0xff]   ;;  %v13028_v7 = vld [vmem:[%s13933_s6 + $0xec8] sm:$0xff]  }
 0x2b7   : > { %11789 = vmatpush3.bf16.msra.mxu0 %v13011_v39  ;;  %11829 = vmatpush3.bf16.msra.mxu1 %v13012_v36  ;;  %v13029_v6 = vld [vmem:[%s13933_s6 + $0xe08] sm:$0xff]   ;;  %v13031_v8 = vld [vmem:[%s13935_s7 + $0x334] ss:$304 sps:$4 sm:$0xff]   ;;  %v13042_v36 = vld [vmem:[%s13933_s6 + $0xed8] sm:$0xff]  }
 0x2b8   : > { %v11324_v28 = vpop.f32.mrb[120].mxu0  ;;  %v14733_v24 = vadd.f32 %v11363_v18, %v8228_v27  ;;  %v11364_v26 = vpop.f32.mrb[120].mxu1  ;;  %11790 = vmatprep.subr.bf16.mxu0 %v13013_v37  ;;  %11830 = vmatprep.subr.bf16.mxu1 %v13014_v45  ;;  %v13035_v18 = vld [vmem:[%s13935_s7 + $0x330] ss:$304 sps:$4 sm:$0xff]   ;;  %v13044_v45 = vld [vmem:[%s13933_s6 + $0xe98] sm:$0xff]  }
 0x2b9   : > { %v11325_v29 = vpop.f32.mrb[121].mxu0  ;;  %v11365_v34 = vpop.f32.mrb[121].mxu1  ;;  %8982 = vmatprep.mubr.bf16.mxu0 %v13019_v46  ;;  %v13038_v27 = vld [vmem:[%s13933_s6 + $0xed0] sm:$0xff]   ;;  %v13051_v46 = vld [vmem:[%s13933_s6 + $0xe60] sm:$0xff]  }
 0x2ba   : > { %v11326_v35 = vadd.f32 %v11325_v29, %v11324_v28  ;;  %v11366_v32 = vadd.f32 %v11365_v34, %v11364_v26  ;;  %v11327_v33 = vpop.f32.mrb[122].mxu0  ;;  %v11367_v38 = vpop.f32.mrb[122].mxu1  ;;  %v13041_v26 = vld [vmem:[%s13933_s6 + $0xe58] sm:$0xff]  }
 0x2bb   : > { %v11328_v40 = vpop.f32.mrb[123].mxu0  ;;  %v11368_v42 = vpop.f32.mrb[123].mxu1  ;;  %11791 = vmatpush3.bf16.msra.mxu0 %v13015_v49  ;;  %11831 = vmatpush3.bf16.msra.mxu1 %v13016_v44  ;;  %v13043_v34 = vld [vmem:[%s13933_s6 + $0xe18] sm:$0xff]  }
 0x2bc   : > { %v8233_v47 = vadd.f32 %v11326_v35, %v14675_v53  ;;  %v11329_v48 = vadd.f32 %v11328_v40, %v11327_v33  ;;  %v11369_v56 = vadd.f32 %v11368_v42, %v11367_v38  ;;  %v13020_v53 = vld [vmem:[%s13935_s7 + $0xd8] ss:$304 sps:$4 sm:$0xff]   ;;  %11856 = vmatprep.subr.bf16.mxu0 %v13023_v59  ;;  %11896 = vmatprep.subr.bf16.mxu1 %v13024_v58  ;;  %v13047_v49 = vld [vmem:[%s13935_s7 + $0x59c] ss:$304 sps:$4 sm:$0xff]   ;;  %v13054_v58 = vld [vmem:[%s13933_s6 + $0xea0] sm:$0xff]  }
 0x2bd   : > { %v13050_v42 = vld [vmem:[%s13935_s7 + $0x598] ss:$304 sps:$4 sm:$0xff]  }
 0x2be   : > { %v14742_v41 = vadd.f32 %v11366_v32, %v8233_v47  ;;  %v8236_v3 = vadd.f32 %v11329_v48, %v14683_v62  ;;  %8983 = vmatmul.mubr.bf16.vlgmr.msra.gmra.mrb[208].mxu0 %v13017_v43  ;;  %9047 = vmatmul.mubr.bf16.vlgmr.msra.gmra.mrb[208].mxu1 %v13020_v53  ;;  %v13026_v62 = vld [vmem:[%s13933_s6 + $0xe80] sm:$0xff]  }
 0x2bf   : > { %11857 = vmatpush3.bf16.msra.mxu0 %v13025_v57  ;;  %11897 = vmatpush3.bf16.msra.mxu1 %v13026_v62  ;;  %v13049_v48 = vld [vmem:[%s13935_s7 + $0x590] ss:$304 sps:$4 sm:$0xff]  }
 0x2c0   : > { %v14750_v52 = vadd.f32 %v11369_v56, %v8236_v3  ;;  %v11330_v61 = vpop.f32.mrb[124].mxu0  ;;  %v11370_v54 = vpop.f32.mrb[124].mxu1  ;;  %11858 = vmatprep.subr.bf16.mxu0 %v13027_v1  ;;  %11898 = vmatprep.subr.bf16.mxu1 %v13028_v7  ;;  %v13052_v53 = vld [vmem:[%s13933_s6 + $0xee0] sm:$0xff]  }
 0x2c1   : > { %v11331_v63 = vpop.f32.mrb[125].mxu0  ;;  %v11371_v4 = vpop.f32.mrb[125].mxu1  ;;  %8990 = vmatprep.mubr.bf16.mxu0 %v13031_v8  ;;  %9054 = vmatprep.mubr.bf16.mxu1 %v13033_v9 }
 0x2c2   : > { %v11332_v0 = vadd.f32 %v11331_v63, %v11330_v61  ;;  %v11372_v60 = vadd.f32 %v11371_v4, %v11370_v54  ;;  %v11333_v14 = vpop.f32.mrb[126].mxu0  ;;  %v11373_v2 = vpop.f32.mrb[126].mxu1  ;;  %v13055_v63 = vld [vmem:[%s13933_s6 + $0xe68] sm:$0xff]  }
 0x2c3   : > { %v11334_v12 = vpop.f32.mrb[127].mxu0  ;;  %v11374_v17 = vpop.f32.mrb[127].mxu1  ;;  %11859 = vmatpush3.bf16.msra.mxu0 %v13029_v6  ;;  %11899 = vmatpush3.bf16.msra.mxu1 %v13030_v11  ;;  %v13057_v14 = vld [vmem:[%s13933_s6 + $0xe28] sm:$0xff]   ;;  %v1004_v2 = vld [vmem:[%s13935_s7 + $0x7f0] sm:$0x77] }
 0x2c4   : > { %v8241_v5 = vadd.f32 %v11332_v0, %v14693_v21  ;;  %v13036_v21 = vld [vmem:[%s13935_s7 + $0x338] ss:$304 sps:$4 sm:$0xff]   ;;  %11860 = vmatprep.subr.bf16.mxu0 %v13037_v16  ;;  %11900 = vmatprep.subr.bf16.mxu1 %v13038_v27  ;;  %v10100_v6 = vcombine.high %v1004_v2, %v1004_v2  ;;  %v10099_v11 = vcombine.low %v1004_v2, %v1004_v2  ;;  %v13066_v27 = vld [vmem:[%s13933_s6 + $0xeb0] sm:$0xff]  }
 0x2c5   : > { %v13056_v0 = vld [vmem:[%s13933_s6 + $0xee8] sm:$0xff]   ;;  %v13091_v2 = vld [vmem:[%s13933_s6 + $0xf50] sm:$0xff]  }
 0x2c6   : > { %v14760_v10 = vadd.f32 %v11372_v60, %v8241_v5  ;;  %8991 = vmatmul.mubr.bf16.gmra.mrb[212].mxu0 %v13035_v18  ;;  %9055 = vmatmul.mubr.bf16.gmra.mrb[212].mxu1 %v13036_v21  ;;  %v13058_v5 = vld [vmem:[%s13933_s6 + $0xea8] sm:$0xff]   ;;  %v13064_v21 = vld [vmem:[%s13933_s6 + $0xef0] sm:$0xff]  }
 0x2c7   : > { %11861 = vmatpush3.bf16.msra.mxu0 %v13039_v23  ;;  %11901 = vmatpush3.bf16.msra.mxu1 %v13040_v31  ;;  %v1005_v12 = vld [vmem:[%s13935_s7 + $0x7f8] sm:$0x77] }
 0x2c8   : > { %v11392_v15 = vpop.f32.mrb[128].mxu0  ;;  %v11432_v19 = vpop.f32.mrb[128].mxu1  ;;  %11862 = vmatprep.subr.bf16.mxu0 %v13041_v26  ;;  %11902 = vmatprep.subr.bf16.mxu1 %v13042_v36  ;;  %v10102_v17 = vcombine.high %v1005_v12, %v1005_v12  ;;  %v10101_v8 = vcombine.low %v1005_v12, %v1005_v12  ;;  %v13070_v36 = vld [vmem:[%s13933_s6 + $0xeb8] sm:$0xff]  }
 0x2c9   : > { %v11393_v22 = vpop.f32.mrb[129].mxu0  ;;  %v11433_v20 = vpop.f32.mrb[129].mxu1  ;;  %9062 = vmatprep.mubr.bf16.mxu1 %v13047_v49  ;;  %v13077_v49 = vld [vmem:[%s13933_s6 + $0xf40] sm:$0xff]  }
 0x2ca   : > { %v11394_v25 = vadd.f32 %v11393_v22, %v11392_v15  ;;  %v11434_v28 = vadd.f32 %v11433_v20, %v11432_v19  ;;  %v11395_v30 = vpop.f32.mrb[130].mxu0  ;;  %v11435_v29 = vpop.f32.mrb[130].mxu1  ;;  %v13063_v15 = vld [vmem:[%s13933_s6 + $0xe70] sm:$0xff]  }
 0x2cb   : > { %v11396_v35 = vpop.f32.mrb[131].mxu0  ;;  %v11436_v33 = vpop.f32.mrb[131].mxu1  ;;  %11863 = vmatpush3.bf16.msra.mxu0 %v13043_v34  ;;  %11903 = vmatpush3.bf16.msra.mxu1 %v13044_v45  ;;  %v13073_v45 = vld [vmem:[%s13935_s7 + $0xe4] ss:$304 sps:$4 sm:$0xff]  }
 0x2cc   : > { %v8345_v39 = vadd.f32 %v11394_v25, %v14707_v51  ;;  %v11397_v32 = vadd.f32 %v11396_v35, %v11395_v30  ;;  %v11437_v47 = vadd.f32 %v11436_v33, %v11435_v29  ;;  %v13045_v51 = vld [vmem:[%s13935_s7 + $0x594] ss:$304 sps:$4 sm:$0xff]   ;;  %11864 = vmatprep.subr.bf16.mxu0 %v13051_v46  ;;  %11904 = vmatprep.subr.bf16.mxu1 %v13052_v53  ;;  %v13067_v25 = vld [vmem:[%s13933_s6 + $0xe78] sm:$0xff]   ;;  %v13071_v33 = vld [vmem:[%s13935_s7 + $0xe0] ss:$304 sps:$4 sm:$0xff]  }
 0x2cd   : > { %8998 = vmatprep.mubr.bf16.mxu0 %v13045_v51  ;;  %v13076_v51 = vld [vmem:[%s13935_s7 + $0xec] ss:$304 sps:$4 sm:$0xff]   ;;  %v13079_v46 = vld [vmem:[%s13933_s6 + $0xf00] sm:$0xff]  }
 0x2ce   : > { %v14774_v37 = vadd.f32 %v11434_v28, %v8345_v39  ;;  %v8348_v38 = vadd.f32 %v11397_v32, %v14716_v55  ;;  %8999 = vmatmul.mubr.bf16.gmra.mrb[216].mxu0 %v13049_v48  ;;  %9063 = vmatmul.mubr.bf16.gmra.mrb[216].mxu1 %v13050_v42  ;;  %v13068_v28 = vld [vmem:[%s13933_s6 + $0xef8] sm:$0xff]   ;;  %v13080_v53 = vld [vmem:[%s13933_s6 + $0xf80] sm:$0xff]  }
 0x2cf   : > { %11865 = vmatpush3.bf16.msra.mxu0 %v13053_v50  ;;  %11905 = vmatpush3.bf16.msra.mxu1 %v13054_v58  ;;  %v13069_v39 = vld [vmem:[%s13933_s6 + $0xe38] sm:$0xff]  }
 0x2d0   : > { %v11398_v40 = vpop.f32.mrb[132].mxu0  ;;  %v11438_v44 = vpop.f32.mrb[132].mxu1  ;;  %v14782_v43 = vadd.f32 %v11437_v47, %v8348_v38  ;;  %11866 = vmatprep.subr.bf16.mxu0 %v13055_v63  ;;  %11906 = vmatprep.subr.bf16.mxu1 %v13056_v0 }
 0x2d1   : > { %v11399_v56 = vpop.f32.mrb[133].mxu0  ;;  %v11439_v3 = vpop.f32.mrb[133].mxu1  ;;  %9006 = vmatprep.mubr.bf16.mxu0 %v10100_v6  ;;  %9070 = vmatprep.mubr.bf16.mxu1 %v10102_v17  ;;  %v13092_v6 = vld [vmem:[%s13933_s6 + $0xfd0] sm:$0xff]  }
 0x2d2   : > { %v11400_v55 = vadd.f32 %v11399_v56, %v11398_v40  ;;  %v11440_v59 = vadd.f32 %v11439_v3, %v11438_v44  ;;  %v11401_v61 = vpop.f32.mrb[134].mxu0  ;;  %v11441_v57 = vpop.f32.mrb[134].mxu1  ;;  %v13078_v44 = vld [vmem:[%s13933_s6 + $0xfc0] sm:$0xff]   ;;  %v13081_v3 = vld [vmem:[%s13933_s6 + $0xf48] sm:$0xff]  }
 0x2d3   : > { %v11402_v62 = vpop.f32.mrb[135].mxu0  ;;  %v11442_v60 = vpop.f32.mrb[135].mxu1  ;;  %11867 = vmatpush3.bf16.msra.mxu0 %v13057_v14  ;;  %11907 = vmatpush3.bf16.msra.mxu1 %v13058_v5  ;;  %v13087_v14 = vld [vmem:[%s13935_s7 + $0x34c] ss:$304 sps:$4 sm:$0xff]   ;;  %v13090_v5 = vld [vmem:[%s13935_s7 + $0x348] ss:$304 sps:$4 sm:$0xff]  }
 0x2d4   : > { %v8353_v54 = vadd.f32 %v11400_v55, %v14725_v13  ;;  %v11403_v1 = vadd.f32 %v11402_v62, %v11401_v61  ;;  %v11443_v7 = vadd.f32 %v11442_v60, %v11441_v57  ;;  %11868 = vmatprep.subr.bf16.mxu0 %v13063_v15  ;;  %11908 = vmatprep.subr.bf16.mxu1 %v13064_v21  ;;  %v13082_v61 = vld [vmem:[%s13933_s6 + $0xfc8] sm:$0xff]   ;;  %v13085_v60 = vld [vmem:[%s13935_s7 + $0x344] ss:$304 sps:$4 sm:$0xff]  }
 0x2d5   : > { %v13083_v57 = vld [vmem:[%s13933_s6 + $0xf08] sm:$0xff]   ;;  %v13094_v15 = vld [vmem:[%s13933_s6 + $0xf90] sm:$0xff]  }
 0x2d6   : > { %v14791_v4 = vadd.f32 %v11440_v59, %v8353_v54  ;;  %v8356_v13 = vadd.f32 %v11403_v1, %v14733_v24  ;;  %9007 = vmatmul.mubr.bf16.gmra.mrb[220].mxu0 %v10099_v11  ;;  %v13065_v24 = vld [vmem:[%s13933_s6 + $0xe30] sm:$0xff]   ;;  %9071 = vmatmul.mubr.bf16.gmra.mrb[220].mxu1 %v10101_v8  ;;  %v13084_v62 = vld [vmem:[%s13933_s6 + $0xf88] sm:$0xff]  }
 0x2d7   : > { %11869 = vmatpush3.bf16.msra.mxu0 %v13065_v24  ;;  %11909 = vmatpush3.bf16.msra.mxu1 %v13066_v27  ;;  %v13093_v11 = vld [vmem:[%s13933_s6 + $0xf10] sm:$0xff]   ;;  %v13096_v27 = vld [vmem:[%s13933_s6 + $0xfd8] sm:$0xff]  }
 0x2d8   : > { %v14799_v9 = vadd.f32 %v11443_v7, %v8356_v13  ;;  %v11404_v18 = vpop.f32.mrb[136].mxu0  ;;  %v11444_v16 = vpop.f32.mrb[136].mxu1  ;;  %11870 = vmatprep.subr.bf16.mxu0 %v13067_v25  ;;  %11910 = vmatprep.subr.bf16.mxu1 %v13068_v28  ;;  %v13098_v28 = vld [vmem:[%s13933_s6 + $0xf98] sm:$0xff]  }
 0x2d9   : > { %v11405_v19 = vpop.f32.mrb[137].mxu0  ;;  %v11445_v23 = vpop.f32.mrb[137].mxu1  ;;  %9110 = vmatprep.mubr.bf16.mxu0 %v13073_v45  ;;  %9174 = vmatprep.mubr.bf16.mxu1 %v13076_v51  ;;  %v13105_v45 = vld [vmem:[%s13933_s6 + $0xf60] sm:$0xff]  }
 0x2da   : > { %v11406_v22 = vadd.f32 %v11405_v19, %v11404_v18  ;;  %v11446_v20 = vadd.f32 %v11445_v23, %v11444_v16  ;;  %v11407_v31 = vpop.f32.mrb[138].mxu0  ;;  %v11447_v26 = vpop.f32.mrb[138].mxu1  ;;  %v13095_v16 = vld [vmem:[%s13933_s6 + $0xf58] sm:$0xff]  }
 0x2db   : > { %v11408_v29 = vpop.f32.mrb[139].mxu0  ;;  %v11448_v32 = vpop.f32.mrb[139].mxu1  ;;  %11871 = vmatpush3.bf16.msra.mxu0 %v13069_v39  ;;  %11911 = vmatpush3.bf16.msra.mxu1 %v13070_v36  ;;  %v13097_v23 = vld [vmem:[%s13933_s6 + $0xf18] sm:$0xff]   ;;  %v13103_v36 = vld [vmem:[%s13935_s7 + $0x5a0] ss:$304 sps:$4 sm:$0xff]  }
 0x2dc   : > { %v8361_v30 = vadd.f32 %v11406_v22, %v14742_v41  ;;  %v11409_v34 = vadd.f32 %v11408_v29, %v11407_v31  ;;  %v11449_v47 = vadd.f32 %v11448_v32, %v11447_v26  ;;  %v13074_v41 = vld [vmem:[%s13935_s7 + $0xe8] ss:$304 sps:$4 sm:$0xff]   ;;  %11936 = vmatprep.subr.bf16.mxu0 %v13077_v49  ;;  %11976 = vmatprep.subr.bf16.mxu1 %v13078_v44  ;;  %v13101_v29 = vld [vmem:[%s13935_s7 + $0x5ac] ss:$304 sps:$4 sm:$0xff]   ;;  %v13108_v44 = vld [vmem:[%s13933_s6 + $0xfa0] sm:$0xff]  }
 0x2dd   : > { %v13104_v32 = vld [vmem:[%s13935_s7 + $0x5a8] ss:$304 sps:$4 sm:$0xff]  }
 0x2de   : > { %v14809_v35 = vadd.f32 %v11446_v20, %v8361_v30  ;;  %v8364_v38 = vadd.f32 %v11409_v34, %v14750_v52  ;;  %9111 = vmatmul.mubr.bf16.vlgmr.msra.gmra.mrb[224].mxu0 %v13071_v33  ;;  %9175 = vmatmul.mubr.bf16.vlgmr.msra.gmra.mrb[224].mxu1 %v13074_v41  ;;  %v13106_v41 = vld [vmem:[%s13933_s6 + $0xfe0] sm:$0xff]  }
 0x2df   : > { %11937 = vmatpush3.bf16.msra.mxu0 %v13079_v46  ;;  %11977 = vmatpush3.bf16.msra.mxu1 %v13080_v53 }
 0x2e0   : > { %v11410_v40 = vpop.f32.mrb[140].mxu0  ;;  %v14818_v48 = vadd.f32 %v11449_v47, %v8364_v38  ;;  %11938 = vmatprep.subr.bf16.mxu0 %v13081_v3  ;;  %11978 = vmatprep.subr.bf16.mxu1 %v13082_v61  ;;  %v13107_v38 = vld [vmem:[%s13933_s6 + $0xf20] sm:$0xff]  }
 0x2e1   : > { %v11411_v56 = vpop.f32.mrb[141].mxu0  ;;  %9118 = vmatprep.mubr.bf16.mxu0 %v13085_v60  ;;  %9182 = vmatprep.mubr.bf16.mxu1 %v13087_v14  ;;  %v13117_v14 = vld [vmem:[%s13933_s6 + $0xf70] sm:$0xff]  }
 0x2e2   : > { %v11450_v42 = vpop.f32.mrb[140].mxu1  ;;  %v11412_v52 = vadd.f32 %v11411_v56, %v11410_v40  ;;  %v11413_v59 = vpop.f32.mrb[142].mxu0  ;;  %v13109_v56 = vld [vmem:[%s13933_s6 + $0xf68] sm:$0xff]  }
 0x2e3   : > { %v11451_v55 = vpop.f32.mrb[141].mxu1  ;;  %v11414_v63 = vpop.f32.mrb[143].mxu0  ;;  %11939 = vmatpush3.bf16.msra.mxu0 %v13083_v57  ;;  %11979 = vmatpush3.bf16.msra.mxu1 %v13084_v62  ;;  %v13111_v59 = vld [vmem:[%s13933_s6 + $0xf28] sm:$0xff]  }
 0x2e4   : > { %v11452_v50 = vadd.f32 %v11451_v55, %v11450_v42  ;;  %v8369_v58 = vadd.f32 %v11412_v52, %v14760_v10  ;;  %v11453_v54 = vpop.f32.mrb[142].mxu1  ;;  %v13089_v10 = vld [vmem:[%s13935_s7 + $0x340] ss:$304 sps:$4 sm:$0xff]   ;;  %11940 = vmatprep.subr.bf16.mxu0 %v13091_v2  ;;  %11980 = vmatprep.subr.bf16.mxu1 %v13092_v6  ;;  %v13110_v52 = vld [vmem:[%s13933_s6 + $0xfe8] sm:$0xff]  }
 0x2e5   : > { %v11454_v1 = vpop.f32.mrb[143].mxu1  ;;  %v1006_v54 = vld [vmem:[%s13935_s7 + $0x800] sm:$0x77] }
 0x2e6   : > { %v14827_v0 = vadd.f32 %v11452_v50, %v8369_v58  ;;  %9119 = vmatmul.mubr.bf16.gmra.mrb[228].mxu0 %v13089_v10  ;;  %9183 = vmatmul.mubr.bf16.gmra.mrb[228].mxu1 %v13090_v5  ;;  %v13112_v58 = vld [vmem:[%s13933_s6 + $0xfa8] sm:$0xff]   ;;  %v10104_v63 = vcombine.high %v1006_v54, %v1006_v54  ;;  %v10103_v1 = vcombine.low %v1006_v54, %v1006_v54  ;;  %v13118_v10 = vld [vmem:[%s13933_s6 + $0xff0] sm:$0xff]  }
 0x2e7   : > { %11941 = vmatpush3.bf16.msra.mxu0 %v13093_v11  ;;  %11981 = vmatpush3.bf16.msra.mxu1 %v13094_v15  ;;  %v13145_v54 = vld [vmem:[%s13933_s6 + $0x1050] sm:$0xff]  }
 0x2e8   : > { %v11472_v7 = vpop.f32.mrb[144].mxu0  ;;  %11942 = vmatprep.subr.bf16.mxu0 %v13095_v16  ;;  %11982 = vmatprep.subr.bf16.mxu1 %v13096_v27  ;;  %v13124_v27 = vld [vmem:[%s13933_s6 + $0xfb8] sm:$0xff]  }
 0x2e9   : > { %v11473_v12 = vpop.f32.mrb[145].mxu0  ;;  %9190 = vmatprep.mubr.bf16.mxu1 %v13101_v29 }
 0x2ea   : > { %v11512_v13 = vpop.f32.mrb[144].mxu1  ;;  %v11474_v17 = vadd.f32 %v11473_v12, %v11472_v7  ;;  %v11475_v21 = vpop.f32.mrb[146].mxu0 }
 0x2eb   : > { %v11513_v8 = vpop.f32.mrb[145].mxu1  ;;  %v11476_v22 = vpop.f32.mrb[147].mxu0  ;;  %11943 = vmatpush3.bf16.msra.mxu0 %v13097_v23  ;;  %11983 = vmatpush3.bf16.msra.mxu1 %v13098_v28 }
 0x2ec   : > { %v11514_v18 = vadd.f32 %v11513_v8, %v11512_v13  ;;  %v8473_v24 = vadd.f32 %v11474_v17, %v14774_v37  ;;  %v11515_v19 = vpop.f32.mrb[146].mxu1  ;;  %v11477_v20 = vadd.f32 %v11476_v22, %v11475_v21  ;;  %v13099_v37 = vld [vmem:[%s13935_s7 + $0x5a4] ss:$304 sps:$4 sm:$0xff]   ;;  %11944 = vmatprep.subr.bf16.mxu0 %v13105_v45  ;;  %11984 = vmatprep.subr.bf16.mxu1 %v13106_v41  ;;  %v13121_v17 = vld [vmem:[%s13933_s6 + $0xf78] sm:$0xff]  }
 0x2ed   : > { %v11516_v31 = vpop.f32.mrb[147].mxu1  ;;  %9126 = vmatprep.mubr.bf16.mxu0 %v13099_v37  ;;  %v13119_v13 = vld [vmem:[%s13933_s6 + $0xf30] sm:$0xff]   ;;  %v13128_v37 = vld [vmem:[%s13935_s7 + $0xf8] ss:$304 sps:$4 sm:$0xff]   ;;  %v13133_v45 = vld [vmem:[%s13933_s6 + $0x1000] sm:$0xff]  }
 0x2ee   : > { %v14841_v25 = vadd.f32 %v11514_v18, %v8473_v24  ;;  %v11517_v30 = vadd.f32 %v11516_v31, %v11515_v19  ;;  %v8476_v26 = vadd.f32 %v11477_v20, %v14782_v43  ;;  %9127 = vmatmul.mubr.bf16.gmra.mrb[232].mxu0 %v13103_v36  ;;  %9191 = vmatmul.mubr.bf16.gmra.mrb[232].mxu1 %v13104_v32  ;;  %v13122_v18 = vld [vmem:[%s13933_s6 + $0xff8] sm:$0xff]   ;;  %v13125_v31 = vld [vmem:[%s13935_s7 + $0xf0] ss:$304 sps:$4 sm:$0xff]  }
 0x2ef   : > { %11945 = vmatpush3.bf16.msra.mxu0 %v13107_v38  ;;  %11985 = vmatpush3.bf16.msra.mxu1 %v13108_v44  ;;  %v13123_v24 = vld [vmem:[%s13933_s6 + $0xf38] sm:$0xff]  }
 0x2f0   : > { %v11478_v39 = vpop.f32.mrb[148].mxu0  ;;  %v14849_v33 = vadd.f32 %v11517_v30, %v8476_v26  ;;  %11946 = vmatprep.subr.bf16.mxu0 %v13109_v56  ;;  %11986 = vmatprep.subr.bf16.mxu1 %v13110_v52  ;;  %v13130_v26 = vld [vmem:[%s13935_s7 + $0xfc] ss:$304 sps:$4 sm:$0xff]  }
 0x2f1   : > { %v11479_v47 = vpop.f32.mrb[149].mxu0  ;;  %9134 = vmatprep.mubr.bf16.mxu0 %v10104_v63 }
 0x2f2   : > { %v11518_v34 = vpop.f32.mrb[148].mxu1  ;;  %v11480_v43 = vadd.f32 %v11479_v47, %v11478_v39  ;;  %v11481_v40 = vpop.f32.mrb[150].mxu0  ;;  %v13131_v39 = vld [vmem:[%s13933_s6 + $0x1040] sm:$0xff]  }
 0x2f3   : > { %v11519_v51 = vpop.f32.mrb[149].mxu1  ;;  %v11482_v53 = vpop.f32.mrb[151].mxu0  ;;  %11947 = vmatpush3.bf16.msra.mxu0 %v13111_v59  ;;  %11987 = vmatpush3.bf16.msra.mxu1 %v13112_v58  ;;  %v13141_v59 = vld [vmem:[%s13935_s7 + $0x35c] ss:$304 sps:$4 sm:$0xff]   ;;  %v13144_v58 = vld [vmem:[%s13935_s7 + $0x358] ss:$304 sps:$4 sm:$0xff]  }
 0x2f4   : > { %v11520_v49 = vadd.f32 %v11519_v51, %v11518_v34  ;;  %v8481_v42 = vadd.f32 %v11480_v43, %v14791_v4  ;;  %v11521_v46 = vpop.f32.mrb[150].mxu1  ;;  %v11483_v3 = vadd.f32 %v11482_v53, %v11481_v40  ;;  %v1007_v4 = vld [vmem:[%s13935_s7 + $0x808] sm:$0x77]  ;;  %11948 = vmatprep.subr.bf16.mxu0 %v13117_v14  ;;  %11988 = vmatprep.subr.bf16.mxu1 %v13118_v10  ;;  %v13132_v34 = vld [vmem:[%s13933_s6 + $0x10c0] sm:$0xff]   ;;  %v13148_v14 = vld [vmem:[%s13933_s6 + $0x1090] sm:$0xff]  }
 0x2f5   : > { %v11522_v50 = vpop.f32.mrb[151].mxu1  ;;  %v10106_v62 = vcombine.high %v1007_v4, %v1007_v4  ;;  %v10105_v60 = vcombine.low %v1007_v4, %v1007_v4  ;;  %v13135_v51 = vld [vmem:[%s13933_s6 + $0x1048] sm:$0xff]  }
 0x2f6   : > { %v14858_v55 = vadd.f32 %v11520_v49, %v8481_v42  ;;  %v11523_v61 = vadd.f32 %v11522_v50, %v11521_v46  ;;  %v8484_v57 = vadd.f32 %v11483_v3, %v14799_v9  ;;  %9135 = vmatmul.mubr.bf16.gmra.mrb[236].mxu0 %v10103_v1  ;;  %v13120_v9 = vld [vmem:[%s13933_s6 + $0xfb0] sm:$0xff]   ;;  %v13136_v40 = vld [vmem:[%s13933_s6 + $0x10c8] sm:$0xff]  }
 0x2f7   : > { %9198 = vmatprep.mubr.bf16.mxu1 %v10106_v62  ;;  %11949 = vmatpush3.bf16.msra.mxu0 %v13119_v13  ;;  %v13137_v46 = vld [vmem:[%s13933_s6 + $0x1008] sm:$0xff]   ;;  %v13139_v50 = vld [vmem:[%s13935_s7 + $0x354] ss:$304 sps:$4 sm:$0xff]  }
 0x2f8   : > { %v11484_v7 = vpop.f32.mrb[152].mxu0  ;;  %v14867_v5 = vadd.f32 %v11523_v61, %v8484_v57  ;;  %9199 = vmatmul.mubr.bf16.gmra.mrb[236].mxu1 %v10105_v60  ;;  %11950 = vmatprep.subr.bf16.mxu0 %v13121_v17  ;;  %v13138_v53 = vld [vmem:[%s13933_s6 + $0x1088] sm:$0xff]   ;;  %v13143_v61 = vld [vmem:[%s13935_s7 + $0x350] ss:$304 sps:$4 sm:$0xff]  }
 0x2f9   : > { %v11485_v6 = vpop.f32.mrb[153].mxu0  ;;  %11989 = vmatpush3.bf16.msra.mxu1 %v13120_v9  ;;  %9302 = vmatprep.mubr.bf16.mxu1 %v13130_v26  ;;  %v13146_v57 = vld [vmem:[%s13933_s6 + $0x10d0] sm:$0xff]   ;;  %v13150_v9 = vld [vmem:[%s13933_s6 + $0x10d8] sm:$0xff]  }
 0x2fa   : > { %v11524_v2 = vpop.f32.mrb[152].mxu1  ;;  %v11486_v12 = vadd.f32 %v11485_v6, %v11484_v7  ;;  %v11487_v15 = vpop.f32.mrb[154].mxu0  ;;  %11990 = vmatprep.subr.bf16.mxu1 %v13122_v18  ;;  %v13147_v62 = vld [vmem:[%s13933_s6 + $0x1010] sm:$0xff]   ;;  %v13152_v18 = vld [vmem:[%s13933_s6 + $0x1098] sm:$0xff]  }
 0x2fb   : > { %v11525_v11 = vpop.f32.mrb[153].mxu1  ;;  %v11488_v19 = vpop.f32.mrb[155].mxu0  ;;  %11951 = vmatpush3.bf16.msra.mxu0 %v13123_v24 }
 0x2fc   : > { %v11526_v8 = vadd.f32 %v11525_v11, %v11524_v2  ;;  %v8489_v21 = vadd.f32 %v11486_v12, %v14809_v35  ;;  %v11527_v16 = vpop.f32.mrb[154].mxu1  ;;  %v11489_v23 = vadd.f32 %v11488_v19, %v11487_v15  ;;  %v13127_v35 = vld [vmem:[%s13935_s7 + $0xf4] ss:$304 sps:$4 sm:$0xff]   ;;  %12016 = vmatprep.subr.bf16.mxu0 %v13131_v39  ;;  %v13149_v2 = vld [vmem:[%s13933_s6 + $0x1058] sm:$0xff]  }
 0x2fd   : > { %v11528_v20 = vpop.f32.mrb[155].mxu1  ;;  %11991 = vmatpush3.bf16.msra.mxu1 %v13124_v27  ;;  %9238 = vmatprep.mubr.bf16.mxu0 %v13127_v35  ;;  %v13151_v11 = vld [vmem:[%s13933_s6 + $0x1018] sm:$0xff]   ;;  %v13157_v27 = vld [vmem:[%s13935_s7 + $0x5b0] ss:$304 sps:$4 sm:$0xff]  }
 0x2fe   : > { %v14876_v22 = vadd.f32 %v11526_v8, %v8489_v21  ;;  %v11529_v28 = vadd.f32 %v11528_v20, %v11527_v16  ;;  %v8492_v30 = vadd.f32 %v11489_v23, %v14818_v48  ;;  %9239 = vmatmul.mubr.bf16.vlgmr.msra.gmra.mrb[240].mxu0 %v13125_v31  ;;  %12056 = vmatprep.subr.bf16.mxu1 %v13132_v34  ;;  %v13134_v48 = vld [vmem:[%s13933_s6 + $0x1080] sm:$0xff]   ;;  %v13155_v19 = vld [vmem:[%s13935_s7 + $0x5bc] ss:$304 sps:$4 sm:$0xff]   ;;  %v13158_v23 = vld [vmem:[%s13935_s7 + $0x5b8] ss:$304 sps:$4 sm:$0xff]  }
 0x2ff   : > { %12017 = vmatpush3.bf16.msra.mxu0 %v13133_v45  ;;  %9246 = vmatprep.mubr.bf16.mxu0 %v13139_v50  ;;  %v13159_v20 = vld [vmem:[%s13933_s6 + $0x1060] sm:$0xff]  }
 0x300   : > { %v14884_v29 = vadd.f32 %v11529_v28, %v8492_v30  ;;  %v11490_v36 = vpop.f32.mrb[156].mxu0  ;;  %9303 = vmatmul.mubr.bf16.vlgmr.msra.gmra.mrb[240].mxu1 %v13128_v37  ;;  %12018 = vmatprep.subr.bf16.mxu0 %v13135_v51  ;;  %v13160_v35 = vld [vmem:[%s13933_s6 + $0x10e0] sm:$0xff]  }
 0x301   : > { %v11491_v47 = vpop.f32.mrb[157].mxu0  ;;  %12057 = vmatpush3.bf16.msra.mxu1 %v13134_v48  ;;  %9310 = vmatprep.mubr.bf16.mxu1 %v13141_v59  ;;  %v13162_v39 = vld [vmem:[%s13933_s6 + $0x10a0] sm:$0xff]   ;;  %v13164_v48 = vld [vmem:[%s13933_s6 + $0x10e8] sm:$0xff]   ;;  %v13171_v59 = vld [vmem:[%s13933_s6 + $0x1070] sm:$0xff]  }
 0x302   : > { %v11530_v32 = vpop.f32.mrb[156].mxu1  ;;  %v11492_v41 = vadd.f32 %v11491_v47, %v11490_v36  ;;  %v11493_v49 = vpop.f32.mrb[158].mxu0  ;;  %12058 = vmatprep.subr.bf16.mxu1 %v13136_v40  ;;  %v13166_v40 = vld [vmem:[%s13933_s6 + $0x10a8] sm:$0xff]  }
 0x303   : > { %v11531_v43 = vpop.f32.mrb[157].mxu1  ;;  %v11494_v56 = vpop.f32.mrb[159].mxu0  ;;  %12019 = vmatpush3.bf16.msra.mxu0 %v13137_v46  ;;  %v1009_v46 = vld [vmem:[%s13935_s7 + $0x818] sm:$0x77] }
 0x304   : > { %v11532_v38 = vadd.f32 %v11531_v43, %v11530_v32  ;;  %v8497_v44 = vadd.f32 %v11492_v41, %v14827_v0  ;;  %v11533_v42 = vpop.f32.mrb[158].mxu1  ;;  %12020 = vmatprep.subr.bf16.mxu0 %v13145_v54  ;;  %v13163_v32 = vld [vmem:[%s13933_s6 + $0x1068] sm:$0xff]   ;;  %v10109_v50 = vcombine.low %v1009_v46, %v1009_v46 }
 0x305   : > { %v11534_v3 = vpop.f32.mrb[159].mxu1  ;;  %12059 = vmatpush3.bf16.msra.mxu1 %v13138_v53  ;;  %v13165_v43 = vld [vmem:[%s13933_s6 + $0x1028] sm:$0xff]   ;;  %v1008_v42 = vld [vmem:[%s13935_s7 + $0x810] sm:$0x77]  ;;  %v10110_v53 = vcombine.high %v1009_v46, %v1009_v46 }
 0x306   : > { %v14894_v52 = vadd.f32 %v11532_v38, %v8497_v44  ;;  %9247 = vmatmul.mubr.bf16.gmra.mrb[244].mxu0 %v13143_v61  ;;  %12060 = vmatprep.subr.bf16.mxu1 %v13146_v57  ;;  %v10108_v56 = vcombine.high %v1008_v42, %v1008_v42  ;;  %v10107_v3 = vcombine.low %v1008_v42, %v1008_v42  ;;  %v13198_v42 = vld [vmem:[%s13935_s7 + $0x36c] ss:$304 sps:$4 sm:$0xff]   ;;  %v13199_v46 = vld [vmem:[%s13933_s6 + $0x1150] sm:$0xff]  }
 0x307   : > { %12021 = vmatpush3.bf16.msra.mxu0 %v13147_v62 }
 0x308   : > { %v11552_v0 = vpop.f32.mrb[160].mxu0  ;;  %9311 = vmatmul.mubr.bf16.gmra.mrb[244].mxu1 %v13144_v58  ;;  %12022 = vmatprep.subr.bf16.mxu0 %v13149_v2 }
 0x309   : > { %v11553_v63 = vpop.f32.mrb[161].mxu0  ;;  %12061 = vmatpush3.bf16.msra.mxu1 %v13148_v14  ;;  %9318 = vmatprep.mubr.bf16.mxu1 %v13155_v19 }
 0x30a   : > { %v11592_v4 = vpop.f32.mrb[160].mxu1  ;;  %v11554_v1 = vadd.f32 %v11553_v63, %v11552_v0  ;;  %v11555_v10 = vpop.f32.mrb[162].mxu0  ;;  %12062 = vmatprep.subr.bf16.mxu1 %v13150_v9  ;;  %v13172_v0 = vld [vmem:[%s13933_s6 + $0x10f0] sm:$0xff]   ;;  %v13178_v9 = vld [vmem:[%s13933_s6 + $0x10b8] sm:$0xff]  }
 0x30b   : > { %v11593_v60 = vpop.f32.mrb[161].mxu1  ;;  %v11556_v12 = vpop.f32.mrb[163].mxu0  ;;  %12023 = vmatpush3.bf16.msra.mxu0 %v13151_v11 }
 0x30c   : > { %v11594_v7 = vadd.f32 %v11593_v60, %v11592_v4  ;;  %v8601_v13 = vadd.f32 %v11554_v1, %v14841_v25  ;;  %v11595_v6 = vpop.f32.mrb[162].mxu1  ;;  %v11557_v8 = vadd.f32 %v11556_v12, %v11555_v10  ;;  %v13153_v25 = vld [vmem:[%s13935_s7 + $0x5b4] ss:$304 sps:$4 sm:$0xff]   ;;  %12024 = vmatprep.subr.bf16.mxu0 %v13159_v20  ;;  %v13175_v1 = vld [vmem:[%s13933_s6 + $0x1078] sm:$0xff]  }
 0x30d   : > { %v11596_v15 = vpop.f32.mrb[163].mxu1  ;;  %12063 = vmatpush3.bf16.msra.mxu1 %v13152_v18  ;;  %9254 = vmatprep.mubr.bf16.mxu0 %v13153_v25  ;;  %v13173_v4 = vld [vmem:[%s13933_s6 + $0x1030] sm:$0xff]  }
 0x30e   : > { %v14908_v17 = vadd.f32 %v11594_v7, %v8601_v13  ;;  %v11597_v21 = vadd.f32 %v11596_v15, %v11595_v6  ;;  %v8604_v16 = vadd.f32 %v11557_v8, %v14849_v33  ;;  %9255 = vmatmul.mubr.bf16.gmra.mrb[248].mxu0 %v13157_v27  ;;  %v13161_v33 = vld [vmem:[%s13933_s6 + $0x1020] sm:$0xff]   ;;  %12064 = vmatprep.subr.bf16.mxu1 %v13160_v35  ;;  %v13176_v7 = vld [vmem:[%s13933_s6 + $0x10f8] sm:$0xff]  }
 0x30f   : > { %12025 = vmatpush3.bf16.msra.mxu0 %v13161_v33  ;;  %9262 = vmatprep.mubr.bf16.mxu0 %v10108_v56  ;;  %v13177_v13 = vld [vmem:[%s13933_s6 + $0x1038] sm:$0xff]   ;;  %v13179_v15 = vld [vmem:[%s13935_s7 + $0x100] ss:$304 sps:$4 sm:$0xff]   ;;  %v13181_v18 = vld [vmem:[%s13935_s7 + $0x104] ss:$304 sps:$4 sm:$0xff]  }
 0x310   : > { %v11558_v24 = vpop.f32.mrb[164].mxu0  ;;  %v14917_v31 = vadd.f32 %v11597_v21, %v8604_v16  ;;  %9319 = vmatmul.mubr.bf16.gmra.mrb[248].mxu1 %v13158_v23  ;;  %12026 = vmatprep.subr.bf16.mxu0 %v13163_v32  ;;  %v13184_v16 = vld [vmem:[%s13935_s7 + $0x10c] ss:$304 sps:$4 sm:$0xff]   ;;  %v13186_v23 = vld [vmem:[%s13933_s6 + $0x11c0] sm:$0xff]   ;;  %v13200_v56 = vld [vmem:[%s13933_s6 + $0x11d0] sm:$0xff]  }
 0x311   : > { %v11559_v30 = vpop.f32.mrb[165].mxu0  ;;  %12065 = vmatpush3.bf16.msra.mxu1 %v13162_v39  ;;  %9326 = vmatprep.mubr.bf16.mxu1 %v10110_v53 }
 0x312   : > { %v11598_v28 = vpop.f32.mrb[164].mxu1  ;;  %v11560_v37 = vadd.f32 %v11559_v30, %v11558_v24  ;;  %v11561_v34 = vpop.f32.mrb[166].mxu0  ;;  %12066 = vmatprep.subr.bf16.mxu1 %v13164_v48  ;;  %v13185_v24 = vld [vmem:[%s13933_s6 + $0x1140] sm:$0xff]   ;;  %v13192_v48 = vld [vmem:[%s13933_s6 + $0x1188] sm:$0xff]  }
 0x313   : > { %v11599_v26 = vpop.f32.mrb[165].mxu1  ;;  %v11562_v41 = vpop.f32.mrb[167].mxu0  ;;  %12027 = vmatpush3.bf16.msra.mxu0 %v13165_v43 }
 0x314   : > { %v11600_v36 = vadd.f32 %v11599_v26, %v11598_v28  ;;  %v8609_v45 = vadd.f32 %v11560_v37, %v14858_v55  ;;  %v11601_v47 = vpop.f32.mrb[166].mxu1  ;;  %v11563_v38 = vadd.f32 %v11562_v41, %v11561_v34  ;;  %12028 = vmatprep.subr.bf16.mxu0 %v13171_v59  ;;  %v13187_v28 = vld [vmem:[%s13933_s6 + $0x1100] sm:$0xff]   ;;  %v13189_v37 = vld [vmem:[%s13933_s6 + $0x1148] sm:$0xff]  }
 0x315   : > { %v11602_v49 = vpop.f32.mrb[167].mxu1  ;;  %12067 = vmatpush3.bf16.msra.mxu1 %v13166_v40 }
 0x316   : > { %v14926_v51 = vadd.f32 %v11600_v36, %v8609_v45  ;;  %v11603_v44 = vadd.f32 %v11602_v49, %v11601_v47  ;;  %v8612_v55 = vadd.f32 %v11563_v38, %v14867_v5  ;;  %9263 = vmatmul.mubr.bf16.gmra.mrb[252].mxu0 %v10107_v3  ;;  %v13174_v5 = vld [vmem:[%s13933_s6 + $0x10b0] sm:$0xff]   ;;  %12068 = vmatprep.subr.bf16.mxu1 %v13172_v0  ;;  %v13190_v36 = vld [vmem:[%s13933_s6 + $0x11c8] sm:$0xff]  }
 0x317   : > { %12029 = vmatpush3.bf16.msra.mxu0 %v13173_v4  ;;  %9366 = vmatprep.mubr.bf16.mxu0 %v13181_v18  ;;  %v13191_v45 = vld [vmem:[%s13933_s6 + $0x1108] sm:$0xff]   ;;  %v13193_v38 = vld [vmem:[%s13935_s7 + $0x360] ss:$304 sps:$4 sm:$0xff]   ;;  %v13195_v49 = vld [vmem:[%s13935_s7 + $0x364] ss:$304 sps:$4 sm:$0xff]  }
 0x318   : > { %v11564_v61 = vpop.f32.mrb[168].mxu0  ;;  %v14934_v58 = vadd.f32 %v11603_v44, %v8612_v55  ;;  %9327 = vmatmul.mubr.bf16.gmra.mrb[252].mxu1 %v10109_v50  ;;  %12030 = vmatprep.subr.bf16.mxu0 %v13175_v1  ;;  %v13196_v44 = vld [vmem:[%s13935_s7 + $0x368] ss:$304 sps:$4 sm:$0xff]   ;;  %v13201_v50 = vld [vmem:[%s13933_s6 + $0x1110] sm:$0xff]   ;;  %v13213_v18 = vld [vmem:[%s13933_s6 + $0x1160] sm:$0xff]  }
 0x319   : > { %v11565_v57 = vpop.f32.mrb[169].mxu0  ;;  %12069 = vmatpush3.bf16.msra.mxu1 %v13174_v5  ;;  %9430 = vmatprep.mubr.bf16.mxu1 %v13184_v16  ;;  %v13202_v0 = vld [vmem:[%s13933_s6 + $0x1190] sm:$0xff]   ;;  %v13215_v16 = vld [vmem:[%s13933_s6 + $0x1120] sm:$0xff]  }
 0x31a   : > { %v11604_v54 = vpop.f32.mrb[168].mxu1  ;;  %v11566_v63 = vadd.f32 %v11565_v57, %v11564_v61  ;;  %v11567_v14 = vpop.f32.mrb[170].mxu0  ;;  %12070 = vmatprep.subr.bf16.mxu1 %v13176_v7  ;;  %v13203_v57 = vld [vmem:[%s13933_s6 + $0x1158] sm:$0xff]  }
 0x31b   : > { %v11605_v62 = vpop.f32.mrb[169].mxu1  ;;  %v11568_v6 = vpop.f32.mrb[171].mxu0  ;;  %12031 = vmatpush3.bf16.msra.mxu0 %v13177_v13  ;;  %v13209_v13 = vld [vmem:[%s13935_s7 + $0x5c4] ss:$304 sps:$4 sm:$0xff]  }
 0x31c   : > { %v11606_v60 = vadd.f32 %v11605_v62, %v11604_v54  ;;  %v8617_v10 = vadd.f32 %v11566_v63, %v14876_v22  ;;  %v11607_v2 = vpop.f32.mrb[170].mxu1  ;;  %v11569_v11 = vadd.f32 %v11568_v6, %v11567_v14  ;;  %v13182_v22 = vld [vmem:[%s13935_s7 + $0x108] ss:$304 sps:$4 sm:$0xff]   ;;  %12096 = vmatprep.subr.bf16.mxu0 %v13185_v24 }
 0x31d   : > { %v11608_v8 = vpop.f32.mrb[171].mxu1  ;;  %12071 = vmatpush3.bf16.msra.mxu1 %v13178_v9  ;;  %v13204_v63 = vld [vmem:[%s13933_s6 + $0x11d8] sm:$0xff]  }
 0x31e   : > { %v14943_v12 = vadd.f32 %v11606_v60, %v8617_v10  ;;  %v11609_v21 = vadd.f32 %v11608_v8, %v11607_v2  ;;  %v8620_v25 = vadd.f32 %v11569_v11, %v14884_v29  ;;  %9367 = vmatmul.mubr.bf16.vlgmr.msra.gmra.mrb[0].mxu0 %v13179_v15  ;;  %12136 = vmatprep.subr.bf16.mxu1 %v13186_v23  ;;  %v13188_v29 = vld [vmem:[%s13933_s6 + $0x1180] sm:$0xff]   ;;  %v13205_v14 = vld [vmem:[%s13933_s6 + $0x1118] sm:$0xff]  }
 0x31f   : > { %12097 = vmatpush3.bf16.msra.mxu0 %v13187_v28  ;;  %9374 = vmatprep.mubr.bf16.mxu0 %v13195_v49  ;;  %v13207_v2 = vld [vmem:[%s13935_s7 + $0x5c0] ss:$304 sps:$4 sm:$0xff]   ;;  %v13210_v8 = vld [vmem:[%s13935_s7 + $0x5c8] ss:$304 sps:$4 sm:$0xff]   ;;  %v13212_v15 = vld [vmem:[%s13935_s7 + $0x5cc] ss:$304 sps:$4 sm:$0xff]  }
 0x320   : > { %v14951_v19 = vadd.f32 %v11609_v21, %v8620_v25  ;;  %v11570_v27 = vpop.f32.mrb[172].mxu0  ;;  %9431 = vmatmul.mubr.bf16.vlgmr.msra.gmra.mrb[0].mxu1 %v13182_v22  ;;  %12098 = vmatprep.subr.bf16.mxu0 %v13189_v37  ;;  %v13214_v22 = vld [vmem:[%s13933_s6 + $0x11e0] sm:$0xff]   ;;  %v13225_v49 = vld [vmem:[%s13933_s6 + $0x1170] sm:$0xff]  }
 0x321   : > { %v11571_v35 = vpop.f32.mrb[173].mxu0  ;;  %12137 = vmatpush3.bf16.msra.mxu1 %v13188_v29  ;;  %9438 = vmatprep.mubr.bf16.mxu1 %v13198_v42  ;;  %v13216_v23 = vld [vmem:[%s13933_s6 + $0x11a0] sm:$0xff]   ;;  %v13226_v42 = vld [vmem:[%s13933_s6 + $0x11f0] sm:$0xff]  }
 0x322   : > { %v11610_v20 = vpop.f32.mrb[172].mxu1  ;;  %v11572_v30 = vadd.f32 %v11571_v35, %v11570_v27  ;;  %v11573_v39 = vpop.f32.mrb[174].mxu0  ;;  %12138 = vmatprep.subr.bf16.mxu1 %v13190_v36  ;;  %v13217_v35 = vld [vmem:[%s13933_s6 + $0x1168] sm:$0xff]  }
 0x323   : > { %v11611_v33 = vpop.f32.mrb[173].mxu1  ;;  %v11574_v47 = vpop.f32.mrb[175].mxu0  ;;  %12099 = vmatpush3.bf16.msra.mxu0 %v13191_v45  ;;  %v13219_v39 = vld [vmem:[%s13933_s6 + $0x1128] sm:$0xff]  }
 0x324   : > { %v11612_v26 = vadd.f32 %v11611_v33, %v11610_v20  ;;  %v8625_v34 = vadd.f32 %v11572_v30, %v14894_v52  ;;  %v11613_v32 = vpop.f32.mrb[174].mxu1  ;;  %12100 = vmatprep.subr.bf16.mxu0 %v13199_v46  ;;  %v13218_v30 = vld [vmem:[%s13933_s6 + $0x11e8] sm:$0xff]  }
 0x325   : > { %v11614_v43 = vpop.f32.mrb[175].mxu1  ;;  %12139 = vmatpush3.bf16.msra.mxu1 %v13192_v48  ;;  %v1010_v32 = vld [vmem:[%s13935_s7 + $0x820] sm:$0x77]  ;;  %v1011_v48 = vld [vmem:[%s13935_s7 + $0x828] sm:$0x77] }
 0x326   : > { %v14961_v41 = vadd.f32 %v11612_v26, %v8625_v34  ;;  %9375 = vmatmul.mubr.bf16.gmra.mrb[4].mxu0 %v13193_v38  ;;  %12140 = vmatprep.subr.bf16.mxu1 %v13200_v56  ;;  %v13220_v34 = vld [vmem:[%s13933_s6 + $0x11a8] sm:$0xff]   ;;  %v10111_v45 = vcombine.low %v1010_v32, %v1010_v32  ;;  %v10112_v47 = vcombine.high %v1010_v32, %v1010_v32  ;;  %v13253_v32 = vld [vmem:[%s13933_s6 + $0x1250] sm:$0xff]  }
 0x327   : > { %12101 = vmatpush3.bf16.msra.mxu0 %v13201_v50  ;;  %9382 = vmatprep.mubr.bf16.mxu0 %v13209_v13  ;;  %v10113_v43 = vcombine.low %v1011_v48, %v1011_v48  ;;  %v10114_v38 = vcombine.high %v1011_v48, %v1011_v48  ;;  %v13239_v13 = vld [vmem:[%s13933_s6 + $0x1240] sm:$0xff]   ;;  %v13255_v48 = vld [vmem:[%s13933_s6 + $0x1210] sm:$0xff]  }
 0x328   : > { %v11632_v40 = vpop.f32.mrb[176].mxu0  ;;  %9439 = vmatmul.mubr.bf16.gmra.mrb[4].mxu1 %v13196_v44  ;;  %12102 = vmatprep.subr.bf16.mxu0 %v13203_v57 }
 0x329   : > { %v11633_v55 = vpop.f32.mrb[177].mxu0  ;;  %12141 = vmatpush3.bf16.msra.mxu1 %v13202_v0  ;;  %9446 = vmatprep.mubr.bf16.mxu1 %v13212_v15 }
 0x32a   : > { %v11672_v52 = vpop.f32.mrb[176].mxu1  ;;  %v11634_v53 = vadd.f32 %v11633_v55, %v11632_v40  ;;  %v11635_v61 = vpop.f32.mrb[178].mxu0  ;;  %12142 = vmatprep.subr.bf16.mxu1 %v13204_v63  ;;  %v13228_v55 = vld [vmem:[%s13933_s6 + $0x11b0] sm:$0xff]  }
 0x32b   : > { %v11673_v3 = vpop.f32.mrb[177].mxu1  ;;  %v11636_v5 = vpop.f32.mrb[179].mxu0  ;;  %12103 = vmatpush3.bf16.msra.mxu0 %v13205_v14  ;;  %v13233_v14 = vld [vmem:[%s13935_s7 + $0x110] ss:$304 sps:$4 sm:$0xff]  }
 0x32c   : > { %v11674_v59 = vadd.f32 %v11673_v3, %v11672_v52  ;;  %v8729_v54 = vadd.f32 %v11634_v53, %v14908_v17  ;;  %v11675_v4 = vpop.f32.mrb[178].mxu1  ;;  %v11637_v1 = vadd.f32 %v11636_v5, %v11635_v61  ;;  %v13206_v17 = vld [vmem:[%s13933_s6 + $0x1198] sm:$0xff]   ;;  %12104 = vmatprep.subr.bf16.mxu0 %v13213_v18  ;;  %v13241_v18 = vld [vmem:[%s13933_s6 + $0x1200] sm:$0xff]  }
 0x32d   : > { %v11676_v60 = vpop.f32.mrb[179].mxu1  ;;  %12143 = vmatpush3.bf16.msra.mxu1 %v13206_v17  ;;  %v13229_v3 = vld [vmem:[%s13933_s6 + $0x1178] sm:$0xff]  }
 0x32e   : > { %v14974_v62 = vadd.f32 %v11674_v59, %v8729_v54  ;;  %v11677_v7 = vadd.f32 %v11676_v60, %v11675_v4  ;;  %v8732_v10 = vadd.f32 %v11637_v1, %v14917_v31  ;;  %9383 = vmatmul.mubr.bf16.gmra.mrb[8].mxu0 %v13207_v2  ;;  %12144 = vmatprep.subr.bf16.mxu1 %v13214_v22  ;;  %v13230_v61 = vld [vmem:[%s13933_s6 + $0x11f8] sm:$0xff]   ;;  %v13242_v22 = vld [vmem:[%s13933_s6 + $0x1280] sm:$0xff]  }
 0x32f   : > { %12105 = vmatpush3.bf16.msra.mxu0 %v13215_v16  ;;  %9390 = vmatprep.mubr.bf16.mxu0 %v10112_v47  ;;  %v13231_v4 = vld [vmem:[%s13933_s6 + $0x1138] sm:$0xff]  }
 0x330   : > { %v14981_v6 = vadd.f32 %v11677_v7, %v8732_v10  ;;  %v11638_v9 = vpop.f32.mrb[180].mxu0  ;;  %9447 = vmatmul.mubr.bf16.gmra.mrb[8].mxu1 %v13210_v8  ;;  %12106 = vmatprep.subr.bf16.mxu0 %v13217_v35  ;;  %v13232_v5 = vld [vmem:[%s13933_s6 + $0x11b8] sm:$0xff]   ;;  %v13235_v7 = vld [vmem:[%s13935_s7 + $0x114] ss:$304 sps:$4 sm:$0xff]  }
 0x331   : > { %v11639_v21 = vpop.f32.mrb[181].mxu0  ;;  %12145 = vmatpush3.bf16.msra.mxu1 %v13216_v23  ;;  %9454 = vmatprep.mubr.bf16.mxu1 %v10114_v38  ;;  %v13238_v10 = vld [vmem:[%s13935_s7 + $0x11c] ss:$304 sps:$4 sm:$0xff]  }
 0x332   : > { %v11678_v11 = vpop.f32.mrb[180].mxu1  ;;  %v11640_v31 = vadd.f32 %v11639_v21, %v11638_v9  ;;  %v11641_v27 = vpop.f32.mrb[182].mxu0  ;;  %12146 = vmatprep.subr.bf16.mxu1 %v13218_v30 }
 0x333   : > { %v11679_v25 = vpop.f32.mrb[181].mxu1  ;;  %v11642_v29 = vpop.f32.mrb[183].mxu0  ;;  %12107 = vmatpush3.bf16.msra.mxu0 %v13219_v39  ;;  %v13249_v39 = vld [vmem:[%s13935_s7 + $0x374] ss:$304 sps:$4 sm:$0xff]  }
 0x334   : > { %v11680_v24 = vadd.f32 %v11679_v25, %v11678_v11  ;;  %v8737_v20 = vadd.f32 %v11640_v31, %v14926_v51  ;;  %v11681_v28 = vpop.f32.mrb[182].mxu1  ;;  %v11643_v37 = vadd.f32 %v11642_v29, %v11641_v27  ;;  %12108 = vmatprep.subr.bf16.mxu0 %v13225_v49  ;;  %v13240_v11 = vld [vmem:[%s13933_s6 + $0x12c0] sm:$0xff]   ;;  %v13243_v25 = vld [vmem:[%s13933_s6 + $0x1248] sm:$0xff]   ;;  %v13256_v49 = vld [vmem:[%s13933_s6 + $0x1290] sm:$0xff]  }
 0x335   : > { %v11682_v26 = vpop.f32.mrb[183].mxu1  ;;  %12147 = vmatpush3.bf16.msra.mxu1 %v13220_v34  ;;  %v13244_v27 = vld [vmem:[%s13933_s6 + $0x12c8] sm:$0xff]  }
 0x336   : > { %v14992_v33 = vadd.f32 %v11680_v24, %v8737_v20  ;;  %v11683_v36 = vadd.f32 %v11682_v26, %v11681_v28  ;;  %v8740_v51 = vadd.f32 %v11643_v37, %v14934_v58  ;;  %9391 = vmatmul.mubr.bf16.gmra.mrb[12].mxu0 %v10111_v45  ;;  %v13227_v58 = vld [vmem:[%s13933_s6 + $0x1130] sm:$0xff]   ;;  %12148 = vmatprep.subr.bf16.mxu1 %v13226_v42  ;;  %v13245_v28 = vld [vmem:[%s13933_s6 + $0x1208] sm:$0xff]  }
 0x337   : > { %12109 = vmatpush3.bf16.msra.mxu0 %v13227_v58  ;;  %9494 = vmatprep.mubr.bf16.mxu0 %v13235_v7  ;;  %v13246_v29 = vld [vmem:[%s13933_s6 + $0x1288] sm:$0xff]   ;;  %v13247_v26 = vld [vmem:[%s13935_s7 + $0x370] ss:$304 sps:$4 sm:$0xff]  }
 0x338   : > { %v15000_v40 = vadd.f32 %v11683_v36, %v8740_v51  ;;  %9455 = vmatmul.mubr.bf16.gmra.mrb[12].mxu1 %v10113_v43  ;;  %12110 = vmatprep.subr.bf16.mxu0 %v13229_v3  ;;  %v13250_v34 = vld [vmem:[%s13935_s7 + $0x378] ss:$304 sps:$4 sm:$0xff]   ;;  %v13254_v45 = vld [vmem:[%s13933_s6 + $0x12d0] sm:$0xff]  }
 0x339   : > { %12149 = vmatpush3.bf16.msra.mxu1 %v13228_v55  ;;  %9558 = vmatprep.mubr.bf16.mxu1 %v13238_v10  ;;  %v13258_v55 = vld [vmem:[%s13933_s6 + $0x12d8] sm:$0xff]  }
 0x33a   : > { %v11684_v52 = vpop.f32.mrb[184].mxu1  ;;  %12150 = vmatprep.subr.bf16.mxu1 %v13230_v61  ;;  %v13260_v61 = vld [vmem:[%s13933_s6 + $0x1298] sm:$0xff]  }
 0x33b   : > { %v11685_v53 = vpop.f32.mrb[185].mxu1  ;;  %12111 = vmatpush3.bf16.msra.mxu0 %v13231_v4 }
 0x33c   : > { %v11686_v50 = vadd.f32 %v11685_v53, %v11684_v52  ;;  %v11687_v54 = vpop.f32.mrb[186].mxu1  ;;  %12176 = vmatprep.subr.bf16.mxu0 %v13239_v13  ;;  %v13257_v52 = vld [vmem:[%s13933_s6 + $0x1258] sm:$0xff]  }
 0x33d   : > { %v11688_v60 = vpop.f32.mrb[187].mxu1  ;;  %12151 = vmatpush3.bf16.msra.mxu1 %v13232_v5  ;;  %v13259_v53 = vld [vmem:[%s13933_s6 + $0x1218] sm:$0xff]  }
 0x33e   : > { %v11689_v17 = vadd.f32 %v11688_v60, %v11687_v54  ;;  %9495 = vmatmul.mubr.bf16.vlgmr.msra.gmra.mrb[16].mxu0 %v13233_v14  ;;  %12216 = vmatprep.subr.bf16.mxu1 %v13240_v11  ;;  %v13261_v54 = vld [vmem:[%s13935_s7 + $0x5d0] ss:$304 sps:$4 sm:$0xff]   ;;  %v13264_v5 = vld [vmem:[%s13935_s7 + $0x5d8] ss:$304 sps:$4 sm:$0xff]   ;;  %v13266_v14 = vld [vmem:[%s13935_s7 + $0x5dc] ss:$304 sps:$4 sm:$0xff]  }
 0x33f   : > { %12177 = vmatpush3.bf16.msra.mxu0 %v13241_v18  ;;  %9502 = vmatprep.mubr.bf16.mxu0 %v13249_v39  ;;  %v13269_v11 = vld [vmem:[%s13933_s6 + $0x1220] sm:$0xff]   ;;  %v13279_v39 = vld [vmem:[%s13933_s6 + $0x1270] sm:$0xff]  }
 0x340   : > { %12178 = vmatprep.subr.bf16.mxu0 %v13243_v25  ;;  %v13270_v18 = vld [vmem:[%s13933_s6 + $0x12a0] sm:$0xff]   ;;  %v13272_v25 = vld [vmem:[%s13933_s6 + $0x12e8] sm:$0xff]  }
 0x343   : > { %12179 = vmatpush3.bf16.msra.mxu0 %v13245_v28  ;;  %v1013_v28 = vld [vmem:[%s13935_s7 + $0x838] sm:$0x77] }
 0x344   : > { %12180 = vmatprep.subr.bf16.mxu0 %v13253_v32 }
 0x346   : > { %9503 = vmatmul.mubr.bf16.gmra.mrb[20].mxu0 %v13247_v26  ;;  %v10118_v26 = vcombine.high %v1013_v28, %v1013_v28 }
 0x347   : > { %12181 = vmatpush3.bf16.msra.mxu0 %v13255_v48 }
 0x348   : > { %12182 = vmatprep.subr.bf16.mxu0 %v13257_v52 }
 0x34b   : > { %12183 = vmatpush3.bf16.msra.mxu0 %v13259_v53 }
 0x352   : > { %v11644_v44 = vpop.f32.mrb[184].mxu0 }
 0x353   : > { %v11645_v46 = vpop.f32.mrb[185].mxu0 }
 0x354   : > { %v11646_v56 = vadd.f32 %v11645_v46, %v11644_v44  ;;  %v11647_v59 = vpop.f32.mrb[186].mxu0 }
 0x355   : > { %v11648_v57 = vpop.f32.mrb[187].mxu0 }
 0x356   : > { %v8745_v0 = vadd.f32 %v11646_v56, %v14943_v12  ;;  %v11649_v1 = vadd.f32 %v11648_v57, %v11647_v59  ;;  %v13236_v12 = vld [vmem:[%s13935_s7 + $0x118] ss:$304 sps:$4 sm:$0xff]  }
 0x357   : > { %9559 = vmatmul.mubr.bf16.vlgmr.msra.gmra.mrb[16].mxu1 %v13236_v12  ;;  %v13267_v12 = vld [vmem:[%s13933_s6 + $0x1260] sm:$0xff]  }
 0x358   : > { %v15010_v63 = vadd.f32 %v11686_v50, %v8745_v0  ;;  %v8748_v2 = vadd.f32 %v11649_v1, %v14951_v19  ;;  %12217 = vmatpush3.bf16.msra.mxu1 %v13242_v22  ;;  %12184 = vmatprep.subr.bf16.mxu0 %v13267_v12 }
 0x359   : > { %12218 = vmatprep.subr.bf16.mxu1 %v13244_v27  ;;  %12185 = vmatpush3.bf16.msra.mxu0 %v13269_v11 }
 0x35a   : > { %v11650_v9 = vpop.f32.mrb[188].mxu0  ;;  %v15019_v8 = vadd.f32 %v11689_v17, %v8748_v2  ;;  %v13268_v2 = vld [vmem:[%s13933_s6 + $0x12e0] sm:$0xff]  }
 0x35b   : > { %v11651_v21 = vpop.f32.mrb[189].mxu0 }
 0x35c   : > { %v11690_v15 = vpop.f32.mrb[188].mxu1  ;;  %v11652_v19 = vadd.f32 %v11651_v21, %v11650_v9  ;;  %v11653_v24 = vpop.f32.mrb[190].mxu0  ;;  %12219 = vmatpush3.bf16.msra.mxu1 %v13246_v29 }
 0x35d   : > { %v11691_v31 = vpop.f32.mrb[189].mxu1  ;;  %v11654_v35 = vpop.f32.mrb[191].mxu0  ;;  %12220 = vmatprep.subr.bf16.mxu1 %v13254_v45  ;;  %v13273_v24 = vld [vmem:[%s13933_s6 + $0x1228] sm:$0xff]   ;;  %v13282_v45 = vld [vmem:[%s13933_s6 + $0x12b0] sm:$0xff]  }
 0x35e   : > { %v11692_v16 = vadd.f32 %v11691_v31, %v11690_v15  ;;  %v8753_v23 = vadd.f32 %v11652_v19, %v14961_v41  ;;  %v11693_v20 = vpop.f32.mrb[190].mxu1  ;;  %v13252_v41 = vld [vmem:[%s13935_s7 + $0x37c] ss:$304 sps:$4 sm:$0xff]  }
 0x35f   : > { %v11694_v37 = vpop.f32.mrb[191].mxu1  ;;  %9566 = vmatprep.mubr.bf16.mxu1 %v13252_v41  ;;  %v13271_v19 = vld [vmem:[%s13933_s6 + $0x1268] sm:$0xff]   ;;  %v1012_v20 = vld [vmem:[%s13935_s7 + $0x830] sm:$0x77] }
 0x360   : > { %v15028_v30 = vadd.f32 %v11692_v16, %v8753_v23  ;;  %9567 = vmatmul.mubr.bf16.gmra.mrb[20].mxu1 %v13250_v34  ;;  %12186 = vmatprep.subr.bf16.mxu0 %v13271_v19  ;;  %v13274_v23 = vld [vmem:[%s13933_s6 + $0x12a8] sm:$0xff]   ;;  %v10115_v35 = vcombine.low %v1012_v20, %v1012_v20  ;;  %v10116_v29 = vcombine.high %v1012_v20, %v1012_v20  ;;  %v13280_v34 = vld [vmem:[%s13933_s6 + $0x12f0] sm:$0xff]  }
 0x361   : > { %12221 = vmatpush3.bf16.msra.mxu1 %v13256_v49  ;;  %9574 = vmatprep.mubr.bf16.mxu1 %v13266_v14  ;;  %v10117_v37 = vcombine.low %v1013_v28, %v1013_v28  ;;  %v13298_v14 = vld [vmem:[%s13935_s7 + $0x38c] ss:$304 sps:$4 sm:$0xff]  }
 0x362   : > { %12222 = vmatprep.subr.bf16.mxu1 %v13258_v55  ;;  %12187 = vmatpush3.bf16.msra.mxu0 %v13273_v24  ;;  %v13286_v55 = vld [vmem:[%s13933_s6 + $0x12b8] sm:$0xff]  }
 0x363   : > { %12188 = vmatprep.subr.bf16.mxu0 %v13279_v39 }
 0x364   : > { %v11752_v51 = vpop.f32.mrb[192].mxu1 }
 0x365   : > { %v11753_v38 = vpop.f32.mrb[193].mxu1  ;;  %12223 = vmatpush3.bf16.msra.mxu1 %v13260_v61 }
 0x366   : > { %v11754_v44 = vadd.f32 %v11753_v38, %v11752_v51  ;;  %v11755_v46 = vpop.f32.mrb[194].mxu1  ;;  %12224 = vmatprep.subr.bf16.mxu1 %v13268_v2 }
 0x367   : > { %v11756_v59 = vpop.f32.mrb[195].mxu1 }
 0x368   : > { %v11757_v0 = vadd.f32 %v11756_v59, %v11755_v46  ;;  %9575 = vmatmul.mubr.bf16.gmra.mrb[24].mxu1 %v13264_v5  ;;  %v13287_v59 = vld [vmem:[%s13935_s7 + $0x120] ss:$304 sps:$4 sm:$0xff]  }
 0x369   : > { %12225 = vmatpush3.bf16.msra.mxu1 %v13270_v18  ;;  %9582 = vmatprep.mubr.bf16.mxu1 %v10118_v26  ;;  %v13301_v18 = vld [vmem:[%s13935_s7 + $0x5e4] ss:$304 sps:$4 sm:$0xff]  }
 0x36a   : > { %12226 = vmatprep.subr.bf16.mxu1 %v13272_v25 }
 0x36c   : > { %v11758_v1 = vpop.f32.mrb[196].mxu1 }
 0x36d   : > { %v11759_v10 = vpop.f32.mrb[197].mxu1  ;;  %12227 = vmatpush3.bf16.msra.mxu1 %v13274_v23  ;;  %v1015_v23 = vld [vmem:[%s13935_s7 + $0x848] sm:$0x77] }
 0x36e   : > { %v11760_v13 = vadd.f32 %v11759_v10, %v11758_v1  ;;  %v11761_v15 = vpop.f32.mrb[198].mxu1  ;;  %12228 = vmatprep.subr.bf16.mxu1 %v13280_v34 }
 0x370   : > { %9583 = vmatmul.mubr.bf16.gmra.mrb[28].mxu1 %v10117_v37 }
 0x371   : > { %v11712_v36 = vpop.f32.mrb[192].mxu0  ;;  %12229 = vmatpush3.bf16.msra.mxu1 %v13282_v45 }
 0x372   : > { %v11713_v47 = vpop.f32.mrb[193].mxu0 }
 0x373   : > { %v11714_v43 = vadd.f32 %v11713_v47, %v11712_v36  ;;  %v11715_v42 = vpop.f32.mrb[194].mxu0 }
 0x374   : > { %v11716_v56 = vpop.f32.mrb[195].mxu0 }
 0x375   : > { %v8857_v58 = vadd.f32 %v11714_v43, %v14974_v62  ;;  %v11717_v50 = vadd.f32 %v11716_v56, %v11715_v42  ;;  %v13263_v62 = vld [vmem:[%s13935_s7 + $0x5d4] ss:$304 sps:$4 sm:$0xff]   ;;  %v13283_v43 = vld [vmem:[%s13933_s6 + $0x1278] sm:$0xff]  }
 0x376   : > { %9510 = vmatprep.mubr.bf16.mxu0 %v13263_v62  ;;  %v13292_v62 = vld [vmem:[%s13935_s7 + $0x12c] ss:$304 sps:$4 sm:$0xff]  }
 0x377   : > { %v15042_v3 = vadd.f32 %v11754_v44, %v8857_v58  ;;  %v8860_v4 = vadd.f32 %v11717_v50, %v14981_v6  ;;  %9511 = vmatmul.mubr.bf16.gmra.mrb[24].mxu0 %v13261_v54  ;;  %v13284_v44 = vld [vmem:[%s13933_s6 + $0x12f8] sm:$0xff]   ;;  %9686 = vmatprep.mubr.bf16.mxu1 %v13292_v62 }
 0x378   : > { %9518 = vmatprep.mubr.bf16.mxu0 %v10116_v29  ;;  %v13285_v58 = vld [vmem:[%s13933_s6 + $0x1238] sm:$0xff]   ;;  %12230 = vmatprep.subr.bf16.mxu1 %v13284_v44  ;;  %v13299_v29 = vld [vmem:[%s13935_s7 + $0x5e0] ss:$304 sps:$4 sm:$0xff]  }
 0x379   : > { %v11718_v57 = vpop.f32.mrb[196].mxu0  ;;  %v15050_v7 = vadd.f32 %v11757_v0, %v8860_v4  ;;  %12231 = vmatpush3.bf16.msra.mxu1 %v13286_v55  ;;  %v13289_v0 = vld [vmem:[%s13935_s7 + $0x124] ss:$304 sps:$4 sm:$0xff]   ;;  %v13290_v54 = vld [vmem:[%s13935_s7 + $0x128] ss:$304 sps:$4 sm:$0xff]  }
 0x37a   : > { %v11719_v60 = vpop.f32.mrb[197].mxu0  ;;  %v13295_v4 = vld [vmem:[%s13935_s7 + $0x384] ss:$304 sps:$4 sm:$0xff]  }
 0x37b   : > { %v11720_v17 = vadd.f32 %v11719_v60, %v11718_v57  ;;  %v11721_v9 = vpop.f32.mrb[198].mxu0 }
 0x37c   : > { %v11722_v22 = vpop.f32.mrb[199].mxu0  ;;  %9687 = vmatmul.mubr.bf16.vlgmr.msra.gmra.mrb[32].mxu1 %v13290_v54 }
 0x37d   : > { %v8865_v6 = vadd.f32 %v11720_v17, %v14992_v33  ;;  %v11723_v31 = vadd.f32 %v11722_v22, %v11721_v9  ;;  %v11762_v33 = vpop.f32.mrb[199].mxu1  ;;  %9694 = vmatprep.mubr.bf16.mxu1 %v13298_v14  ;;  %v13293_v9 = vld [vmem:[%s13935_s7 + $0x380] ss:$304 sps:$4 sm:$0xff]   ;;  %v13304_v22 = vld [vmem:[%s13935_s7 + $0x5ec] ss:$304 sps:$4 sm:$0xff]  }
 0x37e   : > { %v11763_v16 = vadd.f32 %v11762_v33, %v11761_v15  ;;  %v11764_v32 = vpop.f32.mrb[200].mxu1  ;;  %v13296_v15 = vld [vmem:[%s13935_s7 + $0x388] ss:$304 sps:$4 sm:$0xff]  }
 0x37f   : > { %v15057_v21 = vadd.f32 %v11760_v13, %v8865_v6  ;;  %v8868_v27 = vadd.f32 %v11723_v31, %v15000_v40  ;;  %v13281_v40 = vld [vmem:[%s13933_s6 + $0x1230] sm:$0xff]   ;;  %9519 = vmatmul.mubr.bf16.gmra.mrb[28].mxu0 %v10115_v35  ;;  %v11765_v48 = vpop.f32.mrb[201].mxu1 }
 0x380   : > { %v11766_v38 = vadd.f32 %v11765_v48, %v11764_v32  ;;  %12189 = vmatpush3.bf16.msra.mxu0 %v13281_v40  ;;  %v11767_v52 = vpop.f32.mrb[202].mxu1  ;;  %9622 = vmatprep.mubr.bf16.mxu0 %v13289_v0  ;;  %v10122_v40 = vcombine.high %v1015_v23, %v1015_v23 }
 0x381   : > { %v11724_v36 = vpop.f32.mrb[200].mxu0  ;;  %v15068_v41 = vadd.f32 %v11763_v16, %v8868_v27  ;;  %12190 = vmatprep.subr.bf16.mxu0 %v13283_v43  ;;  %v11768_v50 = vpop.f32.mrb[203].mxu1  ;;  %v1014_v16 = vld [vmem:[%s13935_s7 + $0x840] sm:$0x77] }
 0x382   : > { %v11725_v51 = vpop.f32.mrb[201].mxu0  ;;  %v11769_v61 = vadd.f32 %v11768_v50, %v11767_v52  ;;  %v11770_v1 = vpop.f32.mrb[204].mxu1  ;;  %v10120_v34 = vcombine.high %v1014_v16, %v1014_v16  ;;  %v10121_v52 = vcombine.low %v1015_v23, %v1015_v23 }
 0x383   : > { %v11726_v47 = vadd.f32 %v11725_v51, %v11724_v36  ;;  %v11727_v49 = vpop.f32.mrb[202].mxu0  ;;  %v13302_v36 = vld [vmem:[%s13935_s7 + $0x5e8] ss:$304 sps:$4 sm:$0xff]  }
 0x384   : > { %v11728_v46 = vpop.f32.mrb[203].mxu0  ;;  %12191 = vmatpush3.bf16.msra.mxu0 %v13285_v58  ;;  %9695 = vmatmul.mubr.bf16.gmra.mrb[36].mxu1 %v13296_v15 }
 0x385   : > { %v8873_v42 = vadd.f32 %v11726_v47, %v15010_v63  ;;  %v11729_v53 = vadd.f32 %v11728_v46, %v11727_v49  ;;  %9702 = vmatprep.mubr.bf16.mxu1 %v13304_v22 }
 0x387   : > { %v15077_v56 = vadd.f32 %v11766_v38, %v8873_v42  ;;  %v8876_v63 = vadd.f32 %v11729_v53, %v15019_v8  ;;  %9623 = vmatmul.mubr.bf16.vlgmr.msra.gmra.mrb[32].mxu0 %v13287_v59  ;;  %v11771_v8 = vpop.f32.mrb[205].mxu1 }
 0x388   : > { %9630 = vmatprep.mubr.bf16.mxu0 %v13295_v4  ;;  %v11772_v10 = vadd.f32 %v11771_v8, %v11770_v1  ;;  %v11773_v2 = vpop.f32.mrb[206].mxu1 }
 0x389   : > { %v15085_v57 = vadd.f32 %v11769_v61, %v8876_v63  ;;  %v11730_v5 = vpop.f32.mrb[204].mxu0  ;;  %v11774_v11 = vpop.f32.mrb[207].mxu1 }
 0x38a   : > { %v11731_v60 = vpop.f32.mrb[205].mxu0 }
 0x38b   : > { %v11732_v17 = vadd.f32 %v11731_v60, %v11730_v5  ;;  %v11733_v12 = vpop.f32.mrb[206].mxu0 }
 0x38c   : > { %v11734_v13 = vpop.f32.mrb[207].mxu0  ;;  %9703 = vmatmul.mubr.bf16.gmra.mrb[40].mxu1 %v13302_v36 }
 0x38d   : > { %v8881_v6 = vadd.f32 %v11732_v17, %v15028_v30  ;;  %9710 = vmatprep.mubr.bf16.mxu1 %v10122_v40 }
 0x38f   : > { %v15093_v19 = vadd.f32 %v11772_v10, %v8881_v6  ;;  %9631 = vmatmul.mubr.bf16.gmra.mrb[36].mxu0 %v13293_v9 }
 0x390   : > { %9638 = vmatprep.mubr.bf16.mxu0 %v13301_v18 }
 0x391   : > { %v11792_v31 = vpop.f32.mrb[208].mxu0  ;;  %v11832_v33 = vpop.f32.mrb[208].mxu1 }
 0x392   : > { %v11793_v25 = vpop.f32.mrb[209].mxu0  ;;  %v11833_v24 = vpop.f32.mrb[209].mxu1 }
 0x393   : > { %v11794_v30 = vadd.f32 %v11793_v25, %v11792_v31  ;;  %v11795_v27 = vpop.f32.mrb[210].mxu0  ;;  %v11834_v20 = vadd.f32 %v11833_v24, %v11832_v33  ;;  %v11835_v28 = vpop.f32.mrb[210].mxu1 }
 0x394   : > { %v11796_v35 = vpop.f32.mrb[211].mxu0  ;;  %v11836_v39 = vpop.f32.mrb[211].mxu1  ;;  %9711 = vmatmul.mubr.bf16.gmra.mrb[44].mxu1 %v10121_v52 }
 0x395   : > { %v8985_v37 = vadd.f32 %v11794_v30, %v15042_v3  ;;  %v11797_v26 = vadd.f32 %v11796_v35, %v11795_v27  ;;  %v11837_v32 = vadd.f32 %v11836_v39, %v11835_v28  ;;  %v10119_v3 = vcombine.low %v1014_v16, %v1014_v16 }
 0x397   : > { %v15100_v51 = vadd.f32 %v11834_v20, %v8985_v37  ;;  %v8988_v45 = vadd.f32 %v11797_v26, %v15050_v7  ;;  %9639 = vmatmul.mubr.bf16.gmra.mrb[40].mxu0 %v13299_v29 }
 0x398   : > { %9646 = vmatprep.mubr.bf16.mxu0 %v10120_v34 }
 0x399   : > { %v15103_v47 = vadd.f32 %v11837_v32, %v8988_v45  ;;  %v11798_v48 = vpop.f32.mrb[212].mxu0  ;;  %v11838_v43 = vpop.f32.mrb[212].mxu1 }
 0x39a   : > { %v11799_v38 = vpop.f32.mrb[213].mxu0  ;;  %v11839_v44 = vpop.f32.mrb[213].mxu1 }
 0x39b   : > { %v11800_v49 = vadd.f32 %v11799_v38, %v11798_v48  ;;  %v11801_v42 = vpop.f32.mrb[214].mxu0  ;;  %v11840_v58 = vadd.f32 %v11839_v44, %v11838_v43  ;;  %v11841_v46 = vpop.f32.mrb[214].mxu1 }
 0x39c   : > { %v11802_v55 = vpop.f32.mrb[215].mxu0  ;;  %v11842_v50 = vpop.f32.mrb[215].mxu1 }
 0x39d   : > { %v8993_v53 = vadd.f32 %v11800_v49, %v15057_v21  ;;  %v11803_v7 = vadd.f32 %v11802_v55, %v11801_v42  ;;  %v11843_v59 = vadd.f32 %v11842_v50, %v11841_v46 }
 0x39f   : > { %9647 = vmatmul.mubr.bf16.gmra.mrb[44].mxu0 %v10119_v3  ;;  %v9057_v61 = vadd.f32 %v11840_v58, %v8993_v53  ;;  %v8996_v0 = vadd.f32 %v11803_v7, %v15068_v41 }
 0x3a1   : > { %v9060_v63 = vadd.f32 %v11843_v59, %v8996_v0  ;;  %v11804_v54 = vpop.f32.mrb[216].mxu0  ;;  %v11844_v62 = vpop.f32.mrb[216].mxu1 }
 0x3a2   : > { %v11805_v4 = vpop.f32.mrb[217].mxu0  ;;  %v11845_v5 = vpop.f32.mrb[217].mxu1 }
 0x3a3   : > { %v11806_v1 = vadd.f32 %v11805_v4, %v11804_v54  ;;  %v11846_v60 = vadd.f32 %v11845_v5, %v11844_v62  ;;  %v11807_v14 = vpop.f32.mrb[218].mxu0  ;;  %v11847_v17 = vpop.f32.mrb[218].mxu1 }
 0x3a4   : > { %v11808_v8 = vpop.f32.mrb[219].mxu0  ;;  %v11848_v12 = vpop.f32.mrb[219].mxu1 }
 0x3a5   : > { %v9001_v21 = vadd.f32 %v11806_v1, %v15077_v56  ;;  %v11809_v10 = vadd.f32 %v11808_v8, %v11807_v14  ;;  %v11849_v2 = vadd.f32 %v11848_v12, %v11847_v17 }
 0x3a7   : > { %v9065_v6 = vadd.f32 %v11846_v60, %v9001_v21  ;;  %v9004_v13 = vadd.f32 %v11809_v10, %v15085_v57 }
 0x3a9   : > { %v9068_v41 = vadd.f32 %v11849_v2, %v9004_v13  ;;  %v11810_v9 = vpop.f32.mrb[220].mxu0  ;;  %v11850_v11 = vpop.f32.mrb[220].mxu1 }
 0x3aa   : > { %v11811_v15 = vpop.f32.mrb[221].mxu0  ;;  %v11851_v22 = vpop.f32.mrb[221].mxu1 }
 0x3ab   : > { %v11812_v18 = vadd.f32 %v11811_v15, %v11810_v9  ;;  %v11813_v31 = vpop.f32.mrb[222].mxu0  ;;  %v11852_v33 = vadd.f32 %v11851_v22, %v11850_v11  ;;  %v11853_v25 = vpop.f32.mrb[222].mxu1 }
 0x3ac   : > { %v11814_v16 = vpop.f32.mrb[223].mxu0  ;;  %v11854_v24 = vpop.f32.mrb[223].mxu1 }
 0x3ad   : > { %v9009_v30 = vadd.f32 %v11812_v18, %v15093_v19 }
 0x3af   : > { %v9073_v27 = vadd.f32 %v11852_v33, %v9009_v30 }
 0x3b1   : > { %v11872_v56 = vpop.f32.mrb[224].mxu0  ;;  %v11912_v23 = vpop.f32.mrb[224].mxu1 }
 0x3b2   : > { %v11873_v20 = vpop.f32.mrb[225].mxu0  ;;  %v11913_v35 = vpop.f32.mrb[225].mxu1 }
 0x3b3   : > { %v11874_v28 = vadd.f32 %v11873_v20, %v11872_v56  ;;  %v11875_v57 = vpop.f32.mrb[226].mxu0  ;;  %v11914_v29 = vadd.f32 %v11913_v35, %v11912_v23  ;;  %v11915_v37 = vpop.f32.mrb[226].mxu1 }
 0x3b4   : > { %v11876_v26 = vpop.f32.mrb[227].mxu0  ;;  %v11916_v34 = vpop.f32.mrb[227].mxu1 }
 0x3b5   : > { %v9113_v39 = vadd.f32 %v11874_v28, %v15100_v51  ;;  %v11877_v36 = vadd.f32 %v11876_v26, %v11875_v57  ;;  %v11917_v32 = vadd.f32 %v11916_v34, %v11915_v37 }
 0x3b7   : > { %v9177_v40 = vadd.f32 %v11914_v29, %v9113_v39  ;;  %v9116_v45 = vadd.f32 %v11877_v36, %v15103_v47 }
 0x3b9   : > { %v9180_v19 = vadd.f32 %v11917_v32, %v9116_v45  ;;  %v11878_v48 = vpop.f32.mrb[228].mxu0  ;;  %v11918_v43 = vpop.f32.mrb[228].mxu1 }
 0x3ba   : > { %v11879_v38 = vpop.f32.mrb[229].mxu0  ;;  %v11919_v3 = vpop.f32.mrb[229].mxu1 }
 0x3bb   : > { %v11880_v49 = vadd.f32 %v11879_v38, %v11878_v48  ;;  %v11920_v44 = vadd.f32 %v11919_v3, %v11918_v43  ;;  %v11881_v42 = vpop.f32.mrb[230].mxu0  ;;  %v11921_v52 = vpop.f32.mrb[230].mxu1 }
 0x3bc   : > { %v11882_v58 = vpop.f32.mrb[231].mxu0  ;;  %v11922_v46 = vpop.f32.mrb[231].mxu1 }
 0x3bd   : > { %v9121_v55 = vadd.f32 %v11880_v49, %v9057_v61  ;;  %v11883_v53 = vadd.f32 %v11882_v58, %v11881_v42  ;;  %v11923_v51 = vadd.f32 %v11922_v46, %v11921_v52 }
 0x3bf   : > { %v9185_v7 = vadd.f32 %v11920_v44, %v9121_v55  ;;  %v9124_v50 = vadd.f32 %v11883_v53, %v9060_v63 }
 0x3c1   : > { %v9188_v59 = vadd.f32 %v11923_v51, %v9124_v50  ;;  %v11884_v0 = vpop.f32.mrb[232].mxu0  ;;  %v11924_v54 = vpop.f32.mrb[232].mxu1 }
 0x3c2   : > { %v11885_v47 = vpop.f32.mrb[233].mxu0  ;;  %v11925_v4 = vpop.f32.mrb[233].mxu1 }
 0x3c3   : > { %v11886_v62 = vadd.f32 %v11885_v47, %v11884_v0  ;;  %v11887_v5 = vpop.f32.mrb[234].mxu0  ;;  %v11926_v1 = vadd.f32 %v11925_v4, %v11924_v54  ;;  %v11927_v60 = vpop.f32.mrb[234].mxu1 }
 0x3c4   : > { %v11888_v14 = vpop.f32.mrb[235].mxu0  ;;  %v11928_v12 = vpop.f32.mrb[235].mxu1 }
 0x3c5   : > { %v9129_v17 = vadd.f32 %v11886_v62, %v9065_v6  ;;  %v11889_v8 = vadd.f32 %v11888_v14, %v11887_v5  ;;  %v11929_v21 = vadd.f32 %v11928_v12, %v11927_v60 }
 0x3c7   : > { %v9193_v10 = vadd.f32 %v11926_v1, %v9129_v17  ;;  %v9132_v61 = vadd.f32 %v11889_v8, %v9068_v41 }
 0x3c9   : > { %v9196_v2 = vadd.f32 %v11929_v21, %v9132_v61  ;;  %v11890_v13 = vpop.f32.mrb[236].mxu0 }
 0x3ca   : > { %v11891_v63 = vpop.f32.mrb[237].mxu0 }
 0x3cb   : > { %v11930_v9 = vpop.f32.mrb[236].mxu1  ;;  %v11892_v15 = vadd.f32 %v11891_v63, %v11890_v13  ;;  %v11893_v22 = vpop.f32.mrb[238].mxu0 }
 0x3cc   : > { %v11931_v11 = vpop.f32.mrb[237].mxu1  ;;  %v11894_v33 = vpop.f32.mrb[239].mxu0 }
 0x3cd   : > { %v11932_v18 = vadd.f32 %v11931_v11, %v11930_v9  ;;  %v11933_v31 = vpop.f32.mrb[238].mxu1  ;;  %v9137_v16 = vadd.f32 %v11892_v15, %v9073_v27 }
 0x3ce   : > { %v11934_v25 = vpop.f32.mrb[239].mxu1 }
 0x3cf   : > { %v9201_v30 = vadd.f32 %v11932_v18, %v9137_v16 }
 0x3d1   : > { %v11952_v24 = vpop.f32.mrb[240].mxu0 }
 0x3d2   : > { %v11953_v56 = vpop.f32.mrb[241].mxu0 }
 0x3d3   : > { %v11992_v6 = vpop.f32.mrb[240].mxu1  ;;  %v11954_v23 = vadd.f32 %v11953_v56, %v11952_v24  ;;  %v11955_v28 = vpop.f32.mrb[242].mxu0 }
 0x3d4   : > { %v11993_v20 = vpop.f32.mrb[241].mxu1  ;;  %v11956_v57 = vpop.f32.mrb[243].mxu0 }
 0x3d5   : > { %v11994_v41 = vadd.f32 %v11993_v20, %v11992_v6  ;;  %v11995_v35 = vpop.f32.mrb[242].mxu1  ;;  %v9241_v29 = vadd.f32 %v11954_v23, %v9177_v40  ;;  %v11957_v37 = vadd.f32 %v11956_v57, %v11955_v28 }
 0x3d6   : > { %v11996_v26 = vpop.f32.mrb[243].mxu1 }
 0x3d7   : > { %v11997_v39 = vadd.f32 %v11996_v26, %v11995_v35  ;;  %v9305_v36 = vadd.f32 %v11994_v41, %v9241_v29  ;;  %v9244_v34 = vadd.f32 %v11957_v37, %v9180_v19 }
 0x3d9   : > { %v9308_v32 = vadd.f32 %v11997_v39, %v9244_v34  ;;  %v11958_v45 = vpop.f32.mrb[244].mxu0 }
 0x3da   : > { %v11959_v27 = vpop.f32.mrb[245].mxu0 }
 0x3db   : > { %v11998_v48 = vpop.f32.mrb[244].mxu1  ;;  %v11960_v43 = vadd.f32 %v11959_v27, %v11958_v45  ;;  %v11961_v3 = vpop.f32.mrb[246].mxu0 }
 0x3dc   : > { %v11999_v38 = vpop.f32.mrb[245].mxu1  ;;  %v11962_v42 = vpop.f32.mrb[247].mxu0 }
 0x3dd   : > { %v12000_v49 = vadd.f32 %v11999_v38, %v11998_v48  ;;  %v12001_v44 = vpop.f32.mrb[246].mxu1  ;;  %v9249_v52 = vadd.f32 %v11960_v43, %v9185_v7  ;;  %v11963_v58 = vadd.f32 %v11962_v42, %v11961_v3 }
 0x3de   : > { %v12002_v46 = vpop.f32.mrb[247].mxu1 }
 0x3df   : > { %v12003_v55 = vadd.f32 %v12002_v46, %v12001_v44  ;;  %v9313_v40 = vadd.f32 %v12000_v49, %v9249_v52  ;;  %v9252_v53 = vadd.f32 %v11963_v58, %v9188_v59 }
 0x3e1   : > { %v9316_v51 = vadd.f32 %v12003_v55, %v9252_v53  ;;  %v11964_v50 = vpop.f32.mrb[248].mxu0 }
 0x3e2   : > { %v11965_v19 = vpop.f32.mrb[249].mxu0 }
 0x3e3   : > { %v12004_v0 = vpop.f32.mrb[248].mxu1  ;;  %v11966_v54 = vadd.f32 %v11965_v19, %v11964_v50  ;;  %v11967_v62 = vpop.f32.mrb[250].mxu0 }
 0x3e4   : > { %v12005_v47 = vpop.f32.mrb[249].mxu1  ;;  %v11968_v1 = vpop.f32.mrb[251].mxu0 }
 0x3e5   : > { %v12006_v4 = vadd.f32 %v12005_v47, %v12004_v0  ;;  %v12007_v5 = vpop.f32.mrb[250].mxu1  ;;  %v9257_v60 = vadd.f32 %v11966_v54, %v9193_v10  ;;  %v11969_v14 = vadd.f32 %v11968_v1, %v11967_v62 }
 0x3e6   : > { %v12008_v17 = vpop.f32.mrb[251].mxu1 }
 0x3e7   : > { %v12009_v8 = vadd.f32 %v12008_v17, %v12007_v5  ;;  %v9321_v7 = vadd.f32 %v12006_v4, %v9257_v60  ;;  %v9260_v12 = vadd.f32 %v11969_v14, %v9196_v2 }
 0x3e9   : > { %v9324_v21 = vadd.f32 %v12009_v8, %v9260_v12  ;;  %v11970_v61 = vpop.f32.mrb[252].mxu0 }
 0x3ea   : > { %v11971_v59 = vpop.f32.mrb[253].mxu0 }
 0x3eb   : > { %v12010_v13 = vpop.f32.mrb[252].mxu1  ;;  %v11972_v63 = vadd.f32 %v11971_v59, %v11970_v61  ;;  %v11973_v15 = vpop.f32.mrb[254].mxu0 }
 0x3ec   : > { %v12011_v9 = vpop.f32.mrb[253].mxu1  ;;  %v11974_v22 = vpop.f32.mrb[255].mxu0 }
 0x3ed   : > { %v12012_v11 = vadd.f32 %v12011_v9, %v12010_v13  ;;  %v12013_v18 = vpop.f32.mrb[254].mxu1  ;;  %v9265_v33 = vadd.f32 %v11972_v63, %v9201_v30 }
 0x3ee   : > { %v12014_v31 = vpop.f32.mrb[255].mxu1 }
 0x3ef   : > { %v9329_v25 = vadd.f32 %v12012_v11, %v9265_v33 }
 0x3f1   : > { %v12032_v16 = vpop.f32.mrb[0].mxu0 }
 0x3f2   : > { %v12033_v24 = vpop.f32.mrb[1].mxu0 }
 0x3f3   : > { %v12072_v10 = vpop.f32.mrb[0].mxu1  ;;  %v12034_v6 = vadd.f32 %v12033_v24, %v12032_v16  ;;  %v12035_v23 = vpop.f32.mrb[2].mxu0 }
 0x3f4   : > { %v12073_v56 = vpop.f32.mrb[1].mxu1  ;;  %v12036_v28 = vpop.f32.mrb[3].mxu0 }
 0x3f5   : > { %v12074_v2 = vadd.f32 %v12073_v56, %v12072_v10  ;;  %v12075_v20 = vpop.f32.mrb[2].mxu1  ;;  %v9369_v41 = vadd.f32 %v12034_v6, %v9305_v36  ;;  %v12037_v35 = vadd.f32 %v12036_v28, %v12035_v23 }
 0x3f6   : > { %v12076_v57 = vpop.f32.mrb[3].mxu1 }
 0x3f7   : > { %v12077_v29 = vadd.f32 %v12076_v57, %v12075_v20  ;;  %v9433_v37 = vadd.f32 %v12074_v2, %v9369_v41  ;;  %v9372_v26 = vadd.f32 %v12037_v35, %v9308_v32 }
 0x3f9   : > { %v9436_v39 = vadd.f32 %v12077_v29, %v9372_v26  ;;  %v12038_v34 = vpop.f32.mrb[4].mxu0 }
 0x3fa   : > { %v12039_v30 = vpop.f32.mrb[5].mxu0 }
 0x3fb   : > { %v12078_v45 = vpop.f32.mrb[4].mxu1  ;;  %v12040_v48 = vadd.f32 %v12039_v30, %v12038_v34  ;;  %v12041_v43 = vpop.f32.mrb[6].mxu0 }
 0x3fc   : > { %v12079_v27 = vpop.f32.mrb[5].mxu1  ;;  %v12042_v49 = vpop.f32.mrb[7].mxu0 }
 0x3fd   : > { %v12080_v38 = vadd.f32 %v12079_v27, %v12078_v45  ;;  %v12081_v3 = vpop.f32.mrb[6].mxu1  ;;  %v9377_v44 = vadd.f32 %v12040_v48, %v9313_v40  ;;  %v12043_v42 = vadd.f32 %v12042_v49, %v12041_v43 }
 0x3fe   : > { %v12082_v52 = vpop.f32.mrb[7].mxu1 }
 0x3ff   : > { %v12083_v58 = vadd.f32 %v12082_v52, %v12081_v3  ;;  %v9441_v36 = vadd.f32 %v12080_v38, %v9377_v44  ;;  %v9380_v46 = vadd.f32 %v12043_v42, %v9316_v51 }
 0x401   : > { %v9444_v55 = vadd.f32 %v12083_v58, %v9380_v46  ;;  %v12044_v53 = vpop.f32.mrb[8].mxu0 }
 0x402   : > { %v12045_v32 = vpop.f32.mrb[9].mxu0 }
 0x403   : > { %v12084_v50 = vpop.f32.mrb[8].mxu1  ;;  %v12046_v0 = vadd.f32 %v12045_v32, %v12044_v53  ;;  %v12047_v54 = vpop.f32.mrb[10].mxu0 }
 0x404   : > { %v12085_v19 = vpop.f32.mrb[9].mxu1  ;;  %v12048_v4 = vpop.f32.mrb[11].mxu0 }
 0x405   : > { %v12086_v47 = vadd.f32 %v12085_v19, %v12084_v50  ;;  %v12087_v62 = vpop.f32.mrb[10].mxu1  ;;  %v9385_v5 = vadd.f32 %v12046_v0, %v9321_v7  ;;  %v12049_v1 = vadd.f32 %v12048_v4, %v12047_v54 }
 0x406   : > { %v12088_v60 = vpop.f32.mrb[11].mxu1 }
 0x407   : > { %v12089_v14 = vadd.f32 %v12088_v60, %v12087_v62  ;;  %v9449_v40 = vadd.f32 %v12086_v47, %v9385_v5  ;;  %v9388_v17 = vadd.f32 %v12049_v1, %v9324_v21 }
 0x409   : > { %v9452_v8 = vadd.f32 %v12089_v14, %v9388_v17  ;;  %v12050_v12 = vpop.f32.mrb[12].mxu0 }
 0x40a   : > { %v12051_v51 = vpop.f32.mrb[13].mxu0 }
 0x40b   : > { %v12090_v61 = vpop.f32.mrb[12].mxu1  ;;  %v12052_v13 = vadd.f32 %v12051_v51, %v12050_v12  ;;  %v12053_v9 = vpop.f32.mrb[14].mxu0 }
 0x40c   : > { %v12091_v59 = vpop.f32.mrb[13].mxu1  ;;  %v12054_v15 = vpop.f32.mrb[15].mxu0 }
 0x40d   : > { %v12092_v63 = vadd.f32 %v12091_v59, %v12090_v61  ;;  %v12093_v11 = vpop.f32.mrb[14].mxu1  ;;  %v9393_v18 = vadd.f32 %v12052_v13, %v9329_v25 }
 0x40e   : > { %v12094_v22 = vpop.f32.mrb[15].mxu1 }
 0x40f   : > { %v9457_v31 = vadd.f32 %v12092_v63, %v9393_v18 }
 0x411   : > { %v12112_v33 = vpop.f32.mrb[16].mxu0 }
 0x412   : > { %v12113_v16 = vpop.f32.mrb[17].mxu0 }
 0x413   : > { %v12114_v10 = vadd.f32 %v12113_v16, %v12112_v33  ;;  %v12115_v6 = vpop.f32.mrb[18].mxu0 }
 0x414   : > { %v12116_v23 = vpop.f32.mrb[19].mxu0 }
 0x415   : > { %v9497_v2 = vadd.f32 %v12114_v10, %v9433_v37  ;;  %v12117_v20 = vadd.f32 %v12116_v23, %v12115_v6 }
 0x417   : > { %v9500_v57 = vadd.f32 %v12117_v20, %v9436_v39 }
 0x419   : > { %v12118_v26 = vpop.f32.mrb[20].mxu0 }
 0x41a   : > { %v12119_v34 = vpop.f32.mrb[21].mxu0 }
 0x41b   : > { %v12120_v45 = vadd.f32 %v12119_v34, %v12118_v26  ;;  %v12121_v48 = vpop.f32.mrb[22].mxu0 }
 0x41c   : > { %v12122_v38 = vpop.f32.mrb[23].mxu0 }
 0x41d   : > { %v9505_v3 = vadd.f32 %v12120_v45, %v9441_v36  ;;  %v12123_v49 = vadd.f32 %v12122_v38, %v12121_v48 }
 0x41f   : > { %v9508_v52 = vadd.f32 %v12123_v49, %v9444_v55 }
 0x42a   : > { %v12152_v7 = vpop.f32.mrb[16].mxu1 }
 0x42b   : > { %v12153_v24 = vpop.f32.mrb[17].mxu1 }
 0x42c   : > { %v12154_v21 = vadd.f32 %v12153_v24, %v12152_v7  ;;  %v12155_v56 = vpop.f32.mrb[18].mxu1 }
 0x42d   : > { %v12156_v28 = vpop.f32.mrb[19].mxu1 }
 0x42e   : > { %v12157_v41 = vadd.f32 %v12156_v28, %v12155_v56  ;;  %v9561_v35 = vadd.f32 %v12154_v21, %v9497_v2  ;;  %v743_v2 = vld [vmem:[%s15242_s3] sm:$0xff] }
 0x430   : > { %v9564_v29 = vadd.f32 %v12157_v41, %v9500_v57  ;;  %v744_v41 = vld [vmem:[%s15242_s3 + $0x8] sm:$0xff] }
 0x433   : > { %v12158_v25 = vpop.f32.mrb[20].mxu1 }
 0x434   : > { %v12159_v30 = vpop.f32.mrb[21].mxu1 }
 0x435   : > { %v12160_v27 = vadd.f32 %v12159_v30, %v12158_v25  ;;  %v12161_v43 = vpop.f32.mrb[22].mxu1 }
 0x436   : > { %v12162_v44 = vpop.f32.mrb[23].mxu1 }
 0x437   : > { %v12163_v42 = vadd.f32 %v12162_v44, %v12161_v43  ;;  %v15112_v37 = vadd.f32 %v12160_v27, %v9505_v3 }
 0x439   : > { %v15114_v58 = vadd.f32 %v12163_v42, %v9508_v52  ;;  %v745_v42 = vld [vmem:[%s15242_s3 + $0x10] sm:$0xff] }
 0x43b   : > { %v12164_v53 = vpop.f32.mrb[24].mxu1 }
 0x43c   : > { %v12165_v0 = vpop.f32.mrb[25].mxu1 }
 0x43d   : > { %v12166_v47 = vadd.f32 %v12165_v0, %v12164_v53  ;;  %v12167_v62 = vpop.f32.mrb[26].mxu1  ;;  %v746_v53 = vld [vmem:[%s15242_s3 + $0x18] sm:$0xff] }
 0x43e   : > { %v12168_v36 = vpop.f32.mrb[27].mxu1 }
 0x43f   : > { %v12169_v60 = vadd.f32 %v12168_v36, %v12167_v62 }
 0x443   : > { %v12170_v17 = vpop.f32.mrb[28].mxu1 }
 0x444   : > { %v12171_v61 = vpop.f32.mrb[29].mxu1 }
 0x445   : > { %v12172_v13 = vadd.f32 %v12171_v61, %v12170_v17  ;;  %v12173_v9 = vpop.f32.mrb[30].mxu1 }
 0x44a   : > { %v12124_v39 = vpop.f32.mrb[24].mxu0 }
 0x44b   : > { %v12125_v46 = vpop.f32.mrb[25].mxu0 }
 0x44c   : > { %v12126_v50 = vadd.f32 %v12125_v46, %v12124_v39  ;;  %v12127_v32 = vpop.f32.mrb[26].mxu0 }
 0x44d   : > { %v12128_v19 = vpop.f32.mrb[27].mxu0 }
 0x44e   : > { %v9513_v54 = vadd.f32 %v12126_v50, %v9449_v40  ;;  %v12129_v4 = vadd.f32 %v12128_v19, %v12127_v32  ;;  %v12174_v40 = vpop.f32.mrb[31].mxu1 }
 0x44f   : > { %v12232_v22 = vpop.f32.mrb[32].mxu1 }
 0x450   : > { %v15116_v5 = vadd.f32 %v12166_v47, %v9513_v54  ;;  %v9516_v1 = vadd.f32 %v12129_v4, %v9452_v8  ;;  %v12233_v7 = vpop.f32.mrb[33].mxu1 }
 0x451   : > { %v12234_v10 = vadd.f32 %v12233_v7, %v12232_v22  ;;  %v12235_v24 = vpop.f32.mrb[34].mxu1 }
 0x452   : > { %v15118_v14 = vadd.f32 %v12169_v60, %v9516_v1  ;;  %v12130_v55 = vpop.f32.mrb[28].mxu0  ;;  %v12236_v23 = vpop.f32.mrb[35].mxu1 }
 0x453   : > { %v12131_v12 = vpop.f32.mrb[29].mxu0  ;;  %v12237_v20 = vadd.f32 %v12236_v23, %v12235_v24  ;;  %v10732_v23 = vld [vmem:[%s15241_s2] ss:$0 sm:$0xff] (!%p10731_p10) }
 0x454   : > { %v12132_v51 = vadd.f32 %v12131_v12, %v12130_v55  ;;  %v12133_v59 = vpop.f32.mrb[30].mxu0  ;;  %v747_v12 = vld [vmem:[%s15242_s3 + $0x20] sm:$0xff] }
 0x455   : > { %v12134_v63 = vpop.f32.mrb[31].mxu0  ;;  %v748_v59 = vld [vmem:[%s15242_s3 + $0x28] sm:$0xff] }
 0x456   : > { %v9521_v11 = vadd.f32 %v12132_v51, %v9457_v31 }
 0x457   : > { %v12238_v34 = vpop.f32.mrb[36].mxu1 }
 0x458   : > { %v15120_v15 = vadd.f32 %v12172_v13, %v9521_v11  ;;  %v12239_v48 = vpop.f32.mrb[37].mxu1 }
 0x459   : > { %v12241_v43 = vpop.f32.mrb[38].mxu1 }
 0x45a   : > { %v12192_v18 = vpop.f32.mrb[32].mxu0  ;;  %v12242_v44 = vpop.f32.mrb[39].mxu1 }
 0x45b   : > { %v12193_v33 = vpop.f32.mrb[33].mxu0  ;;  %v12243_v52 = vadd.f32 %v12242_v44, %v12241_v43 }
 0x45c   : > { %v12194_v8 = vadd.f32 %v12193_v33, %v12192_v18  ;;  %v12195_v16 = vpop.f32.mrb[34].mxu0 }
 0x45d   : > { %v12196_v6 = vpop.f32.mrb[35].mxu0 }
 0x45e   : > { %v9625_v21 = vadd.f32 %v12194_v8, %v9561_v35  ;;  %v12197_v56 = vadd.f32 %v12196_v6, %v12195_v16  ;;  %v749_v6 = vld [vmem:[%s15242_s3 + $0x30] sm:$0x3f] }
 0x45f   : > { %v12244_v19 = vpop.f32.mrb[40].mxu1 }
 0x460   : > { %v9689_v31 = vadd.f32 %v12234_v10, %v9625_v21  ;;  %v9628_v28 = vadd.f32 %v12197_v56, %v9564_v29  ;;  %v12240_v29 = vadd.f32 %v12239_v48, %v12238_v34  ;;  %v12245_v62 = vpop.f32.mrb[41].mxu1 }
 0x461   : > { %v12246_v36 = vadd.f32 %v12245_v62, %v12244_v19 }
 0x462   : > { %v9718_v57 = vadd.f32 %v9689_v31, %v743_v2  ;;  %v9692_v26 = vadd.f32 %v12237_v20, %v9628_v28  ;;  %v12198_v25 = vpop.f32.mrb[36].mxu0 }
 0x463   : > { %v12199_v45 = vpop.f32.mrb[37].mxu0 }
 0x464   : > { %9726 = vst.msk [vmem:[%s15242_s3] sm:$0xff] %vm9725_vm2, %v9718_v57  ;;  %v9719_v35 = vadd.f32 %v9692_v26, %v744_v41  ;;  %v12200_v30 = vadd.f32 %v12199_v45, %v12198_v25  ;;  %v12201_v27 = vpop.f32.mrb[38].mxu0 }
 0x465   : > { %v12202_v38 = vpop.f32.mrb[39].mxu0 }
 0x466   : > { %9727 = vst.msk [vmem:[%s15242_s3 + $0x8] sm:$0xff] %vm9725_vm2, %v9719_v35  ;;  %v9633_v3 = vadd.f32 %v12200_v30, %v15112_v37  ;;  %v12203_v49 = vadd.f32 %v12202_v38, %v12201_v27 }
 0x468   : > { %v9697_v39 = vadd.f32 %v12240_v29, %v9633_v3  ;;  %v9636_v46 = vadd.f32 %v12203_v49, %v15114_v58  ;;  %v12247_v58 = vpop.f32.mrb[42].mxu1 }
 0x469   : > { %v12248_v17 = vpop.f32.mrb[43].mxu1 }
 0x46a   : > { %v9720_v50 = vadd.f32 %v9697_v39, %v745_v42  ;;  %v9700_v32 = vadd.f32 %v12243_v52, %v9636_v46  ;;  %v12204_v0 = vpop.f32.mrb[40].mxu0  ;;  %v12249_v61 = vadd.f32 %v12248_v17, %v12247_v58  ;;  %v12250_v11 = vpop.f32.mrb[44].mxu1 }
 0x46b   : > { %v12205_v54 = vpop.f32.mrb[41].mxu0  ;;  %v12251_v33 = vpop.f32.mrb[45].mxu1 }
 0x46c   : > { %9728 = vst.msk [vmem:[%s15242_s3 + $0x10] sm:$0xff] %vm9725_vm2, %v9720_v50  ;;  %v9721_v37 = vadd.f32 %v9700_v32, %v746_v53  ;;  %v12206_v47 = vadd.f32 %v12205_v54, %v12204_v0  ;;  %v12207_v4 = vpop.f32.mrb[42].mxu0  ;;  %v12252_v7 = vadd.f32 %v12251_v33, %v12250_v11 }
 0x46d   : > { %v12208_v1 = vpop.f32.mrb[43].mxu0  ;;  %v9739_v2 = vld [vmem:[%s15242_s3 + $0x8] sm:$0xff] (!%p10731_p10) }
 0x46e   : > { %9729 = vst.msk [vmem:[%s15242_s3 + $0x18] sm:$0xff] %vm9725_vm2, %v9721_v37  ;;  %v9641_v60 = vadd.f32 %v12206_v47, %v15116_v5  ;;  %v12209_v55 = vadd.f32 %v12208_v1, %v12207_v4  ;;  %v9753_v31 = vadd.f32 (!%p10731_p10), %v10732_v23, %v9739_v2 }
 0x470   : > { %v9705_v51 = vadd.f32 %v12246_v36, %v9641_v60  ;;  %v9644_v13 = vadd.f32 %v12209_v55, %v15118_v14  ;;  %v12253_v14 = vpop.f32.mrb[46].mxu1  ;;  %9760 = vst.msk [vmem:[%s15242_s3 + $0x8] sm:$0xff] (!%p10731_p10), %vm9725_vm2, %v9753_v31 }
 0x471   : > { %v12254_v24 = vpop.f32.mrb[47].mxu1 }
 0x472   : > { %v9722_v9 = vadd.f32 %v9705_v51, %v747_v12  ;;  %v9708_v63 = vadd.f32 %v12249_v61, %v9644_v13  ;;  %v12210_v40 = vpop.f32.mrb[44].mxu0 }
 0x473   : > { %v12211_v18 = vpop.f32.mrb[45].mxu0  ;;  %v9740_v28 = vld [vmem:[%s15242_s3 + $0x10] sm:$0xff] (!%p10731_p10) }
 0x474   : > { %9730 = vst.msk [vmem:[%s15242_s3 + $0x20] sm:$0xff] %vm9725_vm2, %v9722_v9  ;;  %v9723_v5 = vadd.f32 %v9708_v63, %v748_v59  ;;  %v12212_v22 = vadd.f32 %v12211_v18, %v12210_v40  ;;  %v12213_v8 = vpop.f32.mrb[46].mxu0  ;;  %v9754_v26 = vadd.f32 (!%p10731_p10), %v10732_v23, %v9740_v28 }
 0x475   : > { %v12214_v16 = vpop.f32.mrb[47].mxu0  ;;  %v9741_v41 = vld [vmem:[%s15242_s3 + $0x18] sm:$0xff] (!%p10731_p10) }
 0x476   : > { %9731 = vst.msk [vmem:[%s15242_s3 + $0x28] sm:$0xff] %vm9725_vm2, %v9723_v5  ;;  %v9649_v10 = vadd.f32 %v12212_v22, %v15120_v15  ;;  %9737 = sbr.rel (%p10731_p10) target bundleno = 1159 (0x487), region = 63  ;;  %v9738_v15 = vld [vmem:[%s15242_s3] sm:$0xff] (!%p10731_p10)  ;;  %v9755_v25 = vadd.f32 (!%p10731_p10), %v10732_v23, %v9741_v41  ;;  %9761 = vst.msk [vmem:[%s15242_s3 + $0x10] sm:$0xff] (!%p10731_p10), %vm9725_vm2, %v9754_v26 }
 0x477   : > { %v9752_v20 = vadd.f32 (!%p10731_p10), %v10732_v23, %v9738_v15 }
 0x478   : > { %v9713_v21 = vadd.f32 %v12252_v7, %v9649_v10  ;;  %9762 = vst.msk [vmem:[%s15242_s3 + $0x18] sm:$0xff] (!%p10731_p10), %vm9725_vm2, %v9755_v25 }
 0x479   : > { %9759 = vst.msk [vmem:[%s15242_s3] sm:$0xff] (!%p10731_p10), %vm9725_vm2, %v9752_v20 }
 0x47a   : > { %v9724_v56 = vadd.f32 %v9713_v21, %v749_v6 }
 0x47b   : > { %v9742_v57 = vld [vmem:[%s15242_s3 + $0x20] sm:$0xff] (!%p10731_p10) }
 0x47c   : > { %9733 = vst.msk [vmem:[%s15242_s3 + $0x30] sm:$0x3f] %vm9732_vm3, %v9724_v56  ;;  %v9756_v34 = vadd.f32 (!%p10731_p10), %v10732_v23, %v9742_v57 }
 0x47d   : > { %v9743_v45 = vld [vmem:[%s15242_s3 + $0x28] sm:$0xff] }
 0x47e   : > { %v9757_v30 = vadd.f32 %v10732_v23, %v9743_v45  ;;  %9763 = vst.msk [vmem:[%s15242_s3 + $0x20] sm:$0xff] %vm9725_vm2, %v9756_v34 }
 0x480   : > { %9764 = vst.msk [vmem:[%s15242_s3 + $0x28] sm:$0xff] %vm9725_vm2, %v9757_v30 }
 0x483   : > { %v9744_v35 = vld [vmem:[%s15242_s3 + $0x30] sm:$0x3f] }
 0x484   : > { %v9758_v48 = vadd.f32 %v10732_v23, %v9744_v35 }
 0x486   : > { %9765 = vst.msk [vmem:[%s15242_s3 + $0x30] sm:$0x3f] %vm9732_vm3, %v9758_v48 }
 0x487 PF: > { %p10_p11 = scmp.ge.s32.totalorder %s13373_s16, 11   ;;  %s15243_s12 = smov %s13327_s13 }
 0x488   : > { %s15244_s13 = smov %s13382_s19  ;;  %s15245_s14 = smov %s13373_s16 }
 0x489   :  { %12 = sbr.rel (!%p10_p11) target bundleno = 2 (0x2), region = 97 }

</bundles_post_ra>
